<compile_context>
chip_gen: v7x
topology: tpu7x:2x2x1
jax: 0.10.0
libtpu: 0.0.40
codegen_flags: <defaults>
</compile_context>

<pallas_src>
import functools

import jax
import jax.numpy as jnp
from jax import lax
from jax.experimental import pallas as pl
from jax.experimental.pallas import tpu as pltpu

C = 3                   # conv channels
K = 3                   # conv kernel size
H = W = 28              # spatial size implied by fc1 (2028 = 3*26*26)
HO = WO = H - 2         # valid-conv output size (26)
NUM_CLASSES = 10
FC_IN = C * HO * WO     # 2028

TB = 4                  # images per 128-lane row group (32 lanes per strip)
GR = 32                 # rows per group: 2 (offset) + 28 + 2 (spare)
PAD = 2                 # pixel (y, x) of strip i sits at (PAD+y, 32*i+PAD+x)
VOFF = PAD + 1          # conv4 valid output offset inside the canvas


def _conv_stack_kernel(x_ref, w1, b1, w2, b2, w3, b3, w4, b4,
                       out_ref, buf, *, bg):
    """Conv part of ResidualNet2 for bg*TB lane/sublane-packed images.

    x_ref  : (1, bg, 32, 128) packed input canvas (zero halos pre-packed).
    out_ref: (1, C, bg, 32, 128) masked same-conv4 canvas (valid region only).
    buf    : (9, 32, 128) VMEM scratch holding x1 / x2 / x3 planes per group.
    """
    f32 = jnp.float32
    relu = lambda a: jnp.maximum(a, 0.0)

    row = lax.broadcasted_iota(jnp.int32, (GR, 128), 0)
    lane = lax.broadcasted_iota(jnp.int32, (GR, 128), 1) & 31
    # Real image pixels (28x28 per strip) -> halo/spare rows & lanes stay 0,
    # which is exactly the zero padding the next "same" conv needs.
    m_same = ((row >= PAD) & (row < PAD + H) &
              (lane >= PAD) & (lane < PAD + W))
    # conv4's valid 26x26 output region inside the canvas.
    m_valid = ((row >= VOFF) & (row < VOFF + HO) &
               (lane >= VOFF) & (lane < VOFF + WO))

    def conv3x3(load_plane, cin, w_ref, b_ref):
        # Stream taps: load each input plane once, build its 9 shifted views
        # with XLU rolls (wrap-around only touches masked rows/lanes) and fold
        # each view into all three output-channel accumulators right away.
        acc = [jnp.full((GR, 128), b_ref[co], f32) for co in range(C)]
        for ci in range(cin):
            p = load_plane(ci)
            for ky in range(K):
                dy = ky - 1
                py = pltpu.roll(p, (-dy) % GR, axis=0) if dy else p
                for kx in range(K):
                    dx = kx - 1
                    t = pltpu.roll(py, (-dx) % 128, axis=1) if dx else py
                    for co in range(C):
                        wv = w_ref[((co * cin + ci) * K + ky) * K + kx]
                        acc[co] = acc[co] + wv * t
        return acc

    @pl.loop(0, bg)
    def _(g):
        # conv1 + relu1 -> x1 (buf[0..2]); full-plane masked stores.
        xin = x_ref[0, g].astype(f32)
        a = conv3x3(lambda ci: xin, 1, w1, b1)
        for co in range(C):
            buf[co] = jnp.where(m_same, relu(a[co]), 0.0)

        # conv2 + relu2 ; x2 = relu(x1 + x2) -> buf[3..5]
        a = conv3x3(lambda ci: buf[ci], C, w2, b2)
        for co in range(C):
            buf[C + co] = jnp.where(m_same, relu(buf[co] + relu(a[co])), 0.0)

        # conv3 + relu3 ; x3 = x1 + x3 -> buf[6..8]
        a = conv3x3(lambda ci: buf[C + ci], C, w3, b3)
        for co in range(C):
            buf[2 * C + co] = jnp.where(m_same, buf[co] + relu(a[co]), 0.0)

        # conv4 (valid) = same-conv restricted to the valid interior; mask so
        # no garbage lanes ever reach HBM; full (32,128) aligned store.
        a = conv3x3(lambda ci: buf[2 * C + ci], C, w4, b4)
        for co in range(C):
            out_ref[0, co, g] = jnp.where(m_valid, a[co], 0.0)


def _fc_kernel(x_ref, w_ref, b_ref, o_ref):
    y = jnp.dot(x_ref[...], w_ref[...], preferred_element_type=jnp.float32)
    o_ref[...] = jnp.maximum(y + b_ref[...], 0.0).astype(o_ref.dtype)


def _round_up(a, b):
    return (a + b - 1) // b * b


@jax.jit
def residual_net2_forward(x, params):
    """x: (N, 1, 28, 28) float32 NCHW.  Returns (N, 10)."""
    N, cin, h, w = x.shape
    assert cin == 1 and h == H and w == W
    (w1, b1), (w2, b2), (w3, b3), (w4, b4), (wfc, bfc) = params

    # Images per grid step = BG groups * TB strips (up to 32).  For large
    # batches BG=8 keeps the grid short; for v7x prefer an even grid length.
    groups = _round_up(max(N, 1), TB) // TB
    BG = min(8, groups)
    G = _round_up(groups, BG) // BG
    n_pad = G * BG * TB

    xf32 = x.astype(jnp.float32)
    if n_pad != N:
        xf32 = jnp.concatenate(
            [xf32, jnp.zeros((n_pad - N, 1, H, W), jnp.float32)], axis=0)

    # Lane/sublane-dense pre-pack (one XLA pad+transpose): pixel (y, x) of
    # image (g, i) at (row 32*g + 2 + y, lane 32*i + 2 + x), halos zero.
    ximg = xf32[:, 0].reshape(G, BG, TB, H, W)
    canvas = jnp.zeros((G, BG, GR, TB, GR), jnp.float32)
    canvas = canvas.at[:, :, PAD:PAD + H, :, PAD:PAD + W].set(
        jnp.transpose(ximg, (0, 1, 3, 2, 4)))
    packed = canvas.reshape(G, BG, GR, TB * GR)

    flat = []
    for wgt, bias in ((w1, b1), (w2, b2), (w3, b3), (w4, b4)):
        flat.append(wgt.reshape(-1).astype(jnp.float32))
        flat.append(bias.astype(jnp.float32))

    smem = pl.BlockSpec(memory_space=pltpu.MemorySpace.SMEM)
    grid_spec = pltpu.PrefetchScalarGridSpec(
        num_scalar_prefetch=0,
        grid=(G,),
        in_specs=[pl.BlockSpec((1, BG, GR, TB * GR), lambda n: (n, 0, 0, 0))]
                 + [smem] * 8,
        out_specs=pl.BlockSpec((1, C, BG, GR, TB * GR),
                               lambda n: (n, 0, 0, 0, 0)),
        scratch_shapes=[pltpu.VMEM((3 * C, GR, TB * GR), jnp.float32)],
    )

    conv_flops = 2 * K * K * C * GR * 128 * (1 + 3 * C) * BG * G
    conv_bytes = 4 * (packed.size + G * C * BG * GR * 128
                      + sum(a.size for a in flat))

    conv_out = pl.pallas_call(
        functools.partial(_conv_stack_kernel, bg=BG),
        out_shape=jax.ShapeDtypeStruct((G, C, BG, GR, TB * GR), jnp.float32),
        grid_spec=grid_spec,
        compiler_params=pltpu.CompilerParams(
            dimension_semantics=("parallel",)),
        cost_estimate=pl.CostEstimate(
            flops=int(conv_flops), transcendentals=0,
            bytes_accessed=int(conv_bytes)),
    )(packed, *flat)

    # Unpack strips -> NCHW features -> PyTorch flatten order.
    # TODO(synk): this slice+transpose stays in XLA; fusing the strip-unpack
    # into the FC kernel only matters at very large batch sizes.
    feats = conv_out.reshape(G, C, BG, GR, TB, GR)
    feats = feats[:, :, :, VOFF:VOFF + HO, :, VOFF:VOFF + WO]
    feats = jnp.transpose(feats, (0, 2, 4, 1, 3, 5)).reshape(n_pad, FC_IN)
    xf = feats[:N]

    TILE_N = min(256, _round_up(N, 8))
    NFC = _round_up(N, TILE_N)
    if NFC != N:
        xf = jnp.concatenate(
            [xf, jnp.zeros((NFC - N, FC_IN), jnp.float32)], axis=0)

    fc_out = pl.pallas_call(
        _fc_kernel,
        out_shape=jax.ShapeDtypeStruct((NFC, NUM_CLASSES), jnp.float32),
        grid=(NFC // TILE_N,),
        in_specs=[pl.BlockSpec((TILE_N, FC_IN), lambda i: (i, 0)),
                  pl.BlockSpec((FC_IN, NUM_CLASSES), lambda i: (0, 0)),
                  pl.BlockSpec((1, NUM_CLASSES), lambda i: (0, 0))],
        out_specs=pl.BlockSpec((TILE_N, NUM_CLASSES), lambda i: (i, 0)),
        compiler_params=pltpu.CompilerParams(
            dimension_semantics=("parallel",)),
        cost_estimate=pl.CostEstimate(
            flops=2 * NFC * FC_IN * NUM_CLASSES, transcendentals=0,
            bytes_accessed=4 * (NFC * FC_IN + FC_IN * NUM_CLASSES
                                + NUM_CLASSES + NFC * NUM_CLASSES)),
    )(xf,
      wfc.T.astype(jnp.float32),
      bfc.reshape(1, NUM_CLASSES).astype(jnp.float32))
    return fc_out[:N]


def init_params(key):
    """Deterministic init matching the PyTorch module's parameter shapes."""
    shapes = [
        ((C, 1, K, K), (C,)),                      # conv1
        ((C, C, K, K), (C,)),                      # conv2
        ((C, C, K, K), (C,)),                      # conv3
        ((C, C, K, K), (C,)),                      # conv4
        ((NUM_CLASSES, FC_IN), (NUM_CLASSES,)),    # fc1
    ]
    params = []
    for wshape, bshape in shapes:
        key, kw, kb = jax.random.split(key, 3)
        fan_in = 1
        for d in wshape[1:]:
            fan_in *= d
        bound = 1.0 / float(fan_in) ** 0.5
        wgt = jax.random.uniform(kw, wshape, jnp.float32, -bound, bound)
        bias = jax.random.uniform(kb, bshape, jnp.float32, -bound, bound)
        params.append((wgt, bias))
    return params


def reference_forward(x, params):
    """Pure-JAX reference (mirrors the PyTorch forward) for verification."""
    (w1, b1), (w2, b2), (w3, b3), (w4, b4), (wfc, bfc) = params
    hi = lax.Precision.HIGHEST

    def conv(inp, wgt, bias, pad):
        out = lax.conv_general_dilated(
            inp, wgt, window_strides=(1, 1),
            padding=[(pad, pad), (pad, pad)],
            dimension_numbers=("NCHW", "OIHW", "NCHW"),
            precision=hi)
        return out + bias[None, :, None, None]

    relu = jax.nn.relu
    x1 = relu(conv(x, w1, b1, 1))
    x2 = relu(conv(x1, w2, b2, 1))
    x2 = relu(x1 + x2)
    x3 = relu(conv(x2, w3, b3, 1))
    x3 = x1 + x3
    x4 = conv(x3, w4, b4, 0)
    xf = x4.reshape(x4.shape[0], -1)
    return relu(jnp.dot(xf, wfc.T, precision=hi) + bfc[None, :])


if __name__ == "__main__":
    key = jax.random.PRNGKey(0)
    key, kx = jax.random.split(key)

    N = 10  # exercises both batch-padding paths (conv packing and FC tiling)
    x = jax.random.normal(kx, (N, 1, H, W), jnp.float32)
    params = init_params(key)

    out = residual_net2_forward(x, params)
    out = jax.block_until_ready(out)

    ref = reference_forward(x, params)
    assert out.shape == (N, NUM_CLASSES), out.shape
    max_err = float(jnp.max(jnp.abs(out - ref)))
    assert jnp.allclose(out, ref, atol=5e-3, rtol=5e-3), max_err

    print("KERNEL_OK")
</pallas_src>

<mosaic_0001>
module attributes {stable_mosaic.version = 11 : i64} {
  func.func @_conv_stack_kernel(%arg0: i32, %arg1: memref<1x3x32x128xf32, #tpu.memory_space<vmem>>, %arg2: memref<27xf32, #tpu.memory_space<smem>>, %arg3: memref<3xf32, #tpu.memory_space<smem>>, %arg4: memref<81xf32, #tpu.memory_space<smem>>, %arg5: memref<3xf32, #tpu.memory_space<smem>>, %arg6: memref<81xf32, #tpu.memory_space<smem>>, %arg7: memref<3xf32, #tpu.memory_space<smem>>, %arg8: memref<81xf32, #tpu.memory_space<smem>>, %arg9: memref<3xf32, #tpu.memory_space<smem>>, %arg10: memref<1x3x3x32x128xf32, #tpu.memory_space<vmem>>, %arg11: memref<9x32x128xf32, #tpu.memory_space<vmem>>) attributes {dimension_semantics = [#tpu.dimension_semantics<parallel>], iteration_bounds = array<i64: 1>, scalar_prefetch = 0 : i64, scratch_operands = 1 : i64, tpu.core_type = #tpu.core_type<tc>, window_params = [{transform_indices = @transform_0, window_bounds = array<i64: 1, 3, 32, 128>}, {transform_indices = @transform_1, window_bounds = array<i64: 27>}, {transform_indices = @transform_2, window_bounds = array<i64: 3>}, {transform_indices = @transform_3, window_bounds = array<i64: 81>}, {transform_indices = @transform_4, window_bounds = array<i64: 3>}, {transform_indices = @transform_5, window_bounds = array<i64: 81>}, {transform_indices = @transform_6, window_bounds = array<i64: 3>}, {transform_indices = @transform_7, window_bounds = array<i64: 81>}, {transform_indices = @transform_8, window_bounds = array<i64: 3>}, {transform_indices = @transform_9, window_bounds = array<i64: 1, 3, 3, 32, 128>}]} {
    %0 = tpu.iota {dimensions = array<i32: 0>} : vector<32x128xi32>
    %1 = tpu.iota {dimensions = array<i32: 1>} : vector<32x128xi32>
    %c31_i32 = arith.constant 31 : i32
    %2 = vector.broadcast %c31_i32 : i32 to vector<32x128xi32>
    %3 = arith.andi %1, %2 : vector<32x128xi32>
    %c2_i32 = arith.constant 2 : i32
    %4 = vector.broadcast %c2_i32 : i32 to vector<32x128xi32>
    %5 = arith.cmpi sge, %0, %4 : vector<32x128xi32>
    %c30_i32 = arith.constant 30 : i32
    %6 = vector.broadcast %c30_i32 : i32 to vector<32x128xi32>
    %7 = arith.cmpi slt, %0, %6 : vector<32x128xi32>
    %8 = arith.andi %5, %7 : vector<32x128xi1>
    %c2_i32_0 = arith.constant 2 : i32
    %9 = vector.broadcast %c2_i32_0 : i32 to vector<32x128xi32>
    %10 = arith.cmpi sge, %3, %9 : vector<32x128xi32>
    %11 = arith.andi %8, %10 : vector<32x128xi1>
    %c30_i32_1 = arith.constant 30 : i32
    %12 = vector.broadcast %c30_i32_1 : i32 to vector<32x128xi32>
    %13 = arith.cmpi slt, %3, %12 : vector<32x128xi32>
    %14 = arith.andi %11, %13 : vector<32x128xi1>
    %c3_i32 = arith.constant 3 : i32
    %15 = vector.broadcast %c3_i32 : i32 to vector<32x128xi32>
    %16 = arith.cmpi sge, %0, %15 : vector<32x128xi32>
    %c29_i32 = arith.constant 29 : i32
    %17 = vector.broadcast %c29_i32 : i32 to vector<32x128xi32>
    %18 = arith.cmpi slt, %0, %17 : vector<32x128xi32>
    %19 = arith.andi %16, %18 : vector<32x128xi1>
    %c3_i32_2 = arith.constant 3 : i32
    %20 = vector.broadcast %c3_i32_2 : i32 to vector<32x128xi32>
    %21 = arith.cmpi sge, %3, %20 : vector<32x128xi32>
    %22 = arith.andi %19, %21 : vector<32x128xi1>
    %c29_i32_3 = arith.constant 29 : i32
    %23 = vector.broadcast %c29_i32_3 : i32 to vector<32x128xi32>
    %24 = arith.cmpi slt, %3, %23 : vector<32x128xi32>
    %25 = arith.andi %22, %24 : vector<32x128xi1>
    %c0_i32 = arith.constant 0 : i32
    %c3_i32_4 = arith.constant 3 : i32
    %26 = arith.addi %c0_i32, %c3_i32_4 : i32
    %c1_i32 = arith.constant 1 : i32
    scf.for %arg12 = %c0_i32 to %26 step %c1_i32  : i32 {
      %c1_i32_6 = arith.constant 1 : i32
      %27 = arith.muli %arg12, %c1_i32_6 : i32
      %c0_i32_7 = arith.constant 0 : i32
      %28 = arith.addi %c0_i32_7, %27 : i32
      %c0 = arith.constant 0 : index
      %29 = arith.index_cast %28 : i32 to index
      %c0_8 = arith.constant 0 : index
      %c0_9 = arith.constant 0 : index
      %30 = vector.load %arg1[%c0, %29, %c0_8, %c0_9] : memref<1x3x32x128xf32, #tpu.memory_space<vmem>>, vector<1x1x32x128xf32>
      %31 = vector.shape_cast %30 : vector<1x1x32x128xf32> to vector<32x128xf32>
      %c0_10 = arith.constant 0 : index
      %32 = memref.load %arg3[%c0_10] : memref<3xf32, #tpu.memory_space<smem>>
      %33 = vector.broadcast %32 : f32 to vector<32x128xf32>
      %c1 = arith.constant 1 : index
      %34 = memref.load %arg3[%c1] : memref<3xf32, #tpu.memory_space<smem>>
      %35 = vector.broadcast %34 : f32 to vector<32x128xf32>
      %c2 = arith.constant 2 : index
      %36 = memref.load %arg3[%c2] : memref<3xf32, #tpu.memory_space<smem>>
      %37 = vector.broadcast %36 : f32 to vector<32x128xf32>
      %c1_i32_11 = arith.constant 1 : i32
      %38 = tpu.dynamic_rotate %31 by %c1_i32_11 dim 0 : vector<32x128xf32>, i32 -> vector<32x128xf32>
      %c1_i32_12 = arith.constant 1 : i32
      %39 = tpu.dynamic_rotate %38 by %c1_i32_12 dim 1 : vector<32x128xf32>, i32 -> vector<32x128xf32>
      %c0_13 = arith.constant 0 : index
      %40 = memref.load %arg2[%c0_13] : memref<27xf32, #tpu.memory_space<smem>>
      %41 = vector.broadcast %40 : f32 to vector<32x128xf32>
      %42 = arith.mulf %41, %39 : vector<32x128xf32>
      %43 = arith.addf %33, %42 : vector<32x128xf32>
      %c9 = arith.constant 9 : index
      %44 = memref.load %arg2[%c9] : memref<27xf32, #tpu.memory_space<smem>>
      %45 = vector.broadcast %44 : f32 to vector<32x128xf32>
      %46 = arith.mulf %45, %39 : vector<32x128xf32>
      %47 = arith.addf %35, %46 : vector<32x128xf32>
      %c18 = arith.constant 18 : index
      %48 = memref.load %arg2[%c18] : memref<27xf32, #tpu.memory_space<smem>>
      %49 = vector.broadcast %48 : f32 to vector<32x128xf32>
      %50 = arith.mulf %49, %39 : vector<32x128xf32>
      %51 = arith.addf %37, %50 : vector<32x128xf32>
      %c1_14 = arith.constant 1 : index
      %52 = memref.load %arg2[%c1_14] : memref<27xf32, #tpu.memory_space<smem>>
      %53 = vector.broadcast %52 : f32 to vector<32x128xf32>
      %54 = arith.mulf %53, %38 : vector<32x128xf32>
      %55 = arith.addf %43, %54 : vector<32x128xf32>
      %c10 = arith.constant 10 : index
      %56 = memref.load %arg2[%c10] : memref<27xf32, #tpu.memory_space<smem>>
      %57 = vector.broadcast %56 : f32 to vector<32x128xf32>
      %58 = arith.mulf %57, %38 : vector<32x128xf32>
      %59 = arith.addf %47, %58 : vector<32x128xf32>
      %c19 = arith.constant 19 : index
      %60 = memref.load %arg2[%c19] : memref<27xf32, #tpu.memory_space<smem>>
      %61 = vector.broadcast %60 : f32 to vector<32x128xf32>
      %62 = arith.mulf %61, %38 : vector<32x128xf32>
      %63 = arith.addf %51, %62 : vector<32x128xf32>
      %c127_i32 = arith.constant 127 : i32
      %64 = tpu.dynamic_rotate %38 by %c127_i32 dim 1 : vector<32x128xf32>, i32 -> vector<32x128xf32>
      %c2_15 = arith.constant 2 : index
      %65 = memref.load %arg2[%c2_15] : memref<27xf32, #tpu.memory_space<smem>>
      %66 = vector.broadcast %65 : f32 to vector<32x128xf32>
      %67 = arith.mulf %66, %64 : vector<32x128xf32>
      %68 = arith.addf %55, %67 : vector<32x128xf32>
      %c11 = arith.constant 11 : index
      %69 = memref.load %arg2[%c11] : memref<27xf32, #tpu.memory_space<smem>>
      %70 = vector.broadcast %69 : f32 to vector<32x128xf32>
      %71 = arith.mulf %70, %64 : vector<32x128xf32>
      %72 = arith.addf %59, %71 : vector<32x128xf32>
      %c20 = arith.constant 20 : index
      %73 = memref.load %arg2[%c20] : memref<27xf32, #tpu.memory_space<smem>>
      %74 = vector.broadcast %73 : f32 to vector<32x128xf32>
      %75 = arith.mulf %74, %64 : vector<32x128xf32>
      %76 = arith.addf %63, %75 : vector<32x128xf32>
      %c1_i32_16 = arith.constant 1 : i32
      %77 = tpu.dynamic_rotate %31 by %c1_i32_16 dim 1 : vector<32x128xf32>, i32 -> vector<32x128xf32>
      %c3 = arith.constant 3 : index
      %78 = memref.load %arg2[%c3] : memref<27xf32, #tpu.memory_space<smem>>
      %79 = vector.broadcast %78 : f32 to vector<32x128xf32>
      %80 = arith.mulf %79, %77 : vector<32x128xf32>
      %81 = arith.addf %68, %80 : vector<32x128xf32>
      %c12 = arith.constant 12 : index
      %82 = memref.load %arg2[%c12] : memref<27xf32, #tpu.memory_space<smem>>
      %83 = vector.broadcast %82 : f32 to vector<32x128xf32>
      %84 = arith.mulf %83, %77 : vector<32x128xf32>
      %85 = arith.addf %72, %84 : vector<32x128xf32>
      %c21 = arith.constant 21 : index
      %86 = memref.load %arg2[%c21] : memref<27xf32, #tpu.memory_space<smem>>
      %87 = vector.broadcast %86 : f32 to vector<32x128xf32>
      %88 = arith.mulf %87, %77 : vector<32x128xf32>
      %89 = arith.addf %76, %88 : vector<32x128xf32>
      %c4 = arith.constant 4 : index
      %90 = memref.load %arg2[%c4] : memref<27xf32, #tpu.memory_space<smem>>
      %91 = vector.broadcast %90 : f32 to vector<32x128xf32>
      %92 = arith.mulf %91, %31 : vector<32x128xf32>
      %93 = arith.addf %81, %92 : vector<32x128xf32>
      %c13 = arith.constant 13 : index
      %94 = memref.load %arg2[%c13] : memref<27xf32, #tpu.memory_space<smem>>
      %95 = vector.broadcast %94 : f32 to vector<32x128xf32>
      %96 = arith.mulf %95, %31 : vector<32x128xf32>
      %97 = arith.addf %85, %96 : vector<32x128xf32>
      %c22 = arith.constant 22 : index
      %98 = memref.load %arg2[%c22] : memref<27xf32, #tpu.memory_space<smem>>
      %99 = vector.broadcast %98 : f32 to vector<32x128xf32>
      %100 = arith.mulf %99, %31 : vector<32x128xf32>
      %101 = arith.addf %89, %100 : vector<32x128xf32>
      %c127_i32_17 = arith.constant 127 : i32
      %102 = tpu.dynamic_rotate %31 by %c127_i32_17 dim 1 : vector<32x128xf32>, i32 -> vector<32x128xf32>
      %c5 = arith.constant 5 : index
      %103 = memref.load %arg2[%c5] : memref<27xf32, #tpu.memory_space<smem>>
      %104 = vector.broadcast %103 : f32 to vector<32x128xf32>
      %105 = arith.mulf %104, %102 : vector<32x128xf32>
      %106 = arith.addf %93, %105 : vector<32x128xf32>
      %c14 = arith.constant 14 : index
      %107 = memref.load %arg2[%c14] : memref<27xf32, #tpu.memory_space<smem>>
      %108 = vector.broadcast %107 : f32 to vector<32x128xf32>
      %109 = arith.mulf %108, %102 : vector<32x128xf32>
      %110 = arith.addf %97, %109 : vector<32x128xf32>
      %c23 = arith.constant 23 : index
      %111 = memref.load %arg2[%c23] : memref<27xf32, #tpu.memory_space<smem>>
      %112 = vector.broadcast %111 : f32 to vector<32x128xf32>
      %113 = arith.mulf %112, %102 : vector<32x128xf32>
      %114 = arith.addf %101, %113 : vector<32x128xf32>
      %c31_i32_18 = arith.constant 31 : i32
      %115 = tpu.dynamic_rotate %31 by %c31_i32_18 dim 0 : vector<32x128xf32>, i32 -> vector<32x128xf32>
      %c1_i32_19 = arith.constant 1 : i32
      %116 = tpu.dynamic_rotate %115 by %c1_i32_19 dim 1 : vector<32x128xf32>, i32 -> vector<32x128xf32>
      %c6 = arith.constant 6 : index
      %117 = memref.load %arg2[%c6] : memref<27xf32, #tpu.memory_space<smem>>
      %118 = vector.broadcast %117 : f32 to vector<32x128xf32>
      %119 = arith.mulf %118, %116 : vector<32x128xf32>
      %120 = arith.addf %106, %119 : vector<32x128xf32>
      %c15 = arith.constant 15 : index
      %121 = memref.load %arg2[%c15] : memref<27xf32, #tpu.memory_space<smem>>
      %122 = vector.broadcast %121 : f32 to vector<32x128xf32>
      %123 = arith.mulf %122, %116 : vector<32x128xf32>
      %124 = arith.addf %110, %123 : vector<32x128xf32>
      %c24 = arith.constant 24 : index
      %125 = memref.load %arg2[%c24] : memref<27xf32, #tpu.memory_space<smem>>
      %126 = vector.broadcast %125 : f32 to vector<32x128xf32>
      %127 = arith.mulf %126, %116 : vector<32x128xf32>
      %128 = arith.addf %114, %127 : vector<32x128xf32>
      %c7 = arith.constant 7 : index
      %129 = memref.load %arg2[%c7] : memref<27xf32, #tpu.memory_space<smem>>
      %130 = vector.broadcast %129 : f32 to vector<32x128xf32>
      %131 = arith.mulf %130, %115 : vector<32x128xf32>
      %132 = arith.addf %120, %131 : vector<32x128xf32>
      %c16 = arith.constant 16 : index
      %133 = memref.load %arg2[%c16] : memref<27xf32, #tpu.memory_space<smem>>
      %134 = vector.broadcast %133 : f32 to vector<32x128xf32>
      %135 = arith.mulf %134, %115 : vector<32x128xf32>
      %136 = arith.addf %124, %135 : vector<32x128xf32>
      %c25 = arith.constant 25 : index
      %137 = memref.load %arg2[%c25] : memref<27xf32, #tpu.memory_space<smem>>
      %138 = vector.broadcast %137 : f32 to vector<32x128xf32>
      %139 = arith.mulf %138, %115 : vector<32x128xf32>
      %140 = arith.addf %128, %139 : vector<32x128xf32>
      %c127_i32_20 = arith.constant 127 : i32
      %141 = tpu.dynamic_rotate %115 by %c127_i32_20 dim 1 : vector<32x128xf32>, i32 -> vector<32x128xf32>
      %c8 = arith.constant 8 : index
      %142 = memref.load %arg2[%c8] : memref<27xf32, #tpu.memory_space<smem>>
      %143 = vector.broadcast %142 : f32 to vector<32x128xf32>
      %144 = arith.mulf %143, %141 : vector<32x128xf32>
      %145 = arith.addf %132, %144 : vector<32x128xf32>
      %c17 = arith.constant 17 : index
      %146 = memref.load %arg2[%c17] : memref<27xf32, #tpu.memory_space<smem>>
      %147 = vector.broadcast %146 : f32 to vector<32x128xf32>
      %148 = arith.mulf %147, %141 : vector<32x128xf32>
      %149 = arith.addf %136, %148 : vector<32x128xf32>
      %c26 = arith.constant 26 : index
      %150 = memref.load %arg2[%c26] : memref<27xf32, #tpu.memory_space<smem>>
      %151 = vector.broadcast %150 : f32 to vector<32x128xf32>
      %152 = arith.mulf %151, %141 : vector<32x128xf32>
      %153 = arith.addf %140, %152 : vector<32x128xf32>
      %cst = arith.constant 0.000000e+00 : f32
      %154 = vector.broadcast %cst : f32 to vector<32x128xf32>
      %155 = arith.maximumf %145, %154 : vector<32x128xf32>
      %cst_21 = arith.constant 0.000000e+00 : f32
      %156 = vector.broadcast %cst_21 : f32 to vector<32x128xf32>
      %157 = arith.select %14, %155, %156 : vector<32x128xi1>, vector<32x128xf32>
      %c0_22 = arith.constant 0 : index
      %c0_23 = arith.constant 0 : index
      %c0_24 = arith.constant 0 : index
      %158 = vector.load %arg11[%c0_22, %c0_23, %c0_24] : memref<9x32x128xf32, #tpu.memory_space<vmem>>, vector<1x32x128xf32>
      %159 = vector.shape_cast %158 : vector<1x32x128xf32> to vector<32x128xf32>
      %160 = vector.shape_cast %157 : vector<32x128xf32> to vector<1x32x128xf32>
      tpu.vector_store %arg11[%c0_22, %c0_23, %c0_24], %160 {strides = array<i32>} : memref<9x32x128xf32, #tpu.memory_space<vmem>>, vector<1x32x128xf32>,
      %cst_25 = arith.constant 0.000000e+00 : f32
      %161 = vector.broadcast %cst_25 : f32 to vector<32x128xf32>
      %162 = arith.maximumf %149, %161 : vector<32x128xf32>
      %cst_26 = arith.constant 0.000000e+00 : f32
      %163 = vector.broadcast %cst_26 : f32 to vector<32x128xf32>
      %164 = arith.select %14, %162, %163 : vector<32x128xi1>, vector<32x128xf32>
      %c1_27 = arith.constant 1 : index
      %c0_28 = arith.constant 0 : index
      %c0_29 = arith.constant 0 : index
      %165 = vector.load %arg11[%c1_27, %c0_28, %c0_29] : memref<9x32x128xf32, #tpu.memory_space<vmem>>, vector<1x32x128xf32>
      %166 = vector.shape_cast %165 : vector<1x32x128xf32> to vector<32x128xf32>
      %167 = vector.shape_cast %164 : vector<32x128xf32> to vector<1x32x128xf32>
      tpu.vector_store %arg11[%c1_27, %c0_28, %c0_29], %167 {strides = array<i32>} : memref<9x32x128xf32, #tpu.memory_space<vmem>>, vector<1x32x128xf32>,
      %cst_30 = arith.constant 0.000000e+00 : f32
      %168 = vector.broadcast %cst_30 : f32 to vector<32x128xf32>
      %169 = arith.maximumf %153, %168 : vector<32x128xf32>
      %cst_31 = arith.constant 0.000000e+00 : f32
      %170 = vector.broadcast %cst_31 : f32 to vector<32x128xf32>
      %171 = arith.select %14, %169, %170 : vector<32x128xi1>, vector<32x128xf32>
      %c2_32 = arith.constant 2 : index
      %c0_33 = arith.constant 0 : index
      %c0_34 = arith.constant 0 : index
      %172 = vector.load %arg11[%c2_32, %c0_33, %c0_34] : memref<9x32x128xf32, #tpu.memory_space<vmem>>, vector<1x32x128xf32>
      %173 = vector.shape_cast %172 : vector<1x32x128xf32> to vector<32x128xf32>
      %174 = vector.shape_cast %171 : vector<32x128xf32> to vector<1x32x128xf32>
      tpu.vector_store %arg11[%c2_32, %c0_33, %c0_34], %174 {strides = array<i32>} : memref<9x32x128xf32, #tpu.memory_space<vmem>>, vector<1x32x128xf32>,
      %c0_35 = arith.constant 0 : index
      %175 = memref.load %arg5[%c0_35] : memref<3xf32, #tpu.memory_space<smem>>
      %176 = vector.broadcast %175 : f32 to vector<32x128xf32>
      %c1_36 = arith.constant 1 : index
      %177 = memref.load %arg5[%c1_36] : memref<3xf32, #tpu.memory_space<smem>>
      %178 = vector.broadcast %177 : f32 to vector<32x128xf32>
      %c2_37 = arith.constant 2 : index
      %179 = memref.load %arg5[%c2_37] : memref<3xf32, #tpu.memory_space<smem>>
      %180 = vector.broadcast %179 : f32 to vector<32x128xf32>
      %c0_38 = arith.constant 0 : index
      %c0_39 = arith.constant 0 : index
      %c0_40 = arith.constant 0 : index
      %181 = vector.load %arg11[%c0_38, %c0_39, %c0_40] : memref<9x32x128xf32, #tpu.memory_space<vmem>>, vector<1x32x128xf32>
      %182 = vector.shape_cast %181 : vector<1x32x128xf32> to vector<32x128xf32>
      %c1_i32_41 = arith.constant 1 : i32
      %183 = tpu.dynamic_rotate %182 by %c1_i32_41 dim 0 : vector<32x128xf32>, i32 -> vector<32x128xf32>
      %c1_i32_42 = arith.constant 1 : i32
      %184 = tpu.dynamic_rotate %183 by %c1_i32_42 dim 1 : vector<32x128xf32>, i32 -> vector<32x128xf32>
      %c0_43 = arith.constant 0 : index
      %185 = memref.load %arg4[%c0_43] : memref<81xf32, #tpu.memory_space<smem>>
      %186 = vector.broadcast %185 : f32 to vector<32x128xf32>
      %187 = arith.mulf %186, %184 : vector<32x128xf32>
      %188 = arith.addf %176, %187 : vector<32x128xf32>
      %c27 = arith.constant 27 : index
      %189 = memref.load %arg4[%c27] : memref<81xf32, #tpu.memory_space<smem>>
      %190 = vector.broadcast %189 : f32 to vector<32x128xf32>
      %191 = arith.mulf %190, %184 : vector<32x128xf32>
      %192 = arith.addf %178, %191 : vector<32x128xf32>
      %c54 = arith.constant 54 : index
      %193 = memref.load %arg4[%c54] : memref<81xf32, #tpu.memory_space<smem>>
      %194 = vector.broadcast %193 : f32 to vector<32x128xf32>
      %195 = arith.mulf %194, %184 : vector<32x128xf32>
      %196 = arith.addf %180, %195 : vector<32x128xf32>
      %c1_44 = arith.constant 1 : index
      %197 = memref.load %arg4[%c1_44] : memref<81xf32, #tpu.memory_space<smem>>
      %198 = vector.broadcast %197 : f32 to vector<32x128xf32>
      %199 = arith.mulf %198, %183 : vector<32x128xf32>
      %200 = arith.addf %188, %199 : vector<32x128xf32>
      %c28 = arith.constant 28 : index
      %201 = memref.load %arg4[%c28] : memref<81xf32, #tpu.memory_space<smem>>
      %202 = vector.broadcast %201 : f32 to vector<32x128xf32>
      %203 = arith.mulf %202, %183 : vector<32x128xf32>
      %204 = arith.addf %192, %203 : vector<32x128xf32>
      %c55 = arith.constant 55 : index
      %205 = memref.load %arg4[%c55] : memref<81xf32, #tpu.memory_space<smem>>
      %206 = vector.broadcast %205 : f32 to vector<32x128xf32>
      %207 = arith.mulf %206, %183 : vector<32x128xf32>
      %208 = arith.addf %196, %207 : vector<32x128xf32>
      %c127_i32_45 = arith.constant 127 : i32
      %209 = tpu.dynamic_rotate %183 by %c127_i32_45 dim 1 : vector<32x128xf32>, i32 -> vector<32x128xf32>
      %c2_46 = arith.constant 2 : index
      %210 = memref.load %arg4[%c2_46] : memref<81xf32, #tpu.memory_space<smem>>
      %211 = vector.broadcast %210 : f32 to vector<32x128xf32>
      %212 = arith.mulf %211, %209 : vector<32x128xf32>
      %213 = arith.addf %200, %212 : vector<32x128xf32>
      %c29 = arith.constant 29 : index
      %214 = memref.load %arg4[%c29] : memref<81xf32, #tpu.memory_space<smem>>
      %215 = vector.broadcast %214 : f32 to vector<32x128xf32>
      %216 = arith.mulf %215, %209 : vector<32x128xf32>
      %217 = arith.addf %204, %216 : vector<32x128xf32>
      %c56 = arith.constant 56 : index
      %218 = memref.load %arg4[%c56] : memref<81xf32, #tpu.memory_space<smem>>
      %219 = vector.broadcast %218 : f32 to vector<32x128xf32>
      %220 = arith.mulf %219, %209 : vector<32x128xf32>
      %221 = arith.addf %208, %220 : vector<32x128xf32>
      %c1_i32_47 = arith.constant 1 : i32
      %222 = tpu.dynamic_rotate %182 by %c1_i32_47 dim 1 : vector<32x128xf32>, i32 -> vector<32x128xf32>
      %c3_48 = arith.constant 3 : index
      %223 = memref.load %arg4[%c3_48] : memref<81xf32, #tpu.memory_space<smem>>
      %224 = vector.broadcast %223 : f32 to vector<32x128xf32>
      %225 = arith.mulf %224, %222 : vector<32x128xf32>
      %226 = arith.addf %213, %225 : vector<32x128xf32>
      %c30 = arith.constant 30 : index
      %227 = memref.load %arg4[%c30] : memref<81xf32, #tpu.memory_space<smem>>
      %228 = vector.broadcast %227 : f32 to vector<32x128xf32>
      %229 = arith.mulf %228, %222 : vector<32x128xf32>
      %230 = arith.addf %217, %229 : vector<32x128xf32>
      %c57 = arith.constant 57 : index
      %231 = memref.load %arg4[%c57] : memref<81xf32, #tpu.memory_space<smem>>
      %232 = vector.broadcast %231 : f32 to vector<32x128xf32>
      %233 = arith.mulf %232, %222 : vector<32x128xf32>
      %234 = arith.addf %221, %233 : vector<32x128xf32>
      %c4_49 = arith.constant 4 : index
      %235 = memref.load %arg4[%c4_49] : memref<81xf32, #tpu.memory_space<smem>>
      %236 = vector.broadcast %235 : f32 to vector<32x128xf32>
      %237 = arith.mulf %236, %182 : vector<32x128xf32>
      %238 = arith.addf %226, %237 : vector<32x128xf32>
      %c31 = arith.constant 31 : index
      %239 = memref.load %arg4[%c31] : memref<81xf32, #tpu.memory_space<smem>>
      %240 = vector.broadcast %239 : f32 to vector<32x128xf32>
      %241 = arith.mulf %240, %182 : vector<32x128xf32>
      %242 = arith.addf %230, %241 : vector<32x128xf32>
      %c58 = arith.constant 58 : index
      %243 = memref.load %arg4[%c58] : memref<81xf32, #tpu.memory_space<smem>>
      %244 = vector.broadcast %243 : f32 to vector<32x128xf32>
      %245 = arith.mulf %244, %182 : vector<32x128xf32>
      %246 = arith.addf %234, %245 : vector<32x128xf32>
      %c127_i32_50 = arith.constant 127 : i32
      %247 = tpu.dynamic_rotate %182 by %c127_i32_50 dim 1 : vector<32x128xf32>, i32 -> vector<32x128xf32>
      %c5_51 = arith.constant 5 : index
      %248 = memref.load %arg4[%c5_51] : memref<81xf32, #tpu.memory_space<smem>>
      %249 = vector.broadcast %248 : f32 to vector<32x128xf32>
      %250 = arith.mulf %249, %247 : vector<32x128xf32>
      %251 = arith.addf %238, %250 : vector<32x128xf32>
      %c32 = arith.constant 32 : index
      %252 = memref.load %arg4[%c32] : memref<81xf32, #tpu.memory_space<smem>>
      %253 = vector.broadcast %252 : f32 to vector<32x128xf32>
      %254 = arith.mulf %253, %247 : vector<32x128xf32>
      %255 = arith.addf %242, %254 : vector<32x128xf32>
      %c59 = arith.constant 59 : index
      %256 = memref.load %arg4[%c59] : memref<81xf32, #tpu.memory_space<smem>>
      %257 = vector.broadcast %256 : f32 to vector<32x128xf32>
      %258 = arith.mulf %257, %247 : vector<32x128xf32>
      %259 = arith.addf %246, %258 : vector<32x128xf32>
      %c31_i32_52 = arith.constant 31 : i32
      %260 = tpu.dynamic_rotate %182 by %c31_i32_52 dim 0 : vector<32x128xf32>, i32 -> vector<32x128xf32>
      %c1_i32_53 = arith.constant 1 : i32
      %261 = tpu.dynamic_rotate %260 by %c1_i32_53 dim 1 : vector<32x128xf32>, i32 -> vector<32x128xf32>
      %c6_54 = arith.constant 6 : index
      %262 = memref.load %arg4[%c6_54] : memref<81xf32, #tpu.memory_space<smem>>
      %263 = vector.broadcast %262 : f32 to vector<32x128xf32>
      %264 = arith.mulf %263, %261 : vector<32x128xf32>
      %265 = arith.addf %251, %264 : vector<32x128xf32>
      %c33 = arith.constant 33 : index
      %266 = memref.load %arg4[%c33] : memref<81xf32, #tpu.memory_space<smem>>
      %267 = vector.broadcast %266 : f32 to vector<32x128xf32>
      %268 = arith.mulf %267, %261 : vector<32x128xf32>
      %269 = arith.addf %255, %268 : vector<32x128xf32>
      %c60 = arith.constant 60 : index
      %270 = memref.load %arg4[%c60] : memref<81xf32, #tpu.memory_space<smem>>
      %271 = vector.broadcast %270 : f32 to vector<32x128xf32>
      %272 = arith.mulf %271, %261 : vector<32x128xf32>
      %273 = arith.addf %259, %272 : vector<32x128xf32>
      %c7_55 = arith.constant 7 : index
      %274 = memref.load %arg4[%c7_55] : memref<81xf32, #tpu.memory_space<smem>>
      %275 = vector.broadcast %274 : f32 to vector<32x128xf32>
      %276 = arith.mulf %275, %260 : vector<32x128xf32>
      %277 = arith.addf %265, %276 : vector<32x128xf32>
      %c34 = arith.constant 34 : index
      %278 = memref.load %arg4[%c34] : memref<81xf32, #tpu.memory_space<smem>>
      %279 = vector.broadcast %278 : f32 to vector<32x128xf32>
      %280 = arith.mulf %279, %260 : vector<32x128xf32>
      %281 = arith.addf %269, %280 : vector<32x128xf32>
      %c61 = arith.constant 61 : index
      %282 = memref.load %arg4[%c61] : memref<81xf32, #tpu.memory_space<smem>>
      %283 = vector.broadcast %282 : f32 to vector<32x128xf32>
      %284 = arith.mulf %283, %260 : vector<32x128xf32>
      %285 = arith.addf %273, %284 : vector<32x128xf32>
      %c127_i32_56 = arith.constant 127 : i32
      %286 = tpu.dynamic_rotate %260 by %c127_i32_56 dim 1 : vector<32x128xf32>, i32 -> vector<32x128xf32>
      %c8_57 = arith.constant 8 : index
      %287 = memref.load %arg4[%c8_57] : memref<81xf32, #tpu.memory_space<smem>>
      %288 = vector.broadcast %287 : f32 to vector<32x128xf32>
      %289 = arith.mulf %288, %286 : vector<32x128xf32>
      %290 = arith.addf %277, %289 : vector<32x128xf32>
      %c35 = arith.constant 35 : index
      %291 = memref.load %arg4[%c35] : memref<81xf32, #tpu.memory_space<smem>>
      %292 = vector.broadcast %291 : f32 to vector<32x128xf32>
      %293 = arith.mulf %292, %286 : vector<32x128xf32>
      %294 = arith.addf %281, %293 : vector<32x128xf32>
      %c62 = arith.constant 62 : index
      %295 = memref.load %arg4[%c62] : memref<81xf32, #tpu.memory_space<smem>>
      %296 = vector.broadcast %295 : f32 to vector<32x128xf32>
      %297 = arith.mulf %296, %286 : vector<32x128xf32>
      %298 = arith.addf %285, %297 : vector<32x128xf32>
      %c1_58 = arith.constant 1 : index
      %c0_59 = arith.constant 0 : index
      %c0_60 = arith.constant 0 : index
      %299 = vector.load %arg11[%c1_58, %c0_59, %c0_60] : memref<9x32x128xf32, #tpu.memory_space<vmem>>, vector<1x32x128xf32>
      %300 = vector.shape_cast %299 : vector<1x32x128xf32> to vector<32x128xf32>
      %c1_i32_61 = arith.constant 1 : i32
      %301 = tpu.dynamic_rotate %300 by %c1_i32_61 dim 0 : vector<32x128xf32>, i32 -> vector<32x128xf32>
      %c1_i32_62 = arith.constant 1 : i32
      %302 = tpu.dynamic_rotate %301 by %c1_i32_62 dim 1 : vector<32x128xf32>, i32 -> vector<32x128xf32>
      %c9_63 = arith.constant 9 : index
      %303 = memref.load %arg4[%c9_63] : memref<81xf32, #tpu.memory_space<smem>>
      %304 = vector.broadcast %303 : f32 to vector<32x128xf32>
      %305 = arith.mulf %304, %302 : vector<32x128xf32>
      %306 = arith.addf %290, %305 : vector<32x128xf32>
      %c36 = arith.constant 36 : index
      %307 = memref.load %arg4[%c36] : memref<81xf32, #tpu.memory_space<smem>>
      %308 = vector.broadcast %307 : f32 to vector<32x128xf32>
      %309 = arith.mulf %308, %302 : vector<32x128xf32>
      %310 = arith.addf %294, %309 : vector<32x128xf32>
      %c63 = arith.constant 63 : index
      %311 = memref.load %arg4[%c63] : memref<81xf32, #tpu.memory_space<smem>>
      %312 = vector.broadcast %311 : f32 to vector<32x128xf32>
      %313 = arith.mulf %312, %302 : vector<32x128xf32>
      %314 = arith.addf %298, %313 : vector<32x128xf32>
      %c10_64 = arith.constant 10 : index
      %315 = memref.load %arg4[%c10_64] : memref<81xf32, #tpu.memory_space<smem>>
      %316 = vector.broadcast %315 : f32 to vector<32x128xf32>
      %317 = arith.mulf %316, %301 : vector<32x128xf32>
      %318 = arith.addf %306, %317 : vector<32x128xf32>
      %c37 = arith.constant 37 : index
      %319 = memref.load %arg4[%c37] : memref<81xf32, #tpu.memory_space<smem>>
      %320 = vector.broadcast %319 : f32 to vector<32x128xf32>
      %321 = arith.mulf %320, %301 : vector<32x128xf32>
      %322 = arith.addf %310, %321 : vector<32x128xf32>
      %c64 = arith.constant 64 : index
      %323 = memref.load %arg4[%c64] : memref<81xf32, #tpu.memory_space<smem>>
      %324 = vector.broadcast %323 : f32 to vector<32x128xf32>
      %325 = arith.mulf %324, %301 : vector<32x128xf32>
      %326 = arith.addf %314, %325 : vector<32x128xf32>
      %c127_i32_65 = arith.constant 127 : i32
      %327 = tpu.dynamic_rotate %301 by %c127_i32_65 dim 1 : vector<32x128xf32>, i32 -> vector<32x128xf32>
      %c11_66 = arith.constant 11 : index
      %328 = memref.load %arg4[%c11_66] : memref<81xf32, #tpu.memory_space<smem>>
      %329 = vector.broadcast %328 : f32 to vector<32x128xf32>
      %330 = arith.mulf %329, %327 : vector<32x128xf32>
      %331 = arith.addf %318, %330 : vector<32x128xf32>
      %c38 = arith.constant 38 : index
      %332 = memref.load %arg4[%c38] : memref<81xf32, #tpu.memory_space<smem>>
      %333 = vector.broadcast %332 : f32 to vector<32x128xf32>
      %334 = arith.mulf %333, %327 : vector<32x128xf32>
      %335 = arith.addf %322, %334 : vector<32x128xf32>
      %c65 = arith.constant 65 : index
      %336 = memref.load %arg4[%c65] : memref<81xf32, #tpu.memory_space<smem>>
      %337 = vector.broadcast %336 : f32 to vector<32x128xf32>
      %338 = arith.mulf %337, %327 : vector<32x128xf32>
      %339 = arith.addf %326, %338 : vector<32x128xf32>
      %c1_i32_67 = arith.constant 1 : i32
      %340 = tpu.dynamic_rotate %300 by %c1_i32_67 dim 1 : vector<32x128xf32>, i32 -> vector<32x128xf32>
      %c12_68 = arith.constant 12 : index
      %341 = memref.load %arg4[%c12_68] : memref<81xf32, #tpu.memory_space<smem>>
      %342 = vector.broadcast %341 : f32 to vector<32x128xf32>
      %343 = arith.mulf %342, %340 : vector<32x128xf32>
      %344 = arith.addf %331, %343 : vector<32x128xf32>
      %c39 = arith.constant 39 : index
      %345 = memref.load %arg4[%c39] : memref<81xf32, #tpu.memory_space<smem>>
      %346 = vector.broadcast %345 : f32 to vector<32x128xf32>
      %347 = arith.mulf %346, %340 : vector<32x128xf32>
      %348 = arith.addf %335, %347 : vector<32x128xf32>
      %c66 = arith.constant 66 : index
      %349 = memref.load %arg4[%c66] : memref<81xf32, #tpu.memory_space<smem>>
      %350 = vector.broadcast %349 : f32 to vector<32x128xf32>
      %351 = arith.mulf %350, %340 : vector<32x128xf32>
      %352 = arith.addf %339, %351 : vector<32x128xf32>
      %c13_69 = arith.constant 13 : index
      %353 = memref.load %arg4[%c13_69] : memref<81xf32, #tpu.memory_space<smem>>
      %354 = vector.broadcast %353 : f32 to vector<32x128xf32>
      %355 = arith.mulf %354, %300 : vector<32x128xf32>
      %356 = arith.addf %344, %355 : vector<32x128xf32>
      %c40 = arith.constant 40 : index
      %357 = memref.load %arg4[%c40] : memref<81xf32, #tpu.memory_space<smem>>
      %358 = vector.broadcast %357 : f32 to vector<32x128xf32>
      %359 = arith.mulf %358, %300 : vector<32x128xf32>
      %360 = arith.addf %348, %359 : vector<32x128xf32>
      %c67 = arith.constant 67 : index
      %361 = memref.load %arg4[%c67] : memref<81xf32, #tpu.memory_space<smem>>
      %362 = vector.broadcast %361 : f32 to vector<32x128xf32>
      %363 = arith.mulf %362, %300 : vector<32x128xf32>
      %364 = arith.addf %352, %363 : vector<32x128xf32>
      %c127_i32_70 = arith.constant 127 : i32
      %365 = tpu.dynamic_rotate %300 by %c127_i32_70 dim 1 : vector<32x128xf32>, i32 -> vector<32x128xf32>
      %c14_71 = arith.constant 14 : index
      %366 = memref.load %arg4[%c14_71] : memref<81xf32, #tpu.memory_space<smem>>
      %367 = vector.broadcast %366 : f32 to vector<32x128xf32>
      %368 = arith.mulf %367, %365 : vector<32x128xf32>
      %369 = arith.addf %356, %368 : vector<32x128xf32>
      %c41 = arith.constant 41 : index
      %370 = memref.load %arg4[%c41] : memref<81xf32, #tpu.memory_space<smem>>
      %371 = vector.broadcast %370 : f32 to vector<32x128xf32>
      %372 = arith.mulf %371, %365 : vector<32x128xf32>
      %373 = arith.addf %360, %372 : vector<32x128xf32>
      %c68 = arith.constant 68 : index
      %374 = memref.load %arg4[%c68] : memref<81xf32, #tpu.memory_space<smem>>
      %375 = vector.broadcast %374 : f32 to vector<32x128xf32>
      %376 = arith.mulf %375, %365 : vector<32x128xf32>
      %377 = arith.addf %364, %376 : vector<32x128xf32>
      %c31_i32_72 = arith.constant 31 : i32
      %378 = tpu.dynamic_rotate %300 by %c31_i32_72 dim 0 : vector<32x128xf32>, i32 -> vector<32x128xf32>
      %c1_i32_73 = arith.constant 1 : i32
      %379 = tpu.dynamic_rotate %378 by %c1_i32_73 dim 1 : vector<32x128xf32>, i32 -> vector<32x128xf32>
      %c15_74 = arith.constant 15 : index
      %380 = memref.load %arg4[%c15_74] : memref<81xf32, #tpu.memory_space<smem>>
      %381 = vector.broadcast %380 : f32 to vector<32x128xf32>
      %382 = arith.mulf %381, %379 : vector<32x128xf32>
      %383 = arith.addf %369, %382 : vector<32x128xf32>
      %c42 = arith.constant 42 : index
      %384 = memref.load %arg4[%c42] : memref<81xf32, #tpu.memory_space<smem>>
      %385 = vector.broadcast %384 : f32 to vector<32x128xf32>
      %386 = arith.mulf %385, %379 : vector<32x128xf32>
      %387 = arith.addf %373, %386 : vector<32x128xf32>
      %c69 = arith.constant 69 : index
      %388 = memref.load %arg4[%c69] : memref<81xf32, #tpu.memory_space<smem>>
      %389 = vector.broadcast %388 : f32 to vector<32x128xf32>
      %390 = arith.mulf %389, %379 : vector<32x128xf32>
      %391 = arith.addf %377, %390 : vector<32x128xf32>
      %c16_75 = arith.constant 16 : index
      %392 = memref.load %arg4[%c16_75] : memref<81xf32, #tpu.memory_space<smem>>
      %393 = vector.broadcast %392 : f32 to vector<32x128xf32>
      %394 = arith.mulf %393, %378 : vector<32x128xf32>
      %395 = arith.addf %383, %394 : vector<32x128xf32>
      %c43 = arith.constant 43 : index
      %396 = memref.load %arg4[%c43] : memref<81xf32, #tpu.memory_space<smem>>
      %397 = vector.broadcast %396 : f32 to vector<32x128xf32>
      %398 = arith.mulf %397, %378 : vector<32x128xf32>
      %399 = arith.addf %387, %398 : vector<32x128xf32>
      %c70 = arith.constant 70 : index
      %400 = memref.load %arg4[%c70] : memref<81xf32, #tpu.memory_space<smem>>
      %401 = vector.broadcast %400 : f32 to vector<32x128xf32>
      %402 = arith.mulf %401, %378 : vector<32x128xf32>
      %403 = arith.addf %391, %402 : vector<32x128xf32>
      %c127_i32_76 = arith.constant 127 : i32
      %404 = tpu.dynamic_rotate %378 by %c127_i32_76 dim 1 : vector<32x128xf32>, i32 -> vector<32x128xf32>
      %c17_77 = arith.constant 17 : index
      %405 = memref.load %arg4[%c17_77] : memref<81xf32, #tpu.memory_space<smem>>
      %406 = vector.broadcast %405 : f32 to vector<32x128xf32>
      %407 = arith.mulf %406, %404 : vector<32x128xf32>
      %408 = arith.addf %395, %407 : vector<32x128xf32>
      %c44 = arith.constant 44 : index
      %409 = memref.load %arg4[%c44] : memref<81xf32, #tpu.memory_space<smem>>
      %410 = vector.broadcast %409 : f32 to vector<32x128xf32>
      %411 = arith.mulf %410, %404 : vector<32x128xf32>
      %412 = arith.addf %399, %411 : vector<32x128xf32>
      %c71 = arith.constant 71 : index
      %413 = memref.load %arg4[%c71] : memref<81xf32, #tpu.memory_space<smem>>
      %414 = vector.broadcast %413 : f32 to vector<32x128xf32>
      %415 = arith.mulf %414, %404 : vector<32x128xf32>
      %416 = arith.addf %403, %415 : vector<32x128xf32>
      %c2_78 = arith.constant 2 : index
      %c0_79 = arith.constant 0 : index
      %c0_80 = arith.constant 0 : index
      %417 = vector.load %arg11[%c2_78, %c0_79, %c0_80] : memref<9x32x128xf32, #tpu.memory_space<vmem>>, vector<1x32x128xf32>
      %418 = vector.shape_cast %417 : vector<1x32x128xf32> to vector<32x128xf32>
      %c1_i32_81 = arith.constant 1 : i32
      %419 = tpu.dynamic_rotate %418 by %c1_i32_81 dim 0 : vector<32x128xf32>, i32 -> vector<32x128xf32>
      %c1_i32_82 = arith.constant 1 : i32
      %420 = tpu.dynamic_rotate %419 by %c1_i32_82 dim 1 : vector<32x128xf32>, i32 -> vector<32x128xf32>
      %c18_83 = arith.constant 18 : index
      %421 = memref.load %arg4[%c18_83] : memref<81xf32, #tpu.memory_space<smem>>
      %422 = vector.broadcast %421 : f32 to vector<32x128xf32>
      %423 = arith.mulf %422, %420 : vector<32x128xf32>
      %424 = arith.addf %408, %423 : vector<32x128xf32>
      %c45 = arith.constant 45 : index
      %425 = memref.load %arg4[%c45] : memref<81xf32, #tpu.memory_space<smem>>
      %426 = vector.broadcast %425 : f32 to vector<32x128xf32>
      %427 = arith.mulf %426, %420 : vector<32x128xf32>
      %428 = arith.addf %412, %427 : vector<32x128xf32>
      %c72 = arith.constant 72 : index
      %429 = memref.load %arg4[%c72] : memref<81xf32, #tpu.memory_space<smem>>
      %430 = vector.broadcast %429 : f32 to vector<32x128xf32>
      %431 = arith.mulf %430, %420 : vector<32x128xf32>
      %432 = arith.addf %416, %431 : vector<32x128xf32>
      %c19_84 = arith.constant 19 : index
      %433 = memref.load %arg4[%c19_84] : memref<81xf32, #tpu.memory_space<smem>>
      %434 = vector.broadcast %433 : f32 to vector<32x128xf32>
      %435 = arith.mulf %434, %419 : vector<32x128xf32>
      %436 = arith.addf %424, %435 : vector<32x128xf32>
      %c46 = arith.constant 46 : index
      %437 = memref.load %arg4[%c46] : memref<81xf32, #tpu.memory_space<smem>>
      %438 = vector.broadcast %437 : f32 to vector<32x128xf32>
      %439 = arith.mulf %438, %419 : vector<32x128xf32>
      %440 = arith.addf %428, %439 : vector<32x128xf32>
      %c73 = arith.constant 73 : index
      %441 = memref.load %arg4[%c73] : memref<81xf32, #tpu.memory_space<smem>>
      %442 = vector.broadcast %441 : f32 to vector<32x128xf32>
      %443 = arith.mulf %442, %419 : vector<32x128xf32>
      %444 = arith.addf %432, %443 : vector<32x128xf32>
      %c127_i32_85 = arith.constant 127 : i32
      %445 = tpu.dynamic_rotate %419 by %c127_i32_85 dim 1 : vector<32x128xf32>, i32 -> vector<32x128xf32>
      %c20_86 = arith.constant 20 : index
      %446 = memref.load %arg4[%c20_86] : memref<81xf32, #tpu.memory_space<smem>>
      %447 = vector.broadcast %446 : f32 to vector<32x128xf32>
      %448 = arith.mulf %447, %445 : vector<32x128xf32>
      %449 = arith.addf %436, %448 : vector<32x128xf32>
      %c47 = arith.constant 47 : index
      %450 = memref.load %arg4[%c47] : memref<81xf32, #tpu.memory_space<smem>>
      %451 = vector.broadcast %450 : f32 to vector<32x128xf32>
      %452 = arith.mulf %451, %445 : vector<32x128xf32>
      %453 = arith.addf %440, %452 : vector<32x128xf32>
      %c74 = arith.constant 74 : index
      %454 = memref.load %arg4[%c74] : memref<81xf32, #tpu.memory_space<smem>>
      %455 = vector.broadcast %454 : f32 to vector<32x128xf32>
      %456 = arith.mulf %455, %445 : vector<32x128xf32>
      %457 = arith.addf %444, %456 : vector<32x128xf32>
      %c1_i32_87 = arith.constant 1 : i32
      %458 = tpu.dynamic_rotate %418 by %c1_i32_87 dim 1 : vector<32x128xf32>, i32 -> vector<32x128xf32>
      %c21_88 = arith.constant 21 : index
      %459 = memref.load %arg4[%c21_88] : memref<81xf32, #tpu.memory_space<smem>>
      %460 = vector.broadcast %459 : f32 to vector<32x128xf32>
      %461 = arith.mulf %460, %458 : vector<32x128xf32>
      %462 = arith.addf %449, %461 : vector<32x128xf32>
      %c48 = arith.constant 48 : index
      %463 = memref.load %arg4[%c48] : memref<81xf32, #tpu.memory_space<smem>>
      %464 = vector.broadcast %463 : f32 to vector<32x128xf32>
      %465 = arith.mulf %464, %458 : vector<32x128xf32>
      %466 = arith.addf %453, %465 : vector<32x128xf32>
      %c75 = arith.constant 75 : index
      %467 = memref.load %arg4[%c75] : memref<81xf32, #tpu.memory_space<smem>>
      %468 = vector.broadcast %467 : f32 to vector<32x128xf32>
      %469 = arith.mulf %468, %458 : vector<32x128xf32>
      %470 = arith.addf %457, %469 : vector<32x128xf32>
      %c22_89 = arith.constant 22 : index
      %471 = memref.load %arg4[%c22_89] : memref<81xf32, #tpu.memory_space<smem>>
      %472 = vector.broadcast %471 : f32 to vector<32x128xf32>
      %473 = arith.mulf %472, %418 : vector<32x128xf32>
      %474 = arith.addf %462, %473 : vector<32x128xf32>
      %c49 = arith.constant 49 : index
      %475 = memref.load %arg4[%c49] : memref<81xf32, #tpu.memory_space<smem>>
      %476 = vector.broadcast %475 : f32 to vector<32x128xf32>
      %477 = arith.mulf %476, %418 : vector<32x128xf32>
      %478 = arith.addf %466, %477 : vector<32x128xf32>
      %c76 = arith.constant 76 : index
      %479 = memref.load %arg4[%c76] : memref<81xf32, #tpu.memory_space<smem>>
      %480 = vector.broadcast %479 : f32 to vector<32x128xf32>
      %481 = arith.mulf %480, %418 : vector<32x128xf32>
      %482 = arith.addf %470, %481 : vector<32x128xf32>
      %c127_i32_90 = arith.constant 127 : i32
      %483 = tpu.dynamic_rotate %418 by %c127_i32_90 dim 1 : vector<32x128xf32>, i32 -> vector<32x128xf32>
      %c23_91 = arith.constant 23 : index
      %484 = memref.load %arg4[%c23_91] : memref<81xf32, #tpu.memory_space<smem>>
      %485 = vector.broadcast %484 : f32 to vector<32x128xf32>
      %486 = arith.mulf %485, %483 : vector<32x128xf32>
      %487 = arith.addf %474, %486 : vector<32x128xf32>
      %c50 = arith.constant 50 : index
      %488 = memref.load %arg4[%c50] : memref<81xf32, #tpu.memory_space<smem>>
      %489 = vector.broadcast %488 : f32 to vector<32x128xf32>
      %490 = arith.mulf %489, %483 : vector<32x128xf32>
      %491 = arith.addf %478, %490 : vector<32x128xf32>
      %c77 = arith.constant 77 : index
      %492 = memref.load %arg4[%c77] : memref<81xf32, #tpu.memory_space<smem>>
      %493 = vector.broadcast %492 : f32 to vector<32x128xf32>
      %494 = arith.mulf %493, %483 : vector<32x128xf32>
      %495 = arith.addf %482, %494 : vector<32x128xf32>
      %c31_i32_92 = arith.constant 31 : i32
      %496 = tpu.dynamic_rotate %418 by %c31_i32_92 dim 0 : vector<32x128xf32>, i32 -> vector<32x128xf32>
      %c1_i32_93 = arith.constant 1 : i32
      %497 = tpu.dynamic_rotate %496 by %c1_i32_93 dim 1 : vector<32x128xf32>, i32 -> vector<32x128xf32>
      %c24_94 = arith.constant 24 : index
      %498 = memref.load %arg4[%c24_94] : memref<81xf32, #tpu.memory_space<smem>>
      %499 = vector.broadcast %498 : f32 to vector<32x128xf32>
      %500 = arith.mulf %499, %497 : vector<32x128xf32>
      %501 = arith.addf %487, %500 : vector<32x128xf32>
      %c51 = arith.constant 51 : index
      %502 = memref.load %arg4[%c51] : memref<81xf32, #tpu.memory_space<smem>>
      %503 = vector.broadcast %502 : f32 to vector<32x128xf32>
      %504 = arith.mulf %503, %497 : vector<32x128xf32>
      %505 = arith.addf %491, %504 : vector<32x128xf32>
      %c78 = arith.constant 78 : index
      %506 = memref.load %arg4[%c78] : memref<81xf32, #tpu.memory_space<smem>>
      %507 = vector.broadcast %506 : f32 to vector<32x128xf32>
      %508 = arith.mulf %507, %497 : vector<32x128xf32>
      %509 = arith.addf %495, %508 : vector<32x128xf32>
      %c25_95 = arith.constant 25 : index
      %510 = memref.load %arg4[%c25_95] : memref<81xf32, #tpu.memory_space<smem>>
      %511 = vector.broadcast %510 : f32 to vector<32x128xf32>
      %512 = arith.mulf %511, %496 : vector<32x128xf32>
      %513 = arith.addf %501, %512 : vector<32x128xf32>
      %c52 = arith.constant 52 : index
      %514 = memref.load %arg4[%c52] : memref<81xf32, #tpu.memory_space<smem>>
      %515 = vector.broadcast %514 : f32 to vector<32x128xf32>
      %516 = arith.mulf %515, %496 : vector<32x128xf32>
      %517 = arith.addf %505, %516 : vector<32x128xf32>
      %c79 = arith.constant 79 : index
      %518 = memref.load %arg4[%c79] : memref<81xf32, #tpu.memory_space<smem>>
      %519 = vector.broadcast %518 : f32 to vector<32x128xf32>
      %520 = arith.mulf %519, %496 : vector<32x128xf32>
      %521 = arith.addf %509, %520 : vector<32x128xf32>
      %c127_i32_96 = arith.constant 127 : i32
      %522 = tpu.dynamic_rotate %496 by %c127_i32_96 dim 1 : vector<32x128xf32>, i32 -> vector<32x128xf32>
      %c26_97 = arith.constant 26 : index
      %523 = memref.load %arg4[%c26_97] : memref<81xf32, #tpu.memory_space<smem>>
      %524 = vector.broadcast %523 : f32 to vector<32x128xf32>
      %525 = arith.mulf %524, %522 : vector<32x128xf32>
      %526 = arith.addf %513, %525 : vector<32x128xf32>
      %c53 = arith.constant 53 : index
      %527 = memref.load %arg4[%c53] : memref<81xf32, #tpu.memory_space<smem>>
      %528 = vector.broadcast %527 : f32 to vector<32x128xf32>
      %529 = arith.mulf %528, %522 : vector<32x128xf32>
      %530 = arith.addf %517, %529 : vector<32x128xf32>
      %c80 = arith.constant 80 : index
      %531 = memref.load %arg4[%c80] : memref<81xf32, #tpu.memory_space<smem>>
      %532 = vector.broadcast %531 : f32 to vector<32x128xf32>
      %533 = arith.mulf %532, %522 : vector<32x128xf32>
      %534 = arith.addf %521, %533 : vector<32x128xf32>
      %c0_98 = arith.constant 0 : index
      %c0_99 = arith.constant 0 : index
      %c0_100 = arith.constant 0 : index
      %535 = vector.load %arg11[%c0_98, %c0_99, %c0_100] : memref<9x32x128xf32, #tpu.memory_space<vmem>>, vector<1x32x128xf32>
      %536 = vector.shape_cast %535 : vector<1x32x128xf32> to vector<32x128xf32>
      %cst_101 = arith.constant 0.000000e+00 : f32
      %537 = vector.broadcast %cst_101 : f32 to vector<32x128xf32>
      %538 = arith.maximumf %526, %537 : vector<32x128xf32>
      %539 = arith.addf %536, %538 : vector<32x128xf32>
      %cst_102 = arith.constant 0.000000e+00 : f32
      %540 = vector.broadcast %cst_102 : f32 to vector<32x128xf32>
      %541 = arith.maximumf %539, %540 : vector<32x128xf32>
      %cst_103 = arith.constant 0.000000e+00 : f32
      %542 = vector.broadcast %cst_103 : f32 to vector<32x128xf32>
      %543 = arith.select %14, %541, %542 : vector<32x128xi1>, vector<32x128xf32>
      %c3_104 = arith.constant 3 : index
      %c0_105 = arith.constant 0 : index
      %c0_106 = arith.constant 0 : index
      %544 = vector.load %arg11[%c3_104, %c0_105, %c0_106] : memref<9x32x128xf32, #tpu.memory_space<vmem>>, vector<1x32x128xf32>
      %545 = vector.shape_cast %544 : vector<1x32x128xf32> to vector<32x128xf32>
      %546 = vector.shape_cast %543 : vector<32x128xf32> to vector<1x32x128xf32>
      tpu.vector_store %arg11[%c3_104, %c0_105, %c0_106], %546 {strides = array<i32>} : memref<9x32x128xf32, #tpu.memory_space<vmem>>, vector<1x32x128xf32>,
      %c1_107 = arith.constant 1 : index
      %c0_108 = arith.constant 0 : index
      %c0_109 = arith.constant 0 : index
      %547 = vector.load %arg11[%c1_107, %c0_108, %c0_109] : memref<9x32x128xf32, #tpu.memory_space<vmem>>, vector<1x32x128xf32>
      %548 = vector.shape_cast %547 : vector<1x32x128xf32> to vector<32x128xf32>
      %cst_110 = arith.constant 0.000000e+00 : f32
      %549 = vector.broadcast %cst_110 : f32 to vector<32x128xf32>
      %550 = arith.maximumf %530, %549 : vector<32x128xf32>
      %551 = arith.addf %548, %550 : vector<32x128xf32>
      %cst_111 = arith.constant 0.000000e+00 : f32
      %552 = vector.broadcast %cst_111 : f32 to vector<32x128xf32>
      %553 = arith.maximumf %551, %552 : vector<32x128xf32>
      %cst_112 = arith.constant 0.000000e+00 : f32
      %554 = vector.broadcast %cst_112 : f32 to vector<32x128xf32>
      %555 = arith.select %14, %553, %554 : vector<32x128xi1>, vector<32x128xf32>
      %c4_113 = arith.constant 4 : index
      %c0_114 = arith.constant 0 : index
      %c0_115 = arith.constant 0 : index
      %556 = vector.load %arg11[%c4_113, %c0_114, %c0_115] : memref<9x32x128xf32, #tpu.memory_space<vmem>>, vector<1x32x128xf32>
      %557 = vector.shape_cast %556 : vector<1x32x128xf32> to vector<32x128xf32>
      %558 = vector.shape_cast %555 : vector<32x128xf32> to vector<1x32x128xf32>
      tpu.vector_store %arg11[%c4_113, %c0_114, %c0_115], %558 {strides = array<i32>} : memref<9x32x128xf32, #tpu.memory_space<vmem>>, vector<1x32x128xf32>,
      %c2_116 = arith.constant 2 : index
      %c0_117 = arith.constant 0 : index
      %c0_118 = arith.constant 0 : index
      %559 = vector.load %arg11[%c2_116, %c0_117, %c0_118] : memref<9x32x128xf32, #tpu.memory_space<vmem>>, vector<1x32x128xf32>
      %560 = vector.shape_cast %559 : vector<1x32x128xf32> to vector<32x128xf32>
      %cst_119 = arith.constant 0.000000e+00 : f32
      %561 = vector.broadcast %cst_119 : f32 to vector<32x128xf32>
      %562 = arith.maximumf %534, %561 : vector<32x128xf32>
      %563 = arith.addf %560, %562 : vector<32x128xf32>
      %cst_120 = arith.constant 0.000000e+00 : f32
      %564 = vector.broadcast %cst_120 : f32 to vector<32x128xf32>
      %565 = arith.maximumf %563, %564 : vector<32x128xf32>
      %cst_121 = arith.constant 0.000000e+00 : f32
      %566 = vector.broadcast %cst_121 : f32 to vector<32x128xf32>
      %567 = arith.select %14, %565, %566 : vector<32x128xi1>, vector<32x128xf32>
      %c5_122 = arith.constant 5 : index
      %c0_123 = arith.constant 0 : index
      %c0_124 = arith.constant 0 : index
      %568 = vector.load %arg11[%c5_122, %c0_123, %c0_124] : memref<9x32x128xf32, #tpu.memory_space<vmem>>, vector<1x32x128xf32>
      %569 = vector.shape_cast %568 : vector<1x32x128xf32> to vector<32x128xf32>
      %570 = vector.shape_cast %567 : vector<32x128xf32> to vector<1x32x128xf32>
      tpu.vector_store %arg11[%c5_122, %c0_123, %c0_124], %570 {strides = array<i32>} : memref<9x32x128xf32, #tpu.memory_space<vmem>>, vector<1x32x128xf32>,
      %c0_125 = arith.constant 0 : index
      %571 = memref.load %arg7[%c0_125] : memref<3xf32, #tpu.memory_space<smem>>
      %572 = vector.broadcast %571 : f32 to vector<32x128xf32>
      %c1_126 = arith.constant 1 : index
      %573 = memref.load %arg7[%c1_126] : memref<3xf32, #tpu.memory_space<smem>>
      %574 = vector.broadcast %573 : f32 to vector<32x128xf32>
      %c2_127 = arith.constant 2 : index
      %575 = memref.load %arg7[%c2_127] : memref<3xf32, #tpu.memory_space<smem>>
      %576 = vector.broadcast %575 : f32 to vector<32x128xf32>
      %c3_128 = arith.constant 3 : index
      %c0_129 = arith.constant 0 : index
      %c0_130 = arith.constant 0 : index
      %577 = vector.load %arg11[%c3_128, %c0_129, %c0_130] : memref<9x32x128xf32, #tpu.memory_space<vmem>>, vector<1x32x128xf32>
      %578 = vector.shape_cast %577 : vector<1x32x128xf32> to vector<32x128xf32>
      %c1_i32_131 = arith.constant 1 : i32
      %579 = tpu.dynamic_rotate %578 by %c1_i32_131 dim 0 : vector<32x128xf32>, i32 -> vector<32x128xf32>
      %c1_i32_132 = arith.constant 1 : i32
      %580 = tpu.dynamic_rotate %579 by %c1_i32_132 dim 1 : vector<32x128xf32>, i32 -> vector<32x128xf32>
      %c0_133 = arith.constant 0 : index
      %581 = memref.load %arg6[%c0_133] : memref<81xf32, #tpu.memory_space<smem>>
      %582 = vector.broadcast %581 : f32 to vector<32x128xf32>
      %583 = arith.mulf %582, %580 : vector<32x128xf32>
      %584 = arith.addf %572, %583 : vector<32x128xf32>
      %c27_134 = arith.constant 27 : index
      %585 = memref.load %arg6[%c27_134] : memref<81xf32, #tpu.memory_space<smem>>
      %586 = vector.broadcast %585 : f32 to vector<32x128xf32>
      %587 = arith.mulf %586, %580 : vector<32x128xf32>
      %588 = arith.addf %574, %587 : vector<32x128xf32>
      %c54_135 = arith.constant 54 : index
      %589 = memref.load %arg6[%c54_135] : memref<81xf32, #tpu.memory_space<smem>>
      %590 = vector.broadcast %589 : f32 to vector<32x128xf32>
      %591 = arith.mulf %590, %580 : vector<32x128xf32>
      %592 = arith.addf %576, %591 : vector<32x128xf32>
      %c1_136 = arith.constant 1 : index
      %593 = memref.load %arg6[%c1_136] : memref<81xf32, #tpu.memory_space<smem>>
      %594 = vector.broadcast %593 : f32 to vector<32x128xf32>
      %595 = arith.mulf %594, %579 : vector<32x128xf32>
      %596 = arith.addf %584, %595 : vector<32x128xf32>
      %c28_137 = arith.constant 28 : index
      %597 = memref.load %arg6[%c28_137] : memref<81xf32, #tpu.memory_space<smem>>
      %598 = vector.broadcast %597 : f32 to vector<32x128xf32>
      %599 = arith.mulf %598, %579 : vector<32x128xf32>
      %600 = arith.addf %588, %599 : vector<32x128xf32>
      %c55_138 = arith.constant 55 : index
      %601 = memref.load %arg6[%c55_138] : memref<81xf32, #tpu.memory_space<smem>>
      %602 = vector.broadcast %601 : f32 to vector<32x128xf32>
      %603 = arith.mulf %602, %579 : vector<32x128xf32>
      %604 = arith.addf %592, %603 : vector<32x128xf32>
      %c127_i32_139 = arith.constant 127 : i32
      %605 = tpu.dynamic_rotate %579 by %c127_i32_139 dim 1 : vector<32x128xf32>, i32 -> vector<32x128xf32>
      %c2_140 = arith.constant 2 : index
      %606 = memref.load %arg6[%c2_140] : memref<81xf32, #tpu.memory_space<smem>>
      %607 = vector.broadcast %606 : f32 to vector<32x128xf32>
      %608 = arith.mulf %607, %605 : vector<32x128xf32>
      %609 = arith.addf %596, %608 : vector<32x128xf32>
      %c29_141 = arith.constant 29 : index
      %610 = memref.load %arg6[%c29_141] : memref<81xf32, #tpu.memory_space<smem>>
      %611 = vector.broadcast %610 : f32 to vector<32x128xf32>
      %612 = arith.mulf %611, %605 : vector<32x128xf32>
      %613 = arith.addf %600, %612 : vector<32x128xf32>
      %c56_142 = arith.constant 56 : index
      %614 = memref.load %arg6[%c56_142] : memref<81xf32, #tpu.memory_space<smem>>
      %615 = vector.broadcast %614 : f32 to vector<32x128xf32>
      %616 = arith.mulf %615, %605 : vector<32x128xf32>
      %617 = arith.addf %604, %616 : vector<32x128xf32>
      %c1_i32_143 = arith.constant 1 : i32
      %618 = tpu.dynamic_rotate %578 by %c1_i32_143 dim 1 : vector<32x128xf32>, i32 -> vector<32x128xf32>
      %c3_144 = arith.constant 3 : index
      %619 = memref.load %arg6[%c3_144] : memref<81xf32, #tpu.memory_space<smem>>
      %620 = vector.broadcast %619 : f32 to vector<32x128xf32>
      %621 = arith.mulf %620, %618 : vector<32x128xf32>
      %622 = arith.addf %609, %621 : vector<32x128xf32>
      %c30_145 = arith.constant 30 : index
      %623 = memref.load %arg6[%c30_145] : memref<81xf32, #tpu.memory_space<smem>>
      %624 = vector.broadcast %623 : f32 to vector<32x128xf32>
      %625 = arith.mulf %624, %618 : vector<32x128xf32>
      %626 = arith.addf %613, %625 : vector<32x128xf32>
      %c57_146 = arith.constant 57 : index
      %627 = memref.load %arg6[%c57_146] : memref<81xf32, #tpu.memory_space<smem>>
      %628 = vector.broadcast %627 : f32 to vector<32x128xf32>
      %629 = arith.mulf %628, %618 : vector<32x128xf32>
      %630 = arith.addf %617, %629 : vector<32x128xf32>
      %c4_147 = arith.constant 4 : index
      %631 = memref.load %arg6[%c4_147] : memref<81xf32, #tpu.memory_space<smem>>
      %632 = vector.broadcast %631 : f32 to vector<32x128xf32>
      %633 = arith.mulf %632, %578 : vector<32x128xf32>
      %634 = arith.addf %622, %633 : vector<32x128xf32>
      %c31_148 = arith.constant 31 : index
      %635 = memref.load %arg6[%c31_148] : memref<81xf32, #tpu.memory_space<smem>>
      %636 = vector.broadcast %635 : f32 to vector<32x128xf32>
      %637 = arith.mulf %636, %578 : vector<32x128xf32>
      %638 = arith.addf %626, %637 : vector<32x128xf32>
      %c58_149 = arith.constant 58 : index
      %639 = memref.load %arg6[%c58_149] : memref<81xf32, #tpu.memory_space<smem>>
      %640 = vector.broadcast %639 : f32 to vector<32x128xf32>
      %641 = arith.mulf %640, %578 : vector<32x128xf32>
      %642 = arith.addf %630, %641 : vector<32x128xf32>
      %c127_i32_150 = arith.constant 127 : i32
      %643 = tpu.dynamic_rotate %578 by %c127_i32_150 dim 1 : vector<32x128xf32>, i32 -> vector<32x128xf32>
      %c5_151 = arith.constant 5 : index
      %644 = memref.load %arg6[%c5_151] : memref<81xf32, #tpu.memory_space<smem>>
      %645 = vector.broadcast %644 : f32 to vector<32x128xf32>
      %646 = arith.mulf %645, %643 : vector<32x128xf32>
      %647 = arith.addf %634, %646 : vector<32x128xf32>
      %c32_152 = arith.constant 32 : index
      %648 = memref.load %arg6[%c32_152] : memref<81xf32, #tpu.memory_space<smem>>
      %649 = vector.broadcast %648 : f32 to vector<32x128xf32>
      %650 = arith.mulf %649, %643 : vector<32x128xf32>
      %651 = arith.addf %638, %650 : vector<32x128xf32>
      %c59_153 = arith.constant 59 : index
      %652 = memref.load %arg6[%c59_153] : memref<81xf32, #tpu.memory_space<smem>>
      %653 = vector.broadcast %652 : f32 to vector<32x128xf32>
      %654 = arith.mulf %653, %643 : vector<32x128xf32>
      %655 = arith.addf %642, %654 : vector<32x128xf32>
      %c31_i32_154 = arith.constant 31 : i32
      %656 = tpu.dynamic_rotate %578 by %c31_i32_154 dim 0 : vector<32x128xf32>, i32 -> vector<32x128xf32>
      %c1_i32_155 = arith.constant 1 : i32
      %657 = tpu.dynamic_rotate %656 by %c1_i32_155 dim 1 : vector<32x128xf32>, i32 -> vector<32x128xf32>
      %c6_156 = arith.constant 6 : index
      %658 = memref.load %arg6[%c6_156] : memref<81xf32, #tpu.memory_space<smem>>
      %659 = vector.broadcast %658 : f32 to vector<32x128xf32>
      %660 = arith.mulf %659, %657 : vector<32x128xf32>
      %661 = arith.addf %647, %660 : vector<32x128xf32>
      %c33_157 = arith.constant 33 : index
      %662 = memref.load %arg6[%c33_157] : memref<81xf32, #tpu.memory_space<smem>>
      %663 = vector.broadcast %662 : f32 to vector<32x128xf32>
      %664 = arith.mulf %663, %657 : vector<32x128xf32>
      %665 = arith.addf %651, %664 : vector<32x128xf32>
      %c60_158 = arith.constant 60 : index
      %666 = memref.load %arg6[%c60_158] : memref<81xf32, #tpu.memory_space<smem>>
      %667 = vector.broadcast %666 : f32 to vector<32x128xf32>
      %668 = arith.mulf %667, %657 : vector<32x128xf32>
      %669 = arith.addf %655, %668 : vector<32x128xf32>
      %c7_159 = arith.constant 7 : index
      %670 = memref.load %arg6[%c7_159] : memref<81xf32, #tpu.memory_space<smem>>
      %671 = vector.broadcast %670 : f32 to vector<32x128xf32>
      %672 = arith.mulf %671, %656 : vector<32x128xf32>
      %673 = arith.addf %661, %672 : vector<32x128xf32>
      %c34_160 = arith.constant 34 : index
      %674 = memref.load %arg6[%c34_160] : memref<81xf32, #tpu.memory_space<smem>>
      %675 = vector.broadcast %674 : f32 to vector<32x128xf32>
      %676 = arith.mulf %675, %656 : vector<32x128xf32>
      %677 = arith.addf %665, %676 : vector<32x128xf32>
      %c61_161 = arith.constant 61 : index
      %678 = memref.load %arg6[%c61_161] : memref<81xf32, #tpu.memory_space<smem>>
      %679 = vector.broadcast %678 : f32 to vector<32x128xf32>
      %680 = arith.mulf %679, %656 : vector<32x128xf32>
      %681 = arith.addf %669, %680 : vector<32x128xf32>
      %c127_i32_162 = arith.constant 127 : i32
      %682 = tpu.dynamic_rotate %656 by %c127_i32_162 dim 1 : vector<32x128xf32>, i32 -> vector<32x128xf32>
      %c8_163 = arith.constant 8 : index
      %683 = memref.load %arg6[%c8_163] : memref<81xf32, #tpu.memory_space<smem>>
      %684 = vector.broadcast %683 : f32 to vector<32x128xf32>
      %685 = arith.mulf %684, %682 : vector<32x128xf32>
      %686 = arith.addf %673, %685 : vector<32x128xf32>
      %c35_164 = arith.constant 35 : index
      %687 = memref.load %arg6[%c35_164] : memref<81xf32, #tpu.memory_space<smem>>
      %688 = vector.broadcast %687 : f32 to vector<32x128xf32>
      %689 = arith.mulf %688, %682 : vector<32x128xf32>
      %690 = arith.addf %677, %689 : vector<32x128xf32>
      %c62_165 = arith.constant 62 : index
      %691 = memref.load %arg6[%c62_165] : memref<81xf32, #tpu.memory_space<smem>>
      %692 = vector.broadcast %691 : f32 to vector<32x128xf32>
      %693 = arith.mulf %692, %682 : vector<32x128xf32>
      %694 = arith.addf %681, %693 : vector<32x128xf32>
      %c4_166 = arith.constant 4 : index
      %c0_167 = arith.constant 0 : index
      %c0_168 = arith.constant 0 : index
      %695 = vector.load %arg11[%c4_166, %c0_167, %c0_168] : memref<9x32x128xf32, #tpu.memory_space<vmem>>, vector<1x32x128xf32>
      %696 = vector.shape_cast %695 : vector<1x32x128xf32> to vector<32x128xf32>
      %c1_i32_169 = arith.constant 1 : i32
      %697 = tpu.dynamic_rotate %696 by %c1_i32_169 dim 0 : vector<32x128xf32>, i32 -> vector<32x128xf32>
      %c1_i32_170 = arith.constant 1 : i32
      %698 = tpu.dynamic_rotate %697 by %c1_i32_170 dim 1 : vector<32x128xf32>, i32 -> vector<32x128xf32>
      %c9_171 = arith.constant 9 : index
      %699 = memref.load %arg6[%c9_171] : memref<81xf32, #tpu.memory_space<smem>>
      %700 = vector.broadcast %699 : f32 to vector<32x128xf32>
      %701 = arith.mulf %700, %698 : vector<32x128xf32>
      %702 = arith.addf %686, %701 : vector<32x128xf32>
      %c36_172 = arith.constant 36 : index
      %703 = memref.load %arg6[%c36_172] : memref<81xf32, #tpu.memory_space<smem>>
      %704 = vector.broadcast %703 : f32 to vector<32x128xf32>
      %705 = arith.mulf %704, %698 : vector<32x128xf32>
      %706 = arith.addf %690, %705 : vector<32x128xf32>
      %c63_173 = arith.constant 63 : index
      %707 = memref.load %arg6[%c63_173] : memref<81xf32, #tpu.memory_space<smem>>
      %708 = vector.broadcast %707 : f32 to vector<32x128xf32>
      %709 = arith.mulf %708, %698 : vector<32x128xf32>
      %710 = arith.addf %694, %709 : vector<32x128xf32>
      %c10_174 = arith.constant 10 : index
      %711 = memref.load %arg6[%c10_174] : memref<81xf32, #tpu.memory_space<smem>>
      %712 = vector.broadcast %711 : f32 to vector<32x128xf32>
      %713 = arith.mulf %712, %697 : vector<32x128xf32>
      %714 = arith.addf %702, %713 : vector<32x128xf32>
      %c37_175 = arith.constant 37 : index
      %715 = memref.load %arg6[%c37_175] : memref<81xf32, #tpu.memory_space<smem>>
      %716 = vector.broadcast %715 : f32 to vector<32x128xf32>
      %717 = arith.mulf %716, %697 : vector<32x128xf32>
      %718 = arith.addf %706, %717 : vector<32x128xf32>
      %c64_176 = arith.constant 64 : index
      %719 = memref.load %arg6[%c64_176] : memref<81xf32, #tpu.memory_space<smem>>
      %720 = vector.broadcast %719 : f32 to vector<32x128xf32>
      %721 = arith.mulf %720, %697 : vector<32x128xf32>
      %722 = arith.addf %710, %721 : vector<32x128xf32>
      %c127_i32_177 = arith.constant 127 : i32
      %723 = tpu.dynamic_rotate %697 by %c127_i32_177 dim 1 : vector<32x128xf32>, i32 -> vector<32x128xf32>
      %c11_178 = arith.constant 11 : index
      %724 = memref.load %arg6[%c11_178] : memref<81xf32, #tpu.memory_space<smem>>
      %725 = vector.broadcast %724 : f32 to vector<32x128xf32>
      %726 = arith.mulf %725, %723 : vector<32x128xf32>
      %727 = arith.addf %714, %726 : vector<32x128xf32>
      %c38_179 = arith.constant 38 : index
      %728 = memref.load %arg6[%c38_179] : memref<81xf32, #tpu.memory_space<smem>>
      %729 = vector.broadcast %728 : f32 to vector<32x128xf32>
      %730 = arith.mulf %729, %723 : vector<32x128xf32>
      %731 = arith.addf %718, %730 : vector<32x128xf32>
      %c65_180 = arith.constant 65 : index
      %732 = memref.load %arg6[%c65_180] : memref<81xf32, #tpu.memory_space<smem>>
      %733 = vector.broadcast %732 : f32 to vector<32x128xf32>
      %734 = arith.mulf %733, %723 : vector<32x128xf32>
      %735 = arith.addf %722, %734 : vector<32x128xf32>
      %c1_i32_181 = arith.constant 1 : i32
      %736 = tpu.dynamic_rotate %696 by %c1_i32_181 dim 1 : vector<32x128xf32>, i32 -> vector<32x128xf32>
      %c12_182 = arith.constant 12 : index
      %737 = memref.load %arg6[%c12_182] : memref<81xf32, #tpu.memory_space<smem>>
      %738 = vector.broadcast %737 : f32 to vector<32x128xf32>
      %739 = arith.mulf %738, %736 : vector<32x128xf32>
      %740 = arith.addf %727, %739 : vector<32x128xf32>
      %c39_183 = arith.constant 39 : index
      %741 = memref.load %arg6[%c39_183] : memref<81xf32, #tpu.memory_space<smem>>
      %742 = vector.broadcast %741 : f32 to vector<32x128xf32>
      %743 = arith.mulf %742, %736 : vector<32x128xf32>
      %744 = arith.addf %731, %743 : vector<32x128xf32>
      %c66_184 = arith.constant 66 : index
      %745 = memref.load %arg6[%c66_184] : memref<81xf32, #tpu.memory_space<smem>>
      %746 = vector.broadcast %745 : f32 to vector<32x128xf32>
      %747 = arith.mulf %746, %736 : vector<32x128xf32>
      %748 = arith.addf %735, %747 : vector<32x128xf32>
      %c13_185 = arith.constant 13 : index
      %749 = memref.load %arg6[%c13_185] : memref<81xf32, #tpu.memory_space<smem>>
      %750 = vector.broadcast %749 : f32 to vector<32x128xf32>
      %751 = arith.mulf %750, %696 : vector<32x128xf32>
      %752 = arith.addf %740, %751 : vector<32x128xf32>
      %c40_186 = arith.constant 40 : index
      %753 = memref.load %arg6[%c40_186] : memref<81xf32, #tpu.memory_space<smem>>
      %754 = vector.broadcast %753 : f32 to vector<32x128xf32>
      %755 = arith.mulf %754, %696 : vector<32x128xf32>
      %756 = arith.addf %744, %755 : vector<32x128xf32>
      %c67_187 = arith.constant 67 : index
      %757 = memref.load %arg6[%c67_187] : memref<81xf32, #tpu.memory_space<smem>>
      %758 = vector.broadcast %757 : f32 to vector<32x128xf32>
      %759 = arith.mulf %758, %696 : vector<32x128xf32>
      %760 = arith.addf %748, %759 : vector<32x128xf32>
      %c127_i32_188 = arith.constant 127 : i32
      %761 = tpu.dynamic_rotate %696 by %c127_i32_188 dim 1 : vector<32x128xf32>, i32 -> vector<32x128xf32>
      %c14_189 = arith.constant 14 : index
      %762 = memref.load %arg6[%c14_189] : memref<81xf32, #tpu.memory_space<smem>>
      %763 = vector.broadcast %762 : f32 to vector<32x128xf32>
      %764 = arith.mulf %763, %761 : vector<32x128xf32>
      %765 = arith.addf %752, %764 : vector<32x128xf32>
      %c41_190 = arith.constant 41 : index
      %766 = memref.load %arg6[%c41_190] : memref<81xf32, #tpu.memory_space<smem>>
      %767 = vector.broadcast %766 : f32 to vector<32x128xf32>
      %768 = arith.mulf %767, %761 : vector<32x128xf32>
      %769 = arith.addf %756, %768 : vector<32x128xf32>
      %c68_191 = arith.constant 68 : index
      %770 = memref.load %arg6[%c68_191] : memref<81xf32, #tpu.memory_space<smem>>
      %771 = vector.broadcast %770 : f32 to vector<32x128xf32>
      %772 = arith.mulf %771, %761 : vector<32x128xf32>
      %773 = arith.addf %760, %772 : vector<32x128xf32>
      %c31_i32_192 = arith.constant 31 : i32
      %774 = tpu.dynamic_rotate %696 by %c31_i32_192 dim 0 : vector<32x128xf32>, i32 -> vector<32x128xf32>
      %c1_i32_193 = arith.constant 1 : i32
      %775 = tpu.dynamic_rotate %774 by %c1_i32_193 dim 1 : vector<32x128xf32>, i32 -> vector<32x128xf32>
      %c15_194 = arith.constant 15 : index
      %776 = memref.load %arg6[%c15_194] : memref<81xf32, #tpu.memory_space<smem>>
      %777 = vector.broadcast %776 : f32 to vector<32x128xf32>
      %778 = arith.mulf %777, %775 : vector<32x128xf32>
      %779 = arith.addf %765, %778 : vector<32x128xf32>
      %c42_195 = arith.constant 42 : index
      %780 = memref.load %arg6[%c42_195] : memref<81xf32, #tpu.memory_space<smem>>
      %781 = vector.broadcast %780 : f32 to vector<32x128xf32>
      %782 = arith.mulf %781, %775 : vector<32x128xf32>
      %783 = arith.addf %769, %782 : vector<32x128xf32>
      %c69_196 = arith.constant 69 : index
      %784 = memref.load %arg6[%c69_196] : memref<81xf32, #tpu.memory_space<smem>>
      %785 = vector.broadcast %784 : f32 to vector<32x128xf32>
      %786 = arith.mulf %785, %775 : vector<32x128xf32>
      %787 = arith.addf %773, %786 : vector<32x128xf32>
      %c16_197 = arith.constant 16 : index
      %788 = memref.load %arg6[%c16_197] : memref<81xf32, #tpu.memory_space<smem>>
      %789 = vector.broadcast %788 : f32 to vector<32x128xf32>
      %790 = arith.mulf %789, %774 : vector<32x128xf32>
      %791 = arith.addf %779, %790 : vector<32x128xf32>
      %c43_198 = arith.constant 43 : index
      %792 = memref.load %arg6[%c43_198] : memref<81xf32, #tpu.memory_space<smem>>
      %793 = vector.broadcast %792 : f32 to vector<32x128xf32>
      %794 = arith.mulf %793, %774 : vector<32x128xf32>
      %795 = arith.addf %783, %794 : vector<32x128xf32>
      %c70_199 = arith.constant 70 : index
      %796 = memref.load %arg6[%c70_199] : memref<81xf32, #tpu.memory_space<smem>>
      %797 = vector.broadcast %796 : f32 to vector<32x128xf32>
      %798 = arith.mulf %797, %774 : vector<32x128xf32>
      %799 = arith.addf %787, %798 : vector<32x128xf32>
      %c127_i32_200 = arith.constant 127 : i32
      %800 = tpu.dynamic_rotate %774 by %c127_i32_200 dim 1 : vector<32x128xf32>, i32 -> vector<32x128xf32>
      %c17_201 = arith.constant 17 : index
      %801 = memref.load %arg6[%c17_201] : memref<81xf32, #tpu.memory_space<smem>>
      %802 = vector.broadcast %801 : f32 to vector<32x128xf32>
      %803 = arith.mulf %802, %800 : vector<32x128xf32>
      %804 = arith.addf %791, %803 : vector<32x128xf32>
      %c44_202 = arith.constant 44 : index
      %805 = memref.load %arg6[%c44_202] : memref<81xf32, #tpu.memory_space<smem>>
      %806 = vector.broadcast %805 : f32 to vector<32x128xf32>
      %807 = arith.mulf %806, %800 : vector<32x128xf32>
      %808 = arith.addf %795, %807 : vector<32x128xf32>
      %c71_203 = arith.constant 71 : index
      %809 = memref.load %arg6[%c71_203] : memref<81xf32, #tpu.memory_space<smem>>
      %810 = vector.broadcast %809 : f32 to vector<32x128xf32>
      %811 = arith.mulf %810, %800 : vector<32x128xf32>
      %812 = arith.addf %799, %811 : vector<32x128xf32>
      %c5_204 = arith.constant 5 : index
      %c0_205 = arith.constant 0 : index
      %c0_206 = arith.constant 0 : index
      %813 = vector.load %arg11[%c5_204, %c0_205, %c0_206] : memref<9x32x128xf32, #tpu.memory_space<vmem>>, vector<1x32x128xf32>
      %814 = vector.shape_cast %813 : vector<1x32x128xf32> to vector<32x128xf32>
      %c1_i32_207 = arith.constant 1 : i32
      %815 = tpu.dynamic_rotate %814 by %c1_i32_207 dim 0 : vector<32x128xf32>, i32 -> vector<32x128xf32>
      %c1_i32_208 = arith.constant 1 : i32
      %816 = tpu.dynamic_rotate %815 by %c1_i32_208 dim 1 : vector<32x128xf32>, i32 -> vector<32x128xf32>
      %c18_209 = arith.constant 18 : index
      %817 = memref.load %arg6[%c18_209] : memref<81xf32, #tpu.memory_space<smem>>
      %818 = vector.broadcast %817 : f32 to vector<32x128xf32>
      %819 = arith.mulf %818, %816 : vector<32x128xf32>
      %820 = arith.addf %804, %819 : vector<32x128xf32>
      %c45_210 = arith.constant 45 : index
      %821 = memref.load %arg6[%c45_210] : memref<81xf32, #tpu.memory_space<smem>>
      %822 = vector.broadcast %821 : f32 to vector<32x128xf32>
      %823 = arith.mulf %822, %816 : vector<32x128xf32>
      %824 = arith.addf %808, %823 : vector<32x128xf32>
      %c72_211 = arith.constant 72 : index
      %825 = memref.load %arg6[%c72_211] : memref<81xf32, #tpu.memory_space<smem>>
      %826 = vector.broadcast %825 : f32 to vector<32x128xf32>
      %827 = arith.mulf %826, %816 : vector<32x128xf32>
      %828 = arith.addf %812, %827 : vector<32x128xf32>
      %c19_212 = arith.constant 19 : index
      %829 = memref.load %arg6[%c19_212] : memref<81xf32, #tpu.memory_space<smem>>
      %830 = vector.broadcast %829 : f32 to vector<32x128xf32>
      %831 = arith.mulf %830, %815 : vector<32x128xf32>
      %832 = arith.addf %820, %831 : vector<32x128xf32>
      %c46_213 = arith.constant 46 : index
      %833 = memref.load %arg6[%c46_213] : memref<81xf32, #tpu.memory_space<smem>>
      %834 = vector.broadcast %833 : f32 to vector<32x128xf32>
      %835 = arith.mulf %834, %815 : vector<32x128xf32>
      %836 = arith.addf %824, %835 : vector<32x128xf32>
      %c73_214 = arith.constant 73 : index
      %837 = memref.load %arg6[%c73_214] : memref<81xf32, #tpu.memory_space<smem>>
      %838 = vector.broadcast %837 : f32 to vector<32x128xf32>
      %839 = arith.mulf %838, %815 : vector<32x128xf32>
      %840 = arith.addf %828, %839 : vector<32x128xf32>
      %c127_i32_215 = arith.constant 127 : i32
      %841 = tpu.dynamic_rotate %815 by %c127_i32_215 dim 1 : vector<32x128xf32>, i32 -> vector<32x128xf32>
      %c20_216 = arith.constant 20 : index
      %842 = memref.load %arg6[%c20_216] : memref<81xf32, #tpu.memory_space<smem>>
      %843 = vector.broadcast %842 : f32 to vector<32x128xf32>
      %844 = arith.mulf %843, %841 : vector<32x128xf32>
      %845 = arith.addf %832, %844 : vector<32x128xf32>
      %c47_217 = arith.constant 47 : index
      %846 = memref.load %arg6[%c47_217] : memref<81xf32, #tpu.memory_space<smem>>
      %847 = vector.broadcast %846 : f32 to vector<32x128xf32>
      %848 = arith.mulf %847, %841 : vector<32x128xf32>
      %849 = arith.addf %836, %848 : vector<32x128xf32>
      %c74_218 = arith.constant 74 : index
      %850 = memref.load %arg6[%c74_218] : memref<81xf32, #tpu.memory_space<smem>>
      %851 = vector.broadcast %850 : f32 to vector<32x128xf32>
      %852 = arith.mulf %851, %841 : vector<32x128xf32>
      %853 = arith.addf %840, %852 : vector<32x128xf32>
      %c1_i32_219 = arith.constant 1 : i32
      %854 = tpu.dynamic_rotate %814 by %c1_i32_219 dim 1 : vector<32x128xf32>, i32 -> vector<32x128xf32>
      %c21_220 = arith.constant 21 : index
      %855 = memref.load %arg6[%c21_220] : memref<81xf32, #tpu.memory_space<smem>>
      %856 = vector.broadcast %855 : f32 to vector<32x128xf32>
      %857 = arith.mulf %856, %854 : vector<32x128xf32>
      %858 = arith.addf %845, %857 : vector<32x128xf32>
      %c48_221 = arith.constant 48 : index
      %859 = memref.load %arg6[%c48_221] : memref<81xf32, #tpu.memory_space<smem>>
      %860 = vector.broadcast %859 : f32 to vector<32x128xf32>
      %861 = arith.mulf %860, %854 : vector<32x128xf32>
      %862 = arith.addf %849, %861 : vector<32x128xf32>
      %c75_222 = arith.constant 75 : index
      %863 = memref.load %arg6[%c75_222] : memref<81xf32, #tpu.memory_space<smem>>
      %864 = vector.broadcast %863 : f32 to vector<32x128xf32>
      %865 = arith.mulf %864, %854 : vector<32x128xf32>
      %866 = arith.addf %853, %865 : vector<32x128xf32>
      %c22_223 = arith.constant 22 : index
      %867 = memref.load %arg6[%c22_223] : memref<81xf32, #tpu.memory_space<smem>>
      %868 = vector.broadcast %867 : f32 to vector<32x128xf32>
      %869 = arith.mulf %868, %814 : vector<32x128xf32>
      %870 = arith.addf %858, %869 : vector<32x128xf32>
      %c49_224 = arith.constant 49 : index
      %871 = memref.load %arg6[%c49_224] : memref<81xf32, #tpu.memory_space<smem>>
      %872 = vector.broadcast %871 : f32 to vector<32x128xf32>
      %873 = arith.mulf %872, %814 : vector<32x128xf32>
      %874 = arith.addf %862, %873 : vector<32x128xf32>
      %c76_225 = arith.constant 76 : index
      %875 = memref.load %arg6[%c76_225] : memref<81xf32, #tpu.memory_space<smem>>
      %876 = vector.broadcast %875 : f32 to vector<32x128xf32>
      %877 = arith.mulf %876, %814 : vector<32x128xf32>
      %878 = arith.addf %866, %877 : vector<32x128xf32>
      %c127_i32_226 = arith.constant 127 : i32
      %879 = tpu.dynamic_rotate %814 by %c127_i32_226 dim 1 : vector<32x128xf32>, i32 -> vector<32x128xf32>
      %c23_227 = arith.constant 23 : index
      %880 = memref.load %arg6[%c23_227] : memref<81xf32, #tpu.memory_space<smem>>
      %881 = vector.broadcast %880 : f32 to vector<32x128xf32>
      %882 = arith.mulf %881, %879 : vector<32x128xf32>
      %883 = arith.addf %870, %882 : vector<32x128xf32>
      %c50_228 = arith.constant 50 : index
      %884 = memref.load %arg6[%c50_228] : memref<81xf32, #tpu.memory_space<smem>>
      %885 = vector.broadcast %884 : f32 to vector<32x128xf32>
      %886 = arith.mulf %885, %879 : vector<32x128xf32>
      %887 = arith.addf %874, %886 : vector<32x128xf32>
      %c77_229 = arith.constant 77 : index
      %888 = memref.load %arg6[%c77_229] : memref<81xf32, #tpu.memory_space<smem>>
      %889 = vector.broadcast %888 : f32 to vector<32x128xf32>
      %890 = arith.mulf %889, %879 : vector<32x128xf32>
      %891 = arith.addf %878, %890 : vector<32x128xf32>
      %c31_i32_230 = arith.constant 31 : i32
      %892 = tpu.dynamic_rotate %814 by %c31_i32_230 dim 0 : vector<32x128xf32>, i32 -> vector<32x128xf32>
      %c1_i32_231 = arith.constant 1 : i32
      %893 = tpu.dynamic_rotate %892 by %c1_i32_231 dim 1 : vector<32x128xf32>, i32 -> vector<32x128xf32>
      %c24_232 = arith.constant 24 : index
      %894 = memref.load %arg6[%c24_232] : memref<81xf32, #tpu.memory_space<smem>>
      %895 = vector.broadcast %894 : f32 to vector<32x128xf32>
      %896 = arith.mulf %895, %893 : vector<32x128xf32>
      %897 = arith.addf %883, %896 : vector<32x128xf32>
      %c51_233 = arith.constant 51 : index
      %898 = memref.load %arg6[%c51_233] : memref<81xf32, #tpu.memory_space<smem>>
      %899 = vector.broadcast %898 : f32 to vector<32x128xf32>
      %900 = arith.mulf %899, %893 : vector<32x128xf32>
      %901 = arith.addf %887, %900 : vector<32x128xf32>
      %c78_234 = arith.constant 78 : index
      %902 = memref.load %arg6[%c78_234] : memref<81xf32, #tpu.memory_space<smem>>
      %903 = vector.broadcast %902 : f32 to vector<32x128xf32>
      %904 = arith.mulf %903, %893 : vector<32x128xf32>
      %905 = arith.addf %891, %904 : vector<32x128xf32>
      %c25_235 = arith.constant 25 : index
      %906 = memref.load %arg6[%c25_235] : memref<81xf32, #tpu.memory_space<smem>>
      %907 = vector.broadcast %906 : f32 to vector<32x128xf32>
      %908 = arith.mulf %907, %892 : vector<32x128xf32>
      %909 = arith.addf %897, %908 : vector<32x128xf32>
      %c52_236 = arith.constant 52 : index
      %910 = memref.load %arg6[%c52_236] : memref<81xf32, #tpu.memory_space<smem>>
      %911 = vector.broadcast %910 : f32 to vector<32x128xf32>
      %912 = arith.mulf %911, %892 : vector<32x128xf32>
      %913 = arith.addf %901, %912 : vector<32x128xf32>
      %c79_237 = arith.constant 79 : index
      %914 = memref.load %arg6[%c79_237] : memref<81xf32, #tpu.memory_space<smem>>
      %915 = vector.broadcast %914 : f32 to vector<32x128xf32>
      %916 = arith.mulf %915, %892 : vector<32x128xf32>
      %917 = arith.addf %905, %916 : vector<32x128xf32>
      %c127_i32_238 = arith.constant 127 : i32
      %918 = tpu.dynamic_rotate %892 by %c127_i32_238 dim 1 : vector<32x128xf32>, i32 -> vector<32x128xf32>
      %c26_239 = arith.constant 26 : index
      %919 = memref.load %arg6[%c26_239] : memref<81xf32, #tpu.memory_space<smem>>
      %920 = vector.broadcast %919 : f32 to vector<32x128xf32>
      %921 = arith.mulf %920, %918 : vector<32x128xf32>
      %922 = arith.addf %909, %921 : vector<32x128xf32>
      %c53_240 = arith.constant 53 : index
      %923 = memref.load %arg6[%c53_240] : memref<81xf32, #tpu.memory_space<smem>>
      %924 = vector.broadcast %923 : f32 to vector<32x128xf32>
      %925 = arith.mulf %924, %918 : vector<32x128xf32>
      %926 = arith.addf %913, %925 : vector<32x128xf32>
      %c80_241 = arith.constant 80 : index
      %927 = memref.load %arg6[%c80_241] : memref<81xf32, #tpu.memory_space<smem>>
      %928 = vector.broadcast %927 : f32 to vector<32x128xf32>
      %929 = arith.mulf %928, %918 : vector<32x128xf32>
      %930 = arith.addf %917, %929 : vector<32x128xf32>
      %c0_242 = arith.constant 0 : index
      %c0_243 = arith.constant 0 : index
      %c0_244 = arith.constant 0 : index
      %931 = vector.load %arg11[%c0_242, %c0_243, %c0_244] : memref<9x32x128xf32, #tpu.memory_space<vmem>>, vector<1x32x128xf32>
      %932 = vector.shape_cast %931 : vector<1x32x128xf32> to vector<32x128xf32>
      %cst_245 = arith.constant 0.000000e+00 : f32
      %933 = vector.broadcast %cst_245 : f32 to vector<32x128xf32>
      %934 = arith.maximumf %922, %933 : vector<32x128xf32>
      %935 = arith.addf %932, %934 : vector<32x128xf32>
      %cst_246 = arith.constant 0.000000e+00 : f32
      %936 = vector.broadcast %cst_246 : f32 to vector<32x128xf32>
      %937 = arith.select %14, %935, %936 : vector<32x128xi1>, vector<32x128xf32>
      %c6_247 = arith.constant 6 : index
      %c0_248 = arith.constant 0 : index
      %c0_249 = arith.constant 0 : index
      %938 = vector.load %arg11[%c6_247, %c0_248, %c0_249] : memref<9x32x128xf32, #tpu.memory_space<vmem>>, vector<1x32x128xf32>
      %939 = vector.shape_cast %938 : vector<1x32x128xf32> to vector<32x128xf32>
      %940 = vector.shape_cast %937 : vector<32x128xf32> to vector<1x32x128xf32>
      tpu.vector_store %arg11[%c6_247, %c0_248, %c0_249], %940 {strides = array<i32>} : memref<9x32x128xf32, #tpu.memory_space<vmem>>, vector<1x32x128xf32>,
      %c1_250 = arith.constant 1 : index
      %c0_251 = arith.constant 0 : index
      %c0_252 = arith.constant 0 : index
      %941 = vector.load %arg11[%c1_250, %c0_251, %c0_252] : memref<9x32x128xf32, #tpu.memory_space<vmem>>, vector<1x32x128xf32>
      %942 = vector.shape_cast %941 : vector<1x32x128xf32> to vector<32x128xf32>
      %cst_253 = arith.constant 0.000000e+00 : f32
      %943 = vector.broadcast %cst_253 : f32 to vector<32x128xf32>
      %944 = arith.maximumf %926, %943 : vector<32x128xf32>
      %945 = arith.addf %942, %944 : vector<32x128xf32>
      %cst_254 = arith.constant 0.000000e+00 : f32
      %946 = vector.broadcast %cst_254 : f32 to vector<32x128xf32>
      %947 = arith.select %14, %945, %946 : vector<32x128xi1>, vector<32x128xf32>
      %c7_255 = arith.constant 7 : index
      %c0_256 = arith.constant 0 : index
      %c0_257 = arith.constant 0 : index
      %948 = vector.load %arg11[%c7_255, %c0_256, %c0_257] : memref<9x32x128xf32, #tpu.memory_space<vmem>>, vector<1x32x128xf32>
      %949 = vector.shape_cast %948 : vector<1x32x128xf32> to vector<32x128xf32>
      %950 = vector.shape_cast %947 : vector<32x128xf32> to vector<1x32x128xf32>
      tpu.vector_store %arg11[%c7_255, %c0_256, %c0_257], %950 {strides = array<i32>} : memref<9x32x128xf32, #tpu.memory_space<vmem>>, vector<1x32x128xf32>,
      %c2_258 = arith.constant 2 : index
      %c0_259 = arith.constant 0 : index
      %c0_260 = arith.constant 0 : index
      %951 = vector.load %arg11[%c2_258, %c0_259, %c0_260] : memref<9x32x128xf32, #tpu.memory_space<vmem>>, vector<1x32x128xf32>
      %952 = vector.shape_cast %951 : vector<1x32x128xf32> to vector<32x128xf32>
      %cst_261 = arith.constant 0.000000e+00 : f32
      %953 = vector.broadcast %cst_261 : f32 to vector<32x128xf32>
      %954 = arith.maximumf %930, %953 : vector<32x128xf32>
      %955 = arith.addf %952, %954 : vector<32x128xf32>
      %cst_262 = arith.constant 0.000000e+00 : f32
      %956 = vector.broadcast %cst_262 : f32 to vector<32x128xf32>
      %957 = arith.select %14, %955, %956 : vector<32x128xi1>, vector<32x128xf32>
      %c8_263 = arith.constant 8 : index
      %c0_264 = arith.constant 0 : index
      %c0_265 = arith.constant 0 : index
      %958 = vector.load %arg11[%c8_263, %c0_264, %c0_265] : memref<9x32x128xf32, #tpu.memory_space<vmem>>, vector<1x32x128xf32>
      %959 = vector.shape_cast %958 : vector<1x32x128xf32> to vector<32x128xf32>
      %960 = vector.shape_cast %957 : vector<32x128xf32> to vector<1x32x128xf32>
      tpu.vector_store %arg11[%c8_263, %c0_264, %c0_265], %960 {strides = array<i32>} : memref<9x32x128xf32, #tpu.memory_space<vmem>>, vector<1x32x128xf32>,
      %c0_266 = arith.constant 0 : index
      %961 = memref.load %arg9[%c0_266] : memref<3xf32, #tpu.memory_space<smem>>
      %962 = vector.broadcast %961 : f32 to vector<32x128xf32>
      %c1_267 = arith.constant 1 : index
      %963 = memref.load %arg9[%c1_267] : memref<3xf32, #tpu.memory_space<smem>>
      %964 = vector.broadcast %963 : f32 to vector<32x128xf32>
      %c2_268 = arith.constant 2 : index
      %965 = memref.load %arg9[%c2_268] : memref<3xf32, #tpu.memory_space<smem>>
      %966 = vector.broadcast %965 : f32 to vector<32x128xf32>
      %c6_269 = arith.constant 6 : index
      %c0_270 = arith.constant 0 : index
      %c0_271 = arith.constant 0 : index
      %967 = vector.load %arg11[%c6_269, %c0_270, %c0_271] : memref<9x32x128xf32, #tpu.memory_space<vmem>>, vector<1x32x128xf32>
      %968 = vector.shape_cast %967 : vector<1x32x128xf32> to vector<32x128xf32>
      %c1_i32_272 = arith.constant 1 : i32
      %969 = tpu.dynamic_rotate %968 by %c1_i32_272 dim 0 : vector<32x128xf32>, i32 -> vector<32x128xf32>
      %c1_i32_273 = arith.constant 1 : i32
      %970 = tpu.dynamic_rotate %969 by %c1_i32_273 dim 1 : vector<32x128xf32>, i32 -> vector<32x128xf32>
      %c0_274 = arith.constant 0 : index
      %971 = memref.load %arg8[%c0_274] : memref<81xf32, #tpu.memory_space<smem>>
      %972 = vector.broadcast %971 : f32 to vector<32x128xf32>
      %973 = arith.mulf %972, %970 : vector<32x128xf32>
      %974 = arith.addf %962, %973 : vector<32x128xf32>
      %c27_275 = arith.constant 27 : index
      %975 = memref.load %arg8[%c27_275] : memref<81xf32, #tpu.memory_space<smem>>
      %976 = vector.broadcast %975 : f32 to vector<32x128xf32>
      %977 = arith.mulf %976, %970 : vector<32x128xf32>
      %978 = arith.addf %964, %977 : vector<32x128xf32>
      %c54_276 = arith.constant 54 : index
      %979 = memref.load %arg8[%c54_276] : memref<81xf32, #tpu.memory_space<smem>>
      %980 = vector.broadcast %979 : f32 to vector<32x128xf32>
      %981 = arith.mulf %980, %970 : vector<32x128xf32>
      %982 = arith.addf %966, %981 : vector<32x128xf32>
      %c1_277 = arith.constant 1 : index
      %983 = memref.load %arg8[%c1_277] : memref<81xf32, #tpu.memory_space<smem>>
      %984 = vector.broadcast %983 : f32 to vector<32x128xf32>
      %985 = arith.mulf %984, %969 : vector<32x128xf32>
      %986 = arith.addf %974, %985 : vector<32x128xf32>
      %c28_278 = arith.constant 28 : index
      %987 = memref.load %arg8[%c28_278] : memref<81xf32, #tpu.memory_space<smem>>
      %988 = vector.broadcast %987 : f32 to vector<32x128xf32>
      %989 = arith.mulf %988, %969 : vector<32x128xf32>
      %990 = arith.addf %978, %989 : vector<32x128xf32>
      %c55_279 = arith.constant 55 : index
      %991 = memref.load %arg8[%c55_279] : memref<81xf32, #tpu.memory_space<smem>>
      %992 = vector.broadcast %991 : f32 to vector<32x128xf32>
      %993 = arith.mulf %992, %969 : vector<32x128xf32>
      %994 = arith.addf %982, %993 : vector<32x128xf32>
      %c127_i32_280 = arith.constant 127 : i32
      %995 = tpu.dynamic_rotate %969 by %c127_i32_280 dim 1 : vector<32x128xf32>, i32 -> vector<32x128xf32>
      %c2_281 = arith.constant 2 : index
      %996 = memref.load %arg8[%c2_281] : memref<81xf32, #tpu.memory_space<smem>>
      %997 = vector.broadcast %996 : f32 to vector<32x128xf32>
      %998 = arith.mulf %997, %995 : vector<32x128xf32>
      %999 = arith.addf %986, %998 : vector<32x128xf32>
      %c29_282 = arith.constant 29 : index
      %1000 = memref.load %arg8[%c29_282] : memref<81xf32, #tpu.memory_space<smem>>
      %1001 = vector.broadcast %1000 : f32 to vector<32x128xf32>
      %1002 = arith.mulf %1001, %995 : vector<32x128xf32>
      %1003 = arith.addf %990, %1002 : vector<32x128xf32>
      %c56_283 = arith.constant 56 : index
      %1004 = memref.load %arg8[%c56_283] : memref<81xf32, #tpu.memory_space<smem>>
      %1005 = vector.broadcast %1004 : f32 to vector<32x128xf32>
      %1006 = arith.mulf %1005, %995 : vector<32x128xf32>
      %1007 = arith.addf %994, %1006 : vector<32x128xf32>
      %c1_i32_284 = arith.constant 1 : i32
      %1008 = tpu.dynamic_rotate %968 by %c1_i32_284 dim 1 : vector<32x128xf32>, i32 -> vector<32x128xf32>
      %c3_285 = arith.constant 3 : index
      %1009 = memref.load %arg8[%c3_285] : memref<81xf32, #tpu.memory_space<smem>>
      %1010 = vector.broadcast %1009 : f32 to vector<32x128xf32>
      %1011 = arith.mulf %1010, %1008 : vector<32x128xf32>
      %1012 = arith.addf %999, %1011 : vector<32x128xf32>
      %c30_286 = arith.constant 30 : index
      %1013 = memref.load %arg8[%c30_286] : memref<81xf32, #tpu.memory_space<smem>>
      %1014 = vector.broadcast %1013 : f32 to vector<32x128xf32>
      %1015 = arith.mulf %1014, %1008 : vector<32x128xf32>
      %1016 = arith.addf %1003, %1015 : vector<32x128xf32>
      %c57_287 = arith.constant 57 : index
      %1017 = memref.load %arg8[%c57_287] : memref<81xf32, #tpu.memory_space<smem>>
      %1018 = vector.broadcast %1017 : f32 to vector<32x128xf32>
      %1019 = arith.mulf %1018, %1008 : vector<32x128xf32>
      %1020 = arith.addf %1007, %1019 : vector<32x128xf32>
      %c4_288 = arith.constant 4 : index
      %1021 = memref.load %arg8[%c4_288] : memref<81xf32, #tpu.memory_space<smem>>
      %1022 = vector.broadcast %1021 : f32 to vector<32x128xf32>
      %1023 = arith.mulf %1022, %968 : vector<32x128xf32>
      %1024 = arith.addf %1012, %1023 : vector<32x128xf32>
      %c31_289 = arith.constant 31 : index
      %1025 = memref.load %arg8[%c31_289] : memref<81xf32, #tpu.memory_space<smem>>
      %1026 = vector.broadcast %1025 : f32 to vector<32x128xf32>
      %1027 = arith.mulf %1026, %968 : vector<32x128xf32>
      %1028 = arith.addf %1016, %1027 : vector<32x128xf32>
      %c58_290 = arith.constant 58 : index
      %1029 = memref.load %arg8[%c58_290] : memref<81xf32, #tpu.memory_space<smem>>
      %1030 = vector.broadcast %1029 : f32 to vector<32x128xf32>
      %1031 = arith.mulf %1030, %968 : vector<32x128xf32>
      %1032 = arith.addf %1020, %1031 : vector<32x128xf32>
      %c127_i32_291 = arith.constant 127 : i32
      %1033 = tpu.dynamic_rotate %968 by %c127_i32_291 dim 1 : vector<32x128xf32>, i32 -> vector<32x128xf32>
      %c5_292 = arith.constant 5 : index
      %1034 = memref.load %arg8[%c5_292] : memref<81xf32, #tpu.memory_space<smem>>
      %1035 = vector.broadcast %1034 : f32 to vector<32x128xf32>
      %1036 = arith.mulf %1035, %1033 : vector<32x128xf32>
      %1037 = arith.addf %1024, %1036 : vector<32x128xf32>
      %c32_293 = arith.constant 32 : index
      %1038 = memref.load %arg8[%c32_293] : memref<81xf32, #tpu.memory_space<smem>>
      %1039 = vector.broadcast %1038 : f32 to vector<32x128xf32>
      %1040 = arith.mulf %1039, %1033 : vector<32x128xf32>
      %1041 = arith.addf %1028, %1040 : vector<32x128xf32>
      %c59_294 = arith.constant 59 : index
      %1042 = memref.load %arg8[%c59_294] : memref<81xf32, #tpu.memory_space<smem>>
      %1043 = vector.broadcast %1042 : f32 to vector<32x128xf32>
      %1044 = arith.mulf %1043, %1033 : vector<32x128xf32>
      %1045 = arith.addf %1032, %1044 : vector<32x128xf32>
      %c31_i32_295 = arith.constant 31 : i32
      %1046 = tpu.dynamic_rotate %968 by %c31_i32_295 dim 0 : vector<32x128xf32>, i32 -> vector<32x128xf32>
      %c1_i32_296 = arith.constant 1 : i32
      %1047 = tpu.dynamic_rotate %1046 by %c1_i32_296 dim 1 : vector<32x128xf32>, i32 -> vector<32x128xf32>
      %c6_297 = arith.constant 6 : index
      %1048 = memref.load %arg8[%c6_297] : memref<81xf32, #tpu.memory_space<smem>>
      %1049 = vector.broadcast %1048 : f32 to vector<32x128xf32>
      %1050 = arith.mulf %1049, %1047 : vector<32x128xf32>
      %1051 = arith.addf %1037, %1050 : vector<32x128xf32>
      %c33_298 = arith.constant 33 : index
      %1052 = memref.load %arg8[%c33_298] : memref<81xf32, #tpu.memory_space<smem>>
      %1053 = vector.broadcast %1052 : f32 to vector<32x128xf32>
      %1054 = arith.mulf %1053, %1047 : vector<32x128xf32>
      %1055 = arith.addf %1041, %1054 : vector<32x128xf32>
      %c60_299 = arith.constant 60 : index
      %1056 = memref.load %arg8[%c60_299] : memref<81xf32, #tpu.memory_space<smem>>
      %1057 = vector.broadcast %1056 : f32 to vector<32x128xf32>
      %1058 = arith.mulf %1057, %1047 : vector<32x128xf32>
      %1059 = arith.addf %1045, %1058 : vector<32x128xf32>
      %c7_300 = arith.constant 7 : index
      %1060 = memref.load %arg8[%c7_300] : memref<81xf32, #tpu.memory_space<smem>>
      %1061 = vector.broadcast %1060 : f32 to vector<32x128xf32>
      %1062 = arith.mulf %1061, %1046 : vector<32x128xf32>
      %1063 = arith.addf %1051, %1062 : vector<32x128xf32>
      %c34_301 = arith.constant 34 : index
      %1064 = memref.load %arg8[%c34_301] : memref<81xf32, #tpu.memory_space<smem>>
      %1065 = vector.broadcast %1064 : f32 to vector<32x128xf32>
      %1066 = arith.mulf %1065, %1046 : vector<32x128xf32>
      %1067 = arith.addf %1055, %1066 : vector<32x128xf32>
      %c61_302 = arith.constant 61 : index
      %1068 = memref.load %arg8[%c61_302] : memref<81xf32, #tpu.memory_space<smem>>
      %1069 = vector.broadcast %1068 : f32 to vector<32x128xf32>
      %1070 = arith.mulf %1069, %1046 : vector<32x128xf32>
      %1071 = arith.addf %1059, %1070 : vector<32x128xf32>
      %c127_i32_303 = arith.constant 127 : i32
      %1072 = tpu.dynamic_rotate %1046 by %c127_i32_303 dim 1 : vector<32x128xf32>, i32 -> vector<32x128xf32>
      %c8_304 = arith.constant 8 : index
      %1073 = memref.load %arg8[%c8_304] : memref<81xf32, #tpu.memory_space<smem>>
      %1074 = vector.broadcast %1073 : f32 to vector<32x128xf32>
      %1075 = arith.mulf %1074, %1072 : vector<32x128xf32>
      %1076 = arith.addf %1063, %1075 : vector<32x128xf32>
      %c35_305 = arith.constant 35 : index
      %1077 = memref.load %arg8[%c35_305] : memref<81xf32, #tpu.memory_space<smem>>
      %1078 = vector.broadcast %1077 : f32 to vector<32x128xf32>
      %1079 = arith.mulf %1078, %1072 : vector<32x128xf32>
      %1080 = arith.addf %1067, %1079 : vector<32x128xf32>
      %c62_306 = arith.constant 62 : index
      %1081 = memref.load %arg8[%c62_306] : memref<81xf32, #tpu.memory_space<smem>>
      %1082 = vector.broadcast %1081 : f32 to vector<32x128xf32>
      %1083 = arith.mulf %1082, %1072 : vector<32x128xf32>
      %1084 = arith.addf %1071, %1083 : vector<32x128xf32>
      %c7_307 = arith.constant 7 : index
      %c0_308 = arith.constant 0 : index
      %c0_309 = arith.constant 0 : index
      %1085 = vector.load %arg11[%c7_307, %c0_308, %c0_309] : memref<9x32x128xf32, #tpu.memory_space<vmem>>, vector<1x32x128xf32>
      %1086 = vector.shape_cast %1085 : vector<1x32x128xf32> to vector<32x128xf32>
      %c1_i32_310 = arith.constant 1 : i32
      %1087 = tpu.dynamic_rotate %1086 by %c1_i32_310 dim 0 : vector<32x128xf32>, i32 -> vector<32x128xf32>
      %c1_i32_311 = arith.constant 1 : i32
      %1088 = tpu.dynamic_rotate %1087 by %c1_i32_311 dim 1 : vector<32x128xf32>, i32 -> vector<32x128xf32>
      %c9_312 = arith.constant 9 : index
      %1089 = memref.load %arg8[%c9_312] : memref<81xf32, #tpu.memory_space<smem>>
      %1090 = vector.broadcast %1089 : f32 to vector<32x128xf32>
      %1091 = arith.mulf %1090, %1088 : vector<32x128xf32>
      %1092 = arith.addf %1076, %1091 : vector<32x128xf32>
      %c36_313 = arith.constant 36 : index
      %1093 = memref.load %arg8[%c36_313] : memref<81xf32, #tpu.memory_space<smem>>
      %1094 = vector.broadcast %1093 : f32 to vector<32x128xf32>
      %1095 = arith.mulf %1094, %1088 : vector<32x128xf32>
      %1096 = arith.addf %1080, %1095 : vector<32x128xf32>
      %c63_314 = arith.constant 63 : index
      %1097 = memref.load %arg8[%c63_314] : memref<81xf32, #tpu.memory_space<smem>>
      %1098 = vector.broadcast %1097 : f32 to vector<32x128xf32>
      %1099 = arith.mulf %1098, %1088 : vector<32x128xf32>
      %1100 = arith.addf %1084, %1099 : vector<32x128xf32>
      %c10_315 = arith.constant 10 : index
      %1101 = memref.load %arg8[%c10_315] : memref<81xf32, #tpu.memory_space<smem>>
      %1102 = vector.broadcast %1101 : f32 to vector<32x128xf32>
      %1103 = arith.mulf %1102, %1087 : vector<32x128xf32>
      %1104 = arith.addf %1092, %1103 : vector<32x128xf32>
      %c37_316 = arith.constant 37 : index
      %1105 = memref.load %arg8[%c37_316] : memref<81xf32, #tpu.memory_space<smem>>
      %1106 = vector.broadcast %1105 : f32 to vector<32x128xf32>
      %1107 = arith.mulf %1106, %1087 : vector<32x128xf32>
      %1108 = arith.addf %1096, %1107 : vector<32x128xf32>
      %c64_317 = arith.constant 64 : index
      %1109 = memref.load %arg8[%c64_317] : memref<81xf32, #tpu.memory_space<smem>>
      %1110 = vector.broadcast %1109 : f32 to vector<32x128xf32>
      %1111 = arith.mulf %1110, %1087 : vector<32x128xf32>
      %1112 = arith.addf %1100, %1111 : vector<32x128xf32>
      %c127_i32_318 = arith.constant 127 : i32
      %1113 = tpu.dynamic_rotate %1087 by %c127_i32_318 dim 1 : vector<32x128xf32>, i32 -> vector<32x128xf32>
      %c11_319 = arith.constant 11 : index
      %1114 = memref.load %arg8[%c11_319] : memref<81xf32, #tpu.memory_space<smem>>
      %1115 = vector.broadcast %1114 : f32 to vector<32x128xf32>
      %1116 = arith.mulf %1115, %1113 : vector<32x128xf32>
      %1117 = arith.addf %1104, %1116 : vector<32x128xf32>
      %c38_320 = arith.constant 38 : index
      %1118 = memref.load %arg8[%c38_320] : memref<81xf32, #tpu.memory_space<smem>>
      %1119 = vector.broadcast %1118 : f32 to vector<32x128xf32>
      %1120 = arith.mulf %1119, %1113 : vector<32x128xf32>
      %1121 = arith.addf %1108, %1120 : vector<32x128xf32>
      %c65_321 = arith.constant 65 : index
      %1122 = memref.load %arg8[%c65_321] : memref<81xf32, #tpu.memory_space<smem>>
      %1123 = vector.broadcast %1122 : f32 to vector<32x128xf32>
      %1124 = arith.mulf %1123, %1113 : vector<32x128xf32>
      %1125 = arith.addf %1112, %1124 : vector<32x128xf32>
      %c1_i32_322 = arith.constant 1 : i32
      %1126 = tpu.dynamic_rotate %1086 by %c1_i32_322 dim 1 : vector<32x128xf32>, i32 -> vector<32x128xf32>
      %c12_323 = arith.constant 12 : index
      %1127 = memref.load %arg8[%c12_323] : memref<81xf32, #tpu.memory_space<smem>>
      %1128 = vector.broadcast %1127 : f32 to vector<32x128xf32>
      %1129 = arith.mulf %1128, %1126 : vector<32x128xf32>
      %1130 = arith.addf %1117, %1129 : vector<32x128xf32>
      %c39_324 = arith.constant 39 : index
      %1131 = memref.load %arg8[%c39_324] : memref<81xf32, #tpu.memory_space<smem>>
      %1132 = vector.broadcast %1131 : f32 to vector<32x128xf32>
      %1133 = arith.mulf %1132, %1126 : vector<32x128xf32>
      %1134 = arith.addf %1121, %1133 : vector<32x128xf32>
      %c66_325 = arith.constant 66 : index
      %1135 = memref.load %arg8[%c66_325] : memref<81xf32, #tpu.memory_space<smem>>
      %1136 = vector.broadcast %1135 : f32 to vector<32x128xf32>
      %1137 = arith.mulf %1136, %1126 : vector<32x128xf32>
      %1138 = arith.addf %1125, %1137 : vector<32x128xf32>
      %c13_326 = arith.constant 13 : index
      %1139 = memref.load %arg8[%c13_326] : memref<81xf32, #tpu.memory_space<smem>>
      %1140 = vector.broadcast %1139 : f32 to vector<32x128xf32>
      %1141 = arith.mulf %1140, %1086 : vector<32x128xf32>
      %1142 = arith.addf %1130, %1141 : vector<32x128xf32>
      %c40_327 = arith.constant 40 : index
      %1143 = memref.load %arg8[%c40_327] : memref<81xf32, #tpu.memory_space<smem>>
      %1144 = vector.broadcast %1143 : f32 to vector<32x128xf32>
      %1145 = arith.mulf %1144, %1086 : vector<32x128xf32>
      %1146 = arith.addf %1134, %1145 : vector<32x128xf32>
      %c67_328 = arith.constant 67 : index
      %1147 = memref.load %arg8[%c67_328] : memref<81xf32, #tpu.memory_space<smem>>
      %1148 = vector.broadcast %1147 : f32 to vector<32x128xf32>
      %1149 = arith.mulf %1148, %1086 : vector<32x128xf32>
      %1150 = arith.addf %1138, %1149 : vector<32x128xf32>
      %c127_i32_329 = arith.constant 127 : i32
      %1151 = tpu.dynamic_rotate %1086 by %c127_i32_329 dim 1 : vector<32x128xf32>, i32 -> vector<32x128xf32>
      %c14_330 = arith.constant 14 : index
      %1152 = memref.load %arg8[%c14_330] : memref<81xf32, #tpu.memory_space<smem>>
      %1153 = vector.broadcast %1152 : f32 to vector<32x128xf32>
      %1154 = arith.mulf %1153, %1151 : vector<32x128xf32>
      %1155 = arith.addf %1142, %1154 : vector<32x128xf32>
      %c41_331 = arith.constant 41 : index
      %1156 = memref.load %arg8[%c41_331] : memref<81xf32, #tpu.memory_space<smem>>
      %1157 = vector.broadcast %1156 : f32 to vector<32x128xf32>
      %1158 = arith.mulf %1157, %1151 : vector<32x128xf32>
      %1159 = arith.addf %1146, %1158 : vector<32x128xf32>
      %c68_332 = arith.constant 68 : index
      %1160 = memref.load %arg8[%c68_332] : memref<81xf32, #tpu.memory_space<smem>>
      %1161 = vector.broadcast %1160 : f32 to vector<32x128xf32>
      %1162 = arith.mulf %1161, %1151 : vector<32x128xf32>
      %1163 = arith.addf %1150, %1162 : vector<32x128xf32>
      %c31_i32_333 = arith.constant 31 : i32
      %1164 = tpu.dynamic_rotate %1086 by %c31_i32_333 dim 0 : vector<32x128xf32>, i32 -> vector<32x128xf32>
      %c1_i32_334 = arith.constant 1 : i32
      %1165 = tpu.dynamic_rotate %1164 by %c1_i32_334 dim 1 : vector<32x128xf32>, i32 -> vector<32x128xf32>
      %c15_335 = arith.constant 15 : index
      %1166 = memref.load %arg8[%c15_335] : memref<81xf32, #tpu.memory_space<smem>>
      %1167 = vector.broadcast %1166 : f32 to vector<32x128xf32>
      %1168 = arith.mulf %1167, %1165 : vector<32x128xf32>
      %1169 = arith.addf %1155, %1168 : vector<32x128xf32>
      %c42_336 = arith.constant 42 : index
      %1170 = memref.load %arg8[%c42_336] : memref<81xf32, #tpu.memory_space<smem>>
      %1171 = vector.broadcast %1170 : f32 to vector<32x128xf32>
      %1172 = arith.mulf %1171, %1165 : vector<32x128xf32>
      %1173 = arith.addf %1159, %1172 : vector<32x128xf32>
      %c69_337 = arith.constant 69 : index
      %1174 = memref.load %arg8[%c69_337] : memref<81xf32, #tpu.memory_space<smem>>
      %1175 = vector.broadcast %1174 : f32 to vector<32x128xf32>
      %1176 = arith.mulf %1175, %1165 : vector<32x128xf32>
      %1177 = arith.addf %1163, %1176 : vector<32x128xf32>
      %c16_338 = arith.constant 16 : index
      %1178 = memref.load %arg8[%c16_338] : memref<81xf32, #tpu.memory_space<smem>>
      %1179 = vector.broadcast %1178 : f32 to vector<32x128xf32>
      %1180 = arith.mulf %1179, %1164 : vector<32x128xf32>
      %1181 = arith.addf %1169, %1180 : vector<32x128xf32>
      %c43_339 = arith.constant 43 : index
      %1182 = memref.load %arg8[%c43_339] : memref<81xf32, #tpu.memory_space<smem>>
      %1183 = vector.broadcast %1182 : f32 to vector<32x128xf32>
      %1184 = arith.mulf %1183, %1164 : vector<32x128xf32>
      %1185 = arith.addf %1173, %1184 : vector<32x128xf32>
      %c70_340 = arith.constant 70 : index
      %1186 = memref.load %arg8[%c70_340] : memref<81xf32, #tpu.memory_space<smem>>
      %1187 = vector.broadcast %1186 : f32 to vector<32x128xf32>
      %1188 = arith.mulf %1187, %1164 : vector<32x128xf32>
      %1189 = arith.addf %1177, %1188 : vector<32x128xf32>
      %c127_i32_341 = arith.constant 127 : i32
      %1190 = tpu.dynamic_rotate %1164 by %c127_i32_341 dim 1 : vector<32x128xf32>, i32 -> vector<32x128xf32>
      %c17_342 = arith.constant 17 : index
      %1191 = memref.load %arg8[%c17_342] : memref<81xf32, #tpu.memory_space<smem>>
      %1192 = vector.broadcast %1191 : f32 to vector<32x128xf32>
      %1193 = arith.mulf %1192, %1190 : vector<32x128xf32>
      %1194 = arith.addf %1181, %1193 : vector<32x128xf32>
      %c44_343 = arith.constant 44 : index
      %1195 = memref.load %arg8[%c44_343] : memref<81xf32, #tpu.memory_space<smem>>
      %1196 = vector.broadcast %1195 : f32 to vector<32x128xf32>
      %1197 = arith.mulf %1196, %1190 : vector<32x128xf32>
      %1198 = arith.addf %1185, %1197 : vector<32x128xf32>
      %c71_344 = arith.constant 71 : index
      %1199 = memref.load %arg8[%c71_344] : memref<81xf32, #tpu.memory_space<smem>>
      %1200 = vector.broadcast %1199 : f32 to vector<32x128xf32>
      %1201 = arith.mulf %1200, %1190 : vector<32x128xf32>
      %1202 = arith.addf %1189, %1201 : vector<32x128xf32>
      %c8_345 = arith.constant 8 : index
      %c0_346 = arith.constant 0 : index
      %c0_347 = arith.constant 0 : index
      %1203 = vector.load %arg11[%c8_345, %c0_346, %c0_347] : memref<9x32x128xf32, #tpu.memory_space<vmem>>, vector<1x32x128xf32>
      %1204 = vector.shape_cast %1203 : vector<1x32x128xf32> to vector<32x128xf32>
      %c1_i32_348 = arith.constant 1 : i32
      %1205 = tpu.dynamic_rotate %1204 by %c1_i32_348 dim 0 : vector<32x128xf32>, i32 -> vector<32x128xf32>
      %c1_i32_349 = arith.constant 1 : i32
      %1206 = tpu.dynamic_rotate %1205 by %c1_i32_349 dim 1 : vector<32x128xf32>, i32 -> vector<32x128xf32>
      %c18_350 = arith.constant 18 : index
      %1207 = memref.load %arg8[%c18_350] : memref<81xf32, #tpu.memory_space<smem>>
      %1208 = vector.broadcast %1207 : f32 to vector<32x128xf32>
      %1209 = arith.mulf %1208, %1206 : vector<32x128xf32>
      %1210 = arith.addf %1194, %1209 : vector<32x128xf32>
      %c45_351 = arith.constant 45 : index
      %1211 = memref.load %arg8[%c45_351] : memref<81xf32, #tpu.memory_space<smem>>
      %1212 = vector.broadcast %1211 : f32 to vector<32x128xf32>
      %1213 = arith.mulf %1212, %1206 : vector<32x128xf32>
      %1214 = arith.addf %1198, %1213 : vector<32x128xf32>
      %c72_352 = arith.constant 72 : index
      %1215 = memref.load %arg8[%c72_352] : memref<81xf32, #tpu.memory_space<smem>>
      %1216 = vector.broadcast %1215 : f32 to vector<32x128xf32>
      %1217 = arith.mulf %1216, %1206 : vector<32x128xf32>
      %1218 = arith.addf %1202, %1217 : vector<32x128xf32>
      %c19_353 = arith.constant 19 : index
      %1219 = memref.load %arg8[%c19_353] : memref<81xf32, #tpu.memory_space<smem>>
      %1220 = vector.broadcast %1219 : f32 to vector<32x128xf32>
      %1221 = arith.mulf %1220, %1205 : vector<32x128xf32>
      %1222 = arith.addf %1210, %1221 : vector<32x128xf32>
      %c46_354 = arith.constant 46 : index
      %1223 = memref.load %arg8[%c46_354] : memref<81xf32, #tpu.memory_space<smem>>
      %1224 = vector.broadcast %1223 : f32 to vector<32x128xf32>
      %1225 = arith.mulf %1224, %1205 : vector<32x128xf32>
      %1226 = arith.addf %1214, %1225 : vector<32x128xf32>
      %c73_355 = arith.constant 73 : index
      %1227 = memref.load %arg8[%c73_355] : memref<81xf32, #tpu.memory_space<smem>>
      %1228 = vector.broadcast %1227 : f32 to vector<32x128xf32>
      %1229 = arith.mulf %1228, %1205 : vector<32x128xf32>
      %1230 = arith.addf %1218, %1229 : vector<32x128xf32>
      %c127_i32_356 = arith.constant 127 : i32
      %1231 = tpu.dynamic_rotate %1205 by %c127_i32_356 dim 1 : vector<32x128xf32>, i32 -> vector<32x128xf32>
      %c20_357 = arith.constant 20 : index
      %1232 = memref.load %arg8[%c20_357] : memref<81xf32, #tpu.memory_space<smem>>
      %1233 = vector.broadcast %1232 : f32 to vector<32x128xf32>
      %1234 = arith.mulf %1233, %1231 : vector<32x128xf32>
      %1235 = arith.addf %1222, %1234 : vector<32x128xf32>
      %c47_358 = arith.constant 47 : index
      %1236 = memref.load %arg8[%c47_358] : memref<81xf32, #tpu.memory_space<smem>>
      %1237 = vector.broadcast %1236 : f32 to vector<32x128xf32>
      %1238 = arith.mulf %1237, %1231 : vector<32x128xf32>
      %1239 = arith.addf %1226, %1238 : vector<32x128xf32>
      %c74_359 = arith.constant 74 : index
      %1240 = memref.load %arg8[%c74_359] : memref<81xf32, #tpu.memory_space<smem>>
      %1241 = vector.broadcast %1240 : f32 to vector<32x128xf32>
      %1242 = arith.mulf %1241, %1231 : vector<32x128xf32>
      %1243 = arith.addf %1230, %1242 : vector<32x128xf32>
      %c1_i32_360 = arith.constant 1 : i32
      %1244 = tpu.dynamic_rotate %1204 by %c1_i32_360 dim 1 : vector<32x128xf32>, i32 -> vector<32x128xf32>
      %c21_361 = arith.constant 21 : index
      %1245 = memref.load %arg8[%c21_361] : memref<81xf32, #tpu.memory_space<smem>>
      %1246 = vector.broadcast %1245 : f32 to vector<32x128xf32>
      %1247 = arith.mulf %1246, %1244 : vector<32x128xf32>
      %1248 = arith.addf %1235, %1247 : vector<32x128xf32>
      %c48_362 = arith.constant 48 : index
      %1249 = memref.load %arg8[%c48_362] : memref<81xf32, #tpu.memory_space<smem>>
      %1250 = vector.broadcast %1249 : f32 to vector<32x128xf32>
      %1251 = arith.mulf %1250, %1244 : vector<32x128xf32>
      %1252 = arith.addf %1239, %1251 : vector<32x128xf32>
      %c75_363 = arith.constant 75 : index
      %1253 = memref.load %arg8[%c75_363] : memref<81xf32, #tpu.memory_space<smem>>
      %1254 = vector.broadcast %1253 : f32 to vector<32x128xf32>
      %1255 = arith.mulf %1254, %1244 : vector<32x128xf32>
      %1256 = arith.addf %1243, %1255 : vector<32x128xf32>
      %c22_364 = arith.constant 22 : index
      %1257 = memref.load %arg8[%c22_364] : memref<81xf32, #tpu.memory_space<smem>>
      %1258 = vector.broadcast %1257 : f32 to vector<32x128xf32>
      %1259 = arith.mulf %1258, %1204 : vector<32x128xf32>
      %1260 = arith.addf %1248, %1259 : vector<32x128xf32>
      %c49_365 = arith.constant 49 : index
      %1261 = memref.load %arg8[%c49_365] : memref<81xf32, #tpu.memory_space<smem>>
      %1262 = vector.broadcast %1261 : f32 to vector<32x128xf32>
      %1263 = arith.mulf %1262, %1204 : vector<32x128xf32>
      %1264 = arith.addf %1252, %1263 : vector<32x128xf32>
      %c76_366 = arith.constant 76 : index
      %1265 = memref.load %arg8[%c76_366] : memref<81xf32, #tpu.memory_space<smem>>
      %1266 = vector.broadcast %1265 : f32 to vector<32x128xf32>
      %1267 = arith.mulf %1266, %1204 : vector<32x128xf32>
      %1268 = arith.addf %1256, %1267 : vector<32x128xf32>
      %c127_i32_367 = arith.constant 127 : i32
      %1269 = tpu.dynamic_rotate %1204 by %c127_i32_367 dim 1 : vector<32x128xf32>, i32 -> vector<32x128xf32>
      %c23_368 = arith.constant 23 : index
      %1270 = memref.load %arg8[%c23_368] : memref<81xf32, #tpu.memory_space<smem>>
      %1271 = vector.broadcast %1270 : f32 to vector<32x128xf32>
      %1272 = arith.mulf %1271, %1269 : vector<32x128xf32>
      %1273 = arith.addf %1260, %1272 : vector<32x128xf32>
      %c50_369 = arith.constant 50 : index
      %1274 = memref.load %arg8[%c50_369] : memref<81xf32, #tpu.memory_space<smem>>
      %1275 = vector.broadcast %1274 : f32 to vector<32x128xf32>
      %1276 = arith.mulf %1275, %1269 : vector<32x128xf32>
      %1277 = arith.addf %1264, %1276 : vector<32x128xf32>
      %c77_370 = arith.constant 77 : index
      %1278 = memref.load %arg8[%c77_370] : memref<81xf32, #tpu.memory_space<smem>>
      %1279 = vector.broadcast %1278 : f32 to vector<32x128xf32>
      %1280 = arith.mulf %1279, %1269 : vector<32x128xf32>
      %1281 = arith.addf %1268, %1280 : vector<32x128xf32>
      %c31_i32_371 = arith.constant 31 : i32
      %1282 = tpu.dynamic_rotate %1204 by %c31_i32_371 dim 0 : vector<32x128xf32>, i32 -> vector<32x128xf32>
      %c1_i32_372 = arith.constant 1 : i32
      %1283 = tpu.dynamic_rotate %1282 by %c1_i32_372 dim 1 : vector<32x128xf32>, i32 -> vector<32x128xf32>
      %c24_373 = arith.constant 24 : index
      %1284 = memref.load %arg8[%c24_373] : memref<81xf32, #tpu.memory_space<smem>>
      %1285 = vector.broadcast %1284 : f32 to vector<32x128xf32>
      %1286 = arith.mulf %1285, %1283 : vector<32x128xf32>
      %1287 = arith.addf %1273, %1286 : vector<32x128xf32>
      %c51_374 = arith.constant 51 : index
      %1288 = memref.load %arg8[%c51_374] : memref<81xf32, #tpu.memory_space<smem>>
      %1289 = vector.broadcast %1288 : f32 to vector<32x128xf32>
      %1290 = arith.mulf %1289, %1283 : vector<32x128xf32>
      %1291 = arith.addf %1277, %1290 : vector<32x128xf32>
      %c78_375 = arith.constant 78 : index
      %1292 = memref.load %arg8[%c78_375] : memref<81xf32, #tpu.memory_space<smem>>
      %1293 = vector.broadcast %1292 : f32 to vector<32x128xf32>
      %1294 = arith.mulf %1293, %1283 : vector<32x128xf32>
      %1295 = arith.addf %1281, %1294 : vector<32x128xf32>
      %c25_376 = arith.constant 25 : index
      %1296 = memref.load %arg8[%c25_376] : memref<81xf32, #tpu.memory_space<smem>>
      %1297 = vector.broadcast %1296 : f32 to vector<32x128xf32>
      %1298 = arith.mulf %1297, %1282 : vector<32x128xf32>
      %1299 = arith.addf %1287, %1298 : vector<32x128xf32>
      %c52_377 = arith.constant 52 : index
      %1300 = memref.load %arg8[%c52_377] : memref<81xf32, #tpu.memory_space<smem>>
      %1301 = vector.broadcast %1300 : f32 to vector<32x128xf32>
      %1302 = arith.mulf %1301, %1282 : vector<32x128xf32>
      %1303 = arith.addf %1291, %1302 : vector<32x128xf32>
      %c79_378 = arith.constant 79 : index
      %1304 = memref.load %arg8[%c79_378] : memref<81xf32, #tpu.memory_space<smem>>
      %1305 = vector.broadcast %1304 : f32 to vector<32x128xf32>
      %1306 = arith.mulf %1305, %1282 : vector<32x128xf32>
      %1307 = arith.addf %1295, %1306 : vector<32x128xf32>
      %c127_i32_379 = arith.constant 127 : i32
      %1308 = tpu.dynamic_rotate %1282 by %c127_i32_379 dim 1 : vector<32x128xf32>, i32 -> vector<32x128xf32>
      %c26_380 = arith.constant 26 : index
      %1309 = memref.load %arg8[%c26_380] : memref<81xf32, #tpu.memory_space<smem>>
      %1310 = vector.broadcast %1309 : f32 to vector<32x128xf32>
      %1311 = arith.mulf %1310, %1308 : vector<32x128xf32>
      %1312 = arith.addf %1299, %1311 : vector<32x128xf32>
      %c53_381 = arith.constant 53 : index
      %1313 = memref.load %arg8[%c53_381] : memref<81xf32, #tpu.memory_space<smem>>
      %1314 = vector.broadcast %1313 : f32 to vector<32x128xf32>
      %1315 = arith.mulf %1314, %1308 : vector<32x128xf32>
      %1316 = arith.addf %1303, %1315 : vector<32x128xf32>
      %c80_382 = arith.constant 80 : index
      %1317 = memref.load %arg8[%c80_382] : memref<81xf32, #tpu.memory_space<smem>>
      %1318 = vector.broadcast %1317 : f32 to vector<32x128xf32>
      %1319 = arith.mulf %1318, %1308 : vector<32x128xf32>
      %1320 = arith.addf %1307, %1319 : vector<32x128xf32>
      %cst_383 = arith.constant 0.000000e+00 : f32
      %1321 = vector.broadcast %cst_383 : f32 to vector<32x128xf32>
      %1322 = arith.select %25, %1312, %1321 : vector<32x128xi1>, vector<32x128xf32>
      %c0_384 = arith.constant 0 : index
      %c0_385 = arith.constant 0 : index
      %1323 = arith.index_cast %28 : i32 to index
      %c0_386 = arith.constant 0 : index
      %c0_387 = arith.constant 0 : index
      %1324 = vector.load %arg10[%c0_384, %c0_385, %1323, %c0_386, %c0_387] : memref<1x3x3x32x128xf32, #tpu.memory_space<vmem>>, vector<1x1x1x32x128xf32>
      %1325 = vector.shape_cast %1324 : vector<1x1x1x32x128xf32> to vector<32x128xf32>
      %1326 = vector.shape_cast %1322 : vector<32x128xf32> to vector<1x1x1x32x128xf32>
      tpu.vector_store %arg10[%c0_384, %c0_385, %1323, %c0_386, %c0_387], %1326 {strides = array<i32>} : memref<1x3x3x32x128xf32, #tpu.memory_space<vmem>>, vector<1x1x1x32x128xf32>,
      %cst_388 = arith.constant 0.000000e+00 : f32
      %1327 = vector.broadcast %cst_388 : f32 to vector<32x128xf32>
      %1328 = arith.select %25, %1316, %1327 : vector<32x128xi1>, vector<32x128xf32>
      %c0_389 = arith.constant 0 : index
      %c1_390 = arith.constant 1 : index
      %1329 = arith.index_cast %28 : i32 to index
      %c0_391 = arith.constant 0 : index
      %c0_392 = arith.constant 0 : index
      %1330 = vector.load %arg10[%c0_389, %c1_390, %1329, %c0_391, %c0_392] : memref<1x3x3x32x128xf32, #tpu.memory_space<vmem>>, vector<1x1x1x32x128xf32>
      %1331 = vector.shape_cast %1330 : vector<1x1x1x32x128xf32> to vector<32x128xf32>
      %1332 = vector.shape_cast %1328 : vector<32x128xf32> to vector<1x1x1x32x128xf32>
      tpu.vector_store %arg10[%c0_389, %c1_390, %1329, %c0_391, %c0_392], %1332 {strides = array<i32>} : memref<1x3x3x32x128xf32, #tpu.memory_space<vmem>>, vector<1x1x1x32x128xf32>,
      %cst_393 = arith.constant 0.000000e+00 : f32
      %1333 = vector.broadcast %cst_393 : f32 to vector<32x128xf32>
      %1334 = arith.select %25, %1320, %1333 : vector<32x128xi1>, vector<32x128xf32>
      %c0_394 = arith.constant 0 : index
      %c2_395 = arith.constant 2 : index
      %1335 = arith.index_cast %28 : i32 to index
      %c0_396 = arith.constant 0 : index
      %c0_397 = arith.constant 0 : index
      %1336 = vector.load %arg10[%c0_394, %c2_395, %1335, %c0_396, %c0_397] : memref<1x3x3x32x128xf32, #tpu.memory_space<vmem>>, vector<1x1x1x32x128xf32>
      %1337 = vector.shape_cast %1336 : vector<1x1x1x32x128xf32> to vector<32x128xf32>
      %1338 = vector.shape_cast %1334 : vector<32x128xf32> to vector<1x1x1x32x128xf32>
      tpu.vector_store %arg10[%c0_394, %c2_395, %1335, %c0_396, %c0_397], %1338 {strides = array<i32>} : memref<1x3x3x32x128xf32, #tpu.memory_space<vmem>>, vector<1x1x1x32x128xf32>,
    }
    %c3_i32_5 = arith.constant 3 : i32
    return
  }
  func.func @transform_0(%arg0: i32) -> (i32, i32, i32, i32) {
    %c0_i32 = arith.constant 0 : i32
    %c0_i32_0 = arith.constant 0 : i32
    %c0_i32_1 = arith.constant 0 : i32
    %c0_i32_2 = arith.constant 0 : i32
    return %arg0, %c0_i32, %c0_i32_0, %c0_i32_1 : i32, i32, i32, i32
  }
  func.func @transform_1(%arg0: i32) -> i32 {
    %c0_i32 = arith.constant 0 : i32
    %c0_i32_0 = arith.constant 0 : i32
    return %c0_i32 : i32
  }
  func.func @transform_2(%arg0: i32) -> i32 {
    %c0_i32 = arith.constant 0 : i32
    %c0_i32_0 = arith.constant 0 : i32
    return %c0_i32 : i32
  }
  func.func @transform_3(%arg0: i32) -> i32 {
    %c0_i32 = arith.constant 0 : i32
    %c0_i32_0 = arith.constant 0 : i32
    return %c0_i32 : i32
  }
  func.func @transform_4(%arg0: i32) -> i32 {
    %c0_i32 = arith.constant 0 : i32
    %c0_i32_0 = arith.constant 0 : i32
    return %c0_i32 : i32
  }
  func.func @transform_5(%arg0: i32) -> i32 {
    %c0_i32 = arith.constant 0 : i32
    %c0_i32_0 = arith.constant 0 : i32
    return %c0_i32 : i32
  }
  func.func @transform_6(%arg0: i32) -> i32 {
    %c0_i32 = arith.constant 0 : i32
    %c0_i32_0 = arith.constant 0 : i32
    return %c0_i32 : i32
  }
  func.func @transform_7(%arg0: i32) -> i32 {
    %c0_i32 = arith.constant 0 : i32
    %c0_i32_0 = arith.constant 0 : i32
    return %c0_i32 : i32
  }
  func.func @transform_8(%arg0: i32) -> i32 {
    %c0_i32 = arith.constant 0 : i32
    %c0_i32_0 = arith.constant 0 : i32
    return %c0_i32 : i32
  }
  func.func @transform_9(%arg0: i32) -> (i32, i32, i32, i32, i32) {
    %c0_i32 = arith.constant 0 : i32
    %c0_i32_0 = arith.constant 0 : i32
    %c0_i32_1 = arith.constant 0 : i32
    %c0_i32_2 = arith.constant 0 : i32
    %c0_i32_3 = arith.constant 0 : i32
    return %arg0, %c0_i32, %c0_i32_0, %c0_i32_1, %c0_i32_2 : i32, i32, i32, i32, i32
  }
}

module attributes {stable_mosaic.version = 11 : i64} {
  func.func @_fc_kernel(%arg0: i32, %arg1: memref<16x2028xf32, #tpu.memory_space<vmem>>, %arg2: memref<2028x10xf32, #tpu.memory_space<vmem>>, %arg3: memref<1x10xf32, #tpu.memory_space<vmem>>, %arg4: memref<16x10xf32, #tpu.memory_space<vmem>>) attributes {dimension_semantics = [#tpu.dimension_semantics<parallel>], iteration_bounds = array<i64: 1>, scalar_prefetch = 0 : i64, scratch_operands = 0 : i64, tpu.core_type = #tpu.core_type<tc>, window_params = [{transform_indices = @transform_0, window_bounds = array<i64: 16, 2028>}, {pipeline_mode = #tpu.pipeline_mode<synchronous>, transform_indices = @transform_1, window_bounds = array<i64: 2028, 10>}, {pipeline_mode = #tpu.pipeline_mode<synchronous>, transform_indices = @transform_2, window_bounds = array<i64: 1, 10>}, {transform_indices = @transform_3, window_bounds = array<i64: 16, 10>}]} {
    %c0 = arith.constant 0 : index
    %c0_0 = arith.constant 0 : index
    %0 = vector.load %arg1[%c0, %c0_0] : memref<16x2028xf32, #tpu.memory_space<vmem>>, vector<16x2028xf32>
    %c0_1 = arith.constant 0 : index
    %c0_2 = arith.constant 0 : index
    %1 = vector.load %arg2[%c0_1, %c0_2] : memref<2028x10xf32, #tpu.memory_space<vmem>>, vector<2028x10xf32>
    %cst = arith.constant dense<0.000000e+00> : vector<16x10xf32>
    %2 = tpu.matmul %0, %1, %cst {dimension_numbers = #tpu.dot_dimension_numbers<[1], [0], [0], [1], [0, 0, 1, 1], [], []>} : vector<16x2028xf32>, vector<2028x10xf32>, vector<16x10xf32> -> vector<16x10xf32>
    %c0_3 = arith.constant 0 : index
    %c0_4 = arith.constant 0 : index
    %3 = vector.load %arg3[%c0_3, %c0_4] : memref<1x10xf32, #tpu.memory_space<vmem>>, vector<1x10xf32>
    %4 = vector.broadcast %3 : vector<1x10xf32> to vector<16x10xf32>
    %5 = arith.addf %2, %4 : vector<16x10xf32>
    %cst_5 = arith.constant 0.000000e+00 : f32
    %6 = vector.broadcast %cst_5 : f32 to vector<16x10xf32>
    %7 = arith.maximumf %5, %6 : vector<16x10xf32>
    %c0_6 = arith.constant 0 : index
    %c0_7 = arith.constant 0 : index
    %8 = vector.load %arg4[%c0_6, %c0_7] : memref<16x10xf32, #tpu.memory_space<vmem>>, vector<16x10xf32>
    tpu.vector_store %arg4[%c0_6, %c0_7], %7 {strides = array<i32>} : memref<16x10xf32, #tpu.memory_space<vmem>>, vector<16x10xf32>,
    return
  }
  func.func @transform_0(%arg0: i32) -> (i32, i32) {
    %c0_i32 = arith.constant 0 : i32
    %c0_i32_0 = arith.constant 0 : i32
    return %arg0, %c0_i32 : i32, i32
  }
  func.func @transform_1(%arg0: i32) -> (i32, i32) {
    %c0_i32 = arith.constant 0 : i32
    %c0_i32_0 = arith.constant 0 : i32
    %c0_i32_1 = arith.constant 0 : i32
    return %c0_i32, %c0_i32_0 : i32, i32
  }
  func.func @transform_2(%arg0: i32) -> (i32, i32) {
    %c0_i32 = arith.constant 0 : i32
    %c0_i32_0 = arith.constant 0 : i32
    %c0_i32_1 = arith.constant 0 : i32
    return %c0_i32, %c0_i32_0 : i32, i32
  }
  func.func @transform_3(%arg0: i32) -> (i32, i32) {
    %c0_i32 = arith.constant 0 : i32
    %c0_i32_0 = arith.constant 0 : i32
    return %arg0, %c0_i32 : i32, i32
  }
}

</mosaic_0001>

<bundles_post_ra>
// kernel: residual_net2_forward.3
= control target key start
LH: loop header
LB: loop body
LE: loop exit
PB: predicated region body
PF: predicated region fallthrough
CT: control target
= control target key end

     0   :  { %s2424_s0 = inlined_call_operand.vmem [shape: f32[16,2028], index: 0, kind: input, shape index: {}]   ;;  %s2425_s1 = inlined_call_operand.vmem [shape: f32[2028,10], index: 1, kind: input, shape index: {}]   ;;  %s2426_s2 = inlined_call_operand.vmem [shape: f32[1,10], index: 2, kind: input, shape index: {}]   ;;  %s2427_s3 = inlined_call_operand.hbm [shape: f32[16,10], index: 3, kind: output, shape index: {}]  }
   0x1   :  { %v63_v0 = vld [vmem:[%s2425_s1 + $0x80] sm:$0xff]  ;;  %v64_v1 = vld [vmem:[%s2425_s1 + $0x88] sm:$0xff]  ;;  %v65_v11 = vld [vmem:[%s2425_s1 + $0x90] sm:$0xff] }
   0x2   :  { %v95_v2 = vld [vmem:[%s2425_s1 + $0x180] sm:$0xff]  ;;  %v1210_v3 = vpack.c.bf16 %v64_v1, %v63_v0  ;;  %v96_v4 = vld [vmem:[%s2425_s1 + $0x188] sm:$0xff]  ;;  %v66_v13 = vld [vmem:[%s2425_s1 + $0x98] sm:$0xff] }
   0x3   :  { %v47_v5 = vld [vmem:[%s2425_s1] sm:$0xff]  ;;  %v48_v6 = vld [vmem:[%s2425_s1 + $0x8] sm:$0xff]  ;;  %v1242_v7 = vpack.c.bf16 %v96_v4, %v95_v2  ;;  %v97_v14 = vld [vmem:[%s2425_s1 + $0x190] sm:$0xff]  ;;  %v1214_v16 = vpack.c.bf16 %v66_v13, %v65_v11 }
   0x4   :  { %v1212_v8 = vpack.c.bf16 %v48_v6, %v47_v5  ;;  %v79_v9 = vld [vmem:[%s2425_s1 + $0x100] sm:$0xff]  ;;  %v80_v10 = vld [vmem:[%s2425_s1 + $0x108] sm:$0xff]  ;;  %1211 = vmatprep.subr.bf16.mxu0 %v1210_v3  ;;  %v98_v15 = vld [vmem:[%s2425_s1 + $0x198] sm:$0xff] }
   0x5   :  { %v1244_v12 = vpack.c.bf16 %v80_v10, %v79_v9  ;;  %1243 = vmatprep.subr.bf16.mxu1 %v1242_v7  ;;  %v1246_v17 = vpack.c.bf16 %v98_v15, %v97_v14  ;;  %v49_v18 = vld [vmem:[%s2425_s1 + $0x10] sm:$0xff]  ;;  %v50_v19 = vld [vmem:[%s2425_s1 + $0x18] sm:$0xff]  ;;  %v67_v23 = vld [vmem:[%s2425_s1 + $0xa0] sm:$0xff] }
   0x6   :  { %1213 = vmatpush3.bf16.msra.mxu0 %v1212_v8  ;;  %v81_v20 = vld [vmem:[%s2425_s1 + $0x110] sm:$0xff]  ;;  %v1216_v21 = vpack.c.bf16 %v50_v19, %v49_v18  ;;  %v82_v22 = vld [vmem:[%s2425_s1 + $0x118] sm:$0xff]  ;;  %v68_v24 = vld [vmem:[%s2425_s1 + $0xa8] sm:$0xff] }
   0x7   :  { %1245 = vmatpush3.bf16.msra.mxu1 %v1244_v12  ;;  %1215 = vmatprep.subr.bf16.mxu0 %v1214_v16  ;;  %v1248_v25 = vpack.c.bf16 %v82_v22, %v81_v20  ;;  %v1218_v26 = vpack.c.bf16 %v68_v24, %v67_v23  ;;  %v99_v27 = vld [vmem:[%s2425_s1 + $0x1a0] sm:$0xff]  ;;  %v100_v28 = vld [vmem:[%s2425_s1 + $0x1a8] sm:$0xff]  ;;  %v69_v35 = vld [vmem:[%s2425_s1 + $0xb0] sm:$0xff] }
   0x8   :  { %1247 = vmatprep.subr.bf16.mxu1 %v1246_v17  ;;  %v51_v29 = vld [vmem:[%s2425_s1 + $0x20] sm:$0xff]  ;;  %v1250_v30 = vpack.c.bf16 %v100_v28, %v99_v27  ;;  %v52_v31 = vld [vmem:[%s2425_s1 + $0x28] sm:$0xff]  ;;  %v70_v36 = vld [vmem:[%s2425_s1 + $0xb8] sm:$0xff] }
   0x9   :  { %v83_v32 = vld [vmem:[%s2425_s1 + $0x120] sm:$0xff]  ;;  %v84_v33 = vld [vmem:[%s2425_s1 + $0x128] sm:$0xff]  ;;  %v1220_v34 = vpack.c.bf16 %v52_v31, %v51_v29  ;;  %v101_v37 = vld [vmem:[%s2425_s1 + $0x1b0] sm:$0xff]  ;;  %v1222_v39 = vpack.c.bf16 %v70_v36, %v69_v35 }
   0xa   :  { %1217 = vmatpush3.bf16.msra.mxu0 %v1216_v21  ;;  %v1252_v38 = vpack.c.bf16 %v84_v33, %v83_v32  ;;  %v102_v40 = vld [vmem:[%s2425_s1 + $0x1b8] sm:$0xff]  ;;  %v53_v41 = vld [vmem:[%s2425_s1 + $0x30] sm:$0xff]  ;;  %v71_v46 = vld [vmem:[%s2425_s1 + $0xc0] sm:$0xff] }
   0xb   :  { %1249 = vmatpush3.bf16.msra.mxu1 %v1248_v25  ;;  %1219 = vmatprep.subr.bf16.mxu0 %v1218_v26  ;;  %v54_v42 = vld [vmem:[%s2425_s1 + $0x38] sm:$0xff]  ;;  %v1254_v43 = vpack.c.bf16 %v102_v40, %v101_v37  ;;  %v85_v44 = vld [vmem:[%s2425_s1 + $0x130] sm:$0xff]  ;;  %v72_v47 = vld [vmem:[%s2425_s1 + $0xc8] sm:$0xff] }
   0xc   :  { %1251 = vmatprep.subr.bf16.mxu1 %v1250_v30  ;;  %v86_v45 = vld [vmem:[%s2425_s1 + $0x138] sm:$0xff]  ;;  %v103_v48 = vld [vmem:[%s2425_s1 + $0x1c0] sm:$0xff]  ;;  %v104_v49 = vld [vmem:[%s2425_s1 + $0x1c8] sm:$0xff]  ;;  %v1224_v50 = vpack.c.bf16 %v54_v42, %v53_v41  ;;  %v1226_v52 = vpack.c.bf16 %v72_v47, %v71_v46 }
   0xd   :  { %v1256_v51 = vpack.c.bf16 %v86_v45, %v85_v44  ;;  %v55_v53 = vld [vmem:[%s2425_s1 + $0x40] sm:$0xff]  ;;  %v56_v54 = vld [vmem:[%s2425_s1 + $0x48] sm:$0xff]  ;;  %v1258_v56 = vpack.c.bf16 %v104_v49, %v103_v48  ;;  %v73_v58 = vld [vmem:[%s2425_s1 + $0xd0] sm:$0xff] }
   0xe   :  { %1221 = vmatpush3.bf16.msra.mxu0 %v1220_v34  ;;  %v87_v55 = vld [vmem:[%s2425_s1 + $0x140] sm:$0xff]  ;;  %v88_v57 = vld [vmem:[%s2425_s1 + $0x148] sm:$0xff]  ;;  %v74_v59 = vld [vmem:[%s2425_s1 + $0xd8] sm:$0xff]  ;;  %v1228_v62 = vpack.c.bf16 %v56_v54, %v55_v53 }
   0xf   :  { %1253 = vmatpush3.bf16.msra.mxu1 %v1252_v38  ;;  %1223 = vmatprep.subr.bf16.mxu0 %v1222_v39  ;;  %v105_v60 = vld [vmem:[%s2425_s1 + $0x1d0] sm:$0xff]  ;;  %v106_v61 = vld [vmem:[%s2425_s1 + $0x1d8] sm:$0xff]  ;;  %v1260_v63 = vpack.c.bf16 %v88_v57, %v87_v55  ;;  %v1230_v0 = vpack.c.bf16 %v74_v59, %v73_v58  ;;  %v75_v6 = vld [vmem:[%s2425_s1 + $0xe0] sm:$0xff] }
  0x10   :  { %1255 = vmatprep.subr.bf16.mxu1 %v1254_v43  ;;  %v57_v1 = vld [vmem:[%s2425_s1 + $0x50] sm:$0xff]  ;;  %v58_v2 = vld [vmem:[%s2425_s1 + $0x58] sm:$0xff]  ;;  %v1262_v4 = vpack.c.bf16 %v106_v61, %v105_v60  ;;  %v76_v7 = vld [vmem:[%s2425_s1 + $0xe8] sm:$0xff] }
  0x11   :  { %v89_v3 = vld [vmem:[%s2425_s1 + $0x150] sm:$0xff]  ;;  %v90_v5 = vld [vmem:[%s2425_s1 + $0x158] sm:$0xff]  ;;  %v107_v8 = vld [vmem:[%s2425_s1 + $0x1e0] sm:$0xff]  ;;  %v1232_v10 = vpack.c.bf16 %v58_v2, %v57_v1  ;;  %v1234_v14 = vpack.c.bf16 %v76_v7, %v75_v6 }
  0x12   :  { %1225 = vmatpush3.bf16.msra.mxu0 %v1224_v50  ;;  %v108_v9 = vld [vmem:[%s2425_s1 + $0x1e8] sm:$0xff]  ;;  %v59_v11 = vld [vmem:[%s2425_s1 + $0x60] sm:$0xff]  ;;  %v1264_v13 = vpack.c.bf16 %v90_v5, %v89_v3  ;;  %v18_v17 = vld [vmem:[%s2424_s0 + $0x18] sm:$0xff] }
  0x13   :  { %1257 = vmatpush3.bf16.msra.mxu1 %v1256_v51  ;;  %1227 = vmatprep.subr.bf16.mxu0 %v1226_v52  ;;  %v60_v12 = vld [vmem:[%s2425_s1 + $0x68] sm:$0xff]  ;;  %v91_v15 = vld [vmem:[%s2425_s1 + $0x160] sm:$0xff]  ;;  %v1266_v18 = vpack.c.bf16 %v108_v9, %v107_v8  ;;  %v77_v20 = vld [vmem:[%s2425_s1 + $0xf0] sm:$0xff] }
  0x14   :  { %1259 = vmatprep.subr.bf16.mxu1 %v1258_v56  ;;  %v16_v16 = vld [vmem:[%s2424_s0 + $0x8] sm:$0xff]  ;;  %v78_v21 = vld [vmem:[%s2425_s1 + $0xf8] sm:$0xff]  ;;  %v109_v22 = vld [vmem:[%s2425_s1 + $0x1f0] sm:$0xff]  ;;  %458 = vmatprep.mubr.f32.mxu1 %v18_v17  ;;  %v1236_v24 = vpack.c.bf16 %v60_v12, %v59_v11 }
  0x15   :  { %v92_v19 = vld [vmem:[%s2425_s1 + $0x168] sm:$0xff]  ;;  %383 = vmatprep.mubr.f32.mxu0 %v16_v16  ;;  %v110_v23 = vld [vmem:[%s2425_s1 + $0x1f8] sm:$0xff]  ;;  %v1238_v26 = vpack.c.bf16 %v78_v21, %v77_v20  ;;  %v61_v27 = vld [vmem:[%s2425_s1 + $0x70] sm:$0xff] }
  0x16   :  { %1229 = vmatpush3.bf16.msra.mxu0 %v1228_v62  ;;  %v1268_v25 = vpack.c.bf16 %v92_v19, %v91_v15  ;;  %v62_v28 = vld [vmem:[%s2425_s1 + $0x78] sm:$0xff]  ;;  %v93_v29 = vld [vmem:[%s2425_s1 + $0x170] sm:$0xff]  ;;  %v1270_v30 = vpack.c.bf16 %v110_v23, %v109_v22  ;;  %v127_v32 = vld [vmem:[%s2425_s1 + $0x280] sm:$0xff] }
  0x17   :  { %1261 = vmatpush3.bf16.msra.mxu1 %v1260_v63  ;;  %1231 = vmatprep.subr.bf16.mxu0 %v1230_v0  ;;  %v94_v31 = vld [vmem:[%s2425_s1 + $0x178] sm:$0xff]  ;;  %v128_v33 = vld [vmem:[%s2425_s1 + $0x288] sm:$0xff]  ;;  %v159_v34 = vld [vmem:[%s2425_s1 + $0x380] sm:$0xff]  ;;  %v1240_v36 = vpack.c.bf16 %v62_v28, %v61_v27 }
  0x18   :  { %1263 = vmatprep.subr.bf16.mxu1 %v1262_v4  ;;  %v160_v35 = vld [vmem:[%s2425_s1 + $0x388] sm:$0xff]  ;;  %v1272_v37 = vpack.c.bf16 %v94_v31, %v93_v29  ;;  %v1274_v38 = vpack.c.bf16 %v128_v33, %v127_v32  ;;  %v111_v39 = vld [vmem:[%s2425_s1 + $0x200] sm:$0xff]  ;;  %v129_v44 = vld [vmem:[%s2425_s1 + $0x290] sm:$0xff] }
  0x19   :  { %v112_v40 = vld [vmem:[%s2425_s1 + $0x208] sm:$0xff]  ;;  %v143_v41 = vld [vmem:[%s2425_s1 + $0x300] sm:$0xff]  ;;  %v1306_v42 = vpack.c.bf16 %v160_v35, %v159_v34  ;;  %v130_v45 = vld [vmem:[%s2425_s1 + $0x298] sm:$0xff] }
  0x1a   :  { %1233 = vmatpush3.bf16.msra.mxu0 %v1232_v10  ;;  %v144_v43 = vld [vmem:[%s2425_s1 + $0x308] sm:$0xff]  ;;  %v161_v46 = vld [vmem:[%s2425_s1 + $0x390] sm:$0xff]  ;;  %v162_v47 = vld [vmem:[%s2425_s1 + $0x398] sm:$0xff]  ;;  %v1276_v50 = vpack.c.bf16 %v112_v40, %v111_v39  ;;  %v1278_v52 = vpack.c.bf16 %v130_v45, %v129_v44 }
  0x1b   :  { %1265 = vmatpush3.bf16.msra.mxu1 %v1264_v13  ;;  %1235 = vmatprep.subr.bf16.mxu0 %v1234_v14  ;;  %v15_v48 = vld [vmem:[%s2424_s0] sm:$0xff]  ;;  %v17_v49 = vld [vmem:[%s2424_s0 + $0x10] sm:$0xff]  ;;  %v1308_v51 = vpack.c.bf16 %v144_v43, %v143_v41  ;;  %v114_v54 = vld [vmem:[%s2425_s1 + $0x218] sm:$0xff]  ;;  %v1310_v56 = vpack.c.bf16 %v162_v47, %v161_v46 }
  0x1c   :  { %1267 = vmatprep.subr.bf16.mxu1 %v1266_v18  ;;  %v113_v53 = vld [vmem:[%s2425_s1 + $0x210] sm:$0xff]  ;;  %v146_v57 = vld [vmem:[%s2425_s1 + $0x318] sm:$0xff]  ;;  %v131_v58 = vld [vmem:[%s2425_s1 + $0x2a0] sm:$0xff] }
  0x1d   :  { %v145_v55 = vld [vmem:[%s2425_s1 + $0x310] sm:$0xff]  ;;  %v132_v59 = vld [vmem:[%s2425_s1 + $0x2a8] sm:$0xff]  ;;  %v163_v60 = vld [vmem:[%s2425_s1 + $0x3a0] sm:$0xff]  ;;  %v1280_v62 = vpack.c.bf16 %v114_v54, %v113_v53 }
  0x1e   :  { %1237 = vmatpush3.bf16.msra.mxu0 %v1236_v24  ;;  %v164_v61 = vld [vmem:[%s2425_s1 + $0x3a8] sm:$0xff]  ;;  %v1312_v63 = vpack.c.bf16 %v146_v57, %v145_v55  ;;  %v1282_v0 = vpack.c.bf16 %v132_v59, %v131_v58  ;;  %v115_v1 = vld [vmem:[%s2425_s1 + $0x220] sm:$0xff]  ;;  %v133_v6 = vld [vmem:[%s2425_s1 + $0x2b0] sm:$0xff] }
  0x1f   :  { %1269 = vmatpush3.bf16.msra.mxu1 %v1268_v25  ;;  %1239 = vmatprep.subr.bf16.mxu0 %v1238_v26  ;;  %v116_v2 = vld [vmem:[%s2425_s1 + $0x228] sm:$0xff]  ;;  %v147_v3 = vld [vmem:[%s2425_s1 + $0x320] sm:$0xff]  ;;  %v1314_v4 = vpack.c.bf16 %v164_v61, %v163_v60  ;;  %v134_v7 = vld [vmem:[%s2425_s1 + $0x2b8] sm:$0xff] }
  0x20   :  { %1271 = vmatprep.subr.bf16.mxu1 %v1270_v30  ;;  %v148_v5 = vld [vmem:[%s2425_s1 + $0x328] sm:$0xff]  ;;  %v165_v8 = vld [vmem:[%s2425_s1 + $0x3b0] sm:$0xff]  ;;  %v166_v9 = vld [vmem:[%s2425_s1 + $0x3b8] sm:$0xff]  ;;  %v1284_v11 = vpack.c.bf16 %v116_v2, %v115_v1  ;;  %v1286_v16 = vpack.c.bf16 %v134_v7, %v133_v6 }
  0x21   :  { %v117_v10 = vld [vmem:[%s2425_s1 + $0x230] sm:$0xff]  ;;  %v118_v12 = vld [vmem:[%s2425_s1 + $0x238] sm:$0xff]  ;;  %v32_v14 = vld [vmem:[%s2424_s0 + $0x88] sm:$0xff]  ;;  %v1316_v15 = vpack.c.bf16 %v148_v5, %v147_v3  ;;  %v1318_v20 = vpack.c.bf16 %v166_v9, %v165_v8 }
  0x22   :  { %1241 = vmatpush3.bf16.msra.mxu0 %v1240_v36  ;;  %v149_v13 = vld [vmem:[%s2425_s1 + $0x330] sm:$0xff]  ;;  %v150_v17 = vld [vmem:[%s2425_s1 + $0x338] sm:$0xff]  ;;  %v135_v18 = vld [vmem:[%s2425_s1 + $0x2c0] sm:$0xff]  ;;  %v1288_v26 = vpack.c.bf16 %v118_v12, %v117_v10 }
  0x23   :  { %1273 = vmatpush3.bf16.msra.mxu1 %v1272_v37  ;;  %1275 = vmatprep.subr.bf16.mxu0 %v1274_v38  ;;  %v31_v19 = vld [vmem:[%s2424_s0 + $0x80] sm:$0xff]  ;;  %v136_v21 = vld [vmem:[%s2425_s1 + $0x2c8] sm:$0xff]  ;;  %v34_v22 = vld [vmem:[%s2424_s0 + $0x98] sm:$0xff]  ;;  %v1320_v29 = vpack.c.bf16 %v150_v17, %v149_v13 }
  0x24   :  { %1307 = vmatprep.subr.bf16.mxu1 %v1306_v42  ;;  %v33_v23 = vld [vmem:[%s2424_s0 + $0x90] sm:$0xff]  ;;  %v167_v24 = vld [vmem:[%s2425_s1 + $0x3c0] sm:$0xff]  ;;  %v168_v25 = vld [vmem:[%s2425_s1 + $0x3c8] sm:$0xff]  ;;  %v1290_v30 = vpack.c.bf16 %v136_v21, %v135_v18 }
  0x25   :  { %384 = vmatmul.mubr.f32.vlgmr.msra.gmra.mrb[0].mxu0 %v15_v48  ;;  %v119_v27 = vld [vmem:[%s2425_s1 + $0x240] sm:$0xff]  ;;  %v120_v28 = vld [vmem:[%s2425_s1 + $0x248] sm:$0xff]  ;;  %v22_v33 = vld [vmem:[%s2424_s0 + $0x38] sm:$0xff]  ;;  %v1322_v34 = vpack.c.bf16 %v168_v25, %v167_v24 }
  0x26   :  { %459 = vmatmul.mubr.f32.vlgmr.msra.gmra.mrb[0].mxu1 %v17_v49  ;;  %1277 = vmatpush3.bf16.msra.mxu0 %v1276_v50  ;;  %v151_v31 = vld [vmem:[%s2425_s1 + $0x340] sm:$0xff]  ;;  %v20_v32 = vld [vmem:[%s2424_s0 + $0x28] sm:$0xff]  ;;  %v137_v36 = vld [vmem:[%s2425_s1 + $0x2d0] sm:$0xff]  ;;  %v1292_v40 = vpack.c.bf16 %v120_v28, %v119_v27 }
  0x27   :  { %1309 = vmatpush3.bf16.msra.mxu1 %v1308_v51  ;;  %1279 = vmatprep.subr.bf16.mxu0 %v1278_v52  ;;  %v152_v35 = vld [vmem:[%s2425_s1 + $0x348] sm:$0xff]  ;;  %v138_v37 = vld [vmem:[%s2425_s1 + $0x2d8] sm:$0xff]  ;;  %v169_v38 = vld [vmem:[%s2425_s1 + $0x3d0] sm:$0xff] }
  0x28   :  { %1311 = vmatprep.subr.bf16.mxu1 %v1310_v56  ;;  %388 = vmatprep.mubr.f32.mxu0 %v32_v14  ;;  %v170_v39 = vld [vmem:[%s2425_s1 + $0x3d8] sm:$0xff]  ;;  %v1324_v41 = vpack.c.bf16 %v152_v35, %v151_v31  ;;  %v1294_v42 = vpack.c.bf16 %v138_v37, %v137_v36  ;;  %v121_v43 = vld [vmem:[%s2425_s1 + $0x250] sm:$0xff]  ;;  %v139_v48 = vld [vmem:[%s2425_s1 + $0x2e0] sm:$0xff] }
  0x29   :  { %389 = vmatmul.mubr.f32.gmra.mrb[2].mxu0 %v31_v19  ;;  %463 = vmatprep.mubr.f32.mxu1 %v34_v22  ;;  %v122_v44 = vld [vmem:[%s2425_s1 + $0x258] sm:$0xff]  ;;  %v153_v45 = vld [vmem:[%s2425_s1 + $0x350] sm:$0xff]  ;;  %v1326_v46 = vpack.c.bf16 %v170_v39, %v169_v38  ;;  %v140_v49 = vld [vmem:[%s2425_s1 + $0x2e8] sm:$0xff] }
  0x2a   :  { %1281 = vmatpush3.bf16.msra.mxu0 %v1280_v62  ;;  %464 = vmatmul.mubr.f32.gmra.mrb[2].mxu1 %v33_v23  ;;  %v154_v47 = vld [vmem:[%s2425_s1 + $0x358] sm:$0xff]  ;;  %v171_v50 = vld [vmem:[%s2425_s1 + $0x3e0] sm:$0xff]  ;;  %v172_v51 = vld [vmem:[%s2425_s1 + $0x3e8] sm:$0xff]  ;;  %v1296_v52 = vpack.c.bf16 %v122_v44, %v121_v43  ;;  %v1298_v54 = vpack.c.bf16 %v140_v49, %v139_v48 }
  0x2b   :  { %1313 = vmatpush3.bf16.msra.mxu1 %v1312_v63  ;;  %1283 = vmatprep.subr.bf16.mxu0 %v1282_v0  ;;  %v1328_v53 = vpack.c.bf16 %v154_v47, %v153_v45  ;;  %v123_v55 = vld [vmem:[%s2425_s1 + $0x260] sm:$0xff]  ;;  %v124_v56 = vld [vmem:[%s2425_s1 + $0x268] sm:$0xff]  ;;  %v1330_v58 = vpack.c.bf16 %v172_v51, %v171_v50  ;;  %v141_v60 = vld [vmem:[%s2425_s1 + $0x2f0] sm:$0xff] }
  0x2c   :  { %1315 = vmatprep.subr.bf16.mxu1 %v1314_v4  ;;  %533 = vmatprep.mubr.f32.mxu0 %v20_v32  ;;  %v155_v57 = vld [vmem:[%s2425_s1 + $0x360] sm:$0xff]  ;;  %v156_v59 = vld [vmem:[%s2425_s1 + $0x368] sm:$0xff]  ;;  %v142_v61 = vld [vmem:[%s2425_s1 + $0x2f8] sm:$0xff]  ;;  %v1300_v0 = vpack.c.bf16 %v124_v56, %v123_v55 }
  0x2d   :  { %608 = vmatprep.mubr.f32.mxu1 %v22_v33  ;;  %v173_v62 = vld [vmem:[%s2425_s1 + $0x3f0] sm:$0xff]  ;;  %v174_v63 = vld [vmem:[%s2425_s1 + $0x3f8] sm:$0xff]  ;;  %v1332_v1 = vpack.c.bf16 %v156_v59, %v155_v57  ;;  %v1302_v2 = vpack.c.bf16 %v142_v61, %v141_v60  ;;  %v191_v8 = vld [vmem:[%s2425_s1 + $0x480] sm:$0xff] }
  0x2e   :  { %1285 = vmatpush3.bf16.msra.mxu0 %v1284_v11  ;;  %v125_v3 = vld [vmem:[%s2425_s1 + $0x270] sm:$0xff]  ;;  %v126_v4 = vld [vmem:[%s2425_s1 + $0x278] sm:$0xff]  ;;  %v1334_v6 = vpack.c.bf16 %v174_v63, %v173_v62  ;;  %v192_v9 = vld [vmem:[%s2425_s1 + $0x488] sm:$0xff] }
  0x2f   :  { %1317 = vmatpush3.bf16.msra.mxu1 %v1316_v15  ;;  %1287 = vmatprep.subr.bf16.mxu0 %v1286_v16  ;;  %v157_v5 = vld [vmem:[%s2425_s1 + $0x370] sm:$0xff]  ;;  %v158_v7 = vld [vmem:[%s2425_s1 + $0x378] sm:$0xff]  ;;  %v223_v10 = vld [vmem:[%s2425_s1 + $0x580] sm:$0xff]  ;;  %v1304_v12 = vpack.c.bf16 %v126_v4, %v125_v3  ;;  %v1338_v14 = vpack.c.bf16 %v192_v9, %v191_v8 }
  0x30   :  { %1319 = vmatprep.subr.bf16.mxu1 %v1318_v20  ;;  %v224_v11 = vld [vmem:[%s2425_s1 + $0x588] sm:$0xff]  ;;  %v1336_v13 = vpack.c.bf16 %v158_v7, %v157_v5  ;;  %v175_v15 = vld [vmem:[%s2425_s1 + $0x400] sm:$0xff]  ;;  %v193_v20 = vld [vmem:[%s2425_s1 + $0x490] sm:$0xff] }
  0x31   :  { %v176_v16 = vld [vmem:[%s2425_s1 + $0x408] sm:$0xff]  ;;  %v1370_v17 = vpack.c.bf16 %v224_v11, %v223_v10  ;;  %v207_v18 = vld [vmem:[%s2425_s1 + $0x500] sm:$0xff]  ;;  %v194_v21 = vld [vmem:[%s2425_s1 + $0x498] sm:$0xff] }
  0x32   :  { %1289 = vmatpush3.bf16.msra.mxu0 %v1288_v26  ;;  %v208_v19 = vld [vmem:[%s2425_s1 + $0x508] sm:$0xff]  ;;  %v225_v22 = vld [vmem:[%s2425_s1 + $0x590] sm:$0xff]  ;;  %v226_v23 = vld [vmem:[%s2425_s1 + $0x598] sm:$0xff]  ;;  %v1340_v26 = vpack.c.bf16 %v176_v16, %v175_v15  ;;  %v1342_v32 = vpack.c.bf16 %v194_v21, %v193_v20 }
  0x33   :  { %1321 = vmatpush3.bf16.msra.mxu1 %v1320_v29  ;;  %1291 = vmatprep.subr.bf16.mxu0 %v1290_v30  ;;  %v19_v24 = vld [vmem:[%s2424_s0 + $0x20] sm:$0xff]  ;;  %v21_v25 = vld [vmem:[%s2424_s0 + $0x30] sm:$0xff]  ;;  %v36_v27 = vld [vmem:[%s2424_s0 + $0xa8] sm:$0xff]  ;;  %v1372_v28 = vpack.c.bf16 %v208_v19, %v207_v18  ;;  %v1374_v33 = vpack.c.bf16 %v226_v23, %v225_v22 }
  0x34   :  { %1323 = vmatprep.subr.bf16.mxu1 %v1322_v34  ;;  %v177_v29 = vld [vmem:[%s2425_s1 + $0x410] sm:$0xff]  ;;  %v178_v30 = vld [vmem:[%s2425_s1 + $0x418] sm:$0xff]  ;;  %v195_v35 = vld [vmem:[%s2425_s1 + $0x4a0] sm:$0xff] }
  0x35   :  { %v209_v31 = vld [vmem:[%s2425_s1 + $0x510] sm:$0xff]  ;;  %v210_v34 = vld [vmem:[%s2425_s1 + $0x518] sm:$0xff]  ;;  %v196_v36 = vld [vmem:[%s2425_s1 + $0x4a8] sm:$0xff] }
  0x36   :  { %1293 = vmatpush3.bf16.msra.mxu0 %v1292_v40  ;;  %v227_v37 = vld [vmem:[%s2425_s1 + $0x5a0] sm:$0xff]  ;;  %v228_v38 = vld [vmem:[%s2425_s1 + $0x5a8] sm:$0xff]  ;;  %v38_v40 = vld [vmem:[%s2424_s0 + $0xb8] sm:$0xff]  ;;  %v1376_v43 = vpack.c.bf16 %v210_v34, %v209_v31  ;;  %v1346_v44 = vpack.c.bf16 %v196_v36, %v195_v35 }
  0x37   :  { %1325 = vmatpush3.bf16.msra.mxu1 %v1324_v41  ;;  %1295 = vmatprep.subr.bf16.mxu0 %v1294_v42  ;;  %v35_v39 = vld [vmem:[%s2424_s0 + $0xa0] sm:$0xff]  ;;  %v1344_v41 = vpack.c.bf16 %v178_v30, %v177_v29  ;;  %v37_v42 = vld [vmem:[%s2424_s0 + $0xb0] sm:$0xff]  ;;  %v1378_v48 = vpack.c.bf16 %v228_v38, %v227_v37  ;;  %v212_v49 = vld [vmem:[%s2425_s1 + $0x528] sm:$0xff] }
  0x38   :  { %1327 = vmatprep.subr.bf16.mxu1 %v1326_v46  ;;  %v179_v45 = vld [vmem:[%s2425_s1 + $0x420] sm:$0xff]  ;;  %v180_v46 = vld [vmem:[%s2425_s1 + $0x428] sm:$0xff]  ;;  %v197_v50 = vld [vmem:[%s2425_s1 + $0x4b0] sm:$0xff] }
  0x39   :  { %v211_v47 = vld [vmem:[%s2425_s1 + $0x520] sm:$0xff]  ;;  %v198_v51 = vld [vmem:[%s2425_s1 + $0x4b8] sm:$0xff]  ;;  %v1348_v55 = vpack.c.bf16 %v180_v46, %v179_v45  ;;  %v181_v59 = vld [vmem:[%s2425_s1 + $0x430] sm:$0xff] }
  0x3a   :  { %1297 = vmatpush3.bf16.msra.mxu0 %v1296_v52  ;;  %v229_v52 = vld [vmem:[%s2425_s1 + $0x5b0] sm:$0xff]  ;;  %v26_v56 = vld [vmem:[%s2424_s0 + $0x58] sm:$0xff]  ;;  %v1380_v57 = vpack.c.bf16 %v212_v49, %v211_v47  ;;  %v232_v3 = vld [vmem:[%s2425_s1 + $0x5c8] sm:$0xff] }
  0x3b   :  { %1329 = vmatpush3.bf16.msra.mxu1 %v1328_v53  ;;  %1299 = vmatprep.subr.bf16.mxu0 %v1298_v54  ;;  %v230_v53 = vld [vmem:[%s2425_s1 + $0x5b8] sm:$0xff]  ;;  %v24_v54 = vld [vmem:[%s2424_s0 + $0x48] sm:$0xff]  ;;  %v213_v61 = vld [vmem:[%s2425_s1 + $0x530] sm:$0xff] }
  0x3c   :  { %1331 = vmatprep.subr.bf16.mxu1 %v1330_v58  ;;  %v1350_v58 = vpack.c.bf16 %v198_v51, %v197_v50  ;;  %v182_v60 = vld [vmem:[%s2425_s1 + $0x438] sm:$0xff]  ;;  %v1382_v62 = vpack.c.bf16 %v230_v53, %v229_v52  ;;  %v183_v7 = vld [vmem:[%s2425_s1 + $0x440] sm:$0xff]  ;;  %v184_v8 = vld [vmem:[%s2425_s1 + $0x448] sm:$0xff] }
  0x3d   :  { %v214_v63 = vld [vmem:[%s2425_s1 + $0x538] sm:$0xff]  ;;  %v1352_v4 = vpack.c.bf16 %v182_v60, %v181_v59  ;;  %v215_v9 = vld [vmem:[%s2425_s1 + $0x540] sm:$0xff]  ;;  %v216_v11 = vld [vmem:[%s2425_s1 + $0x548] sm:$0xff]  ;;  %v1356_v16 = vpack.c.bf16 %v184_v8, %v183_v7 }
  0x3e   :  { %1301 = vmatpush3.bf16.msra.mxu0 %v1300_v0  ;;  %v199_v0 = vld [vmem:[%s2425_s1 + $0x4c0] sm:$0xff]  ;;  %v1384_v5 = vpack.c.bf16 %v214_v63, %v213_v61  ;;  %v234_v15 = vld [vmem:[%s2425_s1 + $0x5d8] sm:$0xff]  ;;  %v185_v19 = vld [vmem:[%s2425_s1 + $0x450] sm:$0xff] }
  0x3f   :  { %1333 = vmatpush3.bf16.msra.mxu1 %v1332_v1  ;;  %1303 = vmatprep.subr.bf16.mxu0 %v1302_v2  ;;  %v200_v1 = vld [vmem:[%s2425_s1 + $0x4c8] sm:$0xff]  ;;  %v231_v2 = vld [vmem:[%s2425_s1 + $0x5c0] sm:$0xff]  ;;  %v186_v20 = vld [vmem:[%s2425_s1 + $0x458] sm:$0xff] }
  0x40   :  { %1335 = vmatprep.subr.bf16.mxu1 %v1334_v6  ;;  %v1354_v6 = vpack.c.bf16 %v200_v1, %v199_v0  ;;  %v1386_v10 = vpack.c.bf16 %v232_v3, %v231_v2  ;;  %v217_v21 = vld [vmem:[%s2425_s1 + $0x550] sm:$0xff]  ;;  %v218_v23 = vld [vmem:[%s2425_s1 + $0x558] sm:$0xff]  ;;  %v187_v31 = vld [vmem:[%s2425_s1 + $0x460] sm:$0xff] }
  0x41   :  { %v1392_v29 = vpack.c.bf16 %v218_v23, %v217_v21  ;;  %v220_v35 = vld [vmem:[%s2425_s1 + $0x568] sm:$0xff]  ;;  %v205_v36 = vld [vmem:[%s2425_s1 + $0x4f0] sm:$0xff]  ;;  %v206_v37 = vld [vmem:[%s2425_s1 + $0x4f8] sm:$0xff] }
  0x42   :  { %1305 = vmatpush3.bf16.msra.mxu0 %v1304_v12  ;;  %v201_v12 = vld [vmem:[%s2425_s1 + $0x4d0] sm:$0xff]  ;;  %v222_v47 = vld [vmem:[%s2425_s1 + $0x578] sm:$0xff]  ;;  %v256_v49 = vld [vmem:[%s2425_s1 + $0x688] sm:$0xff] }
  0x43   :  { %1337 = vmatpush3.bf16.msra.mxu1 %v1336_v13  ;;  %1339 = vmatprep.subr.bf16.mxu0 %v1338_v14  ;;  %v202_v13 = vld [vmem:[%s2425_s1 + $0x4d8] sm:$0xff]  ;;  %v233_v14 = vld [vmem:[%s2425_s1 + $0x5d0] sm:$0xff]  ;;  %v239_v53 = vld [vmem:[%s2425_s1 + $0x600] sm:$0xff] }
  0x44   :  { %1371 = vmatprep.subr.bf16.mxu1 %v1370_v17  ;;  %v1388_v17 = vpack.c.bf16 %v216_v11, %v215_v9  ;;  %v1358_v18 = vpack.c.bf16 %v202_v13, %v201_v12  ;;  %v1390_v22 = vpack.c.bf16 %v234_v15, %v233_v14  ;;  %v237_v38 = vld [vmem:[%s2425_s1 + $0x5f0] sm:$0xff] }
  0x45   :  { %534 = vmatmul.mubr.f32.vlgmr.msra.gmra.mrb[4].mxu0 %v19_v24  ;;  %v203_v24 = vld [vmem:[%s2425_s1 + $0x4e0] sm:$0xff]  ;;  %v221_v45 = vld [vmem:[%s2425_s1 + $0x570] sm:$0xff] }
  0x46   :  { %609 = vmatmul.mubr.f32.vlgmr.msra.gmra.mrb[4].mxu1 %v21_v25  ;;  %1341 = vmatpush3.bf16.msra.mxu0 %v1340_v26  ;;  %v204_v25 = vld [vmem:[%s2425_s1 + $0x4e8] sm:$0xff]  ;;  %v235_v26 = vld [vmem:[%s2425_s1 + $0x5e0] sm:$0xff]  ;;  %v1400_v51 = vpack.c.bf16 %v222_v47, %v221_v45 }
  0x47   :  { %1373 = vmatpush3.bf16.msra.mxu1 %v1372_v28  ;;  %538 = vmatprep.mubr.f32.mxu0 %v36_v27  ;;  %v236_v27 = vld [vmem:[%s2425_s1 + $0x5e8] sm:$0xff]  ;;  %v1360_v28 = vpack.c.bf16 %v186_v20, %v185_v19  ;;  %v1362_v30 = vpack.c.bf16 %v204_v25, %v203_v24 }
  0x48   :  { %1343 = vmatprep.subr.bf16.mxu0 %v1342_v32  ;;  %1375 = vmatprep.subr.bf16.mxu1 %v1374_v33  ;;  %v188_v32 = vld [vmem:[%s2425_s1 + $0x468] sm:$0xff]  ;;  %v219_v33 = vld [vmem:[%s2425_s1 + $0x560] sm:$0xff]  ;;  %v1394_v34 = vpack.c.bf16 %v236_v27, %v235_v26 }
  0x49   :  { %539 = vmatmul.mubr.f32.gmra.mrb[6].mxu0 %v35_v39  ;;  %613 = vmatprep.mubr.f32.mxu1 %v38_v40  ;;  %v238_v39 = vld [vmem:[%s2425_s1 + $0x5f8] sm:$0xff]  ;;  %v1364_v40 = vpack.c.bf16 %v188_v32, %v187_v31 }
  0x4a   :  { %1345 = vmatpush3.bf16.msra.mxu0 %v1344_v41  ;;  %614 = vmatmul.mubr.f32.gmra.mrb[6].mxu1 %v37_v42  ;;  %v1396_v41 = vpack.c.bf16 %v220_v35, %v219_v33  ;;  %v1366_v42 = vpack.c.bf16 %v206_v37, %v205_v36  ;;  %v1398_v46 = vpack.c.bf16 %v238_v39, %v237_v38 }
  0x4b   :  { %1377 = vmatpush3.bf16.msra.mxu1 %v1376_v43  ;;  %1347 = vmatprep.subr.bf16.mxu0 %v1346_v44  ;;  %v189_v43 = vld [vmem:[%s2425_s1 + $0x470] sm:$0xff]  ;;  %v190_v44 = vld [vmem:[%s2425_s1 + $0x478] sm:$0xff] }
  0x4c   :  { %1379 = vmatprep.subr.bf16.mxu1 %v1378_v48  ;;  %683 = vmatprep.mubr.f32.mxu0 %v24_v54  ;;  %v255_v48 = vld [vmem:[%s2425_s1 + $0x680] sm:$0xff]  ;;  %v1368_v50 = vpack.c.bf16 %v190_v44, %v189_v43  ;;  %v240_v54 = vld [vmem:[%s2425_s1 + $0x608] sm:$0xff] }
  0x4d   :  { %758 = vmatprep.mubr.f32.mxu1 %v26_v56  ;;  %v1402_v52 = vpack.c.bf16 %v256_v49, %v255_v48  ;;  %v272_v56 = vld [vmem:[%s2425_s1 + $0x708] sm:$0xff] }
  0x4e   :  { %1349 = vmatpush3.bf16.msra.mxu0 %v1348_v55  ;;  %v271_v55 = vld [vmem:[%s2425_s1 + $0x700] sm:$0xff] }
  0x4f   :  { %1381 = vmatpush3.bf16.msra.mxu1 %v1380_v57  ;;  %1351 = vmatprep.subr.bf16.mxu0 %v1350_v58  ;;  %v257_v57 = vld [vmem:[%s2425_s1 + $0x690] sm:$0xff]  ;;  %v258_v58 = vld [vmem:[%s2425_s1 + $0x698] sm:$0xff] }
  0x50   :  { %1383 = vmatprep.subr.bf16.mxu1 %v1382_v62 }
  0x52   :  { %1353 = vmatpush3.bf16.msra.mxu0 %v1352_v4 }
  0x53   :  { %1385 = vmatpush3.bf16.msra.mxu1 %v1384_v5  ;;  %1355 = vmatprep.subr.bf16.mxu0 %v1354_v6 }
  0x54   :  { %1387 = vmatprep.subr.bf16.mxu1 %v1386_v10 }
  0x56   :  { %1357 = vmatpush3.bf16.msra.mxu0 %v1356_v16 }
  0x57   :  { %1389 = vmatpush3.bf16.msra.mxu1 %v1388_v17  ;;  %1359 = vmatprep.subr.bf16.mxu0 %v1358_v18 }
  0x58   :  { %1391 = vmatprep.subr.bf16.mxu1 %v1390_v22 }
  0x5a   :  { %1361 = vmatpush3.bf16.msra.mxu0 %v1360_v28 }
  0x5b   :  { %1393 = vmatpush3.bf16.msra.mxu1 %v1392_v29  ;;  %1363 = vmatprep.subr.bf16.mxu0 %v1362_v30 }
  0x5c   :  { %1395 = vmatprep.subr.bf16.mxu1 %v1394_v34 }
  0x5e   :  { %1365 = vmatpush3.bf16.msra.mxu0 %v1364_v40 }
  0x5f   :  { %1397 = vmatpush3.bf16.msra.mxu1 %v1396_v41  ;;  %1367 = vmatprep.subr.bf16.mxu0 %v1366_v42 }
  0x60   :  { %1399 = vmatprep.subr.bf16.mxu1 %v1398_v46 }
  0x61   :  { %8 = vsyncpa [#allocation3], 0  ;;  %v23_v59 = vld [vmem:[%s2424_s0 + $0x40] sm:$0xff]  ;;  %v25_v60 = vld [vmem:[%s2424_s0 + $0x50] sm:$0xff]  ;;  %v1404_v61 = vpack.c.bf16 %v240_v54, %v239_v53  ;;  %v1435_v63 = vpack.c.bf16 %v272_v56, %v271_v55  ;;  %v1509_v3 = vmov 0.0|0.0   ;;  %v1406_v4 = vpack.c.bf16 %v258_v58, %v257_v57 }
  0x62   :  { %1369 = vmatpush3.bf16.msra.mxu0 %v1368_v50  ;;  %v40_v62 = vld [vmem:[%s2424_s0 + $0xc8] sm:$0xff]  ;;  %v241_v0 = vld [vmem:[%s2425_s1 + $0x610] sm:$0xff]  ;;  %v242_v1 = vld [vmem:[%s2425_s1 + $0x618] sm:$0xff]  ;;  %vm308_vm0 = vcmask 883712   ;;  %vm315_vm1 = vcmask 1043456   ;;  %vm1510_vm2 = vmmov 1  }
  0x63   :  { %1401 = vmatpush3.bf16.msra.mxu1 %v1400_v51  ;;  %1403 = vmatprep.subr.bf16.mxu0 %v1402_v52  ;;  %v273_v2 = vld [vmem:[%s2425_s1 + $0x710] sm:$0xff]  ;;  %v274_v5 = vld [vmem:[%s2425_s1 + $0x718] sm:$0xff]  ;;  %v259_v6 = vld [vmem:[%s2425_s1 + $0x6a0] sm:$0xff]  ;;  %v1408_v10 = vpack.c.bf16 %v242_v1, %v241_v0  ;;  %vm921_vm4 = vcmask 80896  }
  0x64   :  { %1434 = vmatprep.subr.bf16.mxu1 %v1509_v3  ;;  %v260_v7 = vld [vmem:[%s2425_s1 + $0x6a8] sm:$0xff]  ;;  %v39_v8 = vld [vmem:[%s2424_s0 + $0xc0] sm:$0xff]  ;;  %v42_v9 = vld [vmem:[%s2424_s0 + $0xd8] sm:$0xff]  ;;  %v1438_v12 = vpack.c.bf16 %v274_v5, %v273_v2 }
  0x65   :  { %684 = vmatmul.mubr.f32.vlgmr.msra.gmra.mrb[8].mxu0 %v23_v59  ;;  %v41_v11 = vld [vmem:[%s2424_s0 + $0xd0] sm:$0xff]  ;;  %v1410_v13 = vpack.c.bf16 %v260_v7, %v259_v6  ;;  %v243_v14 = vld [vmem:[%s2425_s1 + $0x620] sm:$0xff]  ;;  %v244_v15 = vld [vmem:[%s2425_s1 + $0x628] sm:$0xff] }
  0x66   :  { %759 = vmatmul.mubr.f32.vlgmr.msra.gmra.mrb[8].mxu1 %v25_v60  ;;  %1405 = vmatpush3.bf16.msra.mxu0 %v1404_v61  ;;  %v275_v16 = vld [vmem:[%s2425_s1 + $0x720] sm:$0xff]  ;;  %v276_v17 = vld [vmem:[%s2425_s1 + $0x728] sm:$0xff]  ;;  %v261_v18 = vld [vmem:[%s2425_s1 + $0x6b0] sm:$0xff]  ;;  %v1412_v21 = vpack.c.bf16 %v244_v15, %v243_v14 }
  0x67   :  { %1436 = vmatpush1.bf16.msra.mxu1 %v1435_v63  ;;  %688 = vmatprep.mubr.f32.mxu0 %v40_v62  ;;  %v262_v19 = vld [vmem:[%s2425_s1 + $0x6b8] sm:$0xff]  ;;  %v28_v20 = vld [vmem:[%s2424_s0 + $0x68] sm:$0xff]  ;;  %v1441_v23 = vpack.c.bf16 %v276_v17, %v275_v16  ;;  %v245_v25 = vld [vmem:[%s2425_s1 + $0x630] sm:$0xff] }
  0x68   :  { %1407 = vmatprep.subr.bf16.mxu0 %v1406_v4  ;;  %1437 = vmatprep.subr.bf16.mxu1 %v1509_v3  ;;  %v30_v22 = vld [vmem:[%s2424_s0 + $0x78] sm:$0xff]  ;;  %v1414_v24 = vpack.c.bf16 %v262_v19, %v261_v18  ;;  %v277_v27 = vld [vmem:[%s2425_s1 + $0x730] sm:$0xff]  ;;  %v263_v29 = vld [vmem:[%s2425_s1 + $0x6c0] sm:$0xff] }
  0x69   :  { %689 = vmatmul.mubr.f32.gmra.mrb[10].mxu0 %v39_v8  ;;  %763 = vmatprep.mubr.f32.mxu1 %v42_v9  ;;  %v246_v26 = vld [vmem:[%s2425_s1 + $0x638] sm:$0xff]  ;;  %v264_v30 = vld [vmem:[%s2425_s1 + $0x6c8] sm:$0xff]  ;;  %v247_v34 = vld [vmem:[%s2425_s1 + $0x640] sm:$0xff] }
  0x6a   :  { %1409 = vmatpush3.bf16.msra.mxu0 %v1408_v10  ;;  %764 = vmatmul.mubr.f32.gmra.mrb[10].mxu1 %v41_v11  ;;  %v278_v28 = vld [vmem:[%s2425_s1 + $0x738] sm:$0xff]  ;;  %v1416_v31 = vpack.c.bf16 %v246_v26, %v245_v25  ;;  %v1418_v33 = vpack.c.bf16 %v264_v30, %v263_v29  ;;  %v248_v35 = vld [vmem:[%s2425_s1 + $0x648] sm:$0xff]  ;;  %v279_v36 = vld [vmem:[%s2425_s1 + $0x740] sm:$0xff] }
  0x6b   :  { %1439 = vmatpush1.bf16.msra.mxu1 %v1438_v12  ;;  %1411 = vmatprep.subr.bf16.mxu0 %v1410_v13  ;;  %v1444_v32 = vpack.c.bf16 %v278_v28, %v277_v27  ;;  %v280_v37 = vld [vmem:[%s2425_s1 + $0x748] sm:$0xff]  ;;  %v265_v38 = vld [vmem:[%s2425_s1 + $0x6d0] sm:$0xff]  ;;  %v266_v39 = vld [vmem:[%s2425_s1 + $0x6d8] sm:$0xff]  ;;  %v1420_v40 = vpack.c.bf16 %v248_v35, %v247_v34 }
  0x6c   :  { %1440 = vmatprep.subr.bf16.mxu1 %v1509_v3  ;;  %833 = vmatprep.mubr.f32.mxu0 %v28_v20  ;;  %v1447_v41 = vpack.c.bf16 %v280_v37, %v279_v36  ;;  %v1422_v42 = vpack.c.bf16 %v266_v39, %v265_v38  ;;  %v249_v43 = vld [vmem:[%s2425_s1 + $0x650] sm:$0xff]  ;;  %v250_v44 = vld [vmem:[%s2425_s1 + $0x658] sm:$0xff]  ;;  %v267_v47 = vld [vmem:[%s2425_s1 + $0x6e0] sm:$0xff] }
  0x6d   :  { %942 = vmatprep.mubr.msk.f32.mxu1 %vm308_vm0, %v30_v22  ;;  %v281_v45 = vld [vmem:[%s2425_s1 + $0x750] sm:$0xff]  ;;  %v282_v46 = vld [vmem:[%s2425_s1 + $0x758] sm:$0xff]  ;;  %v268_v48 = vld [vmem:[%s2425_s1 + $0x6e8] sm:$0xff]  ;;  %v1424_v49 = vpack.c.bf16 %v250_v44, %v249_v43 }
  0x6e   :  { %1413 = vmatpush3.bf16.msra.mxu0 %v1412_v21  ;;  %v1450_v50 = vpack.c.bf16 %v282_v46, %v281_v45  ;;  %v1426_v51 = vpack.c.bf16 %v268_v48, %v267_v47  ;;  %v251_v52 = vld [vmem:[%s2425_s1 + $0x660] sm:$0xff]  ;;  %v252_v53 = vld [vmem:[%s2425_s1 + $0x668] sm:$0xff]  ;;  %v269_v56 = vld [vmem:[%s2425_s1 + $0x6f0] sm:$0xff] }
  0x6f   :  { %1442 = vmatpush1.bf16.msra.mxu1 %v1441_v23  ;;  %1415 = vmatprep.subr.bf16.mxu0 %v1414_v24  ;;  %v283_v54 = vld [vmem:[%s2425_s1 + $0x760] sm:$0xff]  ;;  %v284_v55 = vld [vmem:[%s2425_s1 + $0x768] sm:$0xff]  ;;  %v270_v57 = vld [vmem:[%s2425_s1 + $0x6f8] sm:$0xff]  ;;  %v1428_v58 = vpack.c.bf16 %v252_v53, %v251_v52 }
  0x70   :  { %1443 = vmatprep.subr.bf16.mxu1 %v1509_v3  ;;  %v1453_v59 = vpack.c.bf16 %v284_v55, %v283_v54  ;;  %v1430_v60 = vpack.c.bf16 %v270_v57, %v269_v56  ;;  %v253_v61 = vld [vmem:[%s2425_s1 + $0x670] sm:$0xff]  ;;  %v254_v62 = vld [vmem:[%s2425_s1 + $0x678] sm:$0xff]  ;;  %v287_v4 = vld [vmem:[%s2425_s1 + $0x780] sm:$0xff] }
  0x71   :  { %v285_v63 = vld [vmem:[%s2425_s1 + $0x770] sm:$0xff]  ;;  %v286_v0 = vld [vmem:[%s2425_s1 + $0x778] sm:$0xff]  ;;  %v1432_v1 = vpack.c.bf16 %v254_v62, %v253_v61  ;;  %v288_v5 = vld [vmem:[%s2425_s1 + $0x788] sm:$0xff] }
  0x72   :  { %1417 = vmatpush3.bf16.msra.mxu0 %v1416_v31  ;;  %v1456_v2 = vpack.c.bf16 %v286_v0, %v285_v63  ;;  %v27_v6 = vld [vmem:[%s2424_s0 + $0x60] sm:$0xff]  ;;  %v1459_v7 = vpack.c.bf16 %v288_v5, %v287_v4  ;;  %v44_v8 = vld [vmem:[%s2424_s0 + $0xe8] sm:$0xff]  ;;  %v289_v9 = vld [vmem:[%s2425_s1 + $0x790] sm:$0xff] }
  0x73   :  { %1445 = vmatpush1.bf16.msra.mxu1 %v1444_v32  ;;  %1419 = vmatprep.subr.bf16.mxu0 %v1418_v33  ;;  %v290_v10 = vld [vmem:[%s2425_s1 + $0x798] sm:$0xff]  ;;  %v43_v11 = vld [vmem:[%s2424_s0 + $0xe0] sm:$0xff]  ;;  %v292_v14 = vld [vmem:[%s2425_s1 + $0x7a8] sm:$0xff] }
  0x74   :  { %1446 = vmatprep.subr.bf16.mxu1 %v1509_v3  ;;  %v1462_v12 = vpack.c.bf16 %v290_v10, %v289_v9  ;;  %v291_v13 = vld [vmem:[%s2425_s1 + $0x7a0] sm:$0xff]  ;;  %v293_v16 = vld [vmem:[%s2425_s1 + $0x7b0] sm:$0xff]  ;;  %v294_v17 = vld [vmem:[%s2425_s1 + $0x7b8] sm:$0xff] }
  0x75   :  { %v1465_v15 = vpack.c.bf16 %v292_v14, %v291_v13  ;;  %v1468_v18 = vpack.c.bf16 %v294_v17, %v293_v16  ;;  %v295_v19 = vld [vmem:[%s2425_s1 + $0x7c0] sm:$0xff]  ;;  %v296_v20 = vld [vmem:[%s2425_s1 + $0x7c8] sm:$0xff]  ;;  %v297_v22 = vld [vmem:[%s2425_s1 + $0x7d0] sm:$0xff] }
  0x76   :  { %1421 = vmatpush3.bf16.msra.mxu0 %v1420_v40  ;;  %v1471_v21 = vpack.c.bf16 %v296_v20, %v295_v19  ;;  %v298_v23 = vld [vmem:[%s2425_s1 + $0x7d8] sm:$0xff]  ;;  %v299_v25 = vld [vmem:[%s2425_s1 + $0x7e0] sm:$0xff]  ;;  %v300_v26 = vld [vmem:[%s2425_s1 + $0x7e8] sm:$0xf] }
  0x77   :  { %1448 = vmatpush1.bf16.msra.mxu1 %v1447_v41  ;;  %1423 = vmatprep.subr.bf16.mxu0 %v1422_v42  ;;  %v1474_v24 = vpack.c.bf16 %v298_v23, %v297_v22  ;;  %v1477_v27 = vpack.c.bf16 %v300_v26, %v299_v25  ;;  %vm1478_vm3 = vmpackc.low %vm315_vm1, %vm1510_vm2  ;;  %v29_v28 = vld [vmem:[%s2424_s0 + $0x70] sm:$0xff]  ;;  %v46_v29 = vld [vmem:[%s2424_s0 + $0xf8] sm:$0xff] }
  0x78   :  { %1449 = vmatprep.subr.bf16.mxu1 %v1509_v3  ;;  %v45_v30 = vld [vmem:[%s2424_s0 + $0xf0] sm:$0xff]  ;;  %v940_v32 = vld [vmem:[%s2426_s2] ss:$0 sm:$0xff]  ;;  %s1511_s0 = smov [#allocation2]  }
  0x79   :  { %s929_s2 = sshll.u32 %s1511_s0, 4  ;;  %s930_s2 = int_to_ptr.vmem [resolvable:$true] %s929_s2 }
  0x7a   :  { %1425 = vmatpush3.bf16.msra.mxu0 %v1424_v49  ;;  %s1485_s18 = scalar_lea.vmem %s930_s2, 256  ;;  %p1490_p1 = scmp.lt.s32.totalorder %s930_s2, %s930_s2 }
  0x7b   :  { %1451 = vmatpush1.bf16.msra.mxu1 %v1450_v50  ;;  %1427 = vmatprep.subr.bf16.mxu0 %v1426_v51  ;;  %p1486_p0 = scmp.ne.s32.totalorder %s930_s2, %s1485_s18  ;;  %p1491_p2 = scmp.lt.s32.totalorder %s1485_s18, %s1485_s18 }
  0x7c   :  { %1452 = vmatprep.subr.bf16.mxu1 %v1509_v3 }
  0x7d   :  { %p1492_p3 = por %p1491_p2, %p1490_p1 }
  0x7e   :  { %1429 = vmatpush3.bf16.msra.mxu0 %v1428_v58 }
  0x7f   :  { %1454 = vmatpush1.bf16.msra.mxu1 %v1453_v59  ;;  %1431 = vmatprep.subr.bf16.mxu0 %v1430_v60  ;;  %p1493_p4 = pnand %p1492_p3, %p1486_p0 }
  0x80   :  { %1455 = vmatprep.subr.bf16.mxu1 %v1509_v3 }
  0x82   :  { %1433 = vmatpush3.bf16.msra.mxu0 %v1432_v1 }
  0x83   :  { %1457 = vmatpush1.bf16.msra.mxu1 %v1456_v2 }
  0x84   :  { %1458 = vmatprep.subr.bf16.mxu1 %v1509_v3 }
  0x85   :  { %834 = vmatmul.mubr.f32.vlgmr.msra.gmra.mrb[12].mxu0 %v27_v6 }
  0x86   :  { %838 = vmatprep.mubr.f32.mxu0 %v44_v8 }
  0x87   :  { %1460 = vmatpush1.bf16.msra.mxu1 %v1459_v7 }
  0x88   :  { %1461 = vmatprep.subr.bf16.mxu1 %v1509_v3 }
  0x89   :  { %839 = vmatmul.mubr.f32.gmra.mrb[14].mxu0 %v43_v11 }
  0x8b   :  { %1463 = vmatpush1.bf16.msra.mxu1 %v1462_v12 }
  0x8c   :  { %1464 = vmatprep.subr.bf16.mxu1 %v1509_v3 }
  0x8f   :  { %1466 = vmatpush1.bf16.msra.mxu1 %v1465_v15 }
  0x90   :  { %1467 = vmatprep.subr.bf16.mxu1 %v1509_v3 }
  0x93   :  { %1469 = vmatpush1.bf16.msra.mxu1 %v1468_v18 }
  0x94   :  { %1470 = vmatprep.subr.bf16.mxu1 %v1509_v3 }
  0x97   :  { %1472 = vmatpush1.bf16.msra.mxu1 %v1471_v21 }
  0x98   :  { %1473 = vmatprep.subr.bf16.mxu1 %v1509_v3 }
  0x9b   :  { %1475 = vmatpush1.bf16.msra.mxu1 %v1474_v24 }
  0x9c   :  { %1476 = vmatprep.subr.bf16.mxu1 %v1509_v3 }
  0x9f   :  { %1479 = vmatpush1.bf16.msk.msra.mxu1 %vm1478_vm3, %v1477_v27 }
  0xa2   :  { %909 = vmatmul.mubr.f32.vlgmr.msra.gmra.mrb[12].mxu1 %v29_v28 }
  0xa3   :  { %943 = vmatprep.mubr.msk.f32.mxu1 %vm308_vm0, %v46_v29 }
  0xa6   :  { %914 = vmatmul.mubr.f32.gmra.mrb[14].mxu1 %v45_v30 }
  0xf8   :  { %v976_v3 = vpop.f32.mrb[0].mxu0 }
  0xf9   :  { %v1014_v31 = vpop.f32.mrb[0].mxu1  ;;  %v977_v33 = vpop.f32.mrb[1].mxu0 }
  0xfa   :  { %v978_v34 = vadd.f32 %v977_v33, %v976_v3  ;;  %v1015_v35 = vpop.f32.mrb[1].mxu1 }
  0xfb   :  { %v1016_v36 = vadd.f32 %v1015_v35, %v1014_v31 }
  0xfc   :  { %v386_v37 = vadd.f32 %v978_v34, %v940_v32  ;;  %v979_v39 = vpop.f32.mrb[2].mxu0 }
  0xfd   :  { %v980_v40 = vpop.f32.mrb[3].mxu0  ;;  %v1017_v41 = vpop.f32.mrb[2].mxu1 }
  0xfe   :  { %v461_v38 = vadd.f32 %v1016_v36, %v386_v37  ;;  %v981_v42 = vadd.f32 %v980_v40, %v979_v39  ;;  %v1018_v43 = vpop.f32.mrb[3].mxu1 }
  0xff   :  { %v1019_v44 = vadd.f32 %v1018_v43, %v1017_v41 }
 0x100   :  { %v391_v45 = vadd.f32 %v981_v42, %v940_v32 }
 0x102   :  { %v466_v46 = vadd.f32 %v1019_v44, %v391_v45 }
 0x118   :  { %v1052_v47 = vpop.f32.mrb[4].mxu0 }
 0x119   :  { %v1090_v48 = vpop.f32.mrb[4].mxu1  ;;  %v1053_v49 = vpop.f32.mrb[5].mxu0 }
 0x11a   :  { %v1054_v50 = vadd.f32 %v1053_v49, %v1052_v47  ;;  %v1091_v51 = vpop.f32.mrb[5].mxu1 }
 0x11b   :  { %v1092_v52 = vadd.f32 %v1091_v51, %v1090_v48 }
 0x11c   :  { %v536_v53 = vadd.f32 %v1054_v50, %v461_v38  ;;  %v1055_v54 = vpop.f32.mrb[6].mxu0 }
 0x11d   :  { %v1056_v55 = vpop.f32.mrb[7].mxu0  ;;  %v1093_v56 = vpop.f32.mrb[6].mxu1 }
 0x11e   :  { %v611_v57 = vadd.f32 %v1092_v52, %v536_v53  ;;  %v1057_v58 = vadd.f32 %v1056_v55, %v1055_v54  ;;  %v1094_v59 = vpop.f32.mrb[7].mxu1 }
 0x11f   :  { %v1095_v60 = vadd.f32 %v1094_v59, %v1093_v56 }
 0x120   :  { %v541_v61 = vadd.f32 %v1057_v58, %v466_v46 }
 0x122   :  { %v616_v62 = vadd.f32 %v1095_v60, %v541_v61 }
 0x138   :  { %v1128_v63 = vpop.f32.mrb[8].mxu0 }
 0x139   :  { %v1166_v0 = vpop.f32.mrb[8].mxu1  ;;  %v1129_v1 = vpop.f32.mrb[9].mxu0 }
 0x13a   :  { %v1130_v2 = vadd.f32 %v1129_v1, %v1128_v63  ;;  %v1167_v4 = vpop.f32.mrb[9].mxu1 }
 0x13b   :  { %v1168_v5 = vadd.f32 %v1167_v4, %v1166_v0 }
 0x13c   :  { %v686_v6 = vadd.f32 %v1130_v2, %v611_v57  ;;  %v1131_v7 = vpop.f32.mrb[10].mxu0 }
 0x13d   :  { %v1132_v8 = vpop.f32.mrb[11].mxu0  ;;  %v1169_v9 = vpop.f32.mrb[10].mxu1 }
 0x13e   :  { %v761_v10 = vadd.f32 %v1168_v5, %v686_v6  ;;  %v1133_v11 = vadd.f32 %v1132_v8, %v1131_v7  ;;  %v1170_v12 = vpop.f32.mrb[11].mxu1 }
 0x13f   :  { %v1171_v13 = vadd.f32 %v1170_v12, %v1169_v9 }
 0x140   :  { %v691_v14 = vadd.f32 %v1133_v11, %v616_v62 }
 0x142   :  { %v766_v15 = vadd.f32 %v1171_v13, %v691_v14 }
 0x158   :  { %v1204_v16 = vpop.f32.mrb[12].mxu0 }
 0x159   :  { %v1205_v17 = vpop.f32.mrb[13].mxu0 }
 0x15a   :  { %v1206_v18 = vadd.f32 %v1205_v17, %v1204_v16 }
 0x15c   :  { %v1207_v19 = vpop.f32.mrb[14].mxu0  ;;  %v836_v20 = vadd.f32 %v1206_v18, %v761_v10 }
 0x15d   :  { %v1208_v21 = vpop.f32.mrb[15].mxu0 }
 0x15e   :  { %v1209_v22 = vadd.f32 %v1208_v21, %v1207_v19 }
 0x160   :  { %v841_v23 = vadd.f32 %v1209_v22, %v766_v15 }
 0x175   :  { %v910_v24 = vpop.f32.mrb[12].mxu1 }
 0x176   :  { %v911_v25 = vadd.f32 %v910_v24, %v836_v20  ;;  %v912_v26 = vpop.f32.mrb[13].mxu1 }
 0x178   :  { %v919_v27 = vmax.f32 %v911_v25, 0.0 }
 0x179   :  { %v915_v28 = vpop.f32.mrb[14].mxu1 }
 0x17a   :  { %922 = vst.msk [vmem:[#allocation2] sm:$0xff] %vm921_vm4, %v919_v27  ;;  %v916_v29 = vadd.f32 %v915_v28, %v841_v23  ;;  %v917_v30 = vpop.f32.mrb[15].mxu1 }
 0x17c   :  { %v920_v3 = vmax.f32 %v916_v29, 0.0 }
 0x17e   :  { %923 = vst.msk [vmem:[#allocation2 + $0x8] sm:$0xff] %vm921_vm4, %v920_v3 }
 0x17f   :  { %1496 = shalt.err (!%p1493_p4)
}
 0x180   :  { %s1497_s21 = scalar_lea.hbm %s2427_s3, 256 }
 0x181   :  { %p1498_p5 = scmp.ne.s32.totalorder %s2427_s3, %s1497_s21  ;;  %p1501_p6 = scmp.lt.u32.totalorder %s1497_s21, %s2427_s3 }
 0x183   :  { %p1503_p7 = pnand %p1501_p6, %p1498_p5 }
 0x185   :  { %1506 = shalt.err (!%p1503_p7)
}
 0x186   :  { %s1512_s26 = smov 128   ;;  %s1513_s27 = smov 8  }
 0x187   :  { %935 = dma.vmem_to_hbm [thread:$0]  %s930_s2, 256, %s2427_s3, [#allocation3], %s1512_s26, %s1512_s26, %s1513_s27  }
 0x188   :  { %1507 = dma.done.wait [#allocation3], 256  }
 0x189   :  { %1508 = vsyncadd [#allocation3], 4294967040 }
 0x18a   :  { %939 = vsyncpa [#allocation3], 1 }

// kernel: residual_net2_forward.2
= control target key start
LH: loop header
LB: loop body
LE: loop exit
PB: predicated region body
PF: predicated region fallthrough
CT: control target
= control target key end

     0   :  { %14 = vsyncpa [#allocation4], 0  ;;  %s9824_s0 = inlined_call_operand.vmem [shape: f32[1,3,32,128], index: 0, kind: input, shape index: {}]   ;;  %s9825_s1 = inlined_call_operand.vmem [shape: f32[27], index: 1, kind: input, shape index: {}]   ;;  %s9826_s2 = inlined_call_operand.vmem [shape: f32[3], index: 2, kind: input, shape index: {}]   ;;  %s9827_s3 = inlined_call_operand.vmem [shape: f32[81], index: 3, kind: input, shape index: {}]   ;;  %s9828_s4 = inlined_call_operand.vmem [shape: f32[3], index: 4, kind: input, shape index: {}]   ;;  %s9829_s5 = inlined_call_operand.vmem [shape: f32[81], index: 5, kind: input, shape index: {}]   ;;  %s9830_s6 = inlined_call_operand.vmem [shape: f32[3], index: 6, kind: input, shape index: {}]   ;;  %s9831_s7 = inlined_call_operand.vmem [shape: f32[81], index: 7, kind: input, shape index: {}]   ;;  %s9832_s8 = inlined_call_operand.vmem [shape: f32[3], index: 8, kind: input, shape index: {}]   ;;  %s9833_s9 = inlined_call_operand.vmem [shape: f32[1,3,3,32,128], index: 9, kind: output, shape index: {}]  }
   0x1   :  { %15 = vsyncpa [#allocation6], 0 }
   0x2   :  { %16 = vsyncpa [#allocation9], 0 }
   0x3   :  { %17 = vsyncpa [#allocation12], 0  ;;  %s37_s11 = sshll.u32 %s9826_s2, 4  ;;  %s38_s11 = int_to_ptr.vmem [resolvable:$true] %s37_s11 }
   0x4   :  { %18 = vsyncpa [#allocation15], 0  ;;  %s57_s14 = sshll.u32 %s9828_s4, 4  ;;  %s4120_s15 = scalar_lea.vmem %s38_s11, 16  ;;  %s58_s14 = int_to_ptr.vmem [resolvable:$true] %s57_s14 }
   0x5   :  { %p4121_p0 = scmp.ne.s32.totalorder %s38_s11, %s4120_s15  ;;  %p4125_p1 = scmp.lt.s32.totalorder %s38_s11, %s38_s11 }
   0x6   :  { %p4126_p2 = scmp.lt.s32.totalorder %s4120_s15, %s4120_s15 }
   0x8   :  { %p4127_p3 = por %p4126_p2, %p4125_p1 }
   0xa   :  { %p4128_p4 = pnand %p4127_p3, %p4121_p0 }
   0xc   :  { %4131 = shalt.err (!%p4128_p4)
}
   0xd   :  { %s4234_s16 = smov [#allocation5]   ;;  %s4132_s17 = scalar_lea.vmem %s58_s14, 16 }
   0xe   :  { %40 = dma.vmem_to_smem %s38_s11, 16, %s4234_s16, [#allocation6]  }
   0xf   :  { %p4133_p5 = scmp.ne.s32.totalorder %s58_s14, %s4132_s17  ;;  %p4137_p6 = scmp.lt.s32.totalorder %s58_s14, %s58_s14 }
  0x10   :  { %p4138_p7 = scmp.lt.s32.totalorder %s4132_s17, %s4132_s17 }
  0x12   :  { %p4139_p8 = por %p4138_p7, %p4137_p6 }
  0x14   :  { %p4140_p9 = pnand %p4139_p8, %p4133_p5 }
  0x16   :  { %4143 = shalt.err (!%p4140_p9)
}
  0x17   :  { %s4235_s2 = smov [#allocation8]   ;;  %s77_s19 = sshll.u32 %s9830_s6, 4  ;;  %s78_s19 = int_to_ptr.vmem [resolvable:$true] %s77_s19 }
  0x18   :  { %60 = dma.vmem_to_smem %s58_s14, 16, %s4235_s2, [#allocation9]  }
  0x19   :  { %s27_s22 = sshll.u32 %s9825_s1, 4  ;;  %s4144_s23 = scalar_lea.vmem %s78_s19, 16  ;;  %s28_s22 = int_to_ptr.vmem [resolvable:$true] %s27_s22 }
  0x1a   :  { %p4145_p10 = scmp.ne.s32.totalorder %s78_s19, %s4144_s23  ;;  %p4149_p11 = scmp.lt.s32.totalorder %s78_s19, %s78_s19 }
  0x1b   :  { %p4150_p12 = scmp.lt.s32.totalorder %s4144_s23, %s4144_s23 }
  0x1d   :  { %p4151_p13 = por %p4150_p12, %p4149_p11 }
  0x1f   :  { %p4152_p0 = pnand %p4151_p13, %p4145_p10 }
  0x21   :  { %4155 = shalt.err (!%p4152_p0)
}
  0x22   :  { %s4236_s24 = smov [#allocation11]   ;;  %s4156_s25 = scalar_lea.vmem %s28_s22, 16 }
  0x23   :  { %80 = dma.vmem_to_smem %s78_s19, 16, %s4236_s24, [#allocation12]  }
  0x24   :  { %p4157_p1 = scmp.ne.s32.totalorder %s28_s22, %s4156_s25  ;;  %p4161_p2 = scmp.lt.s32.totalorder %s28_s22, %s28_s22 }
  0x25   :  { %p4162_p3 = scmp.lt.s32.totalorder %s4156_s25, %s4156_s25 }
  0x27   :  { %p4163_p4 = por %p4162_p3, %p4161_p2 }
  0x29   :  { %p4164_p5 = pnand %p4163_p4, %p4157_p1 }
  0x2b   :  { %4167 = shalt.err (!%p4164_p5)
}
  0x2c   :  { %s4237_s6 = smov [#allocation3]   ;;  %s47_s27 = sshll.u32 %s9827_s3, 4  ;;  %s48_s27 = int_to_ptr.vmem [resolvable:$true] %s47_s27 }
  0x2d   :  { %30 = dma.vmem_to_smem %s28_s22, 16, %s4237_s6, [#allocation4]  }
  0x2e   :  { %s67_s30 = sshll.u32 %s9829_s5, 4  ;;  %s4168_s10 = scalar_lea.vmem %s48_s27, 16  ;;  %s68_s30 = int_to_ptr.vmem [resolvable:$true] %s67_s30 }
  0x2f   :  { %p4169_p6 = scmp.ne.s32.totalorder %s48_s27, %s4168_s10  ;;  %p4173_p7 = scmp.lt.s32.totalorder %s48_s27, %s48_s27 }
  0x30   :  { %p4174_p8 = scmp.lt.s32.totalorder %s4168_s10, %s4168_s10 }
  0x32   :  { %p4175_p9 = por %p4174_p8, %p4173_p7 }
  0x34   :  { %p4176_p10 = pnand %p4175_p9, %p4169_p6 }
  0x36   :  { %4179 = shalt.err (!%p4176_p10)
}
  0x37   :  { %s4238_s11 = smov [#allocation7]   ;;  %s4180_s12 = scalar_lea.vmem %s68_s30, 16 }
  0x38   :  { %50 = dma.vmem_to_smem %s48_s27, 16, %s4238_s11, [#allocation6]  }
  0x39   :  { %p4181_p11 = scmp.ne.s32.totalorder %s68_s30, %s4180_s12  ;;  %p4185_p12 = scmp.lt.s32.totalorder %s68_s30, %s68_s30 }
  0x3a   :  { %p4186_p13 = scmp.lt.s32.totalorder %s4180_s12, %s4180_s12 }
  0x3c   :  { %p4187_p0 = por %p4186_p13, %p4185_p12 }
  0x3e   :  { %p4188_p1 = pnand %p4187_p0, %p4181_p11 }
  0x40   :  { %4191 = shalt.err (!%p4188_p1)
}
  0x41   :  { %s4239_s3 = smov [#allocation10]   ;;  %s87_s14 = sshll.u32 %s9831_s7, 4  ;;  %s88_s14 = int_to_ptr.vmem [resolvable:$true] %s87_s14 }
  0x42   :  { %70 = dma.vmem_to_smem %s68_s30, 16, %s4239_s3, [#allocation9]  }
  0x43   :  { %s97_s17 = sshll.u32 %s9832_s8, 4  ;;  %s4192_s2 = scalar_lea.vmem %s88_s14, 16  ;;  %s98_s17 = int_to_ptr.vmem [resolvable:$true] %s97_s17 }
  0x44   :  { %p4193_p2 = scmp.ne.s32.totalorder %s88_s14, %s4192_s2  ;;  %p4197_p3 = scmp.lt.s32.totalorder %s88_s14, %s88_s14 }
  0x45   :  { %p4198_p4 = scmp.lt.s32.totalorder %s4192_s2, %s4192_s2 }
  0x47   :  { %p4199_p5 = por %p4198_p4, %p4197_p3 }
  0x49   :  { %p4200_p6 = pnand %p4199_p5, %p4193_p2 }
  0x4b   :  { %4203 = shalt.err (!%p4200_p6)
}
  0x4c   :  { %s4240_s4 = smov [#allocation13]   ;;  %s4204_s18 = scalar_lea.vmem %s98_s17, 16 }
  0x4d   :  { %90 = dma.vmem_to_smem %s88_s14, 16, %s4240_s4, [#allocation12]  }
  0x4e   :  { %p4205_p7 = scmp.ne.s32.totalorder %s98_s17, %s4204_s18  ;;  %p4209_p8 = scmp.lt.s32.totalorder %s98_s17, %s98_s17 }
  0x4f   :  { %p4210_p9 = scmp.lt.s32.totalorder %s4204_s18, %s4204_s18 }
  0x51   :  { %p4211_p10 = por %p4210_p9, %p4209_p8 }
  0x53   :  { %p4212_p11 = pnand %p4211_p10, %p4205_p7 }
  0x55   :  { %4215 = shalt.err (!%p4212_p11)
}
  0x56   :  { %s4241_s7 = smov [#allocation14]  }
  0x57   :  { %100 = dma.vmem_to_smem %s98_s17, 16, %s4241_s7, [#allocation15]  }
  0x58   :  { %4220 = dma.done.wait [#allocation4], 16  }
  0x59   :  { %4221 = vsyncadd [#allocation4], 4294967280 }
  0x5a   :  { %4222 = dma.done.wait [#allocation6], 32  }
  0x5b   :  { %4223 = vsyncadd [#allocation6], 4294967264 }
  0x5c   :  { %4224 = dma.done.wait [#allocation9], 32  }
  0x5d   :  { %4225 = vsyncadd [#allocation9], 4294967264 }
  0x5e   :  { %4226 = dma.done.wait [#allocation12], 32  }
  0x5f   :  { %4227 = vsyncadd [#allocation12], 4294967264 }
  0x60   :  { %4228 = dma.done.wait [#allocation15], 16  }
  0x61   :  { %4229 = vsyncadd [#allocation15], 4294967280 }
  0x62   :  { %125 = sfence }
  0x63   :  { %v126_v0 = vlaneseq  ;;  %v10004_v5 = vmov 0  ;;  %v10007_v6 = vmov 0  ;;  %v10010_v7 = vmov 0  ;;  %s4347_s8 = smov 0  }
  0x64   :  { %v10013_v8 = vmov 0  ;;  %v10016_v9 = vmov 0  ;;  %v10019_v10 = vmov 0 }
  0x65   :  { %v4318_v1 = vshrl.u32 %v126_v0, 7  ;;  %v132_v2 = vand.u32 127, %v126_v0 }
  0x67   :  { %10003 = vst [vmem:[#allocation21_spill] sm:$0xff] %v4318_v1  ;;  %v130_v3 = vadd.s32 24, %v4318_v1  ;;  %v133_v4 = vand.u32 31, %v132_v2  ;;  %vm134_vm0 = vcmp.ge.s32.totalorder %v4318_v1, 2  ;;  %vm156_vm7 = vcmp.ge.s32.totalorder %v4318_v1, 3 }
  0x69   :  { %vm141_vm1 = vcmp.lt.s32.totalorder %v130_v3, 30  ;;  %vm146_vm2 = vcmp.ge.s32.totalorder %v133_v4, 2  ;;  %vm151_vm3 = vcmp.lt.s32.totalorder %v133_v4, 30  ;;  %vm168_vm8 = vcmp.ge.s32.totalorder %v133_v4, 3 }
  0x6a   :  { %vm147_vm4 = vmand %vm134_vm0, %vm146_vm2  ;;  %vm163_vm10 = vcmp.lt.s32.totalorder %v130_v3, 29  ;;  %vm173_vm12 = vcmp.lt.s32.totalorder %v133_v4, 29 }
  0x6b   :  { %vm150_vm5 = vmand %vm141_vm1, %vm146_vm2 }
  0x6c   :  { %vm4322_vm6 = vmand %vm147_vm4, %vm151_vm3 }
  0x6d   :  { %v10005_v5 = vsel %vm4322_vm6, 4294967295, %v10004_v5  ;;  %vm4327_vm9 = vmand %vm146_vm2, %vm151_vm3 }
  0x6e   :  { %10006 = vst [vmem:[#allocation22_spill] sm:$0xff] %v10005_v5  ;;  %v10008_v6 = vsel %vm4327_vm9, 4294967295, %v10007_v6  ;;  %vm4331_vm11 = vmand %vm150_vm5, %vm151_vm3 }
  0x6f   :  { %10009 = vst [vmem:[#allocation23_spill] sm:$0xff] %v10008_v6  ;;  %v10011_v7 = vsel %vm4331_vm11, 4294967295, %v10010_v7  ;;  %vm169_vm13 = vmand %vm156_vm7, %vm168_vm8 }
  0x70   :  { %10012 = vst [vmem:[#allocation24_spill] sm:$0xff] %v10011_v7  ;;  %vm172_vm14 = vmand %vm163_vm10, %vm168_vm8 }
  0x71   :  { %vm4335_vm15 = vmand %vm169_vm13, %vm173_vm12 }
  0x72   :  { %v10014_v8 = vsel %vm4335_vm15, 4294967295, %v10013_v8  ;;  %vm4339_vm0 = vmand %vm168_vm8, %vm173_vm12 }
  0x73   :  { %10015 = vst [vmem:[#allocation25_spill] sm:$0xff] %v10014_v8  ;;  %v10017_v9 = vsel %vm4339_vm0, 4294967295, %v10016_v9  ;;  %vm4343_vm1 = vmand %vm172_vm14, %vm173_vm12 }
  0x74   :  { %10018 = vst [vmem:[#allocation26_spill] sm:$0xff] %v10017_v9  ;;  %v10020_v10 = vsel %vm4343_vm1, 4294967295, %v10019_v10 }
  0x75   :  { %10021 = vst [vmem:[#allocation27_spill] sm:$0xff] %v10020_v10 }
  0x76 LB: > { %v10022_v1 = vld [vmem:[#allocation21_spill] sm:$0xff]  ;;  %s3817_s19 = sshll.u32 %s4232_s8, 5  ;;  %s4242_s23 = smov 1   ;;  %s4232_s8 = sphi %s4347_s8, %s183_s8  }
  0x77   : > { %s185_s22 = scalar_lea.vmem %s9824_s0, %s3817_s19  ;;  %vm200_vm2 = vcmp.lt.s32.totalorder %v10022_v1, 1  ;;  %s4243_s24 = smov 127   ;;  %vm421_vm3 = vcmp.lt.s32.totalorder %v10022_v1, 7 }
  0x78   : > { %v4358_v11 = vld [vmem:[%s185_s22 + $0x8] sm:$0xff]  ;;  %v4360_v12 = vld [vmem:[%s185_s22 + $0x10] sm:$0xff]  ;;  %v4363_v13 = vld [vmem:[%s185_s22] sm:$0xff]  ;;  %s190_s25 = sld [smem:[#allocation5]]  ;;  %s3818_s6 = sld [smem:[#allocation5 + $0x1]] }
  0x79   : > { %v197_v14 = vrot.slane %v4358_v11, 7  ;;  %v198_v15 = vrot.slane %v4360_v12, 7  ;;  %v4367_v16 = vld [vmem:[%s185_s22 + $0x18] sm:$0xff]  ;;  %v196_v17 = vrot.slane %v4363_v13, 7  ;;  %v418_v23 = vrot.slane %v4358_v11, 1  ;;  %s3819_s1 = sld [smem:[#allocation5 + $0x2]] }
  0x7a   : > { %v199_v18 = vrot.slane %v4367_v16, 7  ;;  %v419_v24 = vrot.slane %v4360_v12, 1  ;;  %v417_v25 = vrot.slane %v4363_v13, 1  ;;  %v420_v27 = vrot.slane %v4367_v16, 1  ;;  %s3822_s26 = sld [smem:[#allocation3 + $0x1]]  ;;  %s213_s27 = sld [smem:[#allocation3]] }
  0x7b   : > { %v4373_v19 = vsel %vm200_vm2, %v197_v14, %v198_v15  ;;  %v4389_v22 = vsel %vm200_vm2, %v196_v17, %v197_v14  ;;  %s3820_s28 = sld [smem:[#allocation3 + $0x9]]  ;;  %s3823_s29 = sld [smem:[#allocation3 + $0xa]] }
  0x7c   : > { %209 = vrot.lane.b32.xlu1 %v4373_v19, %s4242_s23  ;;  %v4379_v20 = vsel %vm200_vm2, %v199_v18, %v196_v17  ;;  %v4385_v21 = vsel %vm200_vm2, %v198_v15, %v199_v18  ;;  %v4425_v26 = vsel %vm421_vm3, %v418_v23, %v419_v24  ;;  %v4430_v28 = vsel %vm421_vm3, %v417_v25, %v418_v23  ;;  %s3824_s30 = sld [smem:[#allocation3 + $0x13]]  ;;  %s3821_s10 = sld [smem:[#allocation3 + $0x12]] }
  0x7d   : > { %205 = vrot.lane.b32.xlu0 %v4379_v20, %s4242_s23  ;;  %v4438_v29 = vsel %vm421_vm3, %v420_v27, %v417_v25  ;;  %v4442_v30 = vsel %vm421_vm3, %v419_v24, %v420_v27  ;;  %s3825_s11 = sld [smem:[#allocation3 + $0x2]]  ;;  %s3826_s12 = sld [smem:[#allocation3 + $0xb]] }
  0x7e   : > { %10023 = vst [vmem:[#allocation28_spill] sm:$0xff] %v4438_v29  ;;  %10024 = vst [vmem:[#allocation29_spill] sm:$0xff] %v4442_v30  ;;  %s3827_s3 = sld [smem:[#allocation3 + $0x14]]  ;;  %s3832_s13 = sld [smem:[#allocation3 + $0xd]]  ;;  %v4464_v32 = vstv %s190_s25  ;;  %v4466_v33 = vstv %s3818_s6 }
  0x7f   : > { %s3831_s5 = sld [smem:[#allocation3 + $0x4]]  ;;  %s4456_s14 = sld [smem:[#allocation3 + $0x16]]  ;;  %v4468_v34 = vstv %s3819_s1 }
  0x80   : > { %211 = vrot.lane.b32.xlu1 %v4385_v21, %s4242_s23  ;;  %s4458_s15 = sld [smem:[#allocation3 + $0x3]]  ;;  %v244_v31 = vstv %s3822_s26  ;;  %s4460_s16 = sld [smem:[#allocation3 + $0xc]]  ;;  %v4470_v35 = vstv %s213_s27 }
  0x81   : > { %207 = vrot.lane.b32.xlu0 %v4389_v22, %s4242_s23  ;;  %s4462_s17 = sld [smem:[#allocation3 + $0x15]]  ;;  %v4472_v36 = vstv %s3820_s28  ;;  %v254_v37 = vstv %s3823_s29  ;;  %s4476_s4 = sld [smem:[#allocation3 + $0xe]]  ;;  %v4483_v41 = vmul.f32 %v244_v31, %v4389_v22  ;;  %v4486_v42 = vmul.f32 %v244_v31, %v4379_v20 }
  0x82   : > { %v264_v38 = vstv %s3824_s30  ;;  %s4474_s2 = sld [smem:[#allocation3 + $0x5]]  ;;  %v4478_v39 = vstv %s3821_s10  ;;  %s4488_s18 = sld [smem:[#allocation3 + $0x17]]  ;;  %v4497_v45 = vmul.f32 %v254_v37, %v4389_v22  ;;  %v4507_v47 = vmul.f32 %v254_v37, %v4379_v20 }
  0x83   : > { %v4480_v40 = vstv %s3825_s11  ;;  %s4490_s7 = sld [smem:[#allocation3 + $0x7]]  ;;  %v4492_v43 = vstv %s3826_s12  ;;  %v4500_v46 = vmul.f32 %v264_v38, %v4389_v22  ;;  %s4502_s20 = sld [smem:[#allocation3 + $0x6]]  ;;  %v4510_v48 = vmul.f32 %v264_v38, %v4379_v20 }
  0x84   : > { %275 = vrot.lane.b32.xlu1 %v4389_v22, %s4243_s24  ;;  %v4494_v44 = vstv %s3827_s3  ;;  %s4504_s21 = sld [smem:[#allocation3 + $0xf]]  ;;  %v360_v50 = vstv %s3832_s13  ;;  %v4513_v51 = vmul.f32 %v244_v31, %v4385_v21  ;;  %v4516_v52 = vmul.f32 %v254_v37, %v4385_v21  ;;  %s4522_s22 = sld [smem:[#allocation3 + $0x18]] }
  0x85   : > { %273 = vrot.lane.b32.xlu0 %v4379_v20, %s4243_s24  ;;  %v350_v49 = vstv %s3831_s5  ;;  %v4519_v53 = vmul.f32 %v264_v38, %v4385_v21  ;;  %v370_v54 = vstv %s4456_s14  ;;  %s4524_s25 = sld [smem:[#allocation3 + $0x10]]  ;;  %v4527_v55 = vmul.f32 %v244_v31, %v4373_v19  ;;  %s4538_s6 = sld [smem:[#allocation3 + $0x19]] }
  0x86   : > { %v4530_v56 = vmul.f32 %v254_v37, %v4373_v19  ;;  %v4533_v57 = vmul.f32 %v264_v38, %v4373_v19  ;;  %v4536_v58 = vstv %s4458_s15  ;;  %v4541_v59 = vstv %s4460_s16  ;;  %s4671_s1 = sld [smem:[#allocation3 + $0x8]]  ;;  %s4741_s26 = sld [smem:[#allocation3 + $0x11]] }
  0x87   : > { %v4544_v60 = vstv %s4462_s17  ;;  %v4547_v61 = vmul.f32 %v350_v49, %v4358_v11  ;;  %v4550_v62 = vmul.f32 %v360_v50, %v4358_v11  ;;  %v4553_v63 = vmul.f32 %v370_v54, %v4358_v11  ;;  %s3845_s27 = sld [smem:[#allocation3 + $0x1a]]  ;;  %s4939_s28 = sld [smem:[#allocation7 + $0x4]] }
  0x88   : > { %279 = vrot.lane.b32.xlu1 %v4385_v21, %s4243_s24  ;;  %v4556_v0 = vmul.f32 %v350_v49, %v4363_v13  ;;  %v4559_v2 = vmul.f32 %v360_v50, %v4363_v13  ;;  %v4562_v3 = vmul.f32 %v370_v54, %v4363_v13  ;;  %v4565_v14 = vstv %s4474_s2  ;;  %s4945_s29 = sld [smem:[#allocation7 + $0x1]]  ;;  %s4947_s30 = sld [smem:[#allocation7 + $0x1c]] }
  0x89   : > { %277 = vrot.lane.b32.xlu0 %v4373_v19, %s4243_s24  ;;  %v4568_v15 = vstv %s4476_s4  ;;  %v4571_v17 = vmul.f32 %v350_v49, %v4367_v16  ;;  %v4577_v19 = vstv %s4488_s18  ;;  %v4580_v20 = vmul.f32 %v370_v54, %v4367_v16  ;;  %s4949_s10 = sld [smem:[#allocation7 + $0x37]]  ;;  %s4955_s12 = sld [smem:[#allocation7 + $0x3a]] }
  0x8a   : > { %v4586_v21 = vstv %s4490_s7  ;;  %v4589_v22 = vmul.f32 %v360_v50, %v4360_v12  ;;  %v4592_v23 = vmul.f32 %v370_v54, %v4360_v12  ;;  %v4595_v24 = vstv %s4502_s20  ;;  %s4951_s11 = sld [smem:[#allocation7 + $0x1f]]  ;;  %s4961_s5 = sld [smem:[#allocation7 + $0x22]] }
  0x8b   : > { %10027 = vst [vmem:[#allocation32_spill] sm:$0xff] %v4595_v24  ;;  %v4598_v25 = vstv %s4504_s21  ;;  %v4613_v54 = vstv %s4524_s25  ;;  %v4619_v7 = vstv %s4538_s6  ;;  %s4957_s3 = sld [smem:[#allocation7 + $0x7]]  ;;  %s4963_s13 = sld [smem:[#allocation7 + $0x3d]] }
  0x8c   : > { %313 = vrot.lane.b32.xlu1 %v4358_v11, %s4242_s23  ;;  %10025 = vst [vmem:[#allocation30_spill] sm:$0xff] %v4589_v22  ;;  %10026 = vst [vmem:[#allocation31_spill] sm:$0xff] %v4592_v23  ;;  %s4969_s14 = sld [smem:[#allocation7 + $0xa]]  ;;  %s4971_s15 = sld [smem:[#allocation7 + $0xd]] }
  0x8d   : > { %311 = vrot.lane.b32.xlu0 %v4363_v13, %s4242_s23  ;;  %10028 = vst [vmem:[#allocation33_spill] sm:$0xff] %v4598_v25  ;;  %s4975_s16 = sld [smem:[#allocation7 + $0x25]]  ;;  %s4977_s17 = sld [smem:[#allocation7 + $0x40]] }
  0x8e   : > { %s4981_s2 = sld [smem:[#allocation7 + $0x28]]  ;;  %s4983_s4 = sld [smem:[#allocation7 + $0x43]] }
  0x8f   : > { %s4992_s18 = sld [smem:[#allocation7 + $0x10]]  ;;  %s4994_s7 = sld [smem:[#allocation7 + $0x16]] }
  0x90   : > { %317 = vrot.lane.b32.xlu1 %v4367_v16, %s4242_s23  ;;  %s5000_s20 = sld [smem:[#allocation7 + $0x2b]]  ;;  %s5002_s21 = sld [smem:[#allocation7 + $0x46]] }
  0x91   : > { %315 = vrot.lane.b32.xlu0 %v4360_v12, %s4242_s23  ;;  %s5010_s25 = sld [smem:[#allocation7 + $0x2e]]  ;;  %s5018_s6 = sld [smem:[#allocation7 + $0x49]] }
  0x92   : > { %s183_s8 = sadd.s32 1, %s4232_s8  }
  0x93   : > { %p180_p12 = scmp.ge.s32.totalorder %s183_s8, 3  }
  0x94   : > { %381 = vrot.lane.b32.xlu1 %v4358_v11, %s4243_s24  ;;  %v4574_v11 = vmul.f32 %v360_v50, %v4367_v16  ;;  %v4606_v50 = vstv %s4522_s22  ;;  %s5008_s22 = sld [smem:[#allocation7 + $0x13]] }
  0x95   : > { %379 = vrot.lane.b32.xlu0 %v4363_v13, %s4243_s24  ;;  %v4583_v13 = vmul.f32 %v350_v49, %v4360_v12  ;;  %10029 = vst [vmem:[#allocation34_spill] sm:$0xff] %v4606_v50 }
  0x98   : > { %385 = vrot.lane.b32.xlu1 %v4367_v16, %s4243_s24 }
  0x99   : > { %383 = vrot.lane.b32.xlu0 %v4360_v12, %s4243_s24  ;;  %v4610_v12 = vmul.f32 %v4586_v21, %v4425_v26 }
  0x9b   : > { %10030 = vst [vmem:[#allocation35_spill] sm:$0xff] %v4610_v12 }
  0x9c   : > { %428 = vrot.lane.b32.xlu1 %v4425_v26, %s4242_s23 }
  0x9d   : > { %426 = vrot.lane.b32.xlu0 %v4430_v28, %s4242_s23 }
  0xa0   : > { %432 = vrot.lane.b32.xlu1 %v4438_v29, %s4242_s23 }
  0xa1   : > { %430 = vrot.lane.b32.xlu0 %v4442_v30, %s4242_s23 }
  0xa4   : > { %496 = vrot.lane.b32.xlu1 %v4425_v26, %s4243_s24 }
  0xa5   : > { %494 = vrot.lane.b32.xlu0 %v4430_v28, %s4243_s24 }
  0xa8   : > { %500 = vrot.lane.b32.xlu1 %v4438_v29, %s4243_s24 }
  0xa9   : > { %498 = vrot.lane.b32.xlu0 %v4442_v30, %s4243_s24 }
  0xee   : > { %v210_v4 = vpop.permute.xlu1 %209 }
  0xef   : > { %v206_v18 = vpop.permute.xlu0 %205  ;;  %v217_v27 = vmul.f32 %v4470_v35, %v210_v4  ;;  %v227_v16 = vmul.f32 %v4472_v36, %v210_v4 }
  0xf0   : > { %v215_v31 = vmul.f32 %v4470_v35, %v206_v18  ;;  %v225_v37 = vmul.f32 %v4472_v36, %v206_v18  ;;  %v235_v38 = vmul.f32 %v4478_v39, %v206_v18  ;;  %v237_v18 = vmul.f32 %v4478_v39, %v210_v4 }
  0xf1   : > { %v221_v12 = vadd.f32 %v217_v27, %v4464_v32  ;;  %v231_v50 = vadd.f32 %v227_v16, %v4466_v33 }
  0xf2   : > { %v212_v49 = vpop.permute.xlu1 %211  ;;  %v219_v25 = vadd.f32 %v215_v31, %v4464_v32  ;;  %v229_v24 = vadd.f32 %v225_v37, %v4466_v33 }
  0xf3   : > { %v218_v10 = vmul.f32 %v4470_v35, %v212_v49  ;;  %v228_v9 = vmul.f32 %v4472_v36, %v212_v49  ;;  %v238_v8 = vmul.f32 %v4478_v39, %v212_v49  ;;  %v208_v1 = vpop.permute.xlu0 %207  ;;  %v239_v49 = vadd.f32 %v235_v38, %v4468_v34 }
  0xf4   : > { %v216_v5 = vmul.f32 %v4470_v35, %v208_v1  ;;  %v226_v6 = vmul.f32 %v4472_v36, %v208_v1  ;;  %v236_v30 = vmul.f32 %v4478_v39, %v208_v1 }
  0xf5   : > { %v222_v36 = vadd.f32 %v218_v10, %v4464_v32  ;;  %v232_v1 = vadd.f32 %v228_v9, %v4466_v33  ;;  %v242_v39 = vadd.f32 %v238_v8, %v4468_v34  ;;  %v241_v8 = vadd.f32 %v237_v18, %v4468_v34 }
  0xf6   : > { %v220_v29 = vadd.f32 %v216_v5, %v4464_v32  ;;  %v230_v4 = vadd.f32 %v226_v6, %v4466_v33  ;;  %v240_v35 = vadd.f32 %v236_v30, %v4468_v34  ;;  %v276_v23 = vpop.permute.xlu1 %275  ;;  %v249_v32 = vadd.f32 %v4486_v42, %v219_v25 }
  0xf7   : > { %v284_v27 = vmul.f32 %v4480_v40, %v276_v23  ;;  %v274_v16 = vpop.permute.xlu0 %273  ;;  %v294_v5 = vmul.f32 %v4492_v43, %v276_v23  ;;  %v304_v6 = vmul.f32 %v4494_v44, %v276_v23  ;;  %v252_v23 = vadd.f32 %v4513_v51, %v222_v36 }
  0xf8   : > { %v250_v31 = vadd.f32 %v4483_v41, %v220_v29  ;;  %v260_v37 = vadd.f32 %v4497_v45, %v230_v4  ;;  %v270_v30 = vadd.f32 %v4500_v46, %v240_v35  ;;  %v283_v38 = vmul.f32 %v4480_v40, %v274_v16 }
  0xf9   : > { %v293_v10 = vmul.f32 %v4492_v43, %v274_v16  ;;  %v303_v9 = vmul.f32 %v4494_v44, %v274_v16  ;;  %v259_v29 = vadd.f32 %v4507_v47, %v229_v24  ;;  %v251_v41 = vadd.f32 %v4527_v55, %v221_v12 }
  0xfa   : > { %v280_v33 = vpop.permute.xlu1 %279  ;;  %v269_v45 = vadd.f32 %v4510_v48, %v239_v49  ;;  %v288_v22 = vadd.f32 %v284_v27, %v250_v31  ;;  %v298_v16 = vadd.f32 %v294_v5, %v260_v37  ;;  %v262_v34 = vadd.f32 %v4516_v52, %v232_v1 }
  0xfb   : > { %v286_v46 = vmul.f32 %v4480_v40, %v280_v33  ;;  %v296_v4 = vmul.f32 %v4492_v43, %v280_v33  ;;  %v278_v35 = vpop.permute.xlu0 %277  ;;  %v272_v42 = vadd.f32 %v4519_v53, %v242_v39  ;;  %v308_v25 = vadd.f32 %v304_v6, %v270_v30 }
  0xfc   : > { %v287_v47 = vadd.f32 %v283_v38, %v249_v32  ;;  %v297_v24 = vadd.f32 %v293_v10, %v259_v29  ;;  %v307_v18 = vadd.f32 %v303_v9, %v269_v45  ;;  %v306_v55 = vmul.f32 %v4494_v44, %v280_v33 }
  0xfd   : > { %v261_v48 = vadd.f32 %v4530_v56, %v231_v50  ;;  %v271_v51 = vadd.f32 %v4533_v57, %v241_v8  ;;  %v285_v12 = vmul.f32 %v4480_v40, %v278_v35  ;;  %v290_v36 = vadd.f32 %v286_v46, %v252_v23 }
  0xfe   : > { %v314_v49 = vpop.permute.xlu1 %313  ;;  %v300_v27 = vadd.f32 %v296_v4, %v262_v34  ;;  %v295_v57 = vmul.f32 %v4492_v43, %v278_v35  ;;  %v305_v40 = vmul.f32 %v4494_v44, %v278_v35  ;;  %v310_v46 = vadd.f32 %v306_v55, %v272_v42 }
  0xff   : > { %v322_v31 = vmul.f32 %v4536_v58, %v314_v49  ;;  %v332_v52 = vmul.f32 %v4541_v59, %v314_v49  ;;  %v312_v53 = vpop.permute.xlu0 %311  ;;  %v342_v1 = vmul.f32 %v4544_v60, %v314_v49  ;;  %v289_v4 = vadd.f32 %v285_v12, %v251_v41 }
 0x100   : > { %v321_v39 = vmul.f32 %v4536_v58, %v312_v53  ;;  %v331_v37 = vmul.f32 %v4541_v59, %v312_v53  ;;  %v341_v56 = vmul.f32 %v4544_v60, %v312_v53  ;;  %v299_v34 = vadd.f32 %v295_v57, %v261_v48 }
 0x101   : > { %v326_v50 = vadd.f32 %v322_v31, %v288_v22  ;;  %v336_v5 = vadd.f32 %v332_v52, %v298_v16  ;;  %v346_v6 = vadd.f32 %v342_v1, %v308_v25  ;;  %v309_v25 = vadd.f32 %v305_v40, %v271_v51  ;;  %v10033_v40 = vld [vmem:[#allocation28_spill] sm:$0xff] }
 0x102   : > { %v325_v30 = vadd.f32 %v321_v39, %v287_v47  ;;  %v335_v38 = vadd.f32 %v331_v37, %v297_v24  ;;  %v345_v10 = vadd.f32 %v341_v56, %v307_v18  ;;  %v318_v9 = vpop.permute.xlu1 %317  ;;  %v4693_v48 = vmul.f32 %v4613_v54, %v4430_v28  ;;  %v10031_v39 = vld [vmem:[#allocation30_spill] sm:$0xff]  ;;  %v10032_v56 = vld [vmem:[#allocation31_spill] sm:$0xff] }
 0x103   : > { %v324_v8 = vmul.f32 %v4536_v58, %v318_v9  ;;  %v334_v32 = vmul.f32 %v4541_v59, %v318_v9  ;;  %v344_v29 = vmul.f32 %v4544_v60, %v318_v9  ;;  %v316_v33 = vpop.permute.xlu0 %315  ;;  %v356_v45 = vadd.f32 %v4547_v61, %v326_v50 }
 0x104   : > { %v323_v43 = vmul.f32 %v4536_v58, %v316_v33  ;;  %v333_v44 = vmul.f32 %v4541_v59, %v316_v33  ;;  %v343_v22 = vmul.f32 %v4544_v60, %v316_v33  ;;  %v366_v23 = vadd.f32 %v4550_v62, %v336_v5 }
 0x105   : > { %v328_v35 = vadd.f32 %v324_v8, %v290_v36  ;;  %v376_v16 = vadd.f32 %v4553_v63, %v346_v6  ;;  %v338_v47 = vadd.f32 %v334_v32, %v300_v27  ;;  %v355_v61 = vadd.f32 %v4556_v0, %v325_v30  ;;  %v10034_v8 = vld [vmem:[#allocation32_spill] sm:$0xff] }
 0x106   : > { %v382_v24 = vpop.permute.xlu1 %381  ;;  %v348_v18 = vadd.f32 %v344_v29, %v310_v46  ;;  %v365_v58 = vadd.f32 %v4559_v2, %v335_v38  ;;  %v477_v59 = vmul.f32 %v4613_v54, %v4425_v26  ;;  %v4684_v60 = vmul.f32 %v4586_v21, %v4430_v28  ;;  %v10035_v29 = vld [vmem:[#allocation33_spill] sm:$0xff] }
 0x107   : > { %v380_v49 = vpop.permute.xlu0 %379  ;;  %v327_v62 = vadd.f32 %v323_v43, %v289_v4  ;;  %v337_v63 = vadd.f32 %v333_v44, %v299_v34  ;;  %v347_v41 = vadd.f32 %v343_v22, %v309_v25  ;;  %v375_v42 = vadd.f32 %v4562_v3, %v345_v10 }
 0x108   : > { %v390_v55 = vmul.f32 %v4565_v14, %v382_v24  ;;  %v358_v0 = vadd.f32 %v4571_v17, %v328_v35  ;;  %v487_v2 = vmul.f32 %v4619_v7, %v4425_v26  ;;  %v400_v51 = vmul.f32 %v4568_v15, %v382_v24 }
 0x109   : > { %v410_v12 = vmul.f32 %v4577_v19, %v382_v24  ;;  %v389_v36 = vmul.f32 %v4565_v14, %v380_v49  ;;  %v368_v27 = vadd.f32 %v4574_v11, %v338_v47  ;;  %v399_v31 = vmul.f32 %v4568_v15, %v380_v49 }
 0x10a   : > { %v386_v3 = vpop.permute.xlu1 %385  ;;  %v378_v17 = vadd.f32 %v4580_v20, %v348_v18  ;;  %v4702_v53 = vstv %s4671_s1  ;;  %v486_v26 = vmul.f32 %v4619_v7, %v4430_v28  ;;  %v357_v1 = vadd.f32 %v4583_v13, %v327_v62  ;;  %s5020_s1 = sld [smem:[#allocation7 + $0x31]] }
 0x10b   : > { %v384_v52 = vpop.permute.xlu0 %383  ;;  %v367_v37 = vadd.f32 %v10031_v39, %v337_v63  ;;  %v377_v57 = vadd.f32 %v10032_v56, %v347_v41  ;;  %v469_v11 = vmul.f32 %v4586_v21, %v10033_v40  ;;  %v394_v50 = vadd.f32 %v390_v55, %v356_v45  ;;  %v10036_v45 = vld [vmem:[#allocation34_spill] sm:$0xff]  ;;  %v10037_v55 = vld [vmem:[#allocation35_spill] sm:$0xff] }
 0x10c   : > { %v409_v5 = vmul.f32 %v4577_v19, %v380_v49  ;;  %v479_v20 = vmul.f32 %v4613_v54, %v10033_v40  ;;  %v4716_v6 = vmul.f32 %v4619_v7, %v10033_v40  ;;  %v404_v28 = vadd.f32 %v400_v51, %v366_v23 }
 0x10d   : > { %v414_v30 = vadd.f32 %v410_v12, %v376_v16  ;;  %v393_v13 = vadd.f32 %v389_v36, %v355_v61  ;;  %v392_v38 = vmul.f32 %v4565_v14, %v386_v3  ;;  %v403_v9 = vadd.f32 %v399_v31, %v365_v58 }
 0x10e   : > { %v429_v10 = vpop.permute.xlu1 %428  ;;  %v402_v22 = vmul.f32 %v4568_v15, %v386_v3  ;;  %v412_v35 = vmul.f32 %v4577_v19, %v386_v3  ;;  %v413_v47 = vadd.f32 %v409_v5, %v375_v42  ;;  %v391_v36 = vmul.f32 %v4565_v14, %v384_v52 }
 0x10f   : > { %v437_v32 = vmul.f32 %v10034_v8, %v429_v10  ;;  %v447_v33 = vmul.f32 %v10035_v29, %v429_v10  ;;  %v457_v43 = vmul.f32 %v10036_v45, %v429_v10  ;;  %v427_v44 = vpop.permute.xlu0 %426  ;;  %v396_v24 = vadd.f32 %v392_v38, %v358_v0 }
 0x110   : > { %v436_v46 = vmul.f32 %v10034_v8, %v427_v44  ;;  %v446_v4 = vmul.f32 %v10035_v29, %v427_v44  ;;  %v456_v23 = vmul.f32 %v10036_v45, %v427_v44  ;;  %v406_v12 = vadd.f32 %v402_v22, %v368_v27 }
 0x111   : > { %v441_v16 = vadd.f32 %v437_v32, %v394_v50  ;;  %v451_v34 = vadd.f32 %v447_v33, %v404_v28  ;;  %v461_v25 = vadd.f32 %v457_v43, %v414_v30  ;;  %v416_v39 = vadd.f32 %v412_v35, %v378_v17 }
 0x112   : > { %v440_v61 = vadd.f32 %v436_v46, %v393_v13  ;;  %v450_v18 = vadd.f32 %v446_v4, %v403_v9  ;;  %v433_v58 = vpop.permute.xlu1 %432  ;;  %v460_v3 = vadd.f32 %v456_v23, %v413_v47  ;;  %v401_v42 = vmul.f32 %v4568_v15, %v384_v52 }
 0x113   : > { %v439_v49 = vmul.f32 %v10034_v8, %v433_v58  ;;  %v449_v62 = vmul.f32 %v10035_v29, %v433_v58  ;;  %v459_v63 = vmul.f32 %v10036_v45, %v433_v58  ;;  %v431_v41 = vpop.permute.xlu0 %430  ;;  %v471_v51 = vadd.f32 %v10037_v55, %v441_v16 }
 0x114   : > { %v481_v31 = vadd.f32 %v477_v59, %v451_v34  ;;  %v4733_v56 = vadd.f32 %v487_v2, %v461_v25  ;;  %v411_v40 = vmul.f32 %v4577_v19, %v384_v52  ;;  %v438_v5 = vmul.f32 %v10034_v8, %v431_v41 }
 0x115   : > { %v443_v0 = vadd.f32 %v439_v49, %v396_v24  ;;  %v453_v50 = vadd.f32 %v449_v62, %v406_v12  ;;  %v470_v30 = vadd.f32 %v4684_v60, %v440_v61  ;;  %v463_v27 = vadd.f32 %v459_v63, %v416_v39  ;;  %v10038_v60 = vld [vmem:[#allocation29_spill] sm:$0xff] }
 0x116   : > { %v4737_v28 = vpop.permute.xlu1 %496  ;;  %v448_v14 = vmul.f32 %v10035_v29, %v431_v41  ;;  %v480_v59 = vadd.f32 %v4693_v48, %v450_v18  ;;  %v458_v19 = vmul.f32 %v10036_v45, %v431_v41  ;;  %v4749_v17 = vadd.f32 %v486_v26, %v460_v3 }
 0x117   : > { %v505_v15 = vmul.f32 %v4702_v53, %v4737_v28  ;;  %v4746_v2 = vpop.permute.xlu0 %494  ;;  %v468_v13 = vmul.f32 %v4586_v21, %v10038_v60  ;;  %v395_v38 = vadd.f32 %v391_v36, %v357_v1  ;;  %v405_v10 = vadd.f32 %v401_v42, %v367_v37 }
 0x118   : > { %v504_v52 = vmul.f32 %v4702_v53, %v4746_v2  ;;  %v473_v8 = vadd.f32 %v469_v11, %v443_v0  ;;  %v415_v32 = vadd.f32 %v411_v40, %v377_v57  ;;  %v483_v33 = vadd.f32 %v479_v20, %v453_v50 }
 0x119   : > { %v509_v9 = vadd.f32 %v505_v15, %v471_v51  ;;  %v478_v26 = vmul.f32 %v4613_v54, %v10038_v60  ;;  %v442_v45 = vadd.f32 %v438_v5, %v395_v38  ;;  %v452_v43 = vadd.f32 %v448_v14, %v405_v10 }
 0x11a   : > { %v508_v29 = vadd.f32 %v504_v52, %v470_v30  ;;  %v4755_v48 = vpop.permute.xlu1 %500  ;;  %v4760_v22 = vadd.f32 %v4716_v6, %v463_v27  ;;  %v462_v21 = vadd.f32 %v458_v19, %v415_v32  ;;  %v488_v57 = vmul.f32 %v4619_v7, %v10038_v60 }
 0x11b   : > { %v533_v44 = vmax.f32 %v509_v9, 0.0  ;;  %v507_v37 = vmul.f32 %v4702_v53, %v4755_v48  ;;  %v4770_v46 = vpop.permute.xlu0 %498  ;;  %v513_v23 = vstv %s4741_s26  ;;  %v472_v35 = vadd.f32 %v468_v13, %v442_v45  ;;  %s5033_s26 = sld [smem:[#allocation7 + $0x4c]] }
 0x11c   : > { %v532_v1 = vmax.f32 %v508_v29, 0.0  ;;  %v482_v16 = vadd.f32 %v478_v26, %v452_v43  ;;  %v4781_v34 = vadd.f32 %v488_v57, %v462_v21  ;;  %v506_v25 = vmul.f32 %v4702_v53, %v4770_v46 }
 0x11d   : > { %v4768_v20 = vsel %vm4327_vm9, %v533_v44, 0.0  ;;  %v511_v6 = vadd.f32 %v507_v37, %v473_v8  ;;  %v515_v47 = vmul.f32 %v513_v23, %v4737_v28  ;;  %v514_v62 = vmul.f32 %v513_v23, %v4746_v2 }
 0x11e   : > { %10040 = vst [vmem:[#allocation30_spill] sm:$0xff] %v4768_v20  ;;  %v4774_v4 = vsel %vm4322_vm6, %v532_v1, 0.0  ;;  %696 = vrot.lane.b32.xlu1 %v4768_v20, %s4242_s23  ;;  %v510_v18 = vadd.f32 %v506_v25, %v472_v35  ;;  %v517_v63 = vmul.f32 %v513_v23, %v4755_v48  ;;  %v516_v12 = vmul.f32 %v513_v23, %v4770_v46 }
 0x11f   : > { %10042 = vst [vmem:[#allocation31_spill] sm:$0xff] %v4774_v4  ;;  %694 = vrot.lane.b32.xlu0 %v4774_v4, %s4242_s23  ;;  %v535_v7 = vmax.f32 %v511_v6, 0.0  ;;  %v519_v49 = vadd.f32 %v515_v47, %v481_v31  ;;  %v518_v55 = vadd.f32 %v514_v62, %v480_v59  ;;  %v580_v5 = vrot.slane %v4774_v4, 7 }
 0x120   : > { %v534_v58 = vmax.f32 %v510_v18, 0.0  ;;  %v521_v51 = vadd.f32 %v517_v63, %v483_v33  ;;  %v520_v39 = vadd.f32 %v516_v12, %v482_v16  ;;  %v581_v30 = vrot.slane %v4768_v20, 7 }
 0x121   : > { %v4788_v61 = vsel %vm4331_vm11, %v535_v7, 0.0  ;;  %v545_v53 = vmax.f32 %v519_v49, 0.0  ;;  %v544_v3 = vmax.f32 %v518_v55, 0.0  ;;  %v801_v38 = vrot.slane %v4768_v20, 1 }
 0x122   : > { %10044 = vst [vmem:[#allocation28_spill] sm:$0xff] %v4788_v61  ;;  %700 = vrot.lane.b32.xlu1 %v4788_v61, %s4242_s23  ;;  %v4796_v41 = vsel %vm4327_vm9, %v534_v58, 0.0  ;;  %v547_v31 = vmax.f32 %v521_v51, 0.0  ;;  %v546_v40 = vmax.f32 %v520_v39, 0.0  ;;  %v583_v27 = vrot.slane %v4788_v61, 7 }
 0x123   : > { %10045 = vst [vmem:[#allocation32_spill] sm:$0xff] %v4796_v41  ;;  %698 = vrot.lane.b32.xlu0 %v4796_v41, %s4242_s23  ;;  %v4809_v36 = vsel %vm4327_vm9, %v545_v53, 0.0  ;;  %v4817_v42 = vsel %vm4322_vm6, %v544_v3, 0.0  ;;  %v4844_v15 = vsel %vm200_vm2, %v580_v5, %v581_v30  ;;  %v582_v59 = vrot.slane %v4796_v41, 7 }
 0x124   : > { %10046 = vst [vmem:[#allocation33_spill] sm:$0xff] %v4809_v36  ;;  %10047 = vst [vmem:[#allocation34_spill] sm:$0xff] %v4817_v42  ;;  %v4821_v0 = vsel %vm4331_vm11, %v547_v31, 0.0  ;;  %v4829_v50 = vsel %vm4327_vm9, %v546_v40, 0.0  ;;  %v4853_v19 = vsel %vm200_vm2, %v583_v27, %v580_v5  ;;  %v802_v13 = vrot.slane %v4796_v41, 1 }
 0x125   : > { %10048 = vst [vmem:[#allocation35_spill] sm:$0xff] %v4821_v0  ;;  %10049 = vst [vmem:[#allocation29_spill] sm:$0xff] %v4829_v50  ;;  %v4857_v52 = vsel %vm200_vm2, %v582_v59, %v583_v27  ;;  %v4865_v60 = vsel %vm200_vm2, %v581_v30, %v582_v59  ;;  %v800_v9 = vrot.slane %v4774_v4, 1  ;;  %v803_v8 = vrot.slane %v4788_v61, 1 }
 0x126   : > { %764 = vrot.lane.b32.xlu1 %v4768_v20, %s4243_s24  ;;  %v4879_v10 = vsel %vm421_vm3, %v801_v38, %v802_v13  ;;  %v918_v26 = vrot.slane %v4817_v42, 7  ;;  %v919_v45 = vrot.slane %v4809_v36, 7  ;;  %v921_v44 = vrot.slane %v4821_v0, 7 }
 0x127   : > { %762 = vrot.lane.b32.xlu0 %v4774_v4, %s4243_s24  ;;  %v4889_v32 = vsel %vm421_vm3, %v800_v9, %v801_v38  ;;  %v4893_v29 = vsel %vm421_vm3, %v803_v8, %v800_v9  ;;  %v4901_v33 = vsel %vm421_vm3, %v802_v13, %v803_v8  ;;  %v920_v21 = vrot.slane %v4829_v50, 7 }
 0x128   : > { %v4915_v43 = vsel %vm200_vm2, %v918_v26, %v919_v45  ;;  %v4925_v1 = vsel %vm200_vm2, %v921_v44, %v918_v26  ;;  %v523_v57 = vstv %s3845_s27  ;;  %v1140_v7 = vrot.slane %v4829_v50, 1  ;;  %s5035_s27 = sld [smem:[#allocation7 + $0x19]] }
 0x129   : > { %v4929_v37 = vsel %vm200_vm2, %v920_v21, %v921_v44  ;;  %v4937_v6 = vsel %vm200_vm2, %v919_v45, %v920_v21  ;;  %v525_v23 = vmul.f32 %v523_v57, %v4737_v28  ;;  %v524_v35 = vmul.f32 %v523_v57, %v4746_v2 }
 0x12a   : > { %768 = vrot.lane.b32.xlu1 %v4788_v61, %s4243_s24  ;;  %v527_v16 = vmul.f32 %v523_v57, %v4755_v48  ;;  %v526_v28 = vmul.f32 %v523_v57, %v4770_v46  ;;  %v1139_v2 = vrot.slane %v4809_v36, 1  ;;  %v1138_v18 = vrot.slane %v4817_v42, 1 }
 0x12b   : > { %766 = vrot.lane.b32.xlu0 %v4796_v41, %s4243_s24  ;;  %v529_v48 = vadd.f32 %v525_v23, %v4733_v56  ;;  %v528_v25 = vadd.f32 %v524_v35, %v4749_v17  ;;  %v1141_v58 = vrot.slane %v4821_v0, 1  ;;  %v5006_v17 = vstv %s4939_s28  ;;  %s5047_s28 = sld [smem:[#allocation7 + $0x34]] }
 0x12c   : > { %v531_v47 = vadd.f32 %v527_v16, %v4760_v22  ;;  %v4988_v46 = vsel %vm421_vm3, %v1139_v2, %v1140_v7  ;;  %v530_v56 = vadd.f32 %v526_v28, %v4781_v34  ;;  %v5013_v62 = vstv %s4945_s29  ;;  %s5049_s29 = sld [smem:[#allocation7 + $0x4f]] }
 0x12d   : > { %v558_v22 = vmax.f32 %v529_v48, 0.0  ;;  %v557_v49 = vmax.f32 %v528_v25, 0.0  ;;  %v5016_v63 = vstv %s4947_s30  ;;  %v5024_v53 = vsel %vm421_vm3, %v1138_v18, %v1139_v2  ;;  %s5051_s30 = sld [smem:[#allocation7 + $0x3]] }
 0x12e   : > { %1034 = vrot.lane.b32.xlu1 %v4809_v36, %s4242_s23  ;;  %v560_v34 = vmax.f32 %v531_v47, 0.0  ;;  %v5028_v55 = vsel %vm421_vm3, %v1141_v58, %v1138_v18  ;;  %v5031_v51 = vstv %s4949_s10  ;;  %v5042_v12 = vstv %s4951_s11  ;;  %s5053_s10 = sld [smem:[#allocation7 + $0x1e]]  ;;  %s5072_s11 = sld [smem:[#allocation7 + $0x39]] }
 0x12f   : > { %1032 = vrot.lane.b32.xlu0 %v4817_v42, %s4242_s23  ;;  %v5045_v3 = vstv %s4955_s12  ;;  %v559_v31 = vmax.f32 %v530_v56, 0.0  ;;  %v5056_v39 = vstv %s4957_s3  ;;  %v5059_v40 = vstv %s4961_s5  ;;  %s5074_s12 = sld [smem:[#allocation7 + $0x5]]  ;;  %s5090_s3 = sld [smem:[#allocation7 + $0x20]] }
 0x130   : > { %v5062_v5 = vstv %s4963_s13  ;;  %v5066_v30 = vsel %vm4327_vm9, %v558_v22, 0.0  ;;  %v5070_v27 = vsel %vm4322_vm6, %v557_v49, 0.0  ;;  %v5077_v59 = vstv %s4969_s14  ;;  %s5092_s5 = sld [smem:[#allocation7 + $0x3b]]  ;;  %s5104_s13 = sld [smem:[#allocation7 + $0xc]] }
 0x131   : > { %10051 = vst [vmem:[#allocation36_spill] sm:$0xff] %v5066_v30  ;;  %10052 = vst [vmem:[#allocation37_spill] sm:$0xff] %v5070_v27  ;;  %v5080_v13 = vstv %s4971_s15  ;;  %v5084_v38 = vsel %vm4331_vm11, %v560_v34, 0.0  ;;  %v5088_v9 = vsel %vm421_vm3, %v1140_v7, %v1141_v58  ;;  %v5095_v8 = vstv %s4975_s16  ;;  %s5106_s14 = sld [smem:[#allocation7 + $0x27]]  ;;  %s5120_s15 = sld [smem:[#allocation7 + $0x42]] }
 0x132   : > { %1038 = vrot.lane.b32.xlu1 %v4821_v0, %s4242_s23  ;;  %10053 = vst [vmem:[#allocation38_spill] sm:$0xff] %v5084_v38  ;;  %v5098_v26 = vstv %s4977_s17  ;;  %v5109_v45 = vstv %s4981_s2  ;;  %v5112_v44 = vstv %s4983_s4  ;;  %v5116_v21 = vsel %vm4327_vm9, %v559_v31, 0.0  ;;  %s5126_s16 = sld [smem:[#allocation7 + $0xe]]  ;;  %s5128_s17 = sld [smem:[#allocation7 + $0x29]] }
 0x133   : > { %1036 = vrot.lane.b32.xlu0 %v4829_v50, %s4242_s23  ;;  %10054 = vst [vmem:[#allocation39_spill] sm:$0xff] %v5116_v21  ;;  %v1256_v57 = vrot.slane %v5070_v27, 7  ;;  %v1257_v23 = vrot.slane %v5066_v30, 7  ;;  %v5123_v35 = vstv %s4994_s7  ;;  %v1259_v16 = vrot.slane %v5084_v38, 7  ;;  %s5156_s2 = sld [smem:[#allocation7 + $0x44]]  ;;  %s5194_s4 = sld [smem:[#allocation8]] }
 0x134   : > { %10055 = vst [vmem:[#allocation40_spill] sm:$0xff] %v5123_v35  ;;  %v5131_v7 = vstv %s4992_s18  ;;  %v5134_v28 = vstv %s5000_s20  ;;  %v5137_v2 = vstv %s5002_s21  ;;  %v5140_v48 = vstv %s5008_s22  ;;  %s5196_s18 = sld [smem:[#allocation8 + $0x1]]  ;;  %s5216_s7 = sld [smem:[#allocation8 + $0x2]] }
 0x135   : > { %v5143_v25 = vstv %s5010_s25  ;;  %v5146_v47 = vstv %s5018_s6  ;;  %v5149_v18 = vstv %s5020_s1  ;;  %v1258_v58 = vrot.slane %v5116_v21, 7  ;;  %s5218_s20 = sld [smem:[#allocation7]]  ;;  %s5233_s21 = sld [smem:[#allocation7 + $0x1b]] }
 0x136   : > { %1102 = vrot.lane.b32.xlu1 %v4809_v36, %s4243_s24  ;;  %10056 = vst [vmem:[#allocation41_spill] sm:$0xff] %v5146_v47  ;;  %10057 = vst [vmem:[#allocation42_spill] sm:$0xff] %v5149_v18  ;;  %v5159_v56 = vstv %s5033_s26  ;;  %v5162_v22 = vstv %s5035_s27  ;;  %v5166_v49 = vsel %vm200_vm2, %v1256_v57, %v1257_v23  ;;  %v1478_v34 = vrot.slane %v5116_v21, 1  ;;  %s5272_s22 = sld [smem:[#allocation7 + $0x36]]  ;;  %s5342_s25 = sld [smem:[#allocation7 + $0x2]] }
 0x137   : > { %1100 = vrot.lane.b32.xlu0 %v4817_v42, %s4243_s24  ;;  %10058 = vst [vmem:[#allocation43_spill] sm:$0xff] %v5159_v56  ;;  %10059 = vst [vmem:[#allocation44_spill] sm:$0xff] %v5162_v22  ;;  %v5170_v31 = vstv %s5047_s28  ;;  %v5173_v24 = vstv %s5049_s29  ;;  %v5177_v54 = vsel %vm200_vm2, %v1259_v16, %v1256_v57  ;;  %v5180_v11 = vstv %s5051_s30  ;;  %s5406_s6 = sld [smem:[#allocation7 + $0x1d]]  ;;  %s5475_s1 = sld [smem:[#allocation7 + $0x38]] }
 0x138   : > { %10060 = vst [vmem:[#allocation45_spill] sm:$0xff] %v5170_v31  ;;  %10061 = vst [vmem:[#allocation46_spill] sm:$0xff] %v5173_v24  ;;  %v1477_v22 = vrot.slane %v5066_v30, 1  ;;  %v1476_v56 = vrot.slane %v5070_v27, 1  ;;  %v5185_v18 = vstv %s5053_s10  ;;  %v5188_v35 = vstv %s5072_s11  ;;  %s5523_s26 = sld [smem:[#allocation7 + $0x6]]  ;;  %s5550_s27 = sld [smem:[#allocation7 + $0x21]] }
 0x139   : > { %10062 = vst [vmem:[#allocation47_spill] sm:$0xff] %v5180_v11  ;;  %10063 = vst [vmem:[#allocation48_spill] sm:$0xff] %v5185_v18  ;;  %v5191_v31 = vstv %s5074_s12  ;;  %v1479_v24 = vrot.slane %v5084_v38, 1  ;;  %v5204_v57 = vsel %vm200_vm2, %v1258_v58, %v1259_v16  ;;  %v5214_v18 = vstv %s5092_s5  ;;  %s5552_s28 = sld [smem:[#allocation7 + $0x3c]]  ;;  %s5566_s29 = sld [smem:[#allocation7 + $0x8]] }
 0x13a   : > { %1106 = vrot.lane.b32.xlu1 %v4821_v0, %s4243_s24  ;;  %10064 = vst [vmem:[#allocation49_spill] sm:$0xff] %v5188_v35  ;;  %10065 = vst [vmem:[#allocation50_spill] sm:$0xff] %v5191_v31  ;;  %v5208_v31 = vsel %vm200_vm2, %v1257_v23, %v1258_v58  ;;  %v5211_v35 = vstv %s5090_s3  ;;  %v5222_v11 = vsel %vm421_vm3, %v1477_v22, %v1478_v34  ;;  %v5225_v47 = vstv %s5104_s13  ;;  %s5568_s30 = sld [smem:[#allocation7 + $0x23]]  ;;  %s5588_s10 = sld [smem:[#allocation7 + $0x3e]] }
 0x13b   : > { %1104 = vrot.lane.b32.xlu0 %v4829_v50, %s4243_s24  ;;  %10066 = vst [vmem:[#allocation51_spill] sm:$0xff] %v5211_v35  ;;  %10067 = vst [vmem:[#allocation52_spill] sm:$0xff] %v5214_v18  ;;  %v5228_v16 = vstv %s5106_s14  ;;  %v5231_v21 = vstv %s5120_s15  ;;  %v5237_v23 = vsel %vm421_vm3, %v1476_v56, %v1477_v22  ;;  %v5240_v58 = vstv %s5126_s16  ;;  %s5590_s11 = sld [smem:[#allocation7 + $0x9]]  ;;  %s5608_s12 = sld [smem:[#allocation7 + $0x24]] }
 0x13c   : > { %10068 = vst [vmem:[#allocation53_spill] sm:$0xff] %v5225_v47  ;;  %10069 = vst [vmem:[#allocation54_spill] sm:$0xff] %v5231_v21  ;;  %v5243_v18 = vstv %s5128_s17  ;;  %v5247_v35 = vmul.f32 %v5013_v62, %v4844_v15  ;;  %v5251_v47 = vsel %vm421_vm3, %v1479_v24, %v1476_v56  ;;  %v5255_v21 = vsel %vm421_vm3, %v1478_v34, %v1479_v24  ;;  %s5610_s3 = sld [smem:[#allocation7 + $0x3f]]  ;;  %s5635_s5 = sld [smem:[#allocation7 + $0xb]] }
 0x13d   : > { %10070 = vst [vmem:[#allocation55_spill] sm:$0xff] %v5240_v58  ;;  %v5259_v22 = vmul.f32 %v5016_v63, %v4844_v15  ;;  %v5263_v58 = vmul.f32 %v5031_v51, %v4844_v15  ;;  %v5270_v56 = vstv %s5156_s2  ;;  %v5276_v24 = vmul.f32 %v5013_v62, %v4853_v19  ;;  %s5637_s13 = sld [smem:[#allocation7 + $0x26]]  ;;  %s5651_s14 = sld [smem:[#allocation7 + $0x41]] }
 0x13e   : > { %590 = vrot.lane.b32.xlu1 %v4844_v15, %s4242_s23  ;;  %v5284_v34 = vmul.f32 %v5031_v51, %v4853_v19  ;;  %v5288_v14 = vmul.f32 %v5013_v62, %v4857_v52  ;;  %s5653_s15 = sld [smem:[#allocation7 + $0xf]]  ;;  %s5675_s16 = sld [smem:[#allocation7 + $0x2a]] }
 0x13f   : > { %588 = vrot.lane.b32.xlu0 %v4853_v19, %s4242_s23  ;;  %10071 = vst [vmem:[#allocation56_spill] sm:$0xff] %v5263_v58  ;;  %10072 = vst [vmem:[#allocation57_spill] sm:$0xff] %v5276_v24  ;;  %v5292_v58 = vmul.f32 %v5016_v63, %v4857_v52  ;;  %v5296_v24 = vmul.f32 %v5031_v51, %v4857_v52  ;;  %s5677_s17 = sld [smem:[#allocation7 + $0x45]]  ;;  %s5695_s2 = sld [smem:[#allocation7 + $0x11]] }
 0x140   : > { %10074 = vst [vmem:[#allocation59_spill] sm:$0xff] %v5288_v14  ;;  %v5308_v14 = vmul.f32 %v5031_v51, %v4865_v60  ;;  %v5337_v51 = vstv %s5216_s7  ;;  %s5727_s7 = sld [smem:[#allocation7 + $0x12]] }
 0x141   : > { %10075 = vst [vmem:[#allocation60_spill] sm:$0xff] %v5292_v58  ;;  %10076 = vst [vmem:[#allocation61_spill] sm:$0xff] %v5296_v24  ;;  %v5312_v58 = vmul.f32 %v5006_v17, %v4768_v20  ;;  %v5319_v24 = vstv %s5194_s4  ;;  %s5697_s4 = sld [smem:[#allocation7 + $0x2c]] }
 0x142   : > { %594 = vrot.lane.b32.xlu1 %v4857_v52, %s4242_s23  ;;  %10078 = vst [vmem:[#allocation63_spill] sm:$0xff] %v5308_v14  ;;  %v5361_v14 = vmul.f32 %v5042_v12, %v4788_v61 }
 0x143   : > { %592 = vrot.lane.b32.xlu0 %v4865_v60, %s4242_s23  ;;  %10079 = vst [vmem:[#allocation64_spill] sm:$0xff] %v5312_v58  ;;  %v5357_v58 = vmul.f32 %v5006_v17, %v4788_v61 }
 0x145   : > { %10085 = vst [vmem:[#allocation70_spill] sm:$0xff] %v5357_v58  ;;  %v5381_v58 = vmul.f32 %v5056_v39, %v4879_v10 }
 0x146   : > { %658 = vrot.lane.b32.xlu1 %v4844_v15, %s4243_s24  ;;  %v5280_v15 = vmul.f32 %v5016_v63, %v4853_v19 }
 0x147   : > { %656 = vrot.lane.b32.xlu0 %v4853_v19, %s4243_s24  ;;  %v5304_v19 = vmul.f32 %v5016_v63, %v4865_v60  ;;  %v5326_v63 = vmul.f32 %v5045_v3, %v4768_v20  ;;  %10089 = vst [vmem:[#allocation74_spill] sm:$0xff] %v5381_v58 }
 0x148   : > { %10073 = vst [vmem:[#allocation58_spill] sm:$0xff] %v5280_v15  ;;  %v5300_v15 = vmul.f32 %v5013_v62, %v4865_v60  ;;  %v5322_v62 = vstv %s5196_s18  ;;  %s5725_s18 = sld [smem:[#allocation7 + $0x47]] }
 0x149   : > { %10077 = vst [vmem:[#allocation62_spill] sm:$0xff] %v5304_v19  ;;  %10081 = vst [vmem:[#allocation66_spill] sm:$0xff] %v5326_v63  ;;  %v5353_v63 = vstv %s5233_s21  ;;  %v5365_v19 = vmul.f32 %v5045_v3, %v4788_v61  ;;  %v5385_v61 = vmul.f32 %v5059_v40, %v4879_v10  ;;  %s5739_s21 = sld [smem:[#allocation7 + $0x48]] }
 0x14a   : > { %662 = vrot.lane.b32.xlu1 %v4857_v52, %s4243_s24  ;;  %v5316_v52 = vmul.f32 %v5042_v12, %v4768_v20  ;;  %v5346_v20 = vmul.f32 %v5042_v12, %v4774_v4 }
 0x14b   : > { %660 = vrot.lane.b32.xlu0 %v4865_v60, %s4243_s24  ;;  %v5330_v60 = vmul.f32 %v5006_v17, %v4774_v4  ;;  %10090 = vst [vmem:[#allocation75_spill] sm:$0xff] %v5385_v61  ;;  %v5426_v61 = vmul.f32 %v5056_v39, %v4901_v33 }
 0x14c   : > { %10080 = vst [vmem:[#allocation65_spill] sm:$0xff] %v5316_v52  ;;  %v5340_v52 = vstv %s5218_s20  ;;  %10083 = vst [vmem:[#allocation68_spill] sm:$0xff] %v5346_v20  ;;  %v5369_v20 = vmul.f32 %v5006_v17, %v4796_v41  ;;  %v5389_v17 = vmul.f32 %v5062_v5, %v4879_v10  ;;  %s5737_s20 = sld [smem:[#allocation7 + $0x2d]] }
 0x14d   : > { %10082 = vst [vmem:[#allocation67_spill] sm:$0xff] %v5330_v60  ;;  %v5350_v60 = vmul.f32 %v5045_v3, %v4774_v4  ;;  %v5373_v4 = vmul.f32 %v5042_v12, %v4796_v41  ;;  %v5393_v12 = vmul.f32 %v5056_v39, %v4889_v32  ;;  %10098 = vst [vmem:[#allocation83_spill] sm:$0xff] %v5426_v61 }
 0x14e   : > { %810 = vrot.lane.b32.xlu1 %v4879_v10, %s4242_s23  ;;  %10086 = vst [vmem:[#allocation71_spill] sm:$0xff] %v5369_v20  ;;  %10091 = vst [vmem:[#allocation76_spill] sm:$0xff] %v5389_v17  ;;  %v5422_v17 = vmul.f32 %v5062_v5, %v4893_v29 }
 0x14f   : > { %808 = vrot.lane.b32.xlu0 %v4889_v32, %s4242_s23  ;;  %10084 = vst [vmem:[#allocation69_spill] sm:$0xff] %v5350_v60  ;;  %10087 = vst [vmem:[#allocation72_spill] sm:$0xff] %v5373_v4  ;;  %v5377_v60 = vmul.f32 %v5045_v3, %v4796_v41  ;;  %v5397_v3 = vmul.f32 %v5059_v40, %v4889_v32  ;;  %v5404_v41 = vstv %s5272_s22  ;;  %s5761_s22 = sld [smem:[#allocation7 + $0x14]]  ;;  %v10254_v4 = vld [vmem:[#allocation59_spill] sm:$0xff] }
 0x150   : > { %10092 = vst [vmem:[#allocation77_spill] sm:$0xff] %v5393_v12  ;;  %v5414_v12 = vmul.f32 %v5056_v39, %v4893_v29  ;;  %10097 = vst [vmem:[#allocation82_spill] sm:$0xff] %v5422_v17  ;;  %v5446_v39 = vmul.f32 %v5098_v26, %v4915_v43 }
 0x151   : > { %10088 = vst [vmem:[#allocation73_spill] sm:$0xff] %v5377_v60  ;;  %10093 = vst [vmem:[#allocation78_spill] sm:$0xff] %v5397_v3  ;;  %v5418_v3 = vmul.f32 %v5059_v40, %v4893_v29 }
 0x152   : > { %814 = vrot.lane.b32.xlu1 %v4893_v29, %s4242_s23  ;;  %10095 = vst [vmem:[#allocation80_spill] sm:$0xff] %v5414_v12  ;;  %v5434_v12 = vmul.f32 %v5062_v5, %v4901_v33  ;;  %10103 = vst [vmem:[#allocation88_spill] sm:$0xff] %v5446_v39  ;;  %v5497_v39 = vmul.f32 %v5080_v13, %v4809_v36 }
 0x153   : > { %812 = vrot.lane.b32.xlu0 %v4901_v33, %s4242_s23  ;;  %10096 = vst [vmem:[#allocation81_spill] sm:$0xff] %v5418_v3 }
 0x154   : > { %10100 = vst [vmem:[#allocation85_spill] sm:$0xff] %v5434_v12  ;;  %10113 = vst [vmem:[#allocation98_spill] sm:$0xff] %v5497_v39  ;;  %v5521_v39 = vmul.f32 %v5080_v13, %v4821_v0 }
 0x156   : > { %878 = vrot.lane.b32.xlu1 %v4879_v10, %s4243_s24  ;;  %v5410_v10 = vmul.f32 %v5062_v5, %v4889_v32  ;;  %v5458_v5 = vmul.f32 %v5098_v26, %v4925_v1  ;;  %10119 = vst [vmem:[#allocation104_spill] sm:$0xff] %v5521_v39 }
 0x157   : > { %876 = vrot.lane.b32.xlu0 %v4889_v32, %s4243_s24  ;;  %v5430_v32 = vmul.f32 %v5059_v40, %v4901_v33  ;;  %v5450_v40 = vmul.f32 %v5077_v59, %v4925_v1 }
 0x158   : > { %10094 = vst [vmem:[#allocation79_spill] sm:$0xff] %v5410_v10  ;;  %v5438_v10 = vmul.f32 %v5077_v59, %v4915_v43  ;;  %10106 = vst [vmem:[#allocation91_spill] sm:$0xff] %v5458_v5 }
 0x159   : > { %10099 = vst [vmem:[#allocation84_spill] sm:$0xff] %v5430_v32  ;;  %10104 = vst [vmem:[#allocation89_spill] sm:$0xff] %v5450_v40  ;;  %v5473_v40 = vstv %s5342_s25  ;;  %s5763_s25 = sld [smem:[#allocation7 + $0x2f]] }
 0x15a   : > { %882 = vrot.lane.b32.xlu1 %v4893_v29, %s4243_s24  ;;  %10101 = vst [vmem:[#allocation86_spill] sm:$0xff] %v5438_v10  ;;  %v5442_v29 = vmul.f32 %v5095_v8, %v4915_v43  ;;  %v5462_v10 = vmul.f32 %v5077_v59, %v4929_v37 }
 0x15b   : > { %880 = vrot.lane.b32.xlu0 %v4901_v33, %s4243_s24  ;;  %v5454_v33 = vmul.f32 %v5095_v8, %v4925_v1 }
 0x15c   : > { %10102 = vst [vmem:[#allocation87_spill] sm:$0xff] %v5442_v29  ;;  %10107 = vst [vmem:[#allocation92_spill] sm:$0xff] %v5462_v10  ;;  %v5483_v10 = vmul.f32 %v5077_v59, %v4937_v6  ;;  %v5505_v59 = vmul.f32 %v5112_v44, %v4809_v36 }
 0x15d   : > { %10105 = vst [vmem:[#allocation90_spill] sm:$0xff] %v5454_v33  ;;  %v5493_v33 = vmul.f32 %v5098_v26, %v4937_v6 }
 0x15e   : > { %928 = vrot.lane.b32.xlu1 %v4915_v43, %s4242_s23  ;;  %10110 = vst [vmem:[#allocation95_spill] sm:$0xff] %v5483_v10  ;;  %10115 = vst [vmem:[#allocation100_spill] sm:$0xff] %v5505_v59  ;;  %v5869_v59 = vstv %s5695_s2  ;;  %s3939_s2 = sld [smem:[#allocation10 + $0x1e]] }
 0x15f   : > { %926 = vrot.lane.b32.xlu0 %v4925_v1, %s4242_s23  ;;  %10112 = vst [vmem:[#allocation97_spill] sm:$0xff] %v5493_v33  ;;  %10191 = vst [vmem:[#allocation161_spill] sm:$0xff] %v5869_v59  ;;  %v5888_v33 = vstv %s5727_s7  ;;  %v5894_v59 = vstv %s5739_s21  ;;  %s3945_s7 = sld [smem:[#allocation10 + $0x20]]  ;;  %s3965_s21 = sld [smem:[#allocation10 + $0xc]] }
 0x160   : > { %10196 = vst [vmem:[#allocation166_spill] sm:$0xff] %v5888_v33  ;;  %10198 = vst [vmem:[#allocation168_spill] sm:$0xff] %v5894_v59  ;;  %v5909_v33 = vstv %s5761_s22  ;;  %v5912_v59 = vstv %s5763_s25  ;;  %s3966_s22 = sld [smem:[#allocation10 + $0x27]]  ;;  %s3967_s25 = sld [smem:[#allocation10 + $0x42]] }
 0x162   : > { %932 = vrot.lane.b32.xlu1 %v4929_v37, %s4242_s23 }
 0x163   : > { %930 = vrot.lane.b32.xlu0 %v4937_v6, %s4242_s23 }
 0x166   : > { %996 = vrot.lane.b32.xlu1 %v4915_v43, %s4243_s24  ;;  %v5466_v43 = vmul.f32 %v5095_v8, %v4929_v37 }
 0x167   : > { %994 = vrot.lane.b32.xlu0 %v4925_v1, %s4243_s24  ;;  %v5479_v1 = vmul.f32 %v5098_v26, %v4929_v37  ;;  %v5517_v26 = vmul.f32 %v5112_v44, %v4817_v42 }
 0x168   : > { %10108 = vst [vmem:[#allocation93_spill] sm:$0xff] %v5466_v43  ;;  %v5487_v43 = vmul.f32 %v5095_v8, %v4937_v6  ;;  %v5509_v8 = vmul.f32 %v5080_v13, %v4817_v42 }
 0x169   : > { %10109 = vst [vmem:[#allocation94_spill] sm:$0xff] %v5479_v1  ;;  %10118 = vst [vmem:[#allocation103_spill] sm:$0xff] %v5517_v26  ;;  %v5862_v26 = vstv %s5677_s17  ;;  %v10203_v1 = vld [vmem:[#allocation49_spill] sm:$0xff]  ;;  %s6821_s17 = sld [smem:[#allocation10 + $0x37]] }
 0x16a   : > { %1000 = vrot.lane.b32.xlu1 %v4929_v37, %s4243_s24  ;;  %10111 = vst [vmem:[#allocation96_spill] sm:$0xff] %v5487_v43  ;;  %v5501_v37 = vmul.f32 %v5109_v45, %v4809_v36  ;;  %10116 = vst [vmem:[#allocation101_spill] sm:$0xff] %v5509_v8  ;;  %v5527_v36 = vmul.f32 %v5109_v45, %v4821_v0  ;;  %v5531_v8 = vmul.f32 %v5112_v44, %v4821_v0 }
 0x16b   : > { %998 = vrot.lane.b32.xlu0 %v4937_v6, %s4243_s24  ;;  %v5513_v6 = vmul.f32 %v5109_v45, %v4817_v42  ;;  %v5539_v42 = vmul.f32 %v5109_v45, %v4829_v50  ;;  %v5560_v45 = vmul.f32 %v5131_v7, %v4988_v46  ;;  %v5564_v0 = vmul.f32 %v5134_v28, %v4988_v46 }
 0x16c   : > { %10114 = vst [vmem:[#allocation99_spill] sm:$0xff] %v5501_v37  ;;  %10120 = vst [vmem:[#allocation105_spill] sm:$0xff] %v5527_v36  ;;  %v5548_v36 = vstv %s5406_s6  ;;  %s5804_s6 = sld [smem:[#allocation7 + $0x4a]]  ;;  %v5872_v37 = vstv %s5697_s4  ;;  %v5891_v43 = vstv %s5737_s20  ;;  %s3940_s4 = sld [smem:[#allocation10 + $0x39]] }
 0x16d   : > { %10117 = vst [vmem:[#allocation102_spill] sm:$0xff] %v5513_v6  ;;  %10121 = vst [vmem:[#allocation106_spill] sm:$0xff] %v5531_v8  ;;  %v5535_v6 = vmul.f32 %v5080_v13, %v4829_v50  ;;  %v5556_v13 = vmul.f32 %v5112_v44, %v4829_v50  ;;  %v5576_v44 = vmul.f32 %v5131_v7, %v5024_v53  ;;  %v5859_v8 = vstv %s5675_s16  ;;  %s3938_s16 = sld [smem:[#allocation10 + $0x3]] }
 0x16e   : > { %1148 = vrot.lane.b32.xlu1 %v4988_v46, %s4242_s23  ;;  %10123 = vst [vmem:[#allocation108_spill] sm:$0xff] %v5539_v42  ;;  %10125 = vst [vmem:[#allocation110_spill] sm:$0xff] %v5560_v45  ;;  %v5572_v42 = vmul.f32 %v5137_v2, %v4988_v46  ;;  %v5580_v50 = vmul.f32 %v5134_v28, %v5024_v53  ;;  %v5584_v45 = vmul.f32 %v5137_v2, %v5024_v53  ;;  %s3946_s20 = sld [smem:[#allocation10 + $0x3b]] }
 0x16f   : > { %1146 = vrot.lane.b32.xlu0 %v5024_v53, %s4242_s23  ;;  %10122 = vst [vmem:[#allocation107_spill] sm:$0xff] %v5535_v6  ;;  %10124 = vst [vmem:[#allocation109_spill] sm:$0xff] %v5556_v13  ;;  %v5853_v13 = vstv %s5651_s14  ;;  %v5856_v6 = vstv %s5653_s15  ;;  %s6817_s14 = sld [smem:[#allocation10 + $0x1]]  ;;  %s6819_s15 = sld [smem:[#allocation10 + $0x1c]] }
 0x170   : > { %10126 = vst [vmem:[#allocation111_spill] sm:$0xff] %v5564_v0  ;;  %10127 = vst [vmem:[#allocation112_spill] sm:$0xff] %v5572_v42  ;;  %v5850_v42 = vstv %s5637_s13  ;;  %s6037_s13 = sld [smem:[#allocation7 + $0x50]] }
 0x171   : > { %10128 = vst [vmem:[#allocation113_spill] sm:$0xff] %v5576_v44  ;;  %10129 = vst [vmem:[#allocation114_spill] sm:$0xff] %v5580_v50  ;;  %v5598_v44 = vmul.f32 %v5134_v28, %v5028_v55  ;;  %v5602_v50 = vmul.f32 %v5137_v2, %v5028_v55 }
 0x172   : > { %1152 = vrot.lane.b32.xlu1 %v5028_v55, %s4242_s23  ;;  %10130 = vst [vmem:[#allocation115_spill] sm:$0xff] %v5584_v45  ;;  %v5614_v45 = vmul.f32 %v5134_v28, %v5088_v9  ;;  %v5633_v28 = vstv %s5475_s1  ;;  %s5806_s1 = sld [smem:[#allocation7 + $0x15]]  ;;  %10186 = vst [vmem:[#allocation156_spill] sm:$0xff] %v5850_v42 }
 0x173   : > { %1150 = vrot.lane.b32.xlu0 %v5088_v9, %s4242_s23  ;;  %10132 = vst [vmem:[#allocation117_spill] sm:$0xff] %v5598_v44  ;;  %10133 = vst [vmem:[#allocation118_spill] sm:$0xff] %v5602_v50  ;;  %v5830_v50 = vstv %s5590_s11  ;;  %v5847_v44 = vstv %s5635_s5  ;;  %s5951_s11 = sld [smem:[#allocation7 + $0x33]]  ;;  %s6002_s5 = sld [smem:[#allocation7 + $0x35]] }
 0x174   : > { %10135 = vst [vmem:[#allocation120_spill] sm:$0xff] %v5614_v45  ;;  %10182 = vst [vmem:[#allocation152_spill] sm:$0xff] %v5830_v50 }
 0x175   : > { %10185 = vst [vmem:[#allocation155_spill] sm:$0xff] %v5847_v44  ;;  %10187 = vst [vmem:[#allocation157_spill] sm:$0xff] %v5853_v13 }
 0x176   : > { %1216 = vrot.lane.b32.xlu1 %v4988_v46, %s4243_s24  ;;  %v5594_v46 = vmul.f32 %v5131_v7, %v5028_v55  ;;  %10188 = vst [vmem:[#allocation158_spill] sm:$0xff] %v5856_v6  ;;  %10189 = vst [vmem:[#allocation159_spill] sm:$0xff] %v5859_v8  ;;  %v5885_v8 = vstv %s5725_s18  ;;  %s3944_s18 = sld [smem:[#allocation10 + $0x5]] }
 0x177   : > { %1214 = vrot.lane.b32.xlu0 %v5024_v53, %s4243_s24  ;;  %v5606_v53 = vmul.f32 %v5131_v7, %v5088_v9  ;;  %v5626_v7 = vmul.f32 %v5143_v25, %v5166_v49  ;;  %10190 = vst [vmem:[#allocation160_spill] sm:$0xff] %v5862_v26  ;;  %10192 = vst [vmem:[#allocation162_spill] sm:$0xff] %v5872_v37  ;;  %v10199_v37 = vld [vmem:[#allocation47_spill] sm:$0xff] }
 0x178   : > { %10131 = vst [vmem:[#allocation116_spill] sm:$0xff] %v5594_v46  ;;  %v5618_v46 = vmul.f32 %v5137_v2, %v5088_v9  ;;  %10195 = vst [vmem:[#allocation165_spill] sm:$0xff] %v5885_v8  ;;  %v5958_v29 = vstv %s5806_s1  ;;  %s3972_s1 = sld [smem:[#allocation10 + $0x29]] }
 0x179   : > { %10134 = vst [vmem:[#allocation119_spill] sm:$0xff] %v5606_v53  ;;  %10138 = vst [vmem:[#allocation123_spill] sm:$0xff] %v5626_v7  ;;  %v10139_v53 = vld [vmem:[#allocation39_spill] sm:$0xff]  ;;  %v5649_v7 = vmul.f32 %v5143_v25, %v5177_v54 }
 0x17a   : > { %1220 = vrot.lane.b32.xlu1 %v5028_v55, %s4243_s24  ;;  %10136 = vst [vmem:[#allocation121_spill] sm:$0xff] %v5618_v46  ;;  %v5622_v55 = vmul.f32 %v5140_v48, %v5166_v49  ;;  %10197 = vst [vmem:[#allocation167_spill] sm:$0xff] %v5891_v43 }
 0x17b   : > { %1218 = vrot.lane.b32.xlu0 %v5088_v9, %s4243_s24  ;;  %v10140_v9 = vld [vmem:[#allocation41_spill] sm:$0xff]  ;;  %10143 = vst [vmem:[#allocation125_spill] sm:$0xff] %v5649_v7  ;;  %10201 = vst [vmem:[#allocation47_spill] sm:$0xff] %v5909_v33 }
 0x17c   : > { %10137 = vst [vmem:[#allocation122_spill] sm:$0xff] %v5622_v55  ;;  %v5641_v2 = vmul.f32 %v10140_v9, %v5166_v49  ;;  %v5645_v55 = vmul.f32 %v5140_v48, %v5177_v54  ;;  %v5657_v46 = vmul.f32 %v10140_v9, %v5177_v54  ;;  %10205 = vst [vmem:[#allocation169_spill] sm:$0xff] %v5958_v29  ;;  %v10209_v29 = vld [vmem:[#allocation51_spill] sm:$0xff] }
 0x17e   : > { %1266 = vrot.lane.b32.xlu1 %v5166_v49, %s4242_s23  ;;  %10141 = vst [vmem:[#allocation41_spill] sm:$0xff] %v5641_v2  ;;  %10142 = vst [vmem:[#allocation124_spill] sm:$0xff] %v5645_v55  ;;  %v5665_v2 = vmul.f32 %v5143_v25, %v5204_v57  ;;  %v5669_v55 = vmul.f32 %v10140_v9, %v5204_v57 }
 0x17f   : > { %1264 = vrot.lane.b32.xlu0 %v5177_v54, %s4242_s23  ;;  %10144 = vst [vmem:[#allocation126_spill] sm:$0xff] %v5657_v46  ;;  %v10153_v46 = vld [vmem:[#allocation42_spill] sm:$0xff] }
 0x180   : > { %10146 = vst [vmem:[#allocation128_spill] sm:$0xff] %v5665_v2  ;;  %10147 = vst [vmem:[#allocation129_spill] sm:$0xff] %v5669_v55  ;;  %v5685_v2 = vmul.f32 %v5143_v25, %v5208_v31  ;;  %v10151_v55 = vld [vmem:[#allocation40_spill] sm:$0xff] }
 0x182   : > { %1270 = vrot.lane.b32.xlu1 %v5204_v57, %s4242_s23  ;;  %10149 = vst [vmem:[#allocation131_spill] sm:$0xff] %v5685_v2  ;;  %v5827_v2 = vstv %s5588_s10  ;;  %s5949_s10 = sld [smem:[#allocation7 + $0x18]] }
 0x183   : > { %1268 = vrot.lane.b32.xlu0 %v5208_v31, %s4242_s23  ;;  %10181 = vst [vmem:[#allocation151_spill] sm:$0xff] %v5827_v2 }
 0x186   : > { %1334 = vrot.lane.b32.xlu1 %v5166_v49, %s4243_s24  ;;  %v5661_v49 = vmul.f32 %v5140_v48, %v5204_v57 }
 0x187   : > { %1332 = vrot.lane.b32.xlu0 %v5177_v54, %s4243_s24  ;;  %v5681_v54 = vmul.f32 %v5140_v48, %v5208_v31  ;;  %v5701_v48 = vmul.f32 %v10153_v46, %v5066_v30 }
 0x188   : > { %10145 = vst [vmem:[#allocation127_spill] sm:$0xff] %v5661_v49  ;;  %v5693_v49 = vmul.f32 %v10151_v55, %v5066_v30 }
 0x189   : > { %10148 = vst [vmem:[#allocation130_spill] sm:$0xff] %v5681_v54  ;;  %10154 = vst [vmem:[#allocation42_spill] sm:$0xff] %v5701_v48  ;;  %v10155_v54 = vld [vmem:[#allocation43_spill] sm:$0xff]  ;;  %v5723_v48 = vstv %s5550_s27  ;;  %s5834_s27 = sld [smem:[#allocation7 + $0x4b]] }
 0x18a   : > { %1338 = vrot.lane.b32.xlu1 %v5204_v57, %s4243_s24  ;;  %v5689_v57 = vmul.f32 %v10140_v9, %v5208_v31  ;;  %10152 = vst [vmem:[#allocation40_spill] sm:$0xff] %v5693_v49  ;;  %v5705_v25 = vmul.f32 %v10155_v54, %v5066_v30  ;;  %v5713_v9 = vmul.f32 %v10153_v46, %v5070_v27  ;;  %v5720_v49 = vstv %s5523_s26  ;;  %s5832_s26 = sld [smem:[#allocation7 + $0x30]] }
 0x18b   : > { %1336 = vrot.lane.b32.xlu0 %v5208_v31, %s4243_s24  ;;  %v5709_v31 = vmul.f32 %v10151_v55, %v5070_v27 }
 0x18c   : > { %10150 = vst [vmem:[#allocation132_spill] sm:$0xff] %v5689_v57  ;;  %10156 = vst [vmem:[#allocation43_spill] sm:$0xff] %v5705_v25  ;;  %v5747_v25 = vmul.f32 %v10155_v54, %v5084_v38 }
 0x18d   : > { %10157 = vst [vmem:[#allocation133_spill] sm:$0xff] %v5709_v31  ;;  %10158 = vst [vmem:[#allocation134_spill] sm:$0xff] %v5713_v9  ;;  %v5735_v9 = vmul.f32 %v10151_v55, %v5084_v38  ;;  %v5743_v31 = vmul.f32 %v10153_v46, %v5084_v38 }
 0x18e   : > { %1372 = vrot.lane.b32.xlu1 %v5066_v30, %s4242_s23  ;;  %10162 = vst [vmem:[#allocation138_spill] sm:$0xff] %v5747_v25  ;;  %v10170_v25 = vld [vmem:[#allocation46_spill] sm:$0xff] }
 0x18f   : > { %1370 = vrot.lane.b32.xlu0 %v5070_v27, %s4242_s23  ;;  %10160 = vst [vmem:[#allocation136_spill] sm:$0xff] %v5735_v9  ;;  %10161 = vst [vmem:[#allocation137_spill] sm:$0xff] %v5743_v31  ;;  %v5755_v9 = vmul.f32 %v10153_v46, %v10139_v53  ;;  %v10168_v46 = vld [vmem:[#allocation45_spill] sm:$0xff]  ;;  %v5779_v31 = vmul.f32 %v10170_v25, %v5222_v11  ;;  %v5882_v26 = vmul.f32 %v10170_v25, %v5255_v21 }
 0x190   : > { %v5489_v5 = vpop.permute.xlu1 %696  ;;  %v5878_v6 = vmul.f32 %v10168_v46, %v5255_v21 }
 0x191   : > { %v5543_v39 = vpop.permute.xlu0 %694  ;;  %10164 = vst [vmem:[#allocation140_spill] sm:$0xff] %v5755_v9  ;;  %v5775_v9 = vmul.f32 %v10168_v46, %v5222_v11  ;;  %10171 = vst [vmem:[#allocation46_spill] sm:$0xff] %v5779_v31  ;;  %v5824_v31 = vstv %s5568_s30  ;;  %s5898_s30 = sld [smem:[#allocation7 + $0x4d]]  ;;  %v5928_v42 = vmul.f32 %v10203_v1, %v5489_v5 }
 0x192   : > { %1376 = vrot.lane.b32.xlu1 %v5084_v38, %s4242_s23  ;;  %10180 = vst [vmem:[#allocation150_spill] sm:$0xff] %v5824_v31  ;;  %10193 = vst [vmem:[#allocation163_spill] sm:$0xff] %v5878_v6  ;;  %v5916_v43 = vmul.f32 %v10199_v37, %v5543_v39  ;;  %v5924_v13 = vmul.f32 %v10203_v1, %v5543_v39 }
 0x193   : > { %1374 = vrot.lane.b32.xlu0 %v10139_v53, %s4242_s23  ;;  %10169 = vst [vmem:[#allocation45_spill] sm:$0xff] %v5775_v9  ;;  %10194 = vst [vmem:[#allocation164_spill] sm:$0xff] %v5882_v26 }
 0x194   : > { %v5586_v0 = vpop.permute.xlu1 %700 }
 0x195   : > { %v5671_v7 = vpop.permute.xlu0 %698  ;;  %v5940_v44 = vmul.f32 %v10203_v1, %v5586_v0 }
 0x196   : > { %1440 = vrot.lane.b32.xlu1 %v5066_v30, %s4243_s24  ;;  %v5731_v30 = vmul.f32 %v10155_v54, %v5070_v27 }
 0x197   : > { %1438 = vrot.lane.b32.xlu0 %v5070_v27, %s4243_s24  ;;  %v5751_v27 = vmul.f32 %v10151_v55, %v10139_v53  ;;  %v10166_v55 = vld [vmem:[#allocation44_spill] sm:$0xff] }
 0x198   : > { %v5673_v45 = vpop.permute.xlu1 %764  ;;  %10159 = vst [vmem:[#allocation135_spill] sm:$0xff] %v5731_v30  ;;  %v5795_v9 = vmul.f32 %v10166_v55, %v5251_v47 }
 0x199   : > { %10163 = vst [vmem:[#allocation139_spill] sm:$0xff] %v5751_v27  ;;  %v5757_v30 = vpop.permute.xlu0 %762  ;;  %v5771_v27 = vmul.f32 %v10166_v55, %v5222_v11 }
 0x19a   : > { %1444 = vrot.lane.b32.xlu1 %v5084_v38, %s4243_s24  ;;  %v5767_v38 = vmul.f32 %v10155_v54, %v10139_v53  ;;  %v5783_v54 = vmul.f32 %v10166_v55, %v5237_v23  ;;  %10175 = vst [vmem:[#allocation145_spill] sm:$0xff] %v5795_v9  ;;  %v5810_v9 = vmul.f32 %v10168_v46, %v5251_v47 }
 0x19b   : > { %10167 = vst [vmem:[#allocation44_spill] sm:$0xff] %v5771_v27  ;;  %v5791_v27 = vmul.f32 %v10170_v25, %v5237_v23  ;;  %1442 = vrot.lane.b32.xlu0 %v10139_v53, %s4243_s24  ;;  %v5814_v53 = vmul.f32 %v10170_v25, %v5251_v47  ;;  %v10200_v25 = vld [vmem:[#allocation48_spill] sm:$0xff] }
 0x19c   : > { %v5759_v57 = vpop.permute.xlu1 %768  ;;  %10165 = vst [vmem:[#allocation141_spill] sm:$0xff] %v5767_v38  ;;  %10172 = vst [vmem:[#allocation142_spill] sm:$0xff] %v5783_v54  ;;  %v5787_v38 = vmul.f32 %v10168_v46, %v5237_v23  ;;  %v5802_v54 = vstv %s5552_s28  ;;  %s5874_s28 = sld [smem:[#allocation7 + $0x17]]  ;;  %v5902_v46 = vmul.f32 %v10199_v37, %v5489_v5  ;;  %v5906_v26 = vmul.f32 %v10200_v25, %v5489_v5 }
 0x19d   : > { %10174 = vst [vmem:[#allocation144_spill] sm:$0xff] %v5791_v27  ;;  %10176 = vst [vmem:[#allocation146_spill] sm:$0xff] %v5810_v9  ;;  %v5818_v27 = vmul.f32 %v10166_v55, %v5255_v21  ;;  %v5841_v55 = vstv %s5608_s12  ;;  %v5920_v10 = vmul.f32 %v10200_v25, %v5543_v39  ;;  %v5936_v33 = vmul.f32 %v10200_v25, %v5586_v0  ;;  %s5966_s12 = sld [smem:[#allocation7 + $0x4e]] }
 0x19e   : > { %10173 = vst [vmem:[#allocation143_spill] sm:$0xff] %v5787_v38  ;;  %1486 = vrot.lane.b32.xlu1 %v5222_v11, %s4242_s23  ;;  %10177 = vst [vmem:[#allocation147_spill] sm:$0xff] %v5814_v53  ;;  %v5821_v38 = vstv %s5566_s29  ;;  %v5836_v53 = vpop.permute.xlu0 %766  ;;  %s5896_s29 = sld [smem:[#allocation7 + $0x32]]  ;;  %v5947_v39 = vstv %s5804_s6  ;;  %v5955_v5 = vmul.f32 %v10199_v37, %v5671_v7  ;;  %v6010_v17 = vmul.f32 %v10209_v29, %v5759_v57  ;;  %s3971_s6 = sld [smem:[#allocation10 + $0xe]] }
 0x19f   : > { %10178 = vst [vmem:[#allocation148_spill] sm:$0xff] %v5818_v27  ;;  %10179 = vst [vmem:[#allocation149_spill] sm:$0xff] %v5821_v38  ;;  %v5844_v27 = vstv %s5610_s3  ;;  %1484 = vrot.lane.b32.xlu0 %v5237_v23, %s4242_s23  ;;  %s5984_s3 = sld [smem:[#allocation7 + $0x1a]]  ;;  %v6029_v2 = vmul.f32 %v10209_v29, %v5836_v53 }
 0x1a0   : > { %v5838_v9 = vpop.permute.xlu1 %1034  ;;  %10183 = vst [vmem:[#allocation153_spill] sm:$0xff] %v5841_v55  ;;  %10184 = vst [vmem:[#allocation154_spill] sm:$0xff] %v5844_v27  ;;  %v5964_v27 = vstv %s5834_s27  ;;  %v10208_v55 = vld [vmem:[#allocation50_spill] sm:$0xff]  ;;  %s6831_s27 = sld [smem:[#allocation10 + $0x4]] }
 0x1a1   : > { %10202 = vst [vmem:[#allocation48_spill] sm:$0xff] %v5912_v59  ;;  %v5932_v59 = vmul.f32 %v10199_v37, %v5586_v0  ;;  %10204 = vst [vmem:[#allocation49_spill] sm:$0xff] %v5947_v39  ;;  %v5961_v0 = vstv %s5832_s26  ;;  %v5974_v39 = vmul.f32 %v10203_v1, %v5671_v7  ;;  %v5978_v37 = vmul.f32 %v10208_v55, %v5673_v45  ;;  %s3973_s26 = sld [smem:[#allocation10 + $0x44]] }
 0x1a2   : > { %1490 = vrot.lane.b32.xlu1 %v5251_v47, %s4242_s23  ;;  %v1033_v6 = vpop.permute.xlu0 %1032  ;;  %10206 = vst [vmem:[#allocation170_spill] sm:$0xff] %v5961_v0  ;;  %10207 = vst [vmem:[#allocation171_spill] sm:$0xff] %v5964_v27  ;;  %v5982_v0 = vmul.f32 %v10209_v29, %v5673_v45  ;;  %v5992_v1 = vmul.f32 %v10209_v29, %v5757_v30  ;;  %v6006_v61 = vmul.f32 %v10208_v55, %v5759_v57 }
 0x1a3   : > { %1488 = vrot.lane.b32.xlu0 %v5255_v21, %s4242_s23  ;;  %10214 = vst [vmem:[#allocation172_spill] sm:$0xff] %v6029_v2  ;;  %v6049_v29 = vmul.f32 %v5228_v16, %v5838_v9  ;;  %v10251_v2 = vld [vmem:[#allocation56_spill] sm:$0xff] }
 0x1a4   : > { %v1039_v8 = vpop.permute.xlu1 %1038  ;;  %v6032_v31 = vstv %s5896_s29  ;;  %s6835_s29 = sld [smem:[#allocation10 + $0x3a]] }
 0x1a5   : > { %10215 = vst [vmem:[#allocation173_spill] sm:$0xff] %v6032_v31  ;;  %10220 = vst [vmem:[#allocation176_spill] sm:$0xff] %v6049_v29  ;;  %v10221_v31 = vld [vmem:[#allocation54_spill] sm:$0xff]  ;;  %v6068_v29 = vmul.f32 %v5228_v16, %v1039_v8 }
 0x1a6   : > { %1554 = vrot.lane.b32.xlu1 %v5222_v11, %s4243_s24  ;;  %v5970_v11 = vmul.f32 %v10200_v25, %v5671_v7  ;;  %v1037_v27 = vpop.permute.xlu0 %1036  ;;  %v5988_v25 = vmul.f32 %v10208_v55, %v5757_v30  ;;  %v10210_v7 = vld [vmem:[#allocation52_spill] sm:$0xff] }
 0x1a7   : > { %v5996_v12 = vmul.f32 %v10210_v7, %v5757_v30  ;;  %v6000_v32 = vmul.f32 %v10210_v7, %v5673_v45  ;;  %v6014_v3 = vmul.f32 %v10210_v7, %v5759_v57  ;;  %1552 = vrot.lane.b32.xlu0 %v5237_v23, %s4243_s24  ;;  %v6021_v30 = vstv %s5874_s28  ;;  %v10218_v23 = vld [vmem:[#allocation53_spill] sm:$0xff]  ;;  %10227 = vst [vmem:[#allocation181_spill] sm:$0xff] %v6068_v29  ;;  %s6833_s28 = sld [smem:[#allocation10 + $0x1f]] }
 0x1a8   : > { %v1103_v50 = vpop.permute.xlu1 %1102  ;;  %10212 = vst [vmem:[#allocation51_spill] sm:$0xff] %v6021_v30  ;;  %v6025_v45 = vmul.f32 %v10208_v55, %v5836_v53  ;;  %v6035_v57 = vstv %s5898_s30  ;;  %v6045_v55 = vmul.f32 %v10218_v23, %v5838_v9  ;;  %v6053_v30 = vmul.f32 %v10221_v31, %v5838_v9  ;;  %s6847_s30 = sld [smem:[#allocation10 + $0x7]] }
 0x1a9   : > { %10211 = vst [vmem:[#allocation50_spill] sm:$0xff] %v6014_v3  ;;  %10216 = vst [vmem:[#allocation174_spill] sm:$0xff] %v6035_v57  ;;  %v6056_v58 = vmul.f32 %v10218_v23, %v1033_v6  ;;  %v6071_v9 = vmul.f32 %v10221_v31, %v1039_v8  ;;  %v6091_v29 = vstv %s5966_s12  ;;  %s6865_s12 = sld [smem:[#allocation10 + $0x15]] }
 0x1aa   : > { %1558 = vrot.lane.b32.xlu1 %v5251_v47, %s4243_s24  ;;  %10213 = vst [vmem:[#allocation52_spill] sm:$0xff] %v6025_v45  ;;  %v6041_v47 = vmul.f32 %v10210_v7, %v5836_v53  ;;  %10219 = vst [vmem:[#allocation53_spill] sm:$0xff] %v6045_v55  ;;  %v1101_v57 = vpop.permute.xlu0 %1100  ;;  %v6059_v53 = vmul.f32 %v5228_v16, %v1033_v6  ;;  %v6062_v7 = vmul.f32 %v10221_v31, %v1033_v6 }
 0x1ab   : > { %10222 = vst [vmem:[#allocation54_spill] sm:$0xff] %v6053_v30  ;;  %10223 = vst [vmem:[#allocation177_spill] sm:$0xff] %v6056_v58  ;;  %v6065_v55 = vmul.f32 %v10218_v23, %v1039_v8  ;;  %1556 = vrot.lane.b32.xlu0 %v5255_v21, %s4243_s24  ;;  %v6076_v58 = vstv %s5949_s10  ;;  %v6082_v6 = vmul.f32 %v10218_v23, %v1037_v27  ;;  %v10235_v8 = vld [vmem:[#allocation55_spill] sm:$0xff]  ;;  %s6857_s10 = sld [smem:[#allocation10 + $0x22]] }
 0x1ac   : > { %10217 = vst [vmem:[#allocation175_spill] sm:$0xff] %v6041_v47  ;;  %v1107_v38 = vpop.permute.xlu1 %1106  ;;  %10224 = vst [vmem:[#allocation178_spill] sm:$0xff] %v6059_v53  ;;  %v6079_v53 = vstv %s5951_s11  ;;  %v6097_v21 = vmul.f32 %v5243_v18, %v1103_v50  ;;  %s6859_s11 = sld [smem:[#allocation10 + $0x3d]] }
 0x1ad   : > { %10225 = vst [vmem:[#allocation179_spill] sm:$0xff] %v6062_v7  ;;  %10226 = vst [vmem:[#allocation180_spill] sm:$0xff] %v6065_v55  ;;  %v6085_v7 = vmul.f32 %v5228_v16, %v1037_v27  ;;  %v6088_v55 = vmul.f32 %v10221_v31, %v1037_v27  ;;  %v6106_v16 = vmul.f32 %v10235_v8, %v1101_v57 }
 0x1ae   : > { %10228 = vst [vmem:[#allocation182_spill] sm:$0xff] %v6071_v9  ;;  %10229 = vst [vmem:[#allocation183_spill] sm:$0xff] %v6076_v58  ;;  %v6094_v9 = vmul.f32 %v10235_v8, %v1103_v50  ;;  %v1105_v23 = vpop.permute.xlu0 %1104  ;;  %v6109_v27 = vmul.f32 %v5243_v18, %v1101_v57 }
 0x1af   : > { %10230 = vst [vmem:[#allocation184_spill] sm:$0xff] %v6079_v53  ;;  %10231 = vst [vmem:[#allocation185_spill] sm:$0xff] %v6082_v6  ;;  %v6100_v53 = vmul.f32 %v5270_v56, %v1103_v50  ;;  %v6103_v6 = vstv %s5984_s3  ;;  %v6119_v50 = vmul.f32 %v10235_v8, %v1107_v38  ;;  %s6867_s3 = sld [smem:[#allocation10 + $0x30]] }
 0x1b0   : > { %10232 = vst [vmem:[#allocation186_spill] sm:$0xff] %v6085_v7  ;;  %10233 = vst [vmem:[#allocation187_spill] sm:$0xff] %v6088_v55  ;;  %v591_v58 = vpop.permute.xlu1 %590  ;;  %v6116_v55 = vmul.f32 %v5270_v56, %v1101_v57  ;;  %v6124_v7 = vmul.f32 %v5243_v18, %v1107_v38  ;;  %v6134_v57 = vmul.f32 %v10235_v8, %v1105_v23 }
 0x1b1   : > { %10234 = vst [vmem:[#allocation188_spill] sm:$0xff] %v6091_v29  ;;  %10236 = vst [vmem:[#allocation55_spill] sm:$0xff] %v6094_v9  ;;  %v599_v31 = vmul.f32 %v5340_v52, %v591_v58  ;;  %v6113_v29 = vstv %s6002_s5  ;;  %v6146_v8 = vmul.f32 %v5270_v56, %v1105_v23  ;;  %s6877_s5 = sld [smem:[#allocation10 + $0x4b]] }
 0x1b2   : > { %10237 = vst [vmem:[#allocation189_spill] sm:$0xff] %v6097_v21  ;;  %10238 = vst [vmem:[#allocation190_spill] sm:$0xff] %v6100_v53  ;;  %v609_v53 = vmul.f32 %v5353_v63, %v591_v58  ;;  %v6131_v21 = vstv %s6037_s13  ;;  %s6893_s13 = sld [smem:[#allocation10 + $0xa]] }
 0x1b3   : > { %10239 = vst [vmem:[#allocation191_spill] sm:$0xff] %v6103_v6  ;;  %10240 = vst [vmem:[#allocation192_spill] sm:$0xff] %v6106_v16  ;;  %v619_v6 = vmul.f32 %v5404_v41, %v591_v58  ;;  %v6127_v16 = vmul.f32 %v5270_v56, %v1107_v38 }
 0x1b4   : > { %10241 = vst [vmem:[#allocation193_spill] sm:$0xff] %v6109_v27  ;;  %10242 = vst [vmem:[#allocation194_spill] sm:$0xff] %v6113_v29  ;;  %v603_v27 = vadd.f32 %v599_v31, %v5319_v24  ;;  %v6137_v29 = vmul.f32 %v5243_v18, %v1105_v23  ;;  %v595_v9 = vpop.permute.xlu1 %594 }
 0x1b5   : > { %10243 = vst [vmem:[#allocation195_spill] sm:$0xff] %v6116_v55  ;;  %10244 = vst [vmem:[#allocation196_spill] sm:$0xff] %v6119_v50  ;;  %v589_v50 = vpop.permute.xlu0 %588  ;;  %v613_v55 = vadd.f32 %v609_v53, %v5322_v62  ;;  %v623_v58 = vadd.f32 %v619_v6, %v5337_v51  ;;  %v611_v18 = vmul.f32 %v5353_v63, %v595_v9 }
 0x1b6   : > { %10245 = vst [vmem:[#allocation197_spill] sm:$0xff] %v6124_v7  ;;  %10246 = vst [vmem:[#allocation198_spill] sm:$0xff] %v6127_v16  ;;  %v598_v7 = vmul.f32 %v5340_v52, %v589_v50  ;;  %v608_v38 = vmul.f32 %v5353_v63, %v589_v50  ;;  %v618_v31 = vmul.f32 %v5404_v41, %v589_v50 }
 0x1b7   : > { %10247 = vst [vmem:[#allocation199_spill] sm:$0xff] %v6131_v21  ;;  %10248 = vst [vmem:[#allocation200_spill] sm:$0xff] %v6134_v57  ;;  %v601_v21 = vmul.f32 %v5340_v52, %v595_v9  ;;  %v633_v53 = vadd.f32 %v5247_v35, %v603_v27  ;;  %v643_v30 = vadd.f32 %v5259_v22, %v613_v55 }
 0x1b8   : > { %10249 = vst [vmem:[#allocation201_spill] sm:$0xff] %v6137_v29  ;;  %10250 = vst [vmem:[#allocation202_spill] sm:$0xff] %v6146_v8  ;;  %v621_v29 = vmul.f32 %v5404_v41, %v595_v9  ;;  %v602_v6 = vadd.f32 %v598_v7, %v5319_v24  ;;  %v612_v57 = vadd.f32 %v608_v38, %v5322_v62  ;;  %v659_v8 = vpop.permute.xlu1 %658 }
 0x1b9   : > { %v622_v16 = vadd.f32 %v618_v31, %v5337_v51  ;;  %v605_v50 = vadd.f32 %v601_v21, %v5319_v24  ;;  %v615_v47 = vadd.f32 %v611_v18, %v5322_v62  ;;  %v593_v23 = vpop.permute.xlu0 %592  ;;  %v653_v9 = vadd.f32 %v10251_v2, %v623_v58  ;;  %v10252_v21 = vld [vmem:[#allocation57_spill] sm:$0xff]  ;;  %v10253_v18 = vld [vmem:[#allocation58_spill] sm:$0xff] }
 0x1ba   : > { %v625_v56 = vadd.f32 %v621_v29, %v5337_v51  ;;  %v600_v35 = vmul.f32 %v5340_v52, %v593_v23  ;;  %v610_v7 = vmul.f32 %v5353_v63, %v593_v23  ;;  %v620_v27 = vmul.f32 %v5404_v41, %v593_v23 }
 0x1bb   : > { %v667_v38 = vmul.f32 %v5473_v40, %v659_v8  ;;  %v677_v22 = vmul.f32 %v5548_v36, %v659_v8  ;;  %v687_v55 = vmul.f32 %v5633_v28, %v659_v8  ;;  %v632_v31 = vadd.f32 %v10252_v21, %v602_v6 }
 0x1bc   : > { %v642_v29 = vadd.f32 %v10253_v18, %v612_v57  ;;  %v604_v45 = vadd.f32 %v600_v35, %v5319_v24  ;;  %v614_v2 = vadd.f32 %v610_v7, %v5322_v62  ;;  %v624_v52 = vadd.f32 %v620_v27, %v5337_v51  ;;  %v663_v3 = vpop.permute.xlu1 %662  ;;  %v10258_v18 = vld [vmem:[#allocation63_spill] sm:$0xff] }
 0x1bd   : > { %v671_v58 = vadd.f32 %v667_v38, %v633_v53  ;;  %v681_v63 = vadd.f32 %v677_v22, %v643_v30  ;;  %v691_v60 = vadd.f32 %v687_v55, %v653_v9  ;;  %v652_v41 = vadd.f32 %v5284_v34, %v622_v16  ;;  %v657_v23 = vpop.permute.xlu0 %656  ;;  %v10255_v30 = vld [vmem:[#allocation60_spill] sm:$0xff]  ;;  %v10256_v9 = vld [vmem:[#allocation61_spill] sm:$0xff]  ;;  %v10257_v22 = vld [vmem:[#allocation62_spill] sm:$0xff] }
 0x1be   : > { %v635_v20 = vadd.f32 %v10254_v4, %v605_v50  ;;  %v666_v6 = vmul.f32 %v5473_v40, %v657_v23  ;;  %v676_v57 = vmul.f32 %v5548_v36, %v657_v23  ;;  %v686_v24 = vmul.f32 %v5633_v28, %v657_v23 }
 0x1bf   : > { %v709_v8 = vadd.f32 %v5902_v46, %v671_v58  ;;  %v719_v62 = vadd.f32 %v5906_v26, %v681_v63  ;;  %v729_v51 = vadd.f32 %v5928_v42, %v691_v60  ;;  %v645_v53 = vadd.f32 %v10255_v30, %v615_v47 }
 0x1c0   : > { %v655_v34 = vadd.f32 %v10256_v9, %v625_v56  ;;  %v670_v16 = vadd.f32 %v666_v6, %v632_v31  ;;  %v680_v35 = vadd.f32 %v676_v57, %v642_v29  ;;  %v690_v4 = vadd.f32 %v686_v24, %v652_v41  ;;  %v811_v55 = vpop.permute.xlu1 %810 }
 0x1c1   : > { %v669_v50 = vmul.f32 %v5473_v40, %v663_v3  ;;  %v679_v46 = vmul.f32 %v5548_v36, %v663_v3  ;;  %v689_v7 = vmul.f32 %v5633_v28, %v663_v3  ;;  %v661_v27 = vpop.permute.xlu0 %660  ;;  %v634_v38 = vadd.f32 %v5300_v15, %v604_v45 }
 0x1c2   : > { %v644_v26 = vadd.f32 %v10257_v22, %v614_v2  ;;  %v708_v42 = vadd.f32 %v5916_v43, %v670_v16  ;;  %v718_v60 = vadd.f32 %v5920_v10, %v680_v35  ;;  %v728_v47 = vadd.f32 %v5924_v13, %v690_v4  ;;  %v10259_v2 = vld [vmem:[#allocation64_spill] sm:$0xff] }
 0x1c3   : > { %v673_v56 = vadd.f32 %v669_v50, %v635_v20  ;;  %v683_v21 = vadd.f32 %v679_v46, %v645_v53  ;;  %v693_v31 = vadd.f32 %v689_v7, %v655_v34  ;;  %v654_v29 = vadd.f32 %v10258_v18, %v624_v52  ;;  %v10260_v20 = vld [vmem:[#allocation65_spill] sm:$0xff]  ;;  %v10262_v34 = vld [vmem:[#allocation67_spill] sm:$0xff]  ;;  %v10263_v16 = vld [vmem:[#allocation68_spill] sm:$0xff] }
 0x1c4   : > { %v668_v58 = vmul.f32 %v5473_v40, %v661_v27  ;;  %v678_v15 = vmul.f32 %v5548_v36, %v661_v27  ;;  %v688_v45 = vmul.f32 %v5633_v28, %v661_v27  ;;  %v739_v63 = vadd.f32 %v10259_v2, %v709_v8  ;;  %v815_v6 = vpop.permute.xlu1 %814  ;;  %v10261_v40 = vld [vmem:[#allocation66_spill] sm:$0xff]  ;;  %v10264_v50 = vld [vmem:[#allocation69_spill] sm:$0xff] }
 0x1c5   : > { %v711_v3 = vadd.f32 %v5932_v59, %v673_v56  ;;  %v721_v43 = vadd.f32 %v5936_v33, %v683_v21  ;;  %v731_v10 = vadd.f32 %v5940_v44, %v693_v31  ;;  %v749_v41 = vadd.f32 %v10260_v20, %v719_v62  ;;  %v809_v23 = vpop.permute.xlu0 %808 }
 0x1c6   : > { %v672_v13 = vadd.f32 %v668_v58, %v634_v38  ;;  %v682_v52 = vadd.f32 %v678_v15, %v644_v26  ;;  %v692_v57 = vadd.f32 %v688_v45, %v654_v29  ;;  %v759_v24 = vadd.f32 %v10261_v40, %v729_v51  ;;  %v10265_v38 = vld [vmem:[#allocation70_spill] sm:$0xff]  ;;  %v10267_v15 = vld [vmem:[#allocation71_spill] sm:$0xff]  ;;  %v10268_v45 = vld [vmem:[#allocation72_spill] sm:$0xff] }
 0x1c7   : > { %v777_v59 = vadd.f32 %v5978_v37, %v739_v63  ;;  %v787_v28 = vadd.f32 %v5982_v0, %v749_v41  ;;  %v819_v8 = vmul.f32 %v5720_v49, %v811_v55  ;;  %v829_v33 = vmul.f32 %v5723_v48, %v811_v55  ;;  %v10266_v58 = vld [vmem:[#allocation50_spill] sm:$0xff]  ;;  %v10269_v63 = vld [vmem:[#allocation73_spill] sm:$0xff]  ;;  %v10270_v41 = vld [vmem:[#allocation52_spill] sm:$0xff] }
 0x1c8   : > { %v710_v36 = vadd.f32 %v5955_v5, %v672_v13  ;;  %v720_v44 = vadd.f32 %v5970_v11, %v682_v52  ;;  %v730_v62 = vadd.f32 %v5974_v39, %v692_v57  ;;  %v797_v30 = vadd.f32 %v6000_v32, %v759_v24  ;;  %v879_v0 = vpop.permute.xlu1 %878  ;;  %v10272_v57 = vld [vmem:[#allocation175_spill] sm:$0xff] }
 0x1c9   : > { %v839_v53 = vmul.f32 %v5802_v54, %v811_v55  ;;  %v823_v9 = vadd.f32 %v819_v8, %v777_v59  ;;  %v833_v51 = vadd.f32 %v829_v33, %v787_v28  ;;  %v738_v37 = vadd.f32 %v10262_v34, %v708_v42  ;;  %v813_v35 = vpop.permute.xlu0 %812  ;;  %v10274_v8 = vld [vmem:[#allocation75_spill] sm:$0xff] }
 0x1ca   : > { %v748_v5 = vadd.f32 %v10263_v16, %v718_v60  ;;  %v758_v46 = vadd.f32 %v10264_v50, %v728_v47  ;;  %v818_v7 = vmul.f32 %v5720_v49, %v809_v23  ;;  %v828_v11 = vmul.f32 %v5723_v48, %v809_v23  ;;  %v10278_v50 = vld [vmem:[#allocation151_spill] sm:$0xff] }
 0x1cb   : > { %v843_v4 = vadd.f32 %v839_v53, %v797_v30  ;;  %v776_v39 = vadd.f32 %v5988_v25, %v738_v37  ;;  %v838_v27 = vmul.f32 %v5802_v54, %v809_v23  ;;  %v741_v22 = vadd.f32 %v10265_v38, %v711_v3  ;;  %v10276_v30 = vld [vmem:[#allocation149_spill] sm:$0xff]  ;;  %v10277_v37 = vld [vmem:[#allocation150_spill] sm:$0xff] }
 0x1cc   : > { %v786_v32 = vadd.f32 %v5992_v1, %v748_v5  ;;  %v796_v26 = vadd.f32 %v5996_v12, %v758_v46  ;;  %v751_v55 = vadd.f32 %v5361_v14, %v721_v43  ;;  %v761_v42 = vadd.f32 %v5365_v19, %v731_v10  ;;  %v883_v1 = vpop.permute.xlu1 %882 }
 0x1cd   : > { %v821_v60 = vmul.f32 %v5720_v49, %v815_v6  ;;  %v822_v47 = vadd.f32 %v818_v7, %v776_v39  ;;  %v779_v21 = vadd.f32 %v6006_v61, %v741_v22  ;;  %v831_v25 = vmul.f32 %v5723_v48, %v815_v6  ;;  %v877_v31 = vpop.permute.xlu0 %876  ;;  %v10279_v7 = vld [vmem:[#allocation77_spill] sm:$0xff] }
 0x1ce   : > { %v832_v56 = vadd.f32 %v828_v11, %v786_v32  ;;  %v842_v18 = vadd.f32 %v838_v27, %v796_v26  ;;  %v789_v29 = vadd.f32 %v6010_v17, %v751_v55  ;;  %v799_v3 = vadd.f32 %v10266_v58, %v761_v42  ;;  %v10271_v17 = vld [vmem:[#allocation172_spill] sm:$0xff] }
 0x1cf   : > { %v841_v12 = vmul.f32 %v5802_v54, %v815_v6  ;;  %v825_v14 = vadd.f32 %v821_v60, %v779_v21  ;;  %v740_v19 = vadd.f32 %v10267_v15, %v710_v36  ;;  %v750_v2 = vadd.f32 %v10268_v45, %v720_v44  ;;  %v10273_v36 = vld [vmem:[#allocation74_spill] sm:$0xff]  ;;  %v10275_v44 = vld [vmem:[#allocation76_spill] sm:$0xff]  ;;  %v10283_v60 = vld [vmem:[#allocation81_spill] sm:$0xff] }
 0x1d0   : > { %v760_v43 = vadd.f32 %v10269_v63, %v730_v62  ;;  %v835_v10 = vadd.f32 %v831_v25, %v789_v29  ;;  %v820_v13 = vmul.f32 %v5720_v49, %v813_v35  ;;  %v830_v20 = vmul.f32 %v5723_v48, %v813_v35  ;;  %v929_v59 = vpop.permute.xlu1 %928  ;;  %v10282_v55 = vld [vmem:[#allocation80_spill] sm:$0xff]  ;;  %v10284_v25 = vld [vmem:[#allocation82_spill] sm:$0xff] }
 0x1d1   : > { %v845_v61 = vadd.f32 %v841_v12, %v799_v3  ;;  %v778_v23 = vadd.f32 %v10270_v41, %v740_v19  ;;  %v788_v52 = vadd.f32 %v10271_v17, %v750_v2  ;;  %v840_v6 = vmul.f32 %v5802_v54, %v813_v35  ;;  %v881_v24 = vpop.permute.xlu0 %880  ;;  %v10280_v35 = vld [vmem:[#allocation78_spill] sm:$0xff]  ;;  %v10285_v12 = vld [vmem:[#allocation83_spill] sm:$0xff]  ;;  %v10286_v45 = vld [vmem:[#allocation84_spill] sm:$0xff] }
 0x1d2   : > { %v798_v40 = vadd.f32 %v10272_v57, %v760_v43  ;;  %v853_v28 = vadd.f32 %v10273_v36, %v823_v9  ;;  %v863_v33 = vadd.f32 %v10274_v8, %v833_v51  ;;  %v873_v62 = vadd.f32 %v10275_v44, %v843_v4  ;;  %v10281_v9 = vld [vmem:[#allocation79_spill] sm:$0xff]  ;;  %v10287_v2 = vld [vmem:[#allocation85_spill] sm:$0xff]  ;;  %v10288_v17 = vld [vmem:[#allocation152_spill] sm:$0xff] }
 0x1d3   : > { %v887_v49 = vmul.f32 %v10276_v30, %v879_v0  ;;  %v824_v53 = vadd.f32 %v820_v13, %v778_v23  ;;  %v834_v48 = vadd.f32 %v830_v20, %v788_v52  ;;  %v897_v16 = vmul.f32 %v10277_v37, %v879_v0  ;;  %v10289_v52 = vld [vmem:[#allocation153_spill] sm:$0xff] }
 0x1d4   : > { %v844_v34 = vadd.f32 %v840_v6, %v798_v40  ;;  %v907_v46 = vmul.f32 %v10278_v50, %v879_v0  ;;  %v852_v54 = vadd.f32 %v10279_v7, %v822_v47  ;;  %v862_v11 = vadd.f32 %v10280_v35, %v832_v56  ;;  %v933_v38 = vpop.permute.xlu1 %932  ;;  %v10290_v40 = vld [vmem:[#allocation154_spill] sm:$0xff] }
 0x1d5   : > { %v891_v5 = vadd.f32 %v887_v49, %v853_v28  ;;  %v901_v39 = vadd.f32 %v897_v16, %v863_v33  ;;  %v872_v32 = vadd.f32 %v10281_v9, %v842_v18  ;;  %v886_v51 = vmul.f32 %v10276_v30, %v877_v31  ;;  %v927_v27 = vpop.permute.xlu0 %926 }
 0x1d6   : > { %v896_v4 = vmul.f32 %v10277_v37, %v877_v31  ;;  %v911_v22 = vadd.f32 %v907_v46, %v873_v62  ;;  %v906_v26 = vmul.f32 %v10278_v50, %v877_v31  ;;  %v855_v42 = vadd.f32 %v10282_v55, %v825_v14 }
 0x1d7   : > { %v865_v0 = vadd.f32 %v10283_v60, %v835_v10  ;;  %v890_v21 = vadd.f32 %v886_v51, %v852_v54  ;;  %v875_v56 = vadd.f32 %v10284_v25, %v845_v61  ;;  %v889_v29 = vmul.f32 %v10276_v30, %v883_v1  ;;  %v10294_v60 = vld [vmem:[#allocation155_spill] sm:$0xff]  ;;  %v10296_v25 = vld [vmem:[#allocation157_spill] sm:$0xff] }
 0x1d8   : > { %v900_v47 = vadd.f32 %v896_v4, %v862_v11  ;;  %v910_v18 = vadd.f32 %v906_v26, %v872_v32  ;;  %v899_v58 = vmul.f32 %v10277_v37, %v883_v1  ;;  %v909_v3 = vmul.f32 %v10278_v50, %v883_v1  ;;  %v997_v10 = vpop.permute.xlu1 %996  ;;  %v10291_v11 = vld [vmem:[#allocation86_spill] sm:$0xff]  ;;  %v10292_v4 = vld [vmem:[#allocation87_spill] sm:$0xff] }
 0x1d9   : > { %v854_v15 = vadd.f32 %v10285_v12, %v824_v53  ;;  %v893_v19 = vadd.f32 %v889_v29, %v855_v42  ;;  %v864_v31 = vadd.f32 %v10286_v45, %v834_v48  ;;  %v874_v14 = vadd.f32 %v10287_v2, %v844_v34  ;;  %v931_v43 = vpop.permute.xlu0 %930  ;;  %v10293_v42 = vld [vmem:[#allocation88_spill] sm:$0xff]  ;;  %v10297_v29 = vld [vmem:[#allocation89_spill] sm:$0xff]  ;;  %v10299_v12 = vld [vmem:[#allocation91_spill] sm:$0xff] }
 0x1da   : > { %v888_v63 = vmul.f32 %v10276_v30, %v881_v24  ;;  %v903_v13 = vadd.f32 %v899_v58, %v865_v0  ;;  %v913_v61 = vadd.f32 %v909_v3, %v875_v56  ;;  %v898_v20 = vmul.f32 %v10277_v37, %v881_v24  ;;  %v10298_v58 = vld [vmem:[#allocation90_spill] sm:$0xff] }
 0x1db   : > { %v908_v41 = vmul.f32 %v10278_v50, %v881_v24  ;;  %v937_v1 = vmul.f32 %v10288_v17, %v929_v59  ;;  %v947_v57 = vmul.f32 %v10289_v52, %v929_v59  ;;  %v957_v6 = vmul.f32 %v10290_v40, %v929_v59 }
 0x1dc   : > { %v892_v23 = vadd.f32 %v888_v63, %v854_v15  ;;  %v902_v36 = vadd.f32 %v898_v20, %v864_v31  ;;  %v936_v8 = vmul.f32 %v10288_v17, %v927_v27  ;;  %v946_v33 = vmul.f32 %v10289_v52, %v927_v27  ;;  %v1001_v24 = vpop.permute.xlu1 %1000 }
 0x1dd   : > { %v912_v28 = vadd.f32 %v908_v41, %v874_v14  ;;  %v941_v44 = vadd.f32 %v937_v1, %v891_v5  ;;  %v951_v62 = vadd.f32 %v947_v57, %v901_v39  ;;  %v961_v30 = vadd.f32 %v957_v6, %v911_v22  ;;  %v995_v53 = vpop.permute.xlu0 %994  ;;  %v10303_v1 = vld [vmem:[#allocation176_spill] sm:$0xff]  ;;  %v10304_v6 = vld [vmem:[#allocation54_spill] sm:$0xff] }
 0x1de   : > { %v956_v49 = vmul.f32 %v10290_v40, %v927_v27  ;;  %v940_v48 = vadd.f32 %v936_v8, %v890_v21  ;;  %v950_v34 = vadd.f32 %v946_v33, %v900_v47  ;;  %v939_v37 = vmul.f32 %v10288_v17, %v933_v38  ;;  %v10295_v21 = vld [vmem:[#allocation156_spill] sm:$0xff]  ;;  %v10305_v8 = vld [vmem:[#allocation94_spill] sm:$0xff] }
 0x1df   : > { %v949_v16 = vmul.f32 %v10289_v52, %v933_v38  ;;  %v959_v50 = vmul.f32 %v10290_v40, %v933_v38  ;;  %v938_v46 = vmul.f32 %v10288_v17, %v931_v43  ;;  %v948_v7 = vmul.f32 %v10289_v52, %v931_v43 }
 0x1e0   : > { %v960_v59 = vadd.f32 %v956_v49, %v910_v18  ;;  %v943_v5 = vadd.f32 %v939_v37, %v893_v19  ;;  %v958_v35 = vmul.f32 %v10290_v40, %v931_v43  ;;  %v971_v39 = vadd.f32 %v10291_v11, %v941_v44  ;;  %v1149_v26 = vpop.permute.xlu1 %1148  ;;  %v10300_v43 = vld [vmem:[#allocation92_spill] sm:$0xff]  ;;  %v10307_v49 = vld [vmem:[#allocation178_spill] sm:$0xff]  ;;  %v10308_v37 = vld [vmem:[#allocation179_spill] sm:$0xff] }
 0x1e1   : > { %v953_v54 = vadd.f32 %v949_v16, %v903_v13  ;;  %v963_v9 = vadd.f32 %v959_v50, %v913_v61  ;;  %v942_v32 = vadd.f32 %v938_v46, %v892_v23  ;;  %v952_v51 = vadd.f32 %v948_v7, %v902_v36  ;;  %v999_v22 = vpop.permute.xlu0 %998  ;;  %v10301_v61 = vld [vmem:[#allocation93_spill] sm:$0xff]  ;;  %v10309_v50 = vld [vmem:[#allocation95_spill] sm:$0xff]  ;;  %v10310_v7 = vld [vmem:[#allocation96_spill] sm:$0xff] }
 0x1e2   : > { %v981_v27 = vadd.f32 %v10292_v4, %v951_v62  ;;  %v962_v55 = vadd.f32 %v958_v35, %v912_v28  ;;  %v991_v38 = vadd.f32 %v10293_v42, %v961_v30  ;;  %v1005_v0 = vmul.f32 %v10294_v60, %v997_v10  ;;  %v10302_v23 = vld [vmem:[#allocation53_spill] sm:$0xff]  ;;  %v10312_v42 = vld [vmem:[#allocation180_spill] sm:$0xff] }
 0x1e3   : > { %v1015_v47 = vmul.f32 %v10295_v21, %v997_v10  ;;  %v1025_v56 = vmul.f32 %v10296_v25, %v997_v10  ;;  %v970_v18 = vadd.f32 %v10297_v29, %v940_v48  ;;  %v980_v3 = vadd.f32 %v10298_v58, %v950_v34  ;;  %v10306_v62 = vld [vmem:[#allocation177_spill] sm:$0xff]  ;;  %v10315_v29 = vld [vmem:[#allocation182_spill] sm:$0xff] }
 0x1e4   : > { %v990_v15 = vadd.f32 %v10299_v12, %v960_v59  ;;  %v1009_v19 = vadd.f32 %v1005_v0, %v971_v39  ;;  %v1004_v31 = vmul.f32 %v10294_v60, %v995_v53  ;;  %v1014_v2 = vmul.f32 %v10295_v21, %v995_v53  ;;  %v6284_v41 = vpop.permute.xlu1 %1152 }
 0x1e5   : > { %v1019_v45 = vadd.f32 %v1015_v47, %v981_v27  ;;  %v1029_v14 = vadd.f32 %v1025_v56, %v991_v38  ;;  %v1024_v63 = vmul.f32 %v10296_v25, %v995_v53  ;;  %v973_v13 = vadd.f32 %v10300_v43, %v943_v5  ;;  %v1147_v10 = vpop.permute.xlu0 %1146  ;;  %v10313_v47 = vld [vmem:[#allocation98_spill] sm:$0xff]  ;;  %v10314_v56 = vld [vmem:[#allocation181_spill] sm:$0xff] }
 0x1e6   : > { %v983_v20 = vadd.f32 %v10301_v61, %v953_v54  ;;  %v1047_v17 = vadd.f32 %v10302_v23, %v1009_v19  ;;  %v1008_v57 = vadd.f32 %v1004_v31, %v970_v18  ;;  %v1018_v40 = vadd.f32 %v1014_v2, %v980_v3  ;;  %v10316_v3 = vld [vmem:[#allocation99_spill] sm:$0xff]  ;;  %v10321_v43 = vld [vmem:[#allocation158_spill] sm:$0xff] }
 0x1e7   : > { %v1057_v52 = vadd.f32 %v10303_v1, %v1019_v45  ;;  %v1067_v36 = vadd.f32 %v10304_v6, %v1029_v14  ;;  %v1028_v28 = vadd.f32 %v1024_v63, %v990_v15  ;;  %v993_v33 = vadd.f32 %v10305_v8, %v963_v9  ;;  %v10311_v9 = vld [vmem:[#allocation97_spill] sm:$0xff]  ;;  %v10322_v61 = vld [vmem:[#allocation159_spill] sm:$0xff]  ;;  %v10323_v23 = vld [vmem:[#allocation186_spill] sm:$0xff] }
 0x1e8   : > { %v1007_v44 = vmul.f32 %v10294_v60, %v1001_v24  ;;  %v1046_v30 = vadd.f32 %v10306_v62, %v1008_v57  ;;  %v1056_v53 = vadd.f32 %v10307_v49, %v1018_v40  ;;  %v1017_v48 = vmul.f32 %v10295_v21, %v1001_v24  ;;  %v6300_v35 = vpop.permute.xlu1 %1216  ;;  %v10320_v14 = vld [vmem:[#allocation189_spill] sm:$0xff]  ;;  %v10324_v1 = vld [vmem:[#allocation187_spill] sm:$0xff]  ;;  %v10325_v57 = vld [vmem:[#allocation190_spill] sm:$0xff] }
 0x1e9   : > { %v1027_v34 = vmul.f32 %v10296_v25, %v1001_v24  ;;  %v1066_v16 = vadd.f32 %v10308_v37, %v1028_v28  ;;  %v972_v46 = vadd.f32 %v10309_v50, %v942_v32  ;;  %v982_v5 = vadd.f32 %v10310_v7, %v952_v51  ;;  %v6298_v54 = vpop.permute.xlu0 %1150  ;;  %v10326_v6 = vld [vmem:[#allocation160_spill] sm:$0xff]  ;;  %v10328_v62 = vld [vmem:[#allocation102_spill] sm:$0xff] }
 0x1ea   : > { %v1011_v59 = vadd.f32 %v1007_v44, %v973_v13  ;;  %v1021_v11 = vadd.f32 %v1017_v48, %v983_v20  ;;  %v992_v4 = vadd.f32 %v10311_v9, %v962_v55  ;;  %v1006_v27 = vmul.f32 %v10294_v60, %v999_v22  ;;  %v10317_v55 = vld [vmem:[#allocation100_spill] sm:$0xff]  ;;  %v10318_v60 = vld [vmem:[#allocation55_spill] sm:$0xff] }
 0x1eb   : > { %v1031_v39 = vadd.f32 %v1027_v34, %v993_v33  ;;  %v1016_v24 = vmul.f32 %v10295_v21, %v999_v22  ;;  %v1026_v0 = vmul.f32 %v10296_v25, %v999_v22  ;;  %v1077_v32 = vadd.f32 %v10313_v47, %v1047_v17  ;;  %v10319_v22 = vld [vmem:[#allocation185_spill] sm:$0xff]  ;;  %v10329_v34 = vld [vmem:[#allocation103_spill] sm:$0xff] }
 0x1ec   : > { %v1049_v38 = vadd.f32 %v10312_v42, %v1011_v59  ;;  %v1059_v51 = vadd.f32 %v10314_v56, %v1021_v11  ;;  %v1010_v58 = vadd.f32 %v1006_v27, %v972_v46  ;;  %v1087_v12 = vadd.f32 %v10316_v3, %v1057_v52  ;;  %v6315_v21 = vpop.permute.xlu1 %1220  ;;  %v10327_v33 = vld [vmem:[#allocation101_spill] sm:$0xff] }
 0x1ed   : > { %v1069_v18 = vadd.f32 %v10315_v29, %v1031_v39  ;;  %v1020_v15 = vadd.f32 %v1016_v24, %v982_v5  ;;  %v1030_v19 = vadd.f32 %v1026_v0, %v992_v4  ;;  %v1097_v45 = vadd.f32 %v10317_v55, %v1067_v36  ;;  %v6313_v2 = vpop.permute.xlu0 %1214  ;;  %v10330_v5 = vld [vmem:[#allocation192_spill] sm:$0xff]  ;;  %v10334_v42 = vld [vmem:[#allocation105_spill] sm:$0xff]  ;;  %v10335_v24 = vld [vmem:[#allocation106_spill] sm:$0xff] }
 0x1ee   : > { %v1115_v31 = vadd.f32 %v10318_v60, %v1077_v32  ;;  %v1048_v25 = vadd.f32 %v10319_v22, %v1010_v58  ;;  %v1125_v63 = vadd.f32 %v10320_v14, %v1087_v12  ;;  %v1157_v13 = vmul.f32 %v10321_v43, %v1149_v26  ;;  %v10336_v29 = vld [vmem:[#allocation196_spill] sm:$0xff]  ;;  %v10339_v60 = vld [vmem:[#allocation107_spill] sm:$0xff] }
 0x1ef   : > { %v1167_v20 = vmul.f32 %v10322_v61, %v1149_v26  ;;  %v1058_v17 = vadd.f32 %v10323_v23, %v1020_v15  ;;  %v1068_v52 = vadd.f32 %v10324_v1, %v1030_v19  ;;  %v1135_v40 = vadd.f32 %v10325_v57, %v1097_v45  ;;  %v10340_v22 = vld [vmem:[#allocation108_spill] sm:$0xff] }
 0x1f0   : > { %v1177_v36 = vmul.f32 %v10326_v6, %v1149_v26  ;;  %v1161_v28 = vadd.f32 %v1157_v13, %v1115_v31  ;;  %v1076_v44 = vadd.f32 %v10327_v33, %v1046_v30  ;;  %v1086_v49 = vadd.f32 %v10328_v62, %v1056_v53  ;;  %v6332_v7 = vpop.permute.xlu1 %1266  ;;  %v10331_v26 = vld [vmem:[#allocation193_spill] sm:$0xff]  ;;  %v10332_v30 = vld [vmem:[#allocation104_spill] sm:$0xff]  ;;  %v10333_v53 = vld [vmem:[#allocation195_spill] sm:$0xff] }
 0x1f1   : > { %v1171_v8 = vadd.f32 %v1167_v20, %v1125_v63  ;;  %v1096_v37 = vadd.f32 %v10329_v34, %v1066_v16  ;;  %v1156_v59 = vmul.f32 %v10321_v43, %v1147_v10  ;;  %v1166_v50 = vmul.f32 %v10322_v61, %v1147_v10  ;;  %v6330_v46 = vpop.permute.xlu0 %1218  ;;  %v10341_v63 = vld [vmem:[#allocation109_spill] sm:$0xff] }
 0x1f2   : > { %v1181_v48 = vadd.f32 %v1177_v36, %v1135_v40  ;;  %v1114_v11 = vadd.f32 %v10330_v5, %v1076_v44  ;;  %v1124_v39 = vadd.f32 %v10331_v26, %v1086_v49  ;;  %v1176_v9 = vmul.f32 %v10326_v6, %v1147_v10  ;;  %v10337_v10 = vld [vmem:[#allocation197_spill] sm:$0xff]  ;;  %v10344_v44 = vld [vmem:[#allocation202_spill] sm:$0xff] }
 0x1f3   : > { %v1079_v4 = vadd.f32 %v10332_v30, %v1049_v38  ;;  %v1134_v27 = vadd.f32 %v10333_v53, %v1096_v37  ;;  %v1089_v16 = vadd.f32 %v10334_v42, %v1059_v51  ;;  %v1099_v0 = vadd.f32 %v10335_v24, %v1069_v18  ;;  %v10338_v38 = vld [vmem:[#allocation198_spill] sm:$0xff]  ;;  %v10343_v36 = vld [vmem:[#allocation201_spill] sm:$0xff]  ;;  %v10347_v37 = vld [vmem:[#allocation112_spill] sm:$0xff] }
 0x1f4   : > { %v1159_v47 = vmul.f32 %v10321_v43, %v6284_v41  ;;  %v1160_v32 = vadd.f32 %v1156_v59, %v1114_v11  ;;  %v1170_v56 = vadd.f32 %v1166_v50, %v1124_v39  ;;  %v1169_v3 = vmul.f32 %v10322_v61, %v6284_v41  ;;  %v6352_v18 = vpop.permute.xlu1 %1270  ;;  %v10352_v53 = vld [vmem:[#allocation114_spill] sm:$0xff]  ;;  %v10353_v42 = vld [vmem:[#allocation115_spill] sm:$0xff] }
 0x1f5   : > { %v1117_v58 = vadd.f32 %v10336_v29, %v1079_v4  ;;  %v1180_v12 = vadd.f32 %v1176_v9, %v1134_v27  ;;  %v1127_v15 = vadd.f32 %v10337_v10, %v1089_v16  ;;  %v1137_v19 = vadd.f32 %v10338_v38, %v1099_v0  ;;  %v6350_v55 = vpop.permute.xlu0 %1264  ;;  %v10349_v9 = vld [vmem:[#allocation162_spill] sm:$0xff] }
 0x1f6   : > { %v1179_v51 = vmul.f32 %v10326_v6, %v6284_v41  ;;  %v1078_v31 = vadd.f32 %v10339_v60, %v1048_v25  ;;  %v1088_v14 = vadd.f32 %v10340_v22, %v1058_v17  ;;  %v1098_v13 = vadd.f32 %v10341_v63, %v1068_v52  ;;  %v10342_v41 = vld [vmem:[#allocation200_spill] sm:$0xff]  ;;  %v10345_v17 = vld [vmem:[#allocation110_spill] sm:$0xff]  ;;  %v10346_v52 = vld [vmem:[#allocation111_spill] sm:$0xff] }
 0x1f7   : > { %v1163_v45 = vadd.f32 %v1159_v47, %v1117_v58  ;;  %v1173_v20 = vadd.f32 %v1169_v3, %v1127_v15  ;;  %v1158_v1 = vmul.f32 %v10321_v43, %v6298_v54  ;;  %v1168_v57 = vmul.f32 %v10322_v61, %v6298_v54  ;;  %v10348_v43 = vld [vmem:[#allocation161_spill] sm:$0xff]  ;;  %v10354_v58 = vld [vmem:[#allocation116_spill] sm:$0xff]  ;;  %v10356_v38 = vld [vmem:[#allocation118_spill] sm:$0xff] }
 0x1f8   : > { %v1183_v23 = vadd.f32 %v1179_v51, %v1137_v19  ;;  %v1116_v40 = vadd.f32 %v10342_v41, %v1078_v31  ;;  %v1126_v33 = vadd.f32 %v10343_v36, %v1088_v14  ;;  %v1136_v62 = vadd.f32 %v10344_v44, %v1098_v13  ;;  %v6371_v61 = vpop.permute.xlu1 %1334  ;;  %v10358_v63 = vld [vmem:[#allocation120_spill] sm:$0xff] }
 0x1f9   : > { %v1178_v25 = vmul.f32 %v10326_v6, %v6298_v54  ;;  %v1191_v49 = vadd.f32 %v10345_v17, %v1161_v28  ;;  %v1201_v34 = vadd.f32 %v10346_v52, %v1171_v8  ;;  %v1211_v59 = vadd.f32 %v10347_v37, %v1181_v48  ;;  %v1269_v5 = vpop.permute.xlu0 %1268  ;;  %v10350_v54 = vld [vmem:[#allocation165_spill] sm:$0xff]  ;;  %v10361_v17 = vld [vmem:[#allocation167_spill] sm:$0xff]  ;;  %v10362_v52 = vld [vmem:[#allocation168_spill] sm:$0xff] }
 0x1fa   : > { %v1225_v50 = vmul.f32 %v10348_v43, %v6300_v35  ;;  %v1162_v11 = vadd.f32 %v1158_v1, %v1116_v40  ;;  %v1172_v26 = vadd.f32 %v1168_v57, %v1126_v33  ;;  %v1235_v30 = vmul.f32 %v10349_v9, %v6300_v35  ;;  %v10351_v28 = vld [vmem:[#allocation113_spill] sm:$0xff] }
 0x1fb   : > { %v1182_v39 = vadd.f32 %v1178_v25, %v1136_v62  ;;  %v1245_v6 = vmul.f32 %v10350_v54, %v6300_v35  ;;  %v1190_v8 = vadd.f32 %v10351_v28, %v1160_v32  ;;  %v1200_v48 = vadd.f32 %v10352_v53, %v1170_v56  ;;  %v10355_v35 = vld [vmem:[#allocation117_spill] sm:$0xff]  ;;  %v10360_v62 = vld [vmem:[#allocation166_spill] sm:$0xff] }
 0x1fc   : > { %v1229_v4 = vadd.f32 %v1225_v50, %v1191_v49  ;;  %v1239_v27 = vadd.f32 %v1235_v30, %v1201_v34  ;;  %v1210_v16 = vadd.f32 %v10353_v42, %v1180_v12  ;;  %v1224_v24 = vmul.f32 %v10348_v43, %v6313_v2  ;;  %v6390_v56 = vpop.permute.xlu1 %1338 }
 0x1fd   : > { %v1234_v0 = vmul.f32 %v10349_v9, %v6313_v2  ;;  %v1249_v47 = vadd.f32 %v1245_v6, %v1211_v59  ;;  %v1244_v29 = vmul.f32 %v10350_v54, %v6313_v2  ;;  %v1193_v3 = vadd.f32 %v10354_v58, %v1163_v45  ;;  %v6388_v32 = vpop.permute.xlu0 %1332  ;;  %v10357_v45 = vld [vmem:[#allocation119_spill] sm:$0xff] }
 0x1fe   : > { %v1203_v10 = vadd.f32 %v10355_v35, %v1173_v20  ;;  %v1228_v15 = vadd.f32 %v1224_v24, %v1190_v8  ;;  %v1213_v19 = vadd.f32 %v10356_v38, %v1183_v23  ;;  %v1227_v51 = vmul.f32 %v10348_v43, %v6315_v21  ;;  %v10359_v20 = vld [vmem:[#allocation121_spill] sm:$0xff]  ;;  %v10364_v58 = vld [vmem:[#allocation123_spill] sm:$0xff]  ;;  %v10367_v38 = vld [vmem:[#allocation48_spill] sm:$0xff] }
 0x1ff   : > { %v1238_v12 = vadd.f32 %v1234_v0, %v1200_v48  ;;  %v1248_v60 = vadd.f32 %v1244_v29, %v1210_v16  ;;  %v1237_v31 = vmul.f32 %v10349_v9, %v6315_v21  ;;  %v1247_v2 = vmul.f32 %v10350_v54, %v6315_v21  ;;  %v10363_v16 = vld [vmem:[#allocation122_spill] sm:$0xff] }
 0x200   : > { %v1192_v22 = vadd.f32 %v10357_v45, %v1162_v11  ;;  %v1231_v14 = vadd.f32 %v1227_v51, %v1193_v3  ;;  %v1202_v13 = vadd.f32 %v10358_v63, %v1172_v26  ;;  %v1212_v1 = vadd.f32 %v10359_v20, %v1182_v39  ;;  %v6410_v21 = vpop.permute.xlu1 %1372  ;;  %v10370_v45 = vld [vmem:[#allocation125_spill] sm:$0xff] }
 0x201   : > { %v1226_v23 = vmul.f32 %v10348_v43, %v6330_v46  ;;  %v1241_v57 = vadd.f32 %v1237_v31, %v1203_v10  ;;  %v1251_v41 = vadd.f32 %v1247_v2, %v1213_v19  ;;  %v1236_v40 = vmul.f32 %v10349_v9, %v6330_v46  ;;  %v6408_v33 = vpop.permute.xlu0 %1336  ;;  %v10365_v10 = vld [vmem:[#allocation41_spill] sm:$0xff]  ;;  %v10369_v31 = vld [vmem:[#allocation124_spill] sm:$0xff] }
 0x202   : > { %v1246_v36 = vmul.f32 %v10350_v54, %v6330_v46  ;;  %v1275_v25 = vmul.f32 %v10360_v62, %v6332_v7  ;;  %v1285_v49 = vmul.f32 %v10361_v17, %v6332_v7  ;;  %v1295_v34 = vmul.f32 %v10362_v52, %v6332_v7 }
 0x203   : > { %v1230_v44 = vadd.f32 %v1226_v23, %v1192_v22  ;;  %v1240_v37 = vadd.f32 %v1236_v40, %v1202_v13  ;;  %v1274_v43 = vmul.f32 %v10360_v62, %v6350_v55  ;;  %v1284_v46 = vmul.f32 %v10361_v17, %v6350_v55 }
 0x204   : > { %v1250_v59 = vadd.f32 %v1246_v36, %v1212_v1  ;;  %v1279_v50 = vadd.f32 %v1275_v25, %v1229_v4  ;;  %v1289_v11 = vadd.f32 %v1285_v49, %v1239_v27  ;;  %v1299_v26 = vadd.f32 %v1295_v34, %v1249_v47  ;;  %v6428_v28 = vpop.permute.xlu1 %1376  ;;  %v10374_v49 = vld [vmem:[#allocation129_spill] sm:$0xff] }
 0x205   : > { %v1294_v39 = vmul.f32 %v10362_v52, %v6350_v55  ;;  %v1278_v9 = vadd.f32 %v1274_v43, %v1228_v15  ;;  %v1288_v30 = vadd.f32 %v1284_v46, %v1238_v12  ;;  %v1277_v54 = vmul.f32 %v10360_v62, %v6352_v18  ;;  %v1371_v6 = vpop.permute.xlu0 %1370  ;;  %v10375_v46 = vld [vmem:[#allocation130_spill] sm:$0xff] }
 0x206   : > { %v1287_v7 = vmul.f32 %v10361_v17, %v6352_v18  ;;  %v1297_v4 = vmul.f32 %v10362_v52, %v6352_v18  ;;  %v1276_v53 = vmul.f32 %v10360_v62, %v1269_v5  ;;  %v1286_v48 = vmul.f32 %v10361_v17, %v1269_v5  ;;  %v10366_v18 = vld [vmem:[#allocation47_spill] sm:$0xff] }
 0x207   : > { %v1298_v8 = vadd.f32 %v1294_v39, %v1248_v60  ;;  %v1281_v55 = vadd.f32 %v1277_v54, %v1231_v14  ;;  %v1296_v42 = vmul.f32 %v10362_v52, %v1269_v5  ;;  %v1309_v24 = vadd.f32 %v10363_v16, %v1279_v50  ;;  %v10368_v60 = vld [vmem:[#allocation49_spill] sm:$0xff]  ;;  %v10371_v14 = vld [vmem:[#allocation126_spill] sm:$0xff]  ;;  %v10380_v16 = vld [vmem:[#allocation171_spill] sm:$0xff] }
 0x208   : > { %v1291_v27 = vadd.f32 %v1287_v7, %v1241_v57  ;;  %v1301_v0 = vadd.f32 %v1297_v4, %v1251_v41  ;;  %v1280_v47 = vadd.f32 %v1276_v53, %v1230_v44  ;;  %v1290_v29 = vadd.f32 %v1286_v48, %v1240_v37  ;;  %v1441_v57 = vpop.permute.xlu1 %1440  ;;  %v10373_v44 = vld [vmem:[#allocation128_spill] sm:$0xff]  ;;  %v10378_v48 = vld [vmem:[#allocation169_spill] sm:$0xff] }
 0x209   : > { %v1319_v3 = vadd.f32 %v10364_v58, %v1289_v11  ;;  %v1300_v35 = vadd.f32 %v1296_v42, %v1250_v59  ;;  %v1329_v15 = vadd.f32 %v10365_v10, %v1299_v26  ;;  %v1343_v12 = vmul.f32 %v10366_v18, %v6371_v61  ;;  %v1375_v51 = vpop.permute.xlu0 %1374  ;;  %v10376_v26 = vld [vmem:[#allocation131_spill] sm:$0xff] }
 0x20a   : > { %v1353_v19 = vmul.f32 %v10367_v38, %v6371_v61  ;;  %v1363_v5 = vmul.f32 %v10368_v60, %v6371_v61  ;;  %v1308_v2 = vadd.f32 %v10369_v31, %v1278_v9  ;;  %v1318_v22 = vadd.f32 %v10370_v45, %v1288_v30  ;;  %v10372_v61 = vld [vmem:[#allocation127_spill] sm:$0xff]  ;;  %v10377_v9 = vld [vmem:[#allocation132_spill] sm:$0xff] }
 0x20b   : > { %v1328_v63 = vadd.f32 %v10371_v14, %v1298_v8  ;;  %v1347_v13 = vadd.f32 %v1343_v12, %v1309_v24  ;;  %v1342_v1 = vmul.f32 %v10366_v18, %v6388_v32  ;;  %v1352_v23 = vmul.f32 %v10367_v38, %v6388_v32  ;;  %v10381_v14 = vld [vmem:[#allocation40_spill] sm:$0xff] }
 0x20c   : > { %v1357_v20 = vadd.f32 %v1353_v19, %v1319_v3  ;;  %v1367_v41 = vadd.f32 %v1363_v5, %v1329_v15  ;;  %v1362_v40 = vmul.f32 %v10368_v60, %v6388_v32  ;;  %v1311_v36 = vadd.f32 %v10372_v61, %v1281_v55 }
 0x20d   : > { %v1321_v62 = vadd.f32 %v10373_v44, %v1291_v27  ;;  %v1346_v25 = vadd.f32 %v1342_v1, %v1308_v2  ;;  %v1356_v17 = vadd.f32 %v1352_v23, %v1318_v22  ;;  %v1331_v52 = vadd.f32 %v10374_v49, %v1301_v0  ;;  %v1439_v50 = vpop.permute.xlu0 %1438  ;;  %v10379_v27 = vld [vmem:[#allocation170_spill] sm:$0xff]  ;;  %v1445_v0 = vpop.permute.xlu1 %1444 }
 0x20e   : > { %v1345_v34 = vmul.f32 %v10366_v18, %v6390_v56  ;;  %v1366_v37 = vadd.f32 %v1362_v40, %v1328_v63  ;;  %v1355_v59 = vmul.f32 %v10367_v38, %v6390_v56  ;;  %v1365_v43 = vmul.f32 %v10368_v60, %v6390_v56  ;;  %v10382_v23 = vld [vmem:[#allocation42_spill] sm:$0xff] }
 0x20f   : > { %v1310_v32 = vadd.f32 %v10375_v46, %v1280_v47  ;;  %v1320_v39 = vadd.f32 %v10376_v26, %v1290_v29  ;;  %v1330_v30 = vadd.f32 %v10377_v9, %v1300_v35  ;;  %v1344_v54 = vmul.f32 %v10366_v18, %v6408_v33  ;;  %v10386_v49 = vld [vmem:[#allocation174_spill] sm:$0xff] }
 0x210   : > { %v1349_v11 = vadd.f32 %v1345_v34, %v1311_v36  ;;  %v1359_v7 = vadd.f32 %v1355_v59, %v1321_v62  ;;  %v1369_v8 = vadd.f32 %v1365_v43, %v1331_v52  ;;  %v1354_v4 = vmul.f32 %v10367_v38, %v6408_v33  ;;  %v10383_v36 = vld [vmem:[#allocation43_spill] sm:$0xff]  ;;  %v10387_v34 = vld [vmem:[#allocation133_spill] sm:$0xff] }
 0x211   : > { %v1364_v53 = vmul.f32 %v10368_v60, %v6408_v33  ;;  %v1348_v56 = vadd.f32 %v1344_v54, %v1310_v32  ;;  %v1381_v55 = vmul.f32 %v10378_v48, %v6410_v21  ;;  %v1391_v42 = vmul.f32 %v10379_v27, %v6410_v21  ;;  %v1443_v19 = vpop.permute.xlu0 %1442  ;;  %v1487_v40 = vpop.permute.xlu1 %1486  ;;  %v10389_v43 = vld [vmem:[#allocation135_spill] sm:$0xff] }
 0x212   : > { %v1401_v24 = vmul.f32 %v10380_v16, %v6410_v21  ;;  %v1358_v47 = vadd.f32 %v1354_v4, %v1320_v39  ;;  %v1380_v58 = vmul.f32 %v10378_v48, %v1371_v6  ;;  %v1390_v3 = vmul.f32 %v10379_v27, %v1371_v6  ;;  %v10391_v4 = vld [vmem:[#allocation137_spill] sm:$0xff] }
 0x213   : > { %v1368_v29 = vadd.f32 %v1364_v53, %v1330_v30  ;;  %v1385_v35 = vadd.f32 %v1381_v55, %v1347_v13  ;;  %v1395_v10 = vadd.f32 %v1391_v42, %v1357_v20  ;;  %v1400_v15 = vmul.f32 %v10380_v16, %v1371_v6 }
 0x214   : > { %v1405_v33 = vadd.f32 %v1401_v24, %v1367_v41  ;;  %v1384_v18 = vadd.f32 %v1380_v58, %v1346_v25  ;;  %v1394_v12 = vadd.f32 %v1390_v3, %v1356_v17  ;;  %v1383_v38 = vmul.f32 %v10378_v48, %v6428_v28  ;;  %v10385_v25 = vld [vmem:[#allocation173_spill] sm:$0xff] }
 0x215   : > { %v1393_v21 = vmul.f32 %v10379_v27, %v6428_v28  ;;  %v1404_v60 = vadd.f32 %v1400_v15, %v1366_v37  ;;  %v1403_v5 = vmul.f32 %v10380_v16, %v6428_v28  ;;  %v1382_v31 = vmul.f32 %v10378_v48, %v1375_v51  ;;  %v10384_v28 = vld [vmem:[#allocation51_spill] sm:$0xff]  ;;  %v1485_v9 = vpop.permute.xlu0 %1484  ;;  %v10392_v48 = vld [vmem:[#allocation138_spill] sm:$0xff]  ;;  %v1491_v58 = vpop.permute.xlu1 %1490 }
 0x216   : > { %v1392_v2 = vmul.f32 %v10379_v27, %v1375_v51  ;;  %v1387_v45 = vadd.f32 %v1383_v38, %v1349_v11  ;;  %v1402_v6 = vmul.f32 %v10380_v16, %v1375_v51  ;;  %v1415_v63 = vadd.f32 %v10381_v14, %v1385_v35  ;;  %v10388_v51 = vld [vmem:[#allocation134_spill] sm:$0xff] }
 0x217   : > { %v1397_v22 = vadd.f32 %v1393_v21, %v1359_v7  ;;  %v1407_v13 = vadd.f32 %v1403_v5, %v1369_v8  ;;  %v1386_v20 = vadd.f32 %v1382_v31, %v1348_v56  ;;  %v1425_v41 = vadd.f32 %v10382_v23, %v1395_v10  ;;  %v10390_v7 = vld [vmem:[#allocation136_spill] sm:$0xff]  ;;  %v10395_v10 = vld [vmem:[#allocation141_spill] sm:$0xff]  ;;  %v10396_v5 = vld [vmem:[#allocation183_spill] sm:$0xff] }
 0x218   : > { %v1396_v1 = vadd.f32 %v1392_v2, %v1358_v47  ;;  %v1406_v61 = vadd.f32 %v1402_v6, %v1368_v29  ;;  %v1435_v44 = vadd.f32 %v10383_v36, %v1405_v33  ;;  %v1449_v62 = vmul.f32 %v10384_v28, %v1441_v57  ;;  %v10393_v47 = vld [vmem:[#allocation139_spill] sm:$0xff] }
 0x219   : > { %v1459_v17 = vmul.f32 %v10385_v25, %v1441_v57  ;;  %v1469_v52 = vmul.f32 %v10386_v49, %v1441_v57  ;;  %v1414_v37 = vadd.f32 %v10387_v34, %v1384_v18  ;;  %v1424_v59 = vadd.f32 %v10388_v51, %v1394_v12  ;;  %v1489_v6 = vpop.permute.xlu0 %1488  ;;  %v10399_v51 = vld [vmem:[#allocation44_spill] sm:$0xff] }
 0x21a   : > { %v1434_v46 = vadd.f32 %v10389_v43, %v1404_v60  ;;  %v1453_v32 = vadd.f32 %v1449_v62, %v1415_v63  ;;  %v1448_v26 = vmul.f32 %v10384_v28, %v1439_v50  ;;  %v1458_v39 = vmul.f32 %v10385_v25, %v1439_v50  ;;  %v1555_v62 = vpop.permute.xlu1 %1554 }
 0x21b   : > { %v1463_v11 = vadd.f32 %v1459_v17, %v1425_v41  ;;  %v1473_v30 = vadd.f32 %v1469_v52, %v1435_v44  ;;  %v1468_v54 = vmul.f32 %v10386_v49, %v1439_v50  ;;  %v1417_v8 = vadd.f32 %v10390_v7, %v1387_v45  ;;  %v10394_v50 = vld [vmem:[#allocation140_spill] sm:$0xff]  ;;  %v10402_v7 = vld [vmem:[#allocation191_spill] sm:$0xff] }
 0x21c   : > { %v1427_v57 = vadd.f32 %v10391_v4, %v1397_v22  ;;  %v1452_v53 = vadd.f32 %v1448_v26, %v1414_v37  ;;  %v1462_v56 = vadd.f32 %v1458_v39, %v1424_v59  ;;  %v1437_v55 = vadd.f32 %v10392_v48, %v1407_v13  ;;  %v10398_v45 = vld [vmem:[#allocation188_spill] sm:$0xff]  ;;  %v10403_v4 = vld [vmem:[#allocation194_spill] sm:$0xff] }
 0x21d   : > { %v1451_v27 = vmul.f32 %v10384_v28, %v1445_v0  ;;  %v1472_v42 = vadd.f32 %v1468_v54, %v1434_v46  ;;  %v1461_v16 = vmul.f32 %v10385_v25, %v1445_v0  ;;  %v1471_v24 = vmul.f32 %v10386_v49, %v1445_v0  ;;  %v10397_v0 = vld [vmem:[#allocation184_spill] sm:$0xff]  ;;  %v1553_v39 = vpop.permute.xlu0 %1552  ;;  %v10405_v48 = vld [vmem:[#allocation142_spill] sm:$0xff] }
 0x21e   : > { %v1416_v29 = vadd.f32 %v10393_v47, %v1386_v20  ;;  %v1426_v35 = vadd.f32 %v10394_v50, %v1396_v1  ;;  %v1436_v33 = vadd.f32 %v10395_v10, %v1406_v61  ;;  %v1450_v15 = vmul.f32 %v10384_v28, %v1443_v19  ;;  %v1559_v50 = vpop.permute.xlu1 %1558 }
 0x21f   : > { %v1455_v3 = vadd.f32 %v1451_v27, %v1417_v8  ;;  %v1465_v18 = vadd.f32 %v1461_v16, %v1427_v57  ;;  %v1475_v12 = vadd.f32 %v1471_v24, %v1437_v55  ;;  %v1460_v38 = vmul.f32 %v10385_v25, %v1443_v19  ;;  %v10406_v27 = vld [vmem:[#allocation143_spill] sm:$0xff]  ;;  %v10407_v16 = vld [vmem:[#allocation144_spill] sm:$0xff] }
 0x220   : > { %v1470_v21 = vmul.f32 %v10386_v49, %v1443_v19  ;;  %v1454_v60 = vadd.f32 %v1450_v15, %v1416_v29  ;;  %v1495_v31 = vmul.f32 %v10396_v5, %v1487_v40  ;;  %v1505_v2 = vmul.f32 %v10397_v0, %v1487_v40 }
 0x221   : > { %v1515_v22 = vmul.f32 %v10398_v45, %v1487_v40  ;;  %v1464_v14 = vadd.f32 %v1460_v38, %v1426_v35  ;;  %v1494_v13 = vmul.f32 %v10396_v5, %v1485_v9  ;;  %v1504_v20 = vmul.f32 %v10397_v0, %v1485_v9 }
 0x222   : > { %v1474_v63 = vadd.f32 %v1470_v21, %v1436_v33  ;;  %v1499_v1 = vadd.f32 %v1495_v31, %v1453_v32  ;;  %v1509_v23 = vadd.f32 %v1505_v2, %v1463_v11  ;;  %v1514_v61 = vmul.f32 %v10398_v45, %v1485_v9  ;;  %v10400_v11 = vld [vmem:[#allocation45_spill] sm:$0xff]  ;;  %v10410_v2 = vld [vmem:[#allocation147_spill] sm:$0xff] }
 0x223   : > { %v1519_v41 = vadd.f32 %v1515_v22, %v1473_v30  ;;  %v1498_v19 = vadd.f32 %v1494_v13, %v1452_v53  ;;  %v1508_v36 = vadd.f32 %v1504_v20, %v1462_v56  ;;  %v1497_v44 = vmul.f32 %v10396_v5, %v1491_v58  ;;  %v10401_v30 = vld [vmem:[#allocation46_spill] sm:$0xff]  ;;  %v10404_v53 = vld [vmem:[#allocation199_spill] sm:$0xff]  ;;  %v10408_v33 = vld [vmem:[#allocation145_spill] sm:$0xff] }
 0x224   : > { %v1507_v28 = vmul.f32 %v10397_v0, %v1491_v58  ;;  %v1518_v40 = vadd.f32 %v1514_v61, %v1472_v42  ;;  %v1517_v25 = vmul.f32 %v10398_v45, %v1491_v58  ;;  %v1496_v17 = vmul.f32 %v10396_v5, %v1489_v6 }
 0x225   : > { %v1506_v49 = vmul.f32 %v10397_v0, %v1489_v6  ;;  %v1501_v52 = vadd.f32 %v1497_v44, %v1455_v3  ;;  %v1516_v37 = vmul.f32 %v10398_v45, %v1489_v6  ;;  %v1529_v59 = vadd.f32 %v10399_v51, %v1499_v1  ;;  %v10411_v6 = vld [vmem:[#allocation30_spill] sm:$0xff] }
 0x226   : > { %v1511_v34 = vadd.f32 %v1507_v28, %v1465_v18  ;;  %v1521_v43 = vadd.f32 %v1517_v25, %v1475_v12  ;;  %v1500_v46 = vadd.f32 %v1496_v17, %v1454_v60  ;;  %v1539_v26 = vadd.f32 %v10400_v11, %v1509_v23  ;;  %v10409_v18 = vld [vmem:[#allocation146_spill] sm:$0xff]  ;;  %v10413_v23 = vld [vmem:[#allocation36_spill] sm:$0xff] }
 0x227   : > { %v1510_v32 = vadd.f32 %v1506_v49, %v1464_v14  ;;  %v1520_v9 = vadd.f32 %v1516_v37, %v1474_v63  ;;  %v1549_v54 = vadd.f32 %v10401_v30, %v1519_v41  ;;  %v1563_v8 = vmul.f32 %v10402_v7, %v1555_v62  ;;  %v10412_v63 = vld [vmem:[#allocation33_spill] sm:$0xff]  ;;  %v10415_v25 = vld [vmem:[#allocation34_spill] sm:$0xff] }
 0x228   : > { %v1573_v57 = vmul.f32 %v10403_v4, %v1555_v62  ;;  %v1583_v56 = vmul.f32 %v10404_v53, %v1555_v62  ;;  %v1528_v55 = vadd.f32 %v10405_v48, %v1498_v19  ;;  %v1538_v42 = vadd.f32 %v10406_v27, %v1508_v36  ;;  %v10414_v62 = vld [vmem:[#allocation31_spill] sm:$0xff] }
 0x229   : > { %v1548_v24 = vadd.f32 %v10407_v16, %v1518_v40  ;;  %v1567_v47 = vadd.f32 %v1563_v8, %v1529_v59  ;;  %v1562_v58 = vmul.f32 %v10402_v7, %v1553_v39  ;;  %v1572_v3 = vmul.f32 %v10403_v4, %v1553_v39  ;;  %v10419_v16 = vld [vmem:[#allocation148_spill] sm:$0xff] }
 0x22a   : > { %v1577_v29 = vadd.f32 %v1573_v57, %v1539_v26  ;;  %v1587_v35 = vadd.f32 %v1583_v56, %v1549_v54  ;;  %v1582_v10 = vmul.f32 %v10404_v53, %v1553_v39  ;;  %v1531_v15 = vadd.f32 %v10408_v33, %v1501_v52  ;;  %v10416_v52 = vld [vmem:[#allocation37_spill] sm:$0xff]  ;;  %v1557_v56 = vpop.permute.xlu0 %1556 }
 0x22b   : > { %v1541_v12 = vadd.f32 %v10409_v18, %v1511_v34  ;;  %v1591_v38 = vmax.f32 %v1567_v47, 0.0  ;;  %v1566_v60 = vadd.f32 %v1562_v58, %v1528_v55  ;;  %v1576_v5 = vadd.f32 %v1572_v3, %v1538_v42 }
 0x22c   : > { %v1616_v21 = vmax.f32 %v1577_v29, 0.0  ;;  %v1641_v31 = vmax.f32 %v1587_v35, 0.0  ;;  %v1586_v0 = vadd.f32 %v1582_v10, %v1548_v24  ;;  %v1551_v45 = vadd.f32 %v10410_v2, %v1521_v43  ;;  %v10420_v29 = vld [vmem:[#allocation28_spill] sm:$0xff]  ;;  %v10422_v10 = vld [vmem:[#allocation35_spill] sm:$0xff] }
 0x22d   : > { %v1565_v22 = vmul.f32 %v10402_v7, %v1559_v50  ;;  %v1595_v14 = vadd.f32 %v1591_v38, %v10411_v6  ;;  %v1590_v20 = vmax.f32 %v1566_v60, 0.0  ;;  %v1615_v1 = vmax.f32 %v1576_v5, 0.0 }
 0x22e   : > { %v1620_v13 = vadd.f32 %v1616_v21, %v10412_v63  ;;  %v1645_v41 = vadd.f32 %v1641_v31, %v10413_v23  ;;  %v1640_v61 = vmax.f32 %v1586_v0, 0.0  ;;  %v1575_v36 = vmul.f32 %v10403_v4, %v1559_v50  ;;  %v10424_v21 = vld [vmem:[#allocation38_spill] sm:$0xff] }
 0x22f   : > { %v1569_v19 = vadd.f32 %v1565_v22, %v1531_v15  ;;  %v1599_v44 = vmax.f32 %v1595_v14, 0.0  ;;  %v1594_v40 = vadd.f32 %v1590_v20, %v10414_v62  ;;  %v1619_v17 = vadd.f32 %v1615_v1, %v10415_v25  ;;  %v10423_v15 = vld [vmem:[#allocation164_spill] sm:$0xff] }
 0x230   : > { %v1624_v28 = vmax.f32 %v1620_v13, 0.0  ;;  %v1649_v49 = vmax.f32 %v1645_v41, 0.0  ;;  %v1644_v34 = vadd.f32 %v1640_v61, %v10416_v52  ;;  %v1579_v37 = vadd.f32 %v1575_v36, %v1541_v12 }
 0x231   : > { %v1585_v51 = vmul.f32 %v10404_v53, %v1559_v50  ;;  %v6551_v43 = vsel %vm4327_vm9, %v1599_v44, 0.0  ;;  %v1598_v26 = vmax.f32 %v1594_v40, 0.0  ;;  %v1623_v39 = vmax.f32 %v1619_v17, 0.0  ;;  %v10421_v50 = vld [vmem:[#allocation163_spill] sm:$0xff]  ;;  %v10428_v17 = vld [vmem:[#allocation29_spill] sm:$0xff] }
 0x232   : > { %v6555_v11 = vsel %vm4327_vm9, %v1624_v28, 0.0  ;;  %v6559_v30 = vsel %vm4327_vm9, %v1649_v49, 0.0  ;;  %v1648_v54 = vmax.f32 %v1644_v34, 0.0  ;;  %v1593_v57 = vmax.f32 %v1569_v19, 0.0  ;;  %1787 = vrot.lane.b32.xlu1 %v6551_v43, %s4242_s23  ;;  %v10427_v28 = vld [vmem:[#allocation32_spill] sm:$0xff] }
 0x233   : > { %v1589_v8 = vadd.f32 %v1585_v51, %v1551_v45  ;;  %v6565_v55 = vsel %vm4322_vm6, %v1598_v26, 0.0  ;;  %v6569_v27 = vsel %vm4322_vm6, %v1623_v39, 0.0  ;;  %v1618_v42 = vmax.f32 %v1579_v37, 0.0  ;;  %v10429_v51 = vld [vmem:[#allocation39_spill] sm:$0xff] }
 0x234   : > { %v1530_v24 = vadd.f32 %v10419_v16, %v1500_v46  ;;  %v6574_v47 = vsel %vm4322_vm6, %v1648_v54, 0.0  ;;  %v1597_v58 = vadd.f32 %v1593_v57, %v10420_v29  ;;  %v1540_v35 = vadd.f32 %v10421_v50, %v1510_v32  ;;  %1785 = vrot.lane.b32.xlu0 %v6565_v55, %s4242_s23 }
 0x235   : > { %v1643_v3 = vmax.f32 %v1589_v8, 0.0  ;;  %v1622_v33 = vadd.f32 %v1618_v42, %v10422_v10  ;;  %v1550_v18 = vadd.f32 %v10423_v15, %v1520_v9  ;;  %v1564_v12 = vmul.f32 %v10402_v7, %v1557_v56 }
 0x236   : > { %v1574_v46 = vmul.f32 %v10403_v4, %v1557_v56  ;;  %v1601_v38 = vmax.f32 %v1597_v58, 0.0  ;;  %v1584_v5 = vmul.f32 %v10404_v53, %v1557_v56  ;;  %v1671_v31 = vrot.slane %v6565_v55, 7 }
 0x237   : > { %v1647_v60 = vadd.f32 %v1643_v3, %v10424_v21  ;;  %v1626_v0 = vmax.f32 %v1622_v33, 0.0  ;;  %v1568_v32 = vadd.f32 %v1564_v12, %v1530_v24  ;;  %v1672_v45 = vrot.slane %v6551_v43, 7 }
 0x238   : > { %v1578_v2 = vadd.f32 %v1574_v46, %v1540_v35  ;;  %v6590_v14 = vsel %vm4331_vm11, %v1601_v38, 0.0  ;;  %v1588_v7 = vadd.f32 %v1584_v5, %v1550_v18  ;;  %v1891_v4 = vrot.slane %v6565_v55, 1 }
 0x239   : > { %v1651_v9 = vmax.f32 %v1647_v60, 0.0  ;;  %v6595_v13 = vsel %vm4331_vm11, %v1626_v0, 0.0  ;;  %v1592_v53 = vmax.f32 %v1568_v32, 0.0  ;;  %1791 = vrot.lane.b32.xlu1 %v6590_v14, %s4242_s23  ;;  %v6601_v41 = vsel %vm200_vm2, %v1671_v31, %v1672_v45 }
 0x23a   : > { %v1617_v20 = vmax.f32 %v1578_v2, 0.0  ;;  %v1642_v19 = vmax.f32 %v1588_v7, 0.0  ;;  %v1674_v36 = vrot.slane %v6590_v14, 7  ;;  %v1892_v44 = vrot.slane %v6551_v43, 1 }
 0x23b   : > { %v6605_v61 = vsel %vm4331_vm11, %v1651_v9, 0.0  ;;  %v1596_v40 = vadd.f32 %v1592_v53, %v10427_v28  ;;  %v1894_v34 = vrot.slane %v6590_v14, 1  ;;  %v2009_v37 = vrot.slane %v6569_v27, 7 }
 0x23c   : > { %v1621_v49 = vadd.f32 %v1617_v20, %v10428_v17  ;;  %v1646_v26 = vadd.f32 %v1642_v19, %v10429_v51  ;;  %v6616_v39 = vsel %vm200_vm2, %v1674_v36, %v1671_v31  ;;  %v6620_v54 = vsel %vm421_vm3, %v1891_v4, %v1892_v44 }
 0x23d   : > { %v2012_v8 = vrot.slane %v6595_v13, 7  ;;  %v1600_v57 = vmax.f32 %v1596_v40, 0.0  ;;  %1855 = vrot.lane.b32.xlu1 %v6551_v43, %s4243_s24  ;;  %v6627_v42 = vsel %vm421_vm3, %v1894_v34, %v1891_v4  ;;  %v2010_v16 = vrot.slane %v6555_v11, 7 }
 0x23e   : > { %v1625_v56 = vmax.f32 %v1621_v49, 0.0  ;;  %v1650_v24 = vmax.f32 %v1646_v26, 0.0  ;;  %v2229_v3 = vrot.slane %v6569_v27, 1  ;;  %v2230_v50 = vrot.slane %v6555_v11, 1 }
 0x23f   : > { %v6632_v58 = vsel %vm200_vm2, %v2012_v8, %v2009_v37  ;;  %v6638_v35 = vsel %vm4327_vm9, %v1600_v57, 0.0  ;;  %v6646_v15 = vsel %vm200_vm2, %v2009_v37, %v2010_v16  ;;  %v2232_v18 = vrot.slane %v6595_v13, 1 }
 0x240   : > { %v6642_v33 = vsel %vm4327_vm9, %v1625_v56, 0.0  ;;  %v6651_v12 = vsel %vm4327_vm9, %v1650_v24, 0.0  ;;  %1789 = vrot.lane.b32.xlu0 %v6638_v35, %s4242_s23  ;;  %v1673_v46 = vrot.slane %v6638_v35, 7  ;;  %v1893_v38 = vrot.slane %v6638_v35, 1 }
 0x241   : > { %v2011_v60 = vrot.slane %v6642_v33, 7  ;;  %1859 = vrot.lane.b32.xlu1 %v6590_v14, %s4243_s24  ;;  %v6662_v5 = vsel %vm421_vm3, %v2229_v3, %v2230_v50  ;;  %v2231_v31 = vrot.slane %v6642_v33, 1  ;;  %v6667_v0 = vsel %vm421_vm3, %v2232_v18, %v2229_v3 }
 0x242   : > { %v2347_v32 = vrot.slane %v6574_v47, 7  ;;  %v6672_v2 = vsel %vm200_vm2, %v1672_v45, %v1673_v46  ;;  %v6676_v9 = vsel %vm200_vm2, %v1673_v46, %v1674_v36  ;;  %v6680_v7 = vsel %vm421_vm3, %v1892_v44, %v1893_v38 }
 0x243   : > { %v6684_v4 = vsel %vm421_vm3, %v1893_v38, %v1894_v34  ;;  %v6688_v53 = vsel %vm200_vm2, %v2010_v16, %v2011_v60  ;;  %v6692_v45 = vsel %vm200_vm2, %v2011_v60, %v2012_v8  ;;  %v6696_v20 = vsel %vm421_vm3, %v2230_v50, %v2231_v31 }
 0x244   : > { %v6700_v19 = vsel %vm421_vm3, %v2231_v31, %v2232_v18  ;;  %1853 = vrot.lane.b32.xlu0 %v6565_v55, %s4243_s24  ;;  %v2350_v36 = vrot.slane %v6605_v61, 7  ;;  %v2348_v44 = vrot.slane %v6559_v30, 7  ;;  %v2349_v40 = vrot.slane %v6651_v12, 7 }
 0x245   : > { %2125 = vrot.lane.b32.xlu1 %v6555_v11, %s4242_s23  ;;  %v2567_v37 = vrot.slane %v6574_v47, 1  ;;  %v2568_v57 = vrot.slane %v6559_v30, 1  ;;  %v2569_v56 = vrot.slane %v6651_v12, 1  ;;  %v2570_v16 = vrot.slane %v6605_v61, 1 }
 0x246   : > { %v6711_v49 = vsel %vm200_vm2, %v2350_v36, %v2347_v32  ;;  %v6715_v34 = vsel %vm200_vm2, %v2347_v32, %v2348_v44  ;;  %v6720_v26 = vsel %vm200_vm2, %v2348_v44, %v2349_v40  ;;  %v6724_v8 = vsel %vm200_vm2, %v2349_v40, %v2350_v36 }
 0x247   : > { %v6735_v24 = vsel %vm421_vm3, %v2567_v37, %v2568_v57  ;;  %v6739_v3 = vsel %vm421_vm3, %v2568_v57, %v2569_v56  ;;  %v6743_v50 = vsel %vm421_vm3, %v2569_v56, %v2570_v16  ;;  %v6747_v18 = vsel %vm421_vm3, %v2570_v16, %v2567_v37 }
 0x248   : > { %1857 = vrot.lane.b32.xlu0 %v6638_v35, %s4243_s24  ;;  %v6841_v46 = vstv %s3938_s16  ;;  %v6843_v38 = vstv %s3939_s2  ;;  %v6845_v60 = vstv %s3940_s4  ;;  %s6945_s16 = sld [smem:[#allocation10 + $0xd]]  ;;  %s6959_s2 = sld [smem:[#allocation10 + $0x43]] }
 0x249   : > { %2129 = vrot.lane.b32.xlu1 %v6595_v13, %s4242_s23  ;;  %v6849_v31 = vstv %s3944_s18  ;;  %v6851_v32 = vstv %s3945_s7  ;;  %v6853_v36 = vstv %s3946_s20  ;;  %s6967_s4 = sld [smem:[#allocation10 + $0x17]]  ;;  %s6969_s18 = sld [smem:[#allocation10 + $0x32]] }
 0x24a   : > { %v6855_v44 = vstv %s3965_s21  ;;  %v6861_v40 = vstv %s3966_s22  ;;  %v6863_v37 = vstv %s3967_s25  ;;  %v1718_v57 = vstv %s6817_s14  ;;  %s6913_s14 = sld [smem:[#allocation10 + $0x25]]  ;;  %s7015_s20 = sld [smem:[#allocation10 + $0x10]] }
 0x24b   : > { %v1728_v56 = vstv %s6819_s15  ;;  %v6873_v16 = vstv %s3971_s6  ;;  %v6875_v22 = vstv %s3972_s1  ;;  %v1738_v21 = vstv %s6821_s17  ;;  %s6915_s15 = sld [smem:[#allocation10 + $0x40]]  ;;  %s6978_s7 = sld [smem:[#allocation10 + $0x4d]] }
 0x24c   : > { %2123 = vrot.lane.b32.xlu0 %v6569_v27, %s4242_s23  ;;  %v6882_v10 = vstv %s3973_s26  ;;  %v6885_v29 = vmul.f32 %v1718_v57, %v6616_v39  ;;  %v6888_v1 = vmul.f32 %v1728_v56, %v6616_v39  ;;  %v6891_v51 = vmul.f32 %v1738_v21, %v6616_v39  ;;  %s6957_s17 = sld [smem:[#allocation10 + $0x28]]  ;;  %s7025_s21 = sld [smem:[#allocation10 + $0x2b]] }
 0x24d   : > { %2193 = vrot.lane.b32.xlu1 %v6555_v11, %s4243_s24  ;;  %v6896_v17 = vmul.f32 %v1718_v57, %v6601_v41  ;;  %v1824_v28 = vstv %s6831_s27  ;;  %v1834_v59 = vstv %s6833_s28  ;;  %v1844_v23 = vstv %s6835_s29  ;;  %s7027_s22 = sld [smem:[#allocation10 + $0x46]]  ;;  %s7057_s25 = sld [smem:[#allocation10 + $0x13]] }
 0x24e   : > { %10430 = vst [vmem:[#allocation56_spill] sm:$0xff] %v6885_v29  ;;  %10431 = vst [vmem:[#allocation57_spill] sm:$0xff] %v6888_v1  ;;  %v6902_v63 = vmul.f32 %v1728_v56, %v6601_v41  ;;  %v6905_v6 = vmul.f32 %v1738_v21, %v6601_v41  ;;  %v6908_v48 = vmul.f32 %v1718_v57, %v6672_v2  ;;  %s7059_s6 = sld [smem:[#allocation11]]  ;;  %s7071_s1 = sld [smem:[#allocation10 + $0x2e]] }
 0x24f   : > { %10432 = vst [vmem:[#allocation58_spill] sm:$0xff] %v6891_v51  ;;  %v6920_v52 = vmul.f32 %v1738_v21, %v6672_v2  ;;  %v6926_v25 = vmul.f32 %v1728_v56, %v6676_v9  ;;  %v6929_v62 = vmul.f32 %v1738_v21, %v6676_v9  ;;  %v6948_v21 = vmul.f32 %v1834_v59, %v6551_v43  ;;  %s7081_s26 = sld [smem:[#allocation11 + $0x1]]  ;;  %s7083_s27 = sld [smem:[#allocation11 + $0x2]] }
 0x250   : > { %2127 = vrot.lane.b32.xlu0 %v6642_v33, %s4242_s23  ;;  %10433 = vst [vmem:[#allocation59_spill] sm:$0xff] %v6908_v48  ;;  %v6987_v48 = vmul.f32 %v1824_v28, %v6590_v14  ;;  %v6994_v51 = vmul.f32 %v1834_v59, %v6590_v14  ;;  %v6997_v1 = vmul.f32 %v1844_v23, %v6590_v14  ;;  %v2066_v14 = vstv %s6913_s14  ;;  %s7094_s28 = sld [smem:[#allocation10]]  ;;  %s7096_s29 = sld [smem:[#allocation10 + $0x1b]] }
 0x251   : > { %2197 = vrot.lane.b32.xlu1 %v6595_v13, %s4243_s24  ;;  %10435 = vst [vmem:[#allocation61_spill] sm:$0xff] %v6920_v52  ;;  %10440 = vst [vmem:[#allocation66_spill] sm:$0xff] %v6948_v21  ;;  %v1938_v52 = vstv %s6847_s30  ;;  %v6984_v21 = vmul.f32 %v1844_v23, %v6638_v35  ;;  %s7109_s30 = sld [smem:[#allocation10 + $0x36]]  ;;  %s7223_s14 = sld [smem:[#allocation10 + $0x4f]] }
 0x252   : > { %10445 = vst [vmem:[#allocation50_spill] sm:$0xff] %v6987_v48  ;;  %10446 = vst [vmem:[#allocation71_spill] sm:$0xff] %v6994_v51  ;;  %v7010_v48 = vmul.f32 %v1938_v52, %v6680_v7 }
 0x253   : > { %10444 = vst [vmem:[#allocation70_spill] sm:$0xff] %v6984_v21  ;;  %10447 = vst [vmem:[#allocation72_spill] sm:$0xff] %v6997_v1 }
 0x254   : > { %2191 = vrot.lane.b32.xlu0 %v6569_v27, %s4243_s24  ;;  %10451 = vst [vmem:[#allocation175_spill] sm:$0xff] %v7010_v48  ;;  %v7115_v48 = vmul.f32 %v2066_v14, %v6692_v45 }
 0x255   : > { %2463 = vrot.lane.b32.xlu1 %v6559_v30, %s4242_s23 }
 0x256   : > { %10470 = vst [vmem:[#allocation86_spill] sm:$0xff] %v7115_v48 }
 0x258   : > { %2195 = vrot.lane.b32.xlu0 %v6642_v33, %s4243_s24 }
 0x259   : > { %2467 = vrot.lane.b32.xlu1 %v6605_v61, %s4242_s23 }
 0x25c   : > { %2461 = vrot.lane.b32.xlu0 %v6574_v47, %s4242_s23 }
 0x25d   : > { %2531 = vrot.lane.b32.xlu1 %v6559_v30, %s4243_s24 }
 0x260   : > { %2465 = vrot.lane.b32.xlu0 %v6651_v12, %s4242_s23 }
 0x261   : > { %2535 = vrot.lane.b32.xlu1 %v6605_v61, %s4243_s24 }
 0x264   : > { %2529 = vrot.lane.b32.xlu0 %v6574_v47, %s4243_s24 }
 0x265   : > { %1681 = vrot.lane.b32.xlu1 %v6601_v41, %s4242_s23 }
 0x268   : > { %2533 = vrot.lane.b32.xlu0 %v6651_v12, %s4243_s24 }
 0x269   : > { %1685 = vrot.lane.b32.xlu1 %v6676_v9, %s4242_s23 }
 0x26c   : > { %1679 = vrot.lane.b32.xlu0 %v6616_v39, %s4242_s23 }
 0x26d   : > { %1749 = vrot.lane.b32.xlu1 %v6601_v41, %s4243_s24  ;;  %v6923_v41 = vmul.f32 %v1718_v57, %v6676_v9  ;;  %v6940_v57 = vmul.f32 %v1844_v23, %v6565_v55 }
 0x26f   : > { %10438 = vst [vmem:[#allocation64_spill] sm:$0xff] %v6940_v57  ;;  %v6965_v57 = vstv %s6867_s3  ;;  %s7163_s3 = sld [smem:[#allocation10 + $0x4c]] }
 0x270   : > { %1683 = vrot.lane.b32.xlu0 %v6672_v2, %s4242_s23 }
 0x271   : > { %1753 = vrot.lane.b32.xlu1 %v6676_v9, %s4243_s24  ;;  %v6951_v9 = vmul.f32 %v1844_v23, %v6551_v43 }
 0x273   : > { %10441 = vst [vmem:[#allocation67_spill] sm:$0xff] %v6951_v9  ;;  %v6981_v9 = vmul.f32 %v1834_v59, %v6638_v35 }
 0x274   : > { %1747 = vrot.lane.b32.xlu0 %v6616_v39, %s4243_s24  ;;  %v6911_v39 = vmul.f32 %v1728_v56, %v6672_v2  ;;  %v6943_v56 = vmul.f32 %v1824_v28, %v6551_v43  ;;  %v1958_v43 = vstv %s6859_s11  ;;  %s7145_s11 = sld [smem:[#allocation10 + $0x16]] }
 0x275   : > { %1901 = vrot.lane.b32.xlu1 %v6680_v7, %s4242_s23  ;;  %10443 = vst [vmem:[#allocation69_spill] sm:$0xff] %v6981_v9  ;;  %v7000_v9 = vmul.f32 %v1938_v52, %v6620_v54  ;;  %v7018_v23 = vmul.f32 %v1958_v43, %v6680_v7 }
 0x276   : > { %10434 = vst [vmem:[#allocation60_spill] sm:$0xff] %v6911_v39  ;;  %v6934_v39 = vmul.f32 %v1824_v28, %v6565_v55  ;;  %10439 = vst [vmem:[#allocation65_spill] sm:$0xff] %v6943_v56 }
 0x277   : > { %10448 = vst [vmem:[#allocation73_spill] sm:$0xff] %v7000_v9  ;;  %10453 = vst [vmem:[#allocation75_spill] sm:$0xff] %v7018_v23  ;;  %v2076_v9 = vstv %s6915_s15  ;;  %v7046_v23 = vmul.f32 %v1958_v43, %v6627_v42  ;;  %s7230_s15 = sld [smem:[#allocation10 + $0x2]] }
 0x278   : > { %1751 = vrot.lane.b32.xlu0 %v6672_v2, %s4243_s24  ;;  %10436 = vst [vmem:[#allocation62_spill] sm:$0xff] %v6934_v39  ;;  %v6937_v2 = vmul.f32 %v1834_v59, %v6565_v55  ;;  %v6954_v39 = vmul.f32 %v1824_v28, %v6638_v35  ;;  %v6962_v55 = vstv %s6865_s12  ;;  %v2056_v35 = vstv %s6893_s13  ;;  %s7147_s12 = sld [smem:[#allocation10 + $0x31]]  ;;  %s7221_s13 = sld [smem:[#allocation10 + $0x34]] }
 0x279   : > { %1905 = vrot.lane.b32.xlu1 %v6627_v42, %s4242_s23  ;;  %v7007_v28 = vmul.f32 %v1958_v43, %v6620_v54  ;;  %v7021_v59 = vmul.f32 %v1938_v52, %v6684_v4  ;;  %10459 = vst [vmem:[#allocation78_spill] sm:$0xff] %v7046_v23  ;;  %v7079_v23 = vstv %s6969_s18  ;;  %s7261_s18 = sld [smem:[#allocation10 + $0x3c]] }
 0x27a   : > { %10437 = vst [vmem:[#allocation63_spill] sm:$0xff] %v6937_v2  ;;  %10442 = vst [vmem:[#allocation68_spill] sm:$0xff] %v6954_v39  ;;  %v1948_v2 = vstv %s6857_s10  ;;  %v6976_v39 = vstv %s6877_s5  ;;  %s7123_s10 = sld [smem:[#allocation10 + $0x49]] }
 0x27b   : > { %v7004_v21 = vmul.f32 %v1948_v2, %v6620_v54  ;;  %10450 = vst [vmem:[#allocation172_spill] sm:$0xff] %v7007_v28  ;;  %v7013_v29 = vmul.f32 %v1948_v2, %v6680_v7  ;;  %10454 = vst [vmem:[#allocation76_spill] sm:$0xff] %v7021_v59  ;;  %v7041_v59 = vmul.f32 %v1948_v2, %v6627_v42  ;;  %s7205_s5 = sld [smem:[#allocation10 + $0x19]] }
 0x27c   : > { %1899 = vrot.lane.b32.xlu0 %v6620_v54, %s4242_s23 }
 0x27d   : > { %1969 = vrot.lane.b32.xlu1 %v6680_v7, %s4243_s24  ;;  %10449 = vst [vmem:[#allocation52_spill] sm:$0xff] %v7004_v21  ;;  %10452 = vst [vmem:[#allocation74_spill] sm:$0xff] %v7013_v29  ;;  %v7035_v29 = vmul.f32 %v1958_v43, %v6684_v4  ;;  %v7038_v7 = vmul.f32 %v1938_v52, %v6627_v42  ;;  %v7055_v52 = vmul.f32 %v2056_v35, %v6646_v15 }
 0x27e   : > { %10458 = vst [vmem:[#allocation77_spill] sm:$0xff] %v7041_v59  ;;  %v7068_v43 = vmul.f32 %v2076_v9, %v6646_v15  ;;  %v7102_v59 = vmul.f32 %v2066_v14, %v6688_v53 }
 0x27f   : > { %10456 = vst [vmem:[#allocation150_spill] sm:$0xff] %v7035_v29  ;;  %10457 = vst [vmem:[#allocation151_spill] sm:$0xff] %v7038_v7  ;;  %v7105_v7 = vmul.f32 %v2076_v9, %v6688_v53  ;;  %v7112_v29 = vmul.f32 %v2056_v35, %v6692_v45 }
 0x280   : > { %1903 = vrot.lane.b32.xlu0 %v6684_v4, %s4242_s23  ;;  %10462 = vst [vmem:[#allocation81_spill] sm:$0xff] %v7055_v52  ;;  %10465 = vst [vmem:[#allocation84_spill] sm:$0xff] %v7068_v43  ;;  %v7076_v52 = vstv %s6967_s4  ;;  %v7092_v43 = vstv %s6978_s7  ;;  %s7259_s4 = sld [smem:[#allocation10 + $0x21]]  ;;  %s7273_s7 = sld [smem:[#allocation10 + $0x8]] }
 0x281   : > { %1973 = vrot.lane.b32.xlu1 %v6627_v42, %s4243_s24  ;;  %v7065_v42 = vmul.f32 %v2066_v14, %v6646_v15  ;;  %10467 = vst [vmem:[#allocation152_spill] sm:$0xff] %v7102_v59  ;;  %10468 = vst [vmem:[#allocation153_spill] sm:$0xff] %v7105_v7 }
 0x282   : > { %10469 = vst [vmem:[#allocation154_spill] sm:$0xff] %v7112_v29  ;;  %v2276_v29 = vstv %s7015_s20  ;;  %s7275_s20 = sld [smem:[#allocation10 + $0x23]] }
 0x283   : > { %10464 = vst [vmem:[#allocation83_spill] sm:$0xff] %v7065_v42  ;;  %v7099_v42 = vmul.f32 %v2056_v35, %v6688_v53 }
 0x284   : > { %1967 = vrot.lane.b32.xlu0 %v6620_v54, %s4243_s24  ;;  %v7032_v54 = vmul.f32 %v1948_v2, %v6684_v4  ;;  %v7062_v2 = vmul.f32 %v2076_v9, %v6632_v58 }
 0x285   : > { %2019 = vrot.lane.b32.xlu1 %v6646_v15, %s4242_s23  ;;  %10466 = vst [vmem:[#allocation85_spill] sm:$0xff] %v7099_v42  ;;  %v7118_v42 = vmul.f32 %v2076_v9, %v6692_v45 }
 0x286   : > { %10455 = vst [vmem:[#allocation149_spill] sm:$0xff] %v7032_v54  ;;  %v7049_v54 = vmul.f32 %v2056_v35, %v6632_v58  ;;  %10463 = vst [vmem:[#allocation82_spill] sm:$0xff] %v7062_v2  ;;  %v2182_v2 = vstv %s6959_s2  ;;  %s7243_s2 = sld [smem:[#allocation10 + $0x6]] }
 0x287   : > { %10471 = vst [vmem:[#allocation87_spill] sm:$0xff] %v7118_v42  ;;  %v7129_v7 = vmul.f32 %v2182_v2, %v6569_v27  ;;  %v7141_v9 = vmul.f32 %v2182_v2, %v6555_v11  ;;  %v2296_v42 = vstv %s7027_s22  ;;  %s7291_s22 = sld [smem:[#allocation10 + $0x9]] }
 0x288   : > { %1971 = vrot.lane.b32.xlu0 %v6684_v4, %s4243_s24  ;;  %10460 = vst [vmem:[#allocation79_spill] sm:$0xff] %v7049_v54  ;;  %v7052_v4 = vmul.f32 %v2066_v14, %v6632_v58  ;;  %v2162_v54 = vstv %s6945_s16  ;;  %s7232_s16 = sld [smem:[#allocation10 + $0x1d]]  ;;  %v7252_v28 = vmul.f32 %v2296_v42, %v6667_v0 }
 0x289   : > { %2023 = vrot.lane.b32.xlu1 %v6692_v45, %s4242_s23  ;;  %v7121_v59 = vmul.f32 %v2162_v54, %v6569_v27  ;;  %10474 = vst [vmem:[#allocation156_spill] sm:$0xff] %v7129_v7  ;;  %v7132_v35 = vmul.f32 %v2162_v54, %v6555_v11  ;;  %10477 = vst [vmem:[#allocation90_spill] sm:$0xff] %v7141_v9  ;;  %v7161_v9 = vmul.f32 %v2162_v54, %v6595_v13 }
 0x28a   : > { %10461 = vst [vmem:[#allocation80_spill] sm:$0xff] %v7052_v4  ;;  %v7186_v7 = vmul.f32 %v2296_v42, %v6662_v5  ;;  %10495 = vst [vmem:[#allocation99_spill] sm:$0xff] %v7252_v28 }
 0x28b   : > { %10472 = vst [vmem:[#allocation88_spill] sm:$0xff] %v7121_v59  ;;  %10475 = vst [vmem:[#allocation157_spill] sm:$0xff] %v7132_v35  ;;  %v2286_v59 = vstv %s7025_s21  ;;  %s7289_s21 = sld [smem:[#allocation10 + $0x3e]] }
 0x28c   : > { %2017 = vrot.lane.b32.xlu0 %v6632_v58, %s4242_s23  ;;  %10481 = vst [vmem:[#allocation53_spill] sm:$0xff] %v7161_v9  ;;  %v7183_v9 = vmul.f32 %v2286_v59, %v6662_v5  ;;  %10486 = vst [vmem:[#allocation178_spill] sm:$0xff] %v7186_v7  ;;  %v7216_v7 = vmul.f32 %v2276_v29, %v6700_v19  ;;  %v7249_v48 = vmul.f32 %v2286_v59, %v6667_v0 }
 0x28d   : > { %2087 = vrot.lane.b32.xlu1 %v6646_v15, %s4243_s24 }
 0x28e   : > { %10485 = vst [vmem:[#allocation177_spill] sm:$0xff] %v7183_v9  ;;  %v7203_v9 = vmul.f32 %v2296_v42, %v6696_v20  ;;  %10490 = vst [vmem:[#allocation97_spill] sm:$0xff] %v7216_v7  ;;  %v2404_v7 = vstv %s7071_s1  ;;  %s7325_s1 = sld [smem:[#allocation10 + $0xb]] }
 0x28f   : > { %10494 = vst [vmem:[#allocation182_spill] sm:$0xff] %v7249_v48  ;;  %v7264_v21 = vmul.f32 %v2404_v7, %v6711_v49  ;;  %v2510_v48 = vstv %s7147_s12  ;;  %s7391_s12 = sld [smem:[#allocation10 + $0x47]] }
 0x290   : > { %2021 = vrot.lane.b32.xlu0 %v6688_v53, %s4242_s23  ;;  %10489 = vst [vmem:[#allocation96_spill] sm:$0xff] %v7203_v9  ;;  %v7235_v9 = vmul.f32 %v2296_v42, %v6700_v19  ;;  %v7281_v42 = vmul.f32 %v2404_v7, %v6715_v34 }
 0x291   : > { %2091 = vrot.lane.b32.xlu1 %v6692_v45, %s4243_s24  ;;  %10497 = vst [vmem:[#allocation55_spill] sm:$0xff] %v7264_v21 }
 0x292   : > { %10492 = vst [vmem:[#allocation98_spill] sm:$0xff] %v7235_v9  ;;  %10500 = vst [vmem:[#allocation158_spill] sm:$0xff] %v7281_v42  ;;  %v7312_v42 = vmul.f32 %v2404_v7, %v6724_v8 }
 0x294   : > { %2085 = vrot.lane.b32.xlu0 %v6632_v58, %s4243_s24  ;;  %v2172_v58 = vstv %s6957_s17  ;;  %s7241_s17 = sld [smem:[#allocation10 + $0x38]]  ;;  %10506 = vst [vmem:[#allocation101_spill] sm:$0xff] %v7312_v42 }
 0x295   : > { %2239 = vrot.lane.b32.xlu1 %v6696_v20, %s4242_s23  ;;  %v7138_v45 = vmul.f32 %v2172_v58, %v6555_v11  ;;  %v7158_v11 = vmul.f32 %v2182_v2, %v6642_v33  ;;  %v7168_v35 = vmul.f32 %v2172_v58, %v6595_v13 }
 0x297   : > { %10476 = vst [vmem:[#allocation89_spill] sm:$0xff] %v7138_v45  ;;  %v7155_v45 = vmul.f32 %v2172_v58, %v6642_v33  ;;  %10480 = vst [vmem:[#allocation93_spill] sm:$0xff] %v7158_v11 }
 0x298   : > { %2089 = vrot.lane.b32.xlu0 %v6688_v53, %s4243_s24  ;;  %v7126_v53 = vmul.f32 %v2172_v58, %v6569_v27  ;;  %v7152_v27 = vmul.f32 %v2162_v54, %v6642_v33  ;;  %10482 = vst [vmem:[#allocation176_spill] sm:$0xff] %v7168_v35  ;;  %v2394_v33 = vstv %s7057_s25  ;;  %v7180_v54 = vstv %s7059_s6  ;;  %s7307_s25 = sld [smem:[#allocation10 + $0x24]]  ;;  %s7309_s6 = sld [smem:[#allocation10 + $0x3f]] }
 0x299   : > { %2243 = vrot.lane.b32.xlu1 %v6667_v0, %s4242_s23  ;;  %10479 = vst [vmem:[#allocation92_spill] sm:$0xff] %v7155_v45  ;;  %v7174_v45 = vmul.f32 %v2276_v29, %v6662_v5  ;;  %v7189_v58 = vmul.f32 %v2276_v29, %v6696_v20  ;;  %v7219_v35 = vmul.f32 %v2286_v59, %v6700_v19 }
 0x29a   : > { %10473 = vst [vmem:[#allocation155_spill] sm:$0xff] %v7126_v53  ;;  %10478 = vst [vmem:[#allocation91_spill] sm:$0xff] %v7152_v27  ;;  %v7171_v27 = vmul.f32 %v2182_v2, %v6595_v13  ;;  %v7194_v2 = vstv %s7081_s26  ;;  %v7246_v53 = vmul.f32 %v2276_v29, %v6667_v0  ;;  %v7267_v29 = vmul.f32 %v2394_v33, %v6715_v34  ;;  %s7327_s26 = sld [smem:[#allocation10 + $0x26]] }
 0x29b   : > { %10484 = vst [vmem:[#allocation94_spill] sm:$0xff] %v7174_v45  ;;  %10487 = vst [vmem:[#allocation179_spill] sm:$0xff] %v7189_v58  ;;  %v7197_v45 = vstv %s7083_s27  ;;  %v7213_v58 = vstv %s7096_s29  ;;  %s7343_s27 = sld [smem:[#allocation10 + $0x41]]  ;;  %s7361_s29 = sld [smem:[#allocation10 + $0x2a]]  ;;  %v7374_v42 = vstv %s7241_s17 }
 0x29c   : > { %2237 = vrot.lane.b32.xlu0 %v6662_v5, %s4242_s23  ;;  %10483 = vst [vmem:[#allocation54_spill] sm:$0xff] %v7171_v27  ;;  %v7200_v27 = vmul.f32 %v2286_v59, %v6696_v20  ;;  %10491 = vst [vmem:[#allocation180_spill] sm:$0xff] %v7219_v35  ;;  %v2414_v35 = vstv %s7123_s10  ;;  %v2500_v59 = vstv %s7145_s11  ;;  %s7376_s10 = sld [smem:[#allocation10 + $0x11]]  ;;  %s7389_s11 = sld [smem:[#allocation10 + $0x2c]] }
 0x29d   : > { %2307 = vrot.lane.b32.xlu1 %v6696_v20, %s4243_s24  ;;  %v7228_v20 = vstv %s7109_s30  ;;  %10493 = vst [vmem:[#allocation181_spill] sm:$0xff] %v7246_v53  ;;  %10498 = vst [vmem:[#allocation185_spill] sm:$0xff] %v7267_v29  ;;  %v7284_v21 = vmul.f32 %v2414_v35, %v6715_v34  ;;  %v7294_v29 = vmul.f32 %v2394_v33, %v6720_v26  ;;  %s7363_s30 = sld [smem:[#allocation10 + $0x45]]  ;;  %s7565_s17 = sld [smem:[#allocation10 + $0x18]] }
 0x29e   : > { %10488 = vst [vmem:[#allocation95_spill] sm:$0xff] %v7200_v27 }
 0x29f   : > { %10501 = vst [vmem:[#allocation159_spill] sm:$0xff] %v7284_v21  ;;  %10502 = vst [vmem:[#allocation186_spill] sm:$0xff] %v7294_v29  ;;  %v7315_v29 = vmul.f32 %v2414_v35, %v6724_v8 }
 0x2a0   : > { %2241 = vrot.lane.b32.xlu0 %v6700_v19, %s4242_s23  ;;  %v7475_v53 = vstv %s7327_s26  ;;  %s4022_s26 = sld [smem:[#allocation13 + $0x39]] }
 0x2a1   : > { %2311 = vrot.lane.b32.xlu1 %v6667_v0, %s4243_s24  ;;  %v7278_v0 = vmul.f32 %v2414_v35, %v6711_v49  ;;  %10507 = vst [vmem:[#allocation102_spill] sm:$0xff] %v7315_v29  ;;  %10541 = vst [vmem:[#allocation168_spill] sm:$0xff] %v7475_v53 }
 0x2a2   : > { %v7528_v53 = vstv %s7389_s11  ;;  %s4049_s11 = sld [smem:[#allocation13 + $0x42]] }
 0x2a3   : > { %10499 = vst [vmem:[#allocation189_spill] sm:$0xff] %v7278_v0  ;;  %v7300_v0 = vmul.f32 %v2414_v35, %v6720_v26  ;;  %v7336_v35 = vmul.f32 %v2510_v48, %v6559_v30  ;;  %10548 = vst [vmem:[#allocation124_spill] sm:$0xff] %v7528_v53 }
 0x2a4   : > { %2305 = vrot.lane.b32.xlu0 %v6662_v5, %s4243_s24  ;;  %v6991_v56 = vpop.permute.xlu1 %1787  ;;  %v7210_v5 = vstv %s7094_s28  ;;  %s7345_s28 = sld [smem:[#allocation10 + $0xf]] }
 0x2a5   : > { %2357 = vrot.lane.b32.xlu1 %v6715_v34, %s4242_s23  ;;  %10504 = vst [vmem:[#allocation190_spill] sm:$0xff] %v7300_v0  ;;  %10512 = vst [vmem:[#allocation195_spill] sm:$0xff] %v7336_v35  ;;  %v7356_v35 = vstv %s7230_s15  ;;  %v7379_v0 = vmul.f32 %v2500_v59, %v6605_v61  ;;  %s7480_s15 = sld [smem:[#allocation10 + $0x2f]] }
 0x2a6   : > { %v7089_v15 = vpop.permute.xlu0 %1785 }
 0x2a7   : > { %10517 = vst [vmem:[#allocation198_spill] sm:$0xff] %v7379_v0  ;;  %v7472_v0 = vstv %s7325_s1  ;;  %s4021_s1 = sld [smem:[#allocation13 + $0x1e]] }
 0x2a8   : > { %2309 = vrot.lane.b32.xlu0 %v6700_v19, %s4243_s24  ;;  %v7255_v19 = vmul.f32 %v2394_v33, %v6711_v49  ;;  %10540 = vst [vmem:[#allocation167_spill] sm:$0xff] %v7472_v0  ;;  %v7496_v0 = vstv %s7363_s30  ;;  %s4047_s30 = sld [smem:[#allocation13 + $0xc]] }
 0x2a9   : > { %2361 = vrot.lane.b32.xlu1 %v6724_v8, %s4242_s23  ;;  %10546 = vst [vmem:[#allocation48_spill] sm:$0xff] %v7496_v0 }
 0x2aa   : > { %10496 = vst [vmem:[#allocation100_spill] sm:$0xff] %v7255_v19  ;;  %v2520_v19 = vstv %s7163_s3  ;;  %s7424_s3 = sld [smem:[#allocation10 + $0x12]] }
 0x2ab   : > { %v7073_v4 = vpop.permute.xlu1 %1791  ;;  %v7369_v29 = vmul.f32 %v2520_v19, %v6651_v12  ;;  %v7385_v28 = vmul.f32 %v2520_v19, %v6605_v61 }
 0x2ac   : > { %2355 = vrot.lane.b32.xlu0 %v6711_v49, %s4242_s23  ;;  %v7539_v1 = vmul.f32 %v6843_v38, %v7073_v4 }
 0x2ad   : > { %2425 = vrot.lane.b32.xlu1 %v6715_v34, %s4243_s24  ;;  %v7303_v34 = vmul.f32 %v2394_v33, %v6724_v8  ;;  %v7321_v33 = vmul.f32 %v2510_v48, %v6574_v47  ;;  %10516 = vst [vmem:[#allocation197_spill] sm:$0xff] %v7369_v29  ;;  %10519 = vst [vmem:[#allocation108_spill] sm:$0xff] %v7385_v28  ;;  %v7446_v28 = vstv %s7273_s7  ;;  %s7649_s7 = sld [smem:[#allocation10 + $0x35]] }
 0x2ae   : > { %10534 = vst [vmem:[#allocation117_spill] sm:$0xff] %v7446_v28  ;;  %v7535_v28 = vmul.f32 %v6841_v46, %v7073_v4 }
 0x2af   : > { %v7135_v14 = vpop.permute.xlu1 %1855  ;;  %10505 = vst [vmem:[#allocation160_spill] sm:$0xff] %v7303_v34  ;;  %10509 = vst [vmem:[#allocation192_spill] sm:$0xff] %v7321_v33  ;;  %v2624_v33 = vstv %s7221_s13  ;;  %s7451_s13 = sld [smem:[#allocation10 + $0x48]] }
 0x2b0   : > { %2359 = vrot.lane.b32.xlu0 %v6720_v26, %s4242_s23  ;;  %v7397_v29 = vmul.f32 %v2624_v33, %v6735_v24  ;;  %v7557_v53 = vmul.f32 %v6853_v36, %v7135_v14  ;;  %v7560_v51 = vstv %s7424_s3  ;;  %s4016_s3 = sld [smem:[#allocation13 + $0x37]] }
 0x2b1   : > { %2429 = vrot.lane.b32.xlu1 %v6724_v8, %s4243_s24  ;;  %v7333_v8 = vmul.f32 %v2500_v59, %v6559_v30  ;;  %10550 = vst [vmem:[#allocation126_spill] sm:$0xff] %v7560_v51 }
 0x2b2   : > { %v7177_v11 = vpop.permute.xlu0 %1789  ;;  %10521 = vst [vmem:[#allocation200_spill] sm:$0xff] %v7397_v29 }
 0x2b3   : > { %v7191_v13 = vpop.permute.xlu1 %1859  ;;  %10511 = vst [vmem:[#allocation104_spill] sm:$0xff] %v7333_v8  ;;  %v2634_v8 = vstv %s7223_s14  ;;  %s7467_s14 = sld [smem:[#allocation10 + $0x14]] }
 0x2b4   : > { %2423 = vrot.lane.b32.xlu0 %v6711_v49, %s4243_s24  ;;  %v7297_v49 = vmul.f32 %v2404_v7, %v6720_v26  ;;  %v7330_v7 = vmul.f32 %v2520_v19, %v6574_v47 }
 0x2b5   : > { %2577 = vrot.lane.b32.xlu1 %v6739_v3, %s4242_s23  ;;  %v7580_v51 = vstv %s7451_s13  ;;  %s4055_s13 = sld [smem:[#allocation13 + $0x44]] }
 0x2b6   : > { %v7239_v27 = vpop.permute.xlu0 %1853  ;;  %10503 = vst [vmem:[#allocation187_spill] sm:$0xff] %v7297_v49  ;;  %10510 = vst [vmem:[#allocation193_spill] sm:$0xff] %v7330_v7  ;;  %v2614_v7 = vstv %s7205_s5  ;;  %v7382_v49 = vmul.f32 %v2510_v48, %v6605_v61  ;;  %v7408_v61 = vmul.f32 %v2624_v33, %v6739_v3  ;;  %s7426_s5 = sld [smem:[#allocation10 + $0x2d]] }
 0x2b7   : > { %v7257_v9 = vpop.permute.xlu1 %2125  ;;  %v7414_v29 = vmul.f32 %v2614_v7, %v6743_v50  ;;  %10553 = vst [vmem:[#allocation129_spill] sm:$0xff] %v7580_v51  ;;  %v7603_v51 = vmul.f32 %v6849_v31, %v7239_v27 }
 0x2b8   : > { %2427 = vrot.lane.b32.xlu0 %v6720_v26, %s4243_s24  ;;  %v7318_v26 = vmul.f32 %v2500_v59, %v6574_v47  ;;  %v7348_v47 = vmul.f32 %v2500_v59, %v6651_v12  ;;  %10518 = vst [vmem:[#allocation107_spill] sm:$0xff] %v7382_v49  ;;  %v7400_v59 = vmul.f32 %v2634_v8, %v6735_v24  ;;  %10524 = vst [vmem:[#allocation110_spill] sm:$0xff] %v7408_v61 }
 0x2b9   : > { %2581 = vrot.lane.b32.xlu1 %v6747_v18, %s4242_s23  ;;  %10526 = vst [vmem:[#allocation112_spill] sm:$0xff] %v7414_v29  ;;  %v7432_v29 = vmul.f32 %v2614_v7, %v6747_v18  ;;  %v7440_v61 = vstv %s7259_s4  ;;  %v7449_v49 = vstv %s7275_s20  ;;  %s7599_s4 = sld [smem:[#allocation10 + $0x4e]]  ;;  %s7667_s20 = sld [smem:[#allocation10 + $0x50]] }
 0x2ba   : > { %v7305_v21 = vpop.permute.xlu0 %1857  ;;  %10508 = vst [vmem:[#allocation103_spill] sm:$0xff] %v7318_v26  ;;  %v7339_v26 = vmul.f32 %v2520_v19, %v6559_v30  ;;  %10514 = vst [vmem:[#allocation106_spill] sm:$0xff] %v7348_v47  ;;  %v7359_v30 = vstv %s7232_s16  ;;  %v7411_v19 = vmul.f32 %v2634_v8, %v6739_v3  ;;  %s7498_s16 = sld [smem:[#allocation10 + $0x4a]] }
 0x2bb   : > { %v7323_v34 = vpop.permute.xlu1 %2129  ;;  %10522 = vst [vmem:[#allocation201_spill] sm:$0xff] %v7400_v59  ;;  %v7417_v59 = vmul.f32 %v2624_v33, %v6743_v50  ;;  %10530 = vst [vmem:[#allocation113_spill] sm:$0xff] %v7432_v29  ;;  %v7462_v29 = vstv %s7307_s25  ;;  %s4020_s25 = sld [smem:[#allocation13 + $0x3]] }
 0x2bc   : > { %10513 = vst [vmem:[#allocation105_spill] sm:$0xff] %v7339_v26  ;;  %2575 = vrot.lane.b32.xlu0 %v6735_v24, %s4242_s23  ;;  %v7366_v26 = vmul.f32 %v2510_v48, %v6651_v12  ;;  %v7394_v12 = vmul.f32 %v2614_v7, %v6735_v24  ;;  %v7403_v48 = vmul.f32 %v2614_v7, %v6739_v3  ;;  %10525 = vst [vmem:[#allocation111_spill] sm:$0xff] %v7411_v19 }
 0x2bd   : > { %2645 = vrot.lane.b32.xlu1 %v6739_v3, %s4243_s24  ;;  %10527 = vst [vmem:[#allocation161_spill] sm:$0xff] %v7417_v59  ;;  %v7429_v3 = vmul.f32 %v2634_v8, %v6743_v50  ;;  %v7435_v59 = vmul.f32 %v2624_v33, %v6747_v18  ;;  %10532 = vst [vmem:[#allocation115_spill] sm:$0xff] %v7440_v61  ;;  %v7456_v33 = vstv %s7289_s21  ;;  %s8437_s21 = sld [smem:[#allocation13 + $0x1]] }
 0x2be   : > { %10515 = vst [vmem:[#allocation196_spill] sm:$0xff] %v7366_v26  ;;  %v7371_v47 = vpop.permute.xlu0 %2123  ;;  %10520 = vst [vmem:[#allocation109_spill] sm:$0xff] %v7394_v12  ;;  %v7443_v12 = vstv %s7261_s18  ;;  %v7577_v61 = vmul.f32 %v6845_v60, %v7177_v11  ;;  %s7647_s18 = sld [smem:[#allocation10 + $0x1a]] }
 0x2bf   : > { %v7387_v26 = vpop.permute.xlu1 %2193  ;;  %10523 = vst [vmem:[#allocation202_spill] sm:$0xff] %v7403_v48  ;;  %v7422_v48 = vstv %s7243_s2  ;;  %10529 = vst [vmem:[#allocation165_spill] sm:$0xff] %v7429_v3  ;;  %v7465_v3 = vstv %s7309_s6  ;;  %s7582_s2 = sld [smem:[#allocation10 + $0x33]]  ;;  %s8441_s6 = sld [smem:[#allocation13 + $0x1c]] }
 0x2c0   : > { %2579 = vrot.lane.b32.xlu0 %v6743_v50, %s4242_s23  ;;  %10528 = vst [vmem:[#allocation162_spill] sm:$0xff] %v7422_v48  ;;  %10531 = vst [vmem:[#allocation114_spill] sm:$0xff] %v7435_v59  ;;  %v7459_v59 = vstv %s7291_s22  ;;  %v7614_v48 = vstv %s7480_s15  ;;  %s8439_s22 = sld [smem:[#allocation13 + $0x4]]  ;;  %s8453_s15 = sld [smem:[#allocation13 + $0x3a]] }
 0x2c1   : > { %2649 = vrot.lane.b32.xlu1 %v6747_v18, %s4243_s24  ;;  %10533 = vst [vmem:[#allocation116_spill] sm:$0xff] %v7443_v12  ;;  %10535 = vst [vmem:[#allocation118_spill] sm:$0xff] %v7449_v49  ;;  %v7478_v49 = vstv %s7343_s27  ;;  %v7569_v12 = vmul.f32 %v6841_v46, %v7177_v11  ;;  %s4026_s27 = sld [smem:[#allocation13 + $0x5]] }
 0x2c2   : > { %v7437_v19 = vpop.permute.xlu0 %2127  ;;  %10536 = vst [vmem:[#allocation119_spill] sm:$0xff] %v7456_v33  ;;  %10537 = vst [vmem:[#allocation120_spill] sm:$0xff] %v7459_v59  ;;  %v7490_v59 = vstv %s7345_s28  ;;  %v7531_v33 = vstv %s7391_s12  ;;  %s4027_s28 = sld [smem:[#allocation13 + $0x20]]  ;;  %s4053_s12 = sld [smem:[#allocation13 + $0xe]] }
 0x2c3   : > { %v7453_v7 = vpop.permute.xlu1 %2197  ;;  %10538 = vst [vmem:[#allocation121_spill] sm:$0xff] %v7462_v29  ;;  %10539 = vst [vmem:[#allocation166_spill] sm:$0xff] %v7465_v3  ;;  %v7483_v29 = vmul.f32 %v2634_v8, %v6747_v18  ;;  %v7487_v3 = vmul.f32 %v6841_v46, %v6991_v56  ;;  %v7506_v18 = vmul.f32 %v6845_v60, %v6991_v56 }
 0x2c4   : > { %2643 = vrot.lane.b32.xlu0 %v6735_v24, %s4243_s24  ;;  %10542 = vst [vmem:[#allocation122_spill] sm:$0xff] %v7478_v49  ;;  %10544 = vst [vmem:[#allocation41_spill] sm:$0xff] %v7490_v59  ;;  %v7493_v24 = vstv %s7361_s29  ;;  %v7502_v49 = vmul.f32 %v6843_v38, %v6991_v56  ;;  %v7510_v8 = vmul.f32 %v6841_v46, %v7089_v15  ;;  %v7525_v56 = vstv %s7376_s10  ;;  %s4028_s29 = sld [smem:[#allocation13 + $0x3b]]  ;;  %s4048_s10 = sld [smem:[#allocation13 + $0x27]] }
 0x2c5   : > { %10543 = vst [vmem:[#allocation123_spill] sm:$0xff] %v7483_v29  ;;  %10545 = vst [vmem:[#allocation47_spill] sm:$0xff] %v7493_v24  ;;  %v7514_v29 = vmul.f32 %v6843_v38, %v7089_v15  ;;  %v7520_v24 = vmul.f32 %v6845_v60, %v7089_v15  ;;  %v7543_v15 = vmul.f32 %v6845_v60, %v7073_v4  ;;  %v7563_v4 = vstv %s7426_s5  ;;  %s4054_s5 = sld [smem:[#allocation13 + $0x29]] }
 0x2c6   : > { %v7516_v0 = vpop.permute.xlu0 %2191  ;;  %10547 = vst [vmem:[#allocation49_spill] sm:$0xff] %v7525_v56  ;;  %10549 = vst [vmem:[#allocation125_spill] sm:$0xff] %v7531_v33  ;;  %v7547_v56 = vmul.f32 %v6849_v31, %v7135_v14  ;;  %v7553_v33 = vmul.f32 %v6851_v32, %v7135_v14  ;;  %v7590_v46 = vmul.f32 %v6851_v32, %v7191_v13 }
 0x2c7   : > { %v7522_v59 = vpop.permute.xlu1 %2463  ;;  %10551 = vst [vmem:[#allocation127_spill] sm:$0xff] %v7563_v4  ;;  %10552 = vst [vmem:[#allocation128_spill] sm:$0xff] %v7577_v61  ;;  %v7586_v4 = vmul.f32 %v6849_v31, %v7191_v13  ;;  %v7629_v61 = vstv %s7498_s16  ;;  %s8463_s16 = sld [smem:[#allocation13 + $0x7]] }
 0x2c8   : > { %2647 = vrot.lane.b32.xlu0 %v6743_v50, %s4243_s24  ;;  %v7573_v50 = vmul.f32 %v6843_v38, %v7177_v11  ;;  %10555 = vst [vmem:[#allocation131_spill] sm:$0xff] %v7590_v46  ;;  %v7594_v38 = vmul.f32 %v6853_v36, %v7191_v13  ;;  %v7597_v11 = vstv %s7467_s14  ;;  %v7611_v46 = vmul.f32 %v6853_v36, %v7239_v27  ;;  %s8451_s14 = sld [smem:[#allocation13 + $0x1f]] }
 0x2c9   : > { %10554 = vst [vmem:[#allocation130_spill] sm:$0xff] %v7586_v4  ;;  %10557 = vst [vmem:[#allocation169_spill] sm:$0xff] %v7597_v11  ;;  %v7607_v4 = vmul.f32 %v6851_v32, %v7239_v27  ;;  %v7618_v13 = vmul.f32 %v6855_v44, %v7257_v9  ;;  %v7622_v11 = vmul.f32 %v6861_v40, %v7257_v9 }
 0x2ca   : > { %v2196_v14 = vpop.permute.xlu0 %2195  ;;  %10556 = vst [vmem:[#allocation132_spill] sm:$0xff] %v7594_v38  ;;  %10558 = vst [vmem:[#allocation170_spill] sm:$0xff] %v7614_v48  ;;  %v7626_v38 = vmul.f32 %v6863_v37, %v7257_v9  ;;  %v7633_v27 = vmul.f32 %v6849_v31, %v7305_v21  ;;  %v7637_v48 = vmul.f32 %v6851_v32, %v7305_v21 }
 0x2cb   : > { %v2468_v60 = vpop.permute.xlu1 %2467  ;;  %10559 = vst [vmem:[#allocation171_spill] sm:$0xff] %v7618_v13  ;;  %10560 = vst [vmem:[#allocation40_spill] sm:$0xff] %v7622_v11  ;;  %v7641_v13 = vmul.f32 %v6853_v36, %v7305_v21  ;;  %v7645_v11 = vmul.f32 %v6855_v44, %v7323_v34  ;;  %v7653_v31 = vmul.f32 %v6855_v44, %v7371_v47 }
 0x2cc   : > { %10561 = vst [vmem:[#allocation42_spill] sm:$0xff] %v7626_v38  ;;  %10562 = vst [vmem:[#allocation43_spill] sm:$0xff] %v7629_v61  ;;  %v7657_v32 = vmul.f32 %v6861_v40, %v7371_v47  ;;  %v7661_v36 = vmul.f32 %v6861_v40, %v7323_v34  ;;  %v7665_v21 = vmul.f32 %v6863_v37, %v7323_v34 }
 0x2cd   : > { %10563 = vst [vmem:[#allocation51_spill] sm:$0xff] %v7645_v11  ;;  %v7671_v11 = vmul.f32 %v6863_v37, %v7371_v47  ;;  %v7675_v38 = vmul.f32 %v6873_v16, %v7387_v26  ;;  %v7683_v34 = vmul.f32 %v6882_v10, %v7387_v26  ;;  %v7691_v47 = vmul.f32 %v6861_v40, %v7437_v19 }
 0x2ce   : > { %v2462_v9 = vpop.permute.xlu0 %2461  ;;  %10564 = vst [vmem:[#allocation173_spill] sm:$0xff] %v7661_v36  ;;  %10565 = vst [vmem:[#allocation174_spill] sm:$0xff] %v7665_v21  ;;  %v7679_v36 = vmul.f32 %v6875_v22, %v7387_v26  ;;  %v7687_v21 = vmul.f32 %v6855_v44, %v7437_v19  ;;  %v7706_v26 = vmul.f32 %v6875_v22, %v7453_v7 }
 0x2cf   : > { %v2532_v61 = vpop.permute.xlu1 %2531  ;;  %10566 = vst [vmem:[#allocation133_spill] sm:$0xff] %v7671_v11  ;;  %10567 = vst [vmem:[#allocation134_spill] sm:$0xff] %v7675_v38  ;;  %v7695_v38 = vmul.f32 %v6863_v37, %v7437_v19  ;;  %v7698_v11 = vstv %s7565_s17  ;;  %v7710_v44 = vmul.f32 %v6882_v10, %v7453_v7  ;;  %v7717_v37 = vmul.f32 %v6873_v16, %v7516_v0  ;;  %s8473_s17 = sld [smem:[#allocation13 + $0x15]] }
 0x2d0   : > { %10568 = vst [vmem:[#allocation135_spill] sm:$0xff] %v7679_v36  ;;  %10569 = vst [vmem:[#allocation136_spill] sm:$0xff] %v7683_v34  ;;  %v7702_v36 = vmul.f32 %v6873_v16, %v7453_v7  ;;  %v7713_v34 = vstv %s7582_s2  ;;  %v7721_v19 = vmul.f32 %v6875_v22, %v7516_v0  ;;  %v7728_v7 = vstv %s7599_s4  ;;  %s8475_s2 = sld [smem:[#allocation13 + $0x30]]  ;;  %s8484_s4 = sld [smem:[#allocation13 + $0x22]] }
 0x2d1   : > { %10570 = vst [vmem:[#allocation137_spill] sm:$0xff] %v7698_v11  ;;  %10572 = vst [vmem:[#allocation139_spill] sm:$0xff] %v7706_v26  ;;  %v7725_v11 = vmul.f32 %v6882_v10, %v7516_v0  ;;  %v7746_v0 = vmul.f32 %v6875_v22, %v2196_v14  ;;  %v7767_v22 = vstv %s7649_s7  ;;  %s8492_s7 = sld [smem:[#allocation13 + $0x4b]] }
 0x2d2   : > { %10571 = vst [vmem:[#allocation138_spill] sm:$0xff] %v7702_v36  ;;  %10573 = vst [vmem:[#allocation140_spill] sm:$0xff] %v7710_v44  ;;  %v2466_v40 = vpop.permute.xlu0 %2465  ;;  %v7731_v44 = vmul.f32 %v6873_v16, %v2196_v14  ;;  %v7739_v36 = vmul.f32 %v6965_v57, %v7522_v59  ;;  %v7752_v16 = vmul.f32 %v6962_v55, %v2468_v60 }
 0x2d3   : > { %10574 = vst [vmem:[#allocation141_spill] sm:$0xff] %v7713_v34  ;;  %10575 = vst [vmem:[#allocation183_spill] sm:$0xff] %v7717_v37  ;;  %v2536_v26 = vpop.permute.xlu1 %2535  ;;  %v7735_v34 = vmul.f32 %v6962_v55, %v7522_v59 }
 0x2d4   : > { %10576 = vst [vmem:[#allocation184_spill] sm:$0xff] %v7721_v19  ;;  %10577 = vst [vmem:[#allocation188_spill] sm:$0xff] %v7725_v11  ;;  %v7743_v19 = vmul.f32 %v6976_v39, %v7522_v59 }
 0x2d5   : > { %10578 = vst [vmem:[#allocation44_spill] sm:$0xff] %v7728_v7  ;;  %10579 = vst [vmem:[#allocation45_spill] sm:$0xff] %v7731_v44  ;;  %v7749_v7 = vmul.f32 %v6882_v10, %v2196_v14  ;;  %v7758_v44 = vmul.f32 %v6962_v55, %v2462_v9  ;;  %v7770_v10 = vmul.f32 %v6965_v57, %v2462_v9 }
 0x2d6   : > { %10580 = vst [vmem:[#allocation46_spill] sm:$0xff] %v7735_v34  ;;  %10581 = vst [vmem:[#allocation191_spill] sm:$0xff] %v7739_v36  ;;  %v7755_v34 = vmul.f32 %v6965_v57, %v2468_v60  ;;  %v7761_v36 = vmul.f32 %v6976_v39, %v2468_v60  ;;  %v2530_v59 = vpop.permute.xlu0 %2529  ;;  %v7773_v14 = vmul.f32 %v6976_v39, %v2462_v9 }
 0x2d7   : > { %10582 = vst [vmem:[#allocation194_spill] sm:$0xff] %v7743_v19  ;;  %10583 = vst [vmem:[#allocation199_spill] sm:$0xff] %v7746_v0  ;;  %v7764_v19 = vstv %s7647_s18  ;;  %v7782_v60 = vmul.f32 %v7079_v23, %v2532_v61  ;;  %v7791_v9 = vmul.f32 %v6965_v57, %v2466_v40  ;;  %v7808_v57 = vmul.f32 %v7076_v52, %v2530_v59  ;;  %s8486_s18 = sld [smem:[#allocation13 + $0x3d]] }
 0x2d8   : > { %10584 = vst [vmem:[#allocation142_spill] sm:$0xff] %v7749_v7  ;;  %10585 = vst [vmem:[#allocation143_spill] sm:$0xff] %v7752_v16  ;;  %v7776_v16 = vmul.f32 %v7076_v52, %v2532_v61  ;;  %v7779_v7 = vstv %s7667_s20  ;;  %s8525_s20 = sld [smem:[#allocation13 + $0xa]] }
 0x2d9   : > { %10586 = vst [vmem:[#allocation144_spill] sm:$0xff] %v7755_v34  ;;  %10587 = vst [vmem:[#allocation145_spill] sm:$0xff] %v7758_v44  ;;  %v1682_v34 = vpop.permute.xlu1 %1681 }
 0x2da   : > { %10588 = vst [vmem:[#allocation146_spill] sm:$0xff] %v7761_v36  ;;  %10589 = vst [vmem:[#allocation147_spill] sm:$0xff] %v7764_v19  ;;  %v1690_v36 = vmul.f32 %v7210_v5, %v1682_v34  ;;  %v1700_v19 = vmul.f32 %v7213_v58, %v1682_v34  ;;  %v2534_v44 = vpop.permute.xlu0 %2533 }
 0x2db   : > { %10590 = vst [vmem:[#allocation148_spill] sm:$0xff] %v7767_v22  ;;  %10591 = vst [vmem:[#allocation163_spill] sm:$0xff] %v7770_v10  ;;  %v1710_v22 = vmul.f32 %v7228_v20, %v1682_v34  ;;  %v7788_v10 = vmul.f32 %v6962_v55, %v2466_v40 }
 0x2dc   : > { %10592 = vst [vmem:[#allocation164_spill] sm:$0xff] %v7773_v14  ;;  %10593 = vst [vmem:[#allocation203_spill] sm:$0xff] %v7776_v16  ;;  %v7794_v16 = vmul.f32 %v6976_v39, %v2466_v40  ;;  %v7803_v14 = vmul.f32 %v7079_v23, %v2536_v26  ;;  %v1694_v34 = vadd.f32 %v1690_v36, %v7180_v54 }
 0x2dd   : > { %10594 = vst [vmem:[#allocation204_spill] sm:$0xff] %v7779_v7  ;;  %10595 = vst [vmem:[#allocation205_spill] sm:$0xff] %v7782_v60  ;;  %v7797_v7 = vmul.f32 %v7092_v43, %v2532_v61  ;;  %v7800_v60 = vmul.f32 %v7076_v52, %v2536_v26  ;;  %v1704_v55 = vadd.f32 %v1700_v19, %v7194_v2 }
 0x2de   : > { %10596 = vst [vmem:[#allocation206_spill] sm:$0xff] %v7788_v10  ;;  %10597 = vst [vmem:[#allocation207_spill] sm:$0xff] %v7791_v9  ;;  %v7811_v39 = vmul.f32 %v7079_v23, %v2530_v59  ;;  %v7814_v61 = vmul.f32 %v7092_v43, %v2536_v26  ;;  %v1714_v40 = vadd.f32 %v1710_v22, %v7197_v45 }
 0x2df   : > { %10598 = vst [vmem:[#allocation208_spill] sm:$0xff] %v7794_v16  ;;  %10599 = vst [vmem:[#allocation209_spill] sm:$0xff] %v7797_v7  ;;  %v7818_v7 = vmul.f32 %v7092_v43, %v2530_v59  ;;  %v7830_v26 = vmul.f32 %v7092_v43, %v2534_v44  ;;  %v1724_v22 = vadd.f32 %v6896_v17, %v1694_v34 }
 0x2e0   : > { %10600 = vst [vmem:[#allocation210_spill] sm:$0xff] %v7800_v60  ;;  %10601 = vst [vmem:[#allocation211_spill] sm:$0xff] %v7803_v14  ;;  %v1686_v60 = vpop.permute.xlu1 %1685  ;;  %v1744_v43 = vadd.f32 %v6905_v6, %v1714_v40 }
 0x2e1   : > { %10602 = vst [vmem:[#allocation212_spill] sm:$0xff] %v7808_v57  ;;  %10603 = vst [vmem:[#allocation213_spill] sm:$0xff] %v7811_v39  ;;  %v1692_v14 = vmul.f32 %v7210_v5, %v1686_v60  ;;  %v1702_v36 = vmul.f32 %v7213_v58, %v1686_v60  ;;  %v1712_v19 = vmul.f32 %v7228_v20, %v1686_v60 }
 0x2e2   : > { %10604 = vst [vmem:[#allocation214_spill] sm:$0xff] %v7814_v61  ;;  %10605 = vst [vmem:[#allocation215_spill] sm:$0xff] %v7818_v7  ;;  %v7824_v57 = vmul.f32 %v7076_v52, %v2534_v44  ;;  %v7827_v39 = vmul.f32 %v7079_v23, %v2534_v44  ;;  %v1680_v61 = vpop.permute.xlu0 %1679  ;;  %v1734_v60 = vadd.f32 %v6902_v63, %v1704_v55 }
 0x2e3   : > { %10608 = vst [vmem:[#allocation218_spill] sm:$0xff] %v7830_v26  ;;  %v1696_v59 = vadd.f32 %v1692_v14, %v7180_v54  ;;  %v1706_v7 = vadd.f32 %v1702_v36, %v7194_v2  ;;  %v1716_v16 = vadd.f32 %v1712_v19, %v7197_v45  ;;  %v1689_v52 = vmul.f32 %v7210_v5, %v1680_v61 }
 0x2e4   : > { %10606 = vst [vmem:[#allocation216_spill] sm:$0xff] %v7824_v57  ;;  %10607 = vst [vmem:[#allocation217_spill] sm:$0xff] %v7827_v39  ;;  %v1699_v57 = vmul.f32 %v7213_v58, %v1680_v61  ;;  %v1709_v23 = vmul.f32 %v7228_v20, %v1680_v61  ;;  %v1750_v44 = vpop.permute.xlu1 %1749 }
 0x2e5   : > { %v1758_v17 = vmul.f32 %v7356_v35, %v1750_v44  ;;  %v1768_v34 = vmul.f32 %v7359_v30, %v1750_v44  ;;  %v1778_v14 = vmul.f32 %v7374_v42, %v1750_v44  ;;  %v1726_v36 = vadd.f32 %v6923_v41, %v1696_v59  ;;  %v10609_v59 = vld [vmem:[#allocation56_spill] sm:$0xff] }
 0x2e6   : > { %v1693_v19 = vadd.f32 %v1689_v52, %v7180_v54  ;;  %v1703_v63 = vadd.f32 %v1699_v57, %v7194_v2  ;;  %v1713_v55 = vadd.f32 %v1709_v23, %v7197_v45  ;;  %v1736_v26 = vadd.f32 %v6926_v25, %v1706_v7  ;;  %v1684_v61 = vpop.permute.xlu0 %1683  ;;  %v10610_v57 = vld [vmem:[#allocation57_spill] sm:$0xff]  ;;  %v10611_v23 = vld [vmem:[#allocation58_spill] sm:$0xff] }
 0x2e7   : > { %v1762_v39 = vadd.f32 %v1758_v17, %v1724_v22  ;;  %v1772_v6 = vadd.f32 %v1768_v34, %v1734_v60  ;;  %v1782_v40 = vadd.f32 %v1778_v14, %v1744_v43  ;;  %v1746_v9 = vadd.f32 %v6929_v62, %v1716_v16  ;;  %v10612_v17 = vld [vmem:[#allocation65_spill] sm:$0xff] }
 0x2e8   : > { %v1691_v10 = vmul.f32 %v7210_v5, %v1684_v61  ;;  %v1701_v44 = vmul.f32 %v7213_v58, %v1684_v61  ;;  %v1711_v41 = vmul.f32 %v7228_v20, %v1684_v61  ;;  %v1723_v52 = vadd.f32 %v10609_v59, %v1693_v19  ;;  %v1754_v0 = vpop.permute.xlu1 %1753  ;;  %v10615_v14 = vld [vmem:[#allocation61_spill] sm:$0xff] }
 0x2e9   : > { %v1733_v11 = vadd.f32 %v10610_v57, %v1703_v63  ;;  %v1743_v37 = vadd.f32 %v10611_v23, %v1713_v55  ;;  %v1800_v25 = vadd.f32 %v7487_v3, %v1762_v39  ;;  %v1810_v7 = vadd.f32 %v7502_v49, %v1772_v6  ;;  %v10614_v39 = vld [vmem:[#allocation60_spill] sm:$0xff]  ;;  %v10616_v57 = vld [vmem:[#allocation66_spill] sm:$0xff] }
 0x2ea   : > { %v1695_v22 = vadd.f32 %v1691_v10, %v7180_v54  ;;  %v1705_v62 = vadd.f32 %v1701_v44, %v7194_v2  ;;  %v1715_v5 = vadd.f32 %v1711_v41, %v7197_v45  ;;  %v1820_v58 = vadd.f32 %v7506_v18, %v1782_v40  ;;  %v1748_v20 = vpop.permute.xlu0 %1747  ;;  %v10613_v2 = vld [vmem:[#allocation59_spill] sm:$0xff] }
 0x2eb   : > { %v1760_v16 = vmul.f32 %v7356_v35, %v1754_v0  ;;  %v1770_v60 = vmul.f32 %v7359_v30, %v1754_v0  ;;  %v1780_v43 = vmul.f32 %v7374_v42, %v1754_v0  ;;  %v1830_v34 = vadd.f32 %v10612_v17, %v1800_v25  ;;  %v10617_v25 = vld [vmem:[#allocation67_spill] sm:$0xff] }
 0x2ec   : > { %v1757_v3 = vmul.f32 %v7356_v35, %v1748_v20  ;;  %v1767_v49 = vmul.f32 %v7359_v30, %v1748_v20  ;;  %v1777_v54 = vmul.f32 %v7374_v42, %v1748_v20  ;;  %v1725_v10 = vadd.f32 %v10613_v2, %v1695_v22  ;;  %v1902_v45 = vpop.permute.xlu1 %1901  ;;  %v10622_v2 = vld [vmem:[#allocation162_spill] sm:$0xff] }
 0x2ed   : > { %v1735_v18 = vadd.f32 %v10614_v39, %v1705_v62  ;;  %v1745_v19 = vadd.f32 %v10615_v14, %v1715_v5  ;;  %v1764_v63 = vadd.f32 %v1760_v16, %v1726_v36  ;;  %v1774_v55 = vadd.f32 %v1770_v60, %v1736_v26  ;;  %v10620_v16 = vld [vmem:[#allocation64_spill] sm:$0xff]  ;;  %v10623_v39 = vld [vmem:[#allocation115_spill] sm:$0xff] }
 0x2ee   : > { %v1761_v61 = vadd.f32 %v1757_v3, %v1723_v52  ;;  %v1771_v6 = vadd.f32 %v1767_v49, %v1733_v11  ;;  %v1781_v0 = vadd.f32 %v1777_v54, %v1743_v37  ;;  %v1784_v40 = vadd.f32 %v1780_v43, %v1746_v9  ;;  %v1752_v44 = vpop.permute.xlu0 %1751  ;;  %v10621_v49 = vld [vmem:[#allocation128_spill] sm:$0xff] }
 0x2ef   : > { %v1802_v41 = vadd.f32 %v7535_v28, %v1764_v63  ;;  %v1812_v59 = vadd.f32 %v7539_v1, %v1774_v55  ;;  %v1840_v23 = vadd.f32 %v10616_v57, %v1810_v7  ;;  %v1850_v22 = vadd.f32 %v10617_v25, %v1820_v58  ;;  %v10618_v7 = vld [vmem:[#allocation62_spill] sm:$0xff]  ;;  %v10619_v58 = vld [vmem:[#allocation63_spill] sm:$0xff]  ;;  %v10625_v63 = vld [vmem:[#allocation68_spill] sm:$0xff] }
 0x2f0   : > { %v1799_v20 = vadd.f32 %v7510_v8, %v1761_v61  ;;  %v1809_v62 = vadd.f32 %v7514_v29, %v1771_v6  ;;  %v1819_v36 = vadd.f32 %v7520_v24, %v1781_v0  ;;  %v1759_v26 = vmul.f32 %v7356_v35, %v1752_v44  ;;  %v1906_v11 = vpop.permute.xlu1 %1905 }
 0x2f1   : > { %v1769_v37 = vmul.f32 %v7359_v30, %v1752_v44  ;;  %v1779_v9 = vmul.f32 %v7374_v42, %v1752_v44  ;;  %v1822_v28 = vadd.f32 %v7543_v15, %v1784_v40  ;;  %v1868_v1 = vadd.f32 %v7547_v56, %v1830_v34 }
 0x2f2   : > { %v1763_v52 = vadd.f32 %v1759_v26, %v1725_v10  ;;  %v1829_v5 = vadd.f32 %v10618_v7, %v1799_v20  ;;  %v1839_v8 = vadd.f32 %v10619_v58, %v1809_v62  ;;  %v1849_v29 = vadd.f32 %v10620_v16, %v1819_v36  ;;  %v1900_v43 = vpop.permute.xlu0 %1899  ;;  %v10628_v26 = vld [vmem:[#allocation50_spill] sm:$0xff] }
 0x2f3   : > { %v1773_v60 = vadd.f32 %v1769_v37, %v1735_v18  ;;  %v1783_v24 = vadd.f32 %v1779_v9, %v1745_v19  ;;  %v1878_v35 = vadd.f32 %v7553_v33, %v1840_v23  ;;  %v1888_v30 = vadd.f32 %v7557_v53, %v1850_v22  ;;  %v10624_v33 = vld [vmem:[#allocation116_spill] sm:$0xff]  ;;  %v10627_v23 = vld [vmem:[#allocation70_spill] sm:$0xff]  ;;  %v10629_v9 = vld [vmem:[#allocation71_spill] sm:$0xff] }
 0x2f4   : > { %v1801_v42 = vadd.f32 %v7569_v12, %v1763_v52  ;;  %v1867_v15 = vadd.f32 %v7603_v51, %v1829_v5  ;;  %v1877_v56 = vadd.f32 %v7607_v4, %v1839_v8  ;;  %v1887_v17 = vadd.f32 %v7611_v46, %v1849_v29  ;;  %v1970_v34 = vpop.permute.xlu1 %1969  ;;  %v10630_v5 = vld [vmem:[#allocation72_spill] sm:$0xff] }
 0x2f5   : > { %v1811_v3 = vadd.f32 %v7573_v50, %v1773_v60  ;;  %v1821_v54 = vadd.f32 %v10621_v49, %v1783_v24  ;;  %v1909_v10 = vmul.f32 %v10622_v2, %v1900_v43  ;;  %v1919_v18 = vmul.f32 %v10623_v39, %v1900_v43  ;;  %v10626_v50 = vld [vmem:[#allocation69_spill] sm:$0xff]  ;;  %v10632_v60 = vld [vmem:[#allocation131_spill] sm:$0xff]  ;;  %v10636_v49 = vld [vmem:[#allocation172_spill] sm:$0xff] }
 0x2f6   : > { %v1929_v14 = vmul.f32 %v10624_v33, %v1900_v43  ;;  %v1910_v53 = vmul.f32 %v10622_v2, %v1902_v45  ;;  %v1920_v12 = vmul.f32 %v10623_v39, %v1902_v45  ;;  %v1930_v51 = vmul.f32 %v10624_v33, %v1902_v45  ;;  %v1904_v46 = vpop.permute.xlu0 %1903 }
 0x2f7   : > { %v1913_v4 = vadd.f32 %v1909_v10, %v1867_v15  ;;  %v1923_v19 = vadd.f32 %v1919_v18, %v1877_v56  ;;  %v1831_v55 = vadd.f32 %v10625_v63, %v1801_v42  ;;  %v1841_v61 = vadd.f32 %v10626_v50, %v1811_v3  ;;  %v10637_v10 = vld [vmem:[#allocation117_spill] sm:$0xff] }
 0x2f8   : > { %v1933_v6 = vadd.f32 %v1929_v14, %v1887_v17  ;;  %v1914_v0 = vadd.f32 %v1910_v53, %v1868_v1  ;;  %v1924_v40 = vadd.f32 %v1920_v12, %v1878_v35  ;;  %v1934_v44 = vadd.f32 %v1930_v51, %v1888_v30  ;;  %v1974_v57 = vpop.permute.xlu1 %1973  ;;  %v10635_v17 = vld [vmem:[#allocation52_spill] sm:$0xff]  ;;  %v10638_v14 = vld [vmem:[#allocation118_spill] sm:$0xff] }
 0x2f9   : > { %v1851_v25 = vadd.f32 %v10627_v23, %v1821_v54  ;;  %v1869_v22 = vadd.f32 %v7633_v27, %v1831_v55  ;;  %v1879_v20 = vadd.f32 %v7637_v48, %v1841_v61  ;;  %v1911_v45 = vmul.f32 %v10622_v2, %v1904_v46  ;;  %v10631_v48 = vld [vmem:[#allocation130_spill] sm:$0xff] }
 0x2fa   : > { %v1921_v62 = vmul.f32 %v10623_v39, %v1904_v46  ;;  %v1931_v36 = vmul.f32 %v10624_v33, %v1904_v46  ;;  %v1832_v37 = vadd.f32 %v10628_v26, %v1802_v41  ;;  %v1842_v52 = vadd.f32 %v10629_v9, %v1812_v59  ;;  %v1968_v27 = vpop.permute.xlu0 %1967  ;;  %v10633_v41 = vld [vmem:[#allocation132_spill] sm:$0xff]  ;;  %v10640_v46 = vld [vmem:[#allocation175_spill] sm:$0xff]  ;;  %v10641_v55 = vld [vmem:[#allocation74_spill] sm:$0xff] }
 0x2fb   : > { %v1889_v1 = vadd.f32 %v7641_v13, %v1851_v25  ;;  %v1915_v7 = vadd.f32 %v1911_v45, %v1869_v22  ;;  %v1852_v58 = vadd.f32 %v10630_v5, %v1822_v28  ;;  %v1912_v8 = vmul.f32 %v10622_v2, %v1906_v11  ;;  %v10634_v13 = vld [vmem:[#allocation73_spill] sm:$0xff]  ;;  %v10643_v45 = vld [vmem:[#allocation76_spill] sm:$0xff] }
 0x2fc   : > { %v1925_v16 = vadd.f32 %v1921_v62, %v1879_v20  ;;  %v1870_v29 = vadd.f32 %v10631_v48, %v1832_v37  ;;  %v1880_v24 = vadd.f32 %v10632_v60, %v1842_v52  ;;  %v1922_v43 = vmul.f32 %v10623_v39, %v1906_v11  ;;  %v2020_v35 = vpop.permute.xlu1 %2019  ;;  %v10639_v39 = vld [vmem:[#allocation119_spill] sm:$0xff]  ;;  %v10645_v37 = vld [vmem:[#allocation150_spill] sm:$0xff] }
 0x2fd   : > { %v1935_v30 = vadd.f32 %v1931_v36, %v1889_v1  ;;  %v1890_v42 = vadd.f32 %v10633_v41, %v1852_v58  ;;  %v1932_v59 = vmul.f32 %v10624_v33, %v1906_v11  ;;  %v1943_v15 = vadd.f32 %v10634_v13, %v1913_v4  ;;  %v10642_v33 = vld [vmem:[#allocation75_spill] sm:$0xff]  ;;  %v10644_v36 = vld [vmem:[#allocation149_spill] sm:$0xff]  ;;  %v10648_v60 = vld [vmem:[#allocation78_spill] sm:$0xff] }
 0x2fe   : > { %v1916_v56 = vadd.f32 %v1912_v8, %v1870_v29  ;;  %v1926_v28 = vadd.f32 %v1922_v43, %v1880_v24  ;;  %v1953_v3 = vadd.f32 %v10635_v17, %v1923_v19  ;;  %v1963_v54 = vadd.f32 %v10636_v49, %v1933_v6  ;;  %v1972_v51 = vpop.permute.xlu0 %1971  ;;  %v10646_v58 = vld [vmem:[#allocation151_spill] sm:$0xff] }
 0x2ff   : > { %v1936_v2 = vadd.f32 %v1932_v59, %v1890_v42  ;;  %v1977_v18 = vmul.f32 %v10637_v10, %v1968_v27  ;;  %v1987_v53 = vmul.f32 %v10638_v14, %v1968_v27  ;;  %v1997_v12 = vmul.f32 %v10639_v39, %v1968_v27  ;;  %v10647_v27 = vld [vmem:[#allocation77_spill] sm:$0xff]  ;;  %v10649_v42 = vld [vmem:[#allocation120_spill] sm:$0xff] }
 0x300   : > { %v1944_v63 = vadd.f32 %v10640_v46, %v1914_v0  ;;  %v1954_v11 = vadd.f32 %v10641_v55, %v1924_v40  ;;  %v1964_v4 = vadd.f32 %v10642_v33, %v1934_v44  ;;  %v1978_v50 = vmul.f32 %v10637_v10, %v1970_v34  ;;  %v2024_v61 = vpop.permute.xlu1 %2023 }
 0x301   : > { %v1981_v19 = vadd.f32 %v1977_v18, %v1943_v15  ;;  %v1991_v23 = vadd.f32 %v1987_v53, %v1953_v3  ;;  %v2001_v6 = vadd.f32 %v1997_v12, %v1963_v54  ;;  %v1988_v25 = vmul.f32 %v10638_v14, %v1970_v34  ;;  %v10650_v15 = vld [vmem:[#allocation121_spill] sm:$0xff] }
 0x302   : > { %v1982_v22 = vadd.f32 %v1978_v50, %v1944_v63  ;;  %v1998_v20 = vmul.f32 %v10639_v39, %v1970_v34  ;;  %v1945_v62 = vadd.f32 %v10643_v45, %v1915_v7  ;;  %v1955_v26 = vadd.f32 %v10644_v36, %v1925_v16  ;;  %v2018_v52 = vpop.permute.xlu0 %2017  ;;  %v10653_v36 = vld [vmem:[#allocation80_spill] sm:$0xff] }
 0x303   : > { %v1992_v0 = vadd.f32 %v1988_v25, %v1954_v11  ;;  %v1965_v40 = vadd.f32 %v10645_v37, %v1935_v30  ;;  %v1979_v44 = vmul.f32 %v10637_v10, %v1972_v51  ;;  %v1989_v9 = vmul.f32 %v10638_v14, %v1972_v51 }
 0x304   : > { %v2002_v1 = vadd.f32 %v1998_v20, %v1964_v4  ;;  %v1999_v5 = vmul.f32 %v10639_v39, %v1972_v51  ;;  %v1946_v8 = vadd.f32 %v10646_v58, %v1916_v56  ;;  %v1956_v48 = vadd.f32 %v10647_v27, %v1926_v28  ;;  %v2088_v34 = vpop.permute.xlu1 %2087  ;;  %v10651_v56 = vld [vmem:[#allocation166_spill] sm:$0xff] }
 0x305   : > { %v1983_v29 = vadd.f32 %v1979_v44, %v1945_v62  ;;  %v1993_v7 = vadd.f32 %v1989_v9, %v1955_v26  ;;  %v1966_v16 = vadd.f32 %v10648_v60, %v1936_v2  ;;  %v1980_v24 = vmul.f32 %v10637_v10, %v1974_v57  ;;  %v10656_v9 = vld [vmem:[#allocation168_spill] sm:$0xff] }
 0x306   : > { %v2003_v43 = vadd.f32 %v1999_v5, %v1965_v40  ;;  %v1990_v30 = vmul.f32 %v10638_v14, %v1974_v57  ;;  %v2000_v41 = vmul.f32 %v10639_v39, %v1974_v57  ;;  %v2027_v59 = vmul.f32 %v10649_v42, %v2018_v52  ;;  %v2022_v49 = vpop.permute.xlu0 %2021  ;;  %v10655_v40 = vld [vmem:[#allocation167_spill] sm:$0xff] }
 0x307   : > { %v1984_v13 = vadd.f32 %v1980_v24, %v1946_v8  ;;  %v2037_v17 = vmul.f32 %v10650_v15, %v2018_v52  ;;  %v2047_v3 = vmul.f32 %v10651_v56, %v2018_v52  ;;  %v2028_v28 = vmul.f32 %v10649_v42, %v2020_v35  ;;  %v10659_v8 = vld [vmem:[#allocation83_spill] sm:$0xff] }
 0x308   : > { %v1994_v54 = vadd.f32 %v1990_v30, %v1956_v48  ;;  %v2004_v18 = vadd.f32 %v2000_v41, %v1966_v16  ;;  %v2031_v2 = vadd.f32 %v2027_v59, %v1981_v19  ;;  %v2038_v10 = vmul.f32 %v10650_v15, %v2020_v35  ;;  %v2092_v39 = vpop.permute.xlu1 %2091  ;;  %v10660_v48 = vld [vmem:[#allocation84_spill] sm:$0xff] }
 0x309   : > { %v2041_v53 = vadd.f32 %v2037_v17, %v1991_v23  ;;  %v2051_v12 = vadd.f32 %v2047_v3, %v2001_v6  ;;  %v2032_v14 = vadd.f32 %v2028_v28, %v1982_v22  ;;  %v2048_v57 = vmul.f32 %v10651_v56, %v2020_v35  ;;  %v10652_v35 = vld [vmem:[#allocation79_spill] sm:$0xff]  ;;  %v10662_v17 = vld [vmem:[#allocation152_spill] sm:$0xff] }
 0x30a   : > { %v2042_v51 = vadd.f32 %v2038_v10, %v1992_v0  ;;  %v2029_v46 = vmul.f32 %v10649_v42, %v2022_v49  ;;  %v2039_v63 = vmul.f32 %v10650_v15, %v2022_v49  ;;  %v2049_v55 = vmul.f32 %v10651_v56, %v2022_v49  ;;  %v2086_v19 = vpop.permute.xlu0 %2085  ;;  %v10654_v0 = vld [vmem:[#allocation82_spill] sm:$0xff]  ;;  %v10663_v49 = vld [vmem:[#allocation133_spill] sm:$0xff]  ;;  %v10664_v10 = vld [vmem:[#allocation171_spill] sm:$0xff] }
 0x30b   : > { %v2052_v11 = vadd.f32 %v2048_v57, %v2002_v1  ;;  %v2030_v33 = vmul.f32 %v10649_v42, %v2024_v61  ;;  %v2040_v4 = vmul.f32 %v10650_v15, %v2024_v61  ;;  %v2050_v50 = vmul.f32 %v10651_v56, %v2024_v61  ;;  %v10657_v1 = vld [vmem:[#allocation122_spill] sm:$0xff]  ;;  %v10658_v61 = vld [vmem:[#allocation81_spill] sm:$0xff] }
 0x30c   : > { %v2033_v23 = vadd.f32 %v2029_v46, %v1983_v29  ;;  %v2043_v6 = vadd.f32 %v2039_v63, %v1993_v7  ;;  %v2053_v25 = vadd.f32 %v2049_v55, %v2003_v43  ;;  %v2061_v22 = vadd.f32 %v10652_v35, %v2031_v2  ;;  %v7965_v16 = vpop.permute.xlu1 %2239 }
 0x30d   : > { %v2034_v20 = vadd.f32 %v2030_v33, %v1984_v13  ;;  %v2044_v45 = vadd.f32 %v2040_v4, %v1994_v54  ;;  %v2054_v62 = vadd.f32 %v2050_v50, %v2004_v18  ;;  %v2071_v26 = vadd.f32 %v10653_v36, %v2041_v53  ;;  %v10661_v13 = vld [vmem:[#allocation85_spill] sm:$0xff]  ;;  %v10669_v50 = vld [vmem:[#allocation86_spill] sm:$0xff] }
 0x30e   : > { %v2081_v37 = vadd.f32 %v10654_v0, %v2051_v12  ;;  %v2095_v44 = vmul.f32 %v10655_v40, %v2086_v19  ;;  %v2105_v52 = vmul.f32 %v10656_v9, %v2086_v19  ;;  %v2115_v5 = vmul.f32 %v10657_v1, %v2086_v19  ;;  %v2090_v60 = vpop.permute.xlu0 %2089  ;;  %v10665_v12 = vld [vmem:[#allocation153_spill] sm:$0xff] }
 0x30f   : > { %v2062_v58 = vadd.f32 %v10658_v61, %v2032_v14  ;;  %v2072_v27 = vadd.f32 %v10659_v8, %v2042_v51  ;;  %v2082_v29 = vadd.f32 %v10660_v48, %v2052_v11  ;;  %v2096_v7 = vmul.f32 %v10655_v40, %v2088_v34  ;;  %v10673_v48 = vld [vmem:[#allocation156_spill] sm:$0xff] }
 0x310   : > { %v2099_v24 = vadd.f32 %v2095_v44, %v2061_v22  ;;  %v2109_v43 = vadd.f32 %v2105_v52, %v2071_v26  ;;  %v2119_v30 = vadd.f32 %v2115_v5, %v2081_v37  ;;  %v2106_v41 = vmul.f32 %v10656_v9, %v2088_v34  ;;  %v7984_v35 = vpop.permute.xlu1 %2243  ;;  %v10672_v52 = vld [vmem:[#allocation155_spill] sm:$0xff] }
 0x311   : > { %v2100_v42 = vadd.f32 %v2096_v7, %v2062_v58  ;;  %v2116_v59 = vmul.f32 %v10657_v1, %v2088_v34  ;;  %v2063_v15 = vadd.f32 %v10661_v13, %v2033_v23  ;;  %v2073_v56 = vadd.f32 %v10662_v17, %v2043_v6  ;;  %v10666_v34 = vld [vmem:[#allocation40_spill] sm:$0xff]  ;;  %v10670_v23 = vld [vmem:[#allocation87_spill] sm:$0xff] }
 0x312   : > { %v2137_v3 = vadd.f32 %v7653_v31, %v2099_v24  ;;  %v2147_v28 = vadd.f32 %v7657_v32, %v2109_v43  ;;  %v2157_v54 = vadd.f32 %v10663_v49, %v2119_v30  ;;  %v2110_v18 = vadd.f32 %v2106_v41, %v2072_v27  ;;  %v2238_v51 = vpop.permute.xlu0 %2237  ;;  %v10667_v31 = vld [vmem:[#allocation154_spill] sm:$0xff]  ;;  %v10675_v7 = vld [vmem:[#allocation184_spill] sm:$0xff]  ;;  %v10678_v43 = vld [vmem:[#allocation41_spill] sm:$0xff] }
 0x313   : > { %v2120_v2 = vadd.f32 %v2116_v59, %v2082_v29  ;;  %v2138_v53 = vadd.f32 %v10664_v10, %v2100_v42  ;;  %v2083_v14 = vadd.f32 %v10665_v12, %v2053_v25  ;;  %v2097_v57 = vmul.f32 %v10655_v40, %v2090_v60  ;;  %v10668_v32 = vld [vmem:[#allocation42_spill] sm:$0xff]  ;;  %v10674_v29 = vld [vmem:[#allocation183_spill] sm:$0xff] }
 0x314   : > { %v2148_v46 = vadd.f32 %v10666_v34, %v2110_v18  ;;  %v2107_v63 = vmul.f32 %v10656_v9, %v2090_v60  ;;  %v2117_v55 = vmul.f32 %v10657_v1, %v2090_v60  ;;  %v2064_v11 = vadd.f32 %v10667_v31, %v2034_v20  ;;  %v10671_v20 = vld [vmem:[#allocation88_spill] sm:$0xff]  ;;  %v10676_v60 = vld [vmem:[#allocation51_spill] sm:$0xff]  ;;  %v2308_v49 = vpop.permute.xlu1 %2307  ;;  %v10685_v12 = vld [vmem:[#allocation90_spill] sm:$0xff] }
 0x315   : > { %v2158_v33 = vadd.f32 %v10668_v32, %v2120_v2  ;;  %v2101_v4 = vadd.f32 %v2097_v57, %v2063_v15  ;;  %v2074_v19 = vadd.f32 %v10669_v50, %v2044_v45  ;;  %v2084_v6 = vadd.f32 %v10670_v23, %v2054_v62  ;;  %v10679_v41 = vld [vmem:[#allocation47_spill] sm:$0xff]  ;;  %v10682_v15 = vld [vmem:[#allocation48_spill] sm:$0xff]  ;;  %v10684_v2 = vld [vmem:[#allocation89_spill] sm:$0xff] }
 0x316   : > { %v2111_v25 = vadd.f32 %v2107_v63, %v2073_v56  ;;  %v2121_v22 = vadd.f32 %v2117_v55, %v2083_v14  ;;  %v2098_v36 = vmul.f32 %v10655_v40, %v2092_v39  ;;  %v2108_v26 = vmul.f32 %v10656_v9, %v2092_v39  ;;  %v2242_v61 = vpop.permute.xlu0 %2241  ;;  %v10683_v56 = vld [vmem:[#allocation157_spill] sm:$0xff]  ;;  %v10686_v34 = vld [vmem:[#allocation134_spill] sm:$0xff]  ;;  %v10689_v50 = vld [vmem:[#allocation91_spill] sm:$0xff] }
 0x317   : > { %v2139_v0 = vadd.f32 %v7687_v21, %v2101_v4  ;;  %v2118_v37 = vmul.f32 %v10657_v1, %v2092_v39  ;;  %v2167_v44 = vadd.f32 %v10671_v20, %v2137_v3  ;;  %v2177_v5 = vadd.f32 %v10672_v52, %v2147_v28  ;;  %v10677_v1 = vld [vmem:[#allocation173_spill] sm:$0xff] }
 0x318   : > { %v2149_v45 = vadd.f32 %v7691_v47, %v2111_v25  ;;  %v2159_v62 = vadd.f32 %v7695_v38, %v2121_v22  ;;  %v2102_v58 = vadd.f32 %v2098_v36, %v2064_v11  ;;  %v2112_v8 = vadd.f32 %v2108_v26, %v2074_v19  ;;  %v10680_v47 = vld [vmem:[#allocation174_spill] sm:$0xff]  ;;  %v10681_v38 = vld [vmem:[#allocation188_spill] sm:$0xff]  ;;  %v10692_v20 = vld [vmem:[#allocation45_spill] sm:$0xff] }
 0x319   : > { %v2122_v27 = vadd.f32 %v2118_v37, %v2084_v6  ;;  %v2187_v40 = vadd.f32 %v10673_v48, %v2157_v54  ;;  %v2205_v9 = vadd.f32 %v10674_v29, %v2167_v44  ;;  %v2215_v21 = vadd.f32 %v10675_v7, %v2177_v5  ;;  %v10691_v6 = vld [vmem:[#allocation93_spill] sm:$0xff]  ;;  %v10693_v5 = vld [vmem:[#allocation199_spill] sm:$0xff] }
 0x31a   : > { %v2140_v39 = vadd.f32 %v10676_v60, %v2102_v58  ;;  %v2150_v24 = vadd.f32 %v10677_v1, %v2112_v8  ;;  %v2247_v30 = vmul.f32 %v10678_v43, %v2238_v51  ;;  %v2257_v42 = vmul.f32 %v10679_v41, %v2238_v51  ;;  %v2306_v28 = vpop.permute.xlu0 %2305  ;;  %v10694_v8 = vld [vmem:[#allocation142_spill] sm:$0xff] }
 0x31b   : > { %v2160_v59 = vadd.f32 %v10680_v47, %v2122_v27  ;;  %v2225_v13 = vadd.f32 %v10681_v38, %v2187_v40  ;;  %v2267_v17 = vmul.f32 %v10682_v15, %v2238_v51  ;;  %v2168_v3 = vadd.f32 %v10683_v56, %v2138_v53  ;;  %v10687_v51 = vld [vmem:[#allocation135_spill] sm:$0xff]  ;;  %v10688_v53 = vld [vmem:[#allocation136_spill] sm:$0xff]  ;;  %v10695_v27 = vld [vmem:[#allocation53_spill] sm:$0xff] }
 0x31c   : > { %v2251_v54 = vadd.f32 %v2247_v30, %v2205_v9  ;;  %v2261_v18 = vadd.f32 %v2257_v42, %v2215_v21  ;;  %v2178_v10 = vadd.f32 %v10684_v2, %v2148_v46  ;;  %v2188_v14 = vadd.f32 %v10685_v12, %v2158_v33  ;;  %v10690_v33 = vld [vmem:[#allocation92_spill] sm:$0xff]  ;;  %v10697_v9 = vld [vmem:[#allocation54_spill] sm:$0xff]  ;;  %v10699_v38 = vld [vmem:[#allocation139_spill] sm:$0xff] }
 0x31d   : > { %v2271_v57 = vadd.f32 %v2267_v17, %v2225_v13  ;;  %v2206_v63 = vadd.f32 %v10686_v34, %v2168_v3  ;;  %v2248_v55 = vmul.f32 %v10678_v43, %v7965_v16  ;;  %v2258_v31 = vmul.f32 %v10679_v41, %v7965_v16  ;;  %v10698_v30 = vld [vmem:[#allocation138_spill] sm:$0xff]  ;;  %v10700_v13 = vld [vmem:[#allocation140_spill] sm:$0xff]  ;;  %v10702_v3 = vld [vmem:[#allocation177_spill] sm:$0xff] }
 0x31e   : > { %v2216_v11 = vadd.f32 %v10687_v51, %v2178_v10  ;;  %v2226_v32 = vadd.f32 %v10688_v53, %v2188_v14  ;;  %v2268_v4 = vmul.f32 %v10682_v15, %v7965_v16  ;;  %v2169_v46 = vadd.f32 %v10689_v50, %v2139_v0  ;;  %v2310_v36 = vpop.permute.xlu0 %2309  ;;  %v10704_v12 = vld [vmem:[#allocation49_spill] sm:$0xff] }
 0x31f   : > { %v2252_v19 = vadd.f32 %v2248_v55, %v2206_v63  ;;  %v2179_v23 = vadd.f32 %v10690_v33, %v2149_v45  ;;  %v2189_v25 = vadd.f32 %v10691_v6, %v2159_v62  ;;  %v2249_v22 = vmul.f32 %v10678_v43, %v2242_v61  ;;  %v2312_v45 = vpop.permute.xlu1 %2311  ;;  %v10696_v62 = vld [vmem:[#allocation176_spill] sm:$0xff]  ;;  %v10706_v51 = vld [vmem:[#allocation125_spill] sm:$0xff] }
 0x320   : > { %v2262_v26 = vadd.f32 %v2258_v31, %v2216_v11  ;;  %v2272_v37 = vadd.f32 %v2268_v4, %v2226_v32  ;;  %v2207_v44 = vadd.f32 %v10692_v20, %v2169_v46  ;;  %v2259_v52 = vmul.f32 %v10679_v41, %v2242_v61  ;;  %v10707_v32 = vld [vmem:[#allocation179_spill] sm:$0xff]  ;;  %v10711_v20 = vld [vmem:[#allocation180_spill] sm:$0xff] }
 0x321   : > { %v2217_v58 = vadd.f32 %v10693_v5, %v2179_v23  ;;  %v2227_v16 = vadd.f32 %v10694_v8, %v2189_v25  ;;  %v2269_v0 = vmul.f32 %v10682_v15, %v2242_v61  ;;  %v2170_v48 = vadd.f32 %v10695_v27, %v2140_v39  ;;  %v10710_v25 = vld [vmem:[#allocation97_spill] sm:$0xff]  ;;  %v10714_v27 = vld [vmem:[#allocation182_spill] sm:$0xff] }
 0x322   : > { %v2253_v40 = vadd.f32 %v2249_v22, %v2207_v44  ;;  %v2180_v29 = vadd.f32 %v10696_v62, %v2150_v24  ;;  %v2190_v7 = vadd.f32 %v10697_v9, %v2160_v59  ;;  %v2250_v21 = vmul.f32 %v10678_v43, %v7984_v35  ;;  %v10701_v24 = vld [vmem:[#allocation94_spill] sm:$0xff]  ;;  %v2356_v34 = vpop.permute.xlu0 %2355 }
 0x323   : > { %v2263_v60 = vadd.f32 %v2259_v52, %v2217_v58  ;;  %v2273_v1 = vadd.f32 %v2269_v0, %v2227_v16  ;;  %v2208_v42 = vadd.f32 %v10698_v30, %v2170_v48  ;;  %v2260_v47 = vmul.f32 %v10679_v41, %v7984_v35  ;;  %v10703_v43 = vld [vmem:[#allocation178_spill] sm:$0xff]  ;;  %v10705_v41 = vld [vmem:[#allocation124_spill] sm:$0xff]  ;;  %v2358_v46 = vpop.permute.xlu1 %2357  ;;  %v10713_v16 = vld [vmem:[#allocation181_spill] sm:$0xff] }
 0x324   : > { %v2218_v61 = vadd.f32 %v10699_v38, %v2180_v29  ;;  %v2228_v39 = vadd.f32 %v10700_v13, %v2190_v7  ;;  %v2270_v17 = vmul.f32 %v10682_v15, %v7984_v35  ;;  %v2281_v56 = vadd.f32 %v10701_v24, %v2251_v54  ;;  %v10708_v35 = vld [vmem:[#allocation95_spill] sm:$0xff]  ;;  %v10709_v54 = vld [vmem:[#allocation96_spill] sm:$0xff]  ;;  %v10712_v44 = vld [vmem:[#allocation98_spill] sm:$0xff] }
 0x325   : > { %v2254_v59 = vadd.f32 %v2250_v21, %v2208_v42  ;;  %v2291_v2 = vadd.f32 %v10702_v3, %v2261_v18  ;;  %v2301_v10 = vadd.f32 %v10703_v43, %v2271_v57  ;;  %v2315_v14 = vmul.f32 %v10704_v12, %v2306_v28  ;;  %v10715_v29 = vld [vmem:[#allocation99_spill] sm:$0xff]  ;;  %v10716_v30 = vld [vmem:[#allocation126_spill] sm:$0xff]  ;;  %v10718_v13 = vld [vmem:[#allocation129_spill] sm:$0xff] }
 0x326   : > { %v2264_v63 = vadd.f32 %v2260_v47, %v2218_v61  ;;  %v2274_v55 = vadd.f32 %v2270_v17, %v2228_v39  ;;  %v2325_v31 = vmul.f32 %v10705_v41, %v2306_v28  ;;  %v2335_v11 = vmul.f32 %v10706_v51, %v2306_v28  ;;  %v10717_v38 = vld [vmem:[#allocation127_spill] sm:$0xff] }
 0x327   : > { %v2319_v53 = vadd.f32 %v2315_v14, %v2281_v56  ;;  %v2282_v4 = vadd.f32 %v10707_v32, %v2252_v19  ;;  %v2292_v15 = vadd.f32 %v10708_v35, %v2262_v26  ;;  %v2302_v50 = vadd.f32 %v10709_v54, %v2272_v37  ;;  %v2362_v47 = vpop.permute.xlu1 %2361  ;;  %v10719_v35 = vld [vmem:[#allocation100_spill] sm:$0xff] }
 0x328   : > { %v2329_v18 = vadd.f32 %v2325_v31, %v2291_v2  ;;  %v2339_v33 = vadd.f32 %v2335_v11, %v2301_v10  ;;  %v2316_v57 = vmul.f32 %v10704_v12, %v2308_v49  ;;  %v2326_v23 = vmul.f32 %v10705_v41, %v2308_v49 }
 0x329   : > { %v2336_v6 = vmul.f32 %v10706_v51, %v2308_v49  ;;  %v2283_v22 = vadd.f32 %v10710_v25, %v2253_v40  ;;  %v2293_v28 = vadd.f32 %v10711_v20, %v2263_v60  ;;  %v2303_v52 = vadd.f32 %v10712_v44, %v2273_v1  ;;  %v2360_v49 = vpop.permute.xlu0 %2359  ;;  %v10722_v25 = vld [vmem:[#allocation169_spill] sm:$0xff]  ;;  %v10723_v20 = vld [vmem:[#allocation170_spill] sm:$0xff]  ;;  %v10724_v44 = vld [vmem:[#allocation43_spill] sm:$0xff] }
 0x32a   : > { %v2320_v19 = vadd.f32 %v2316_v57, %v2282_v4  ;;  %v2330_v5 = vadd.f32 %v2326_v23, %v2292_v15  ;;  %v2317_v26 = vmul.f32 %v10704_v12, %v2310_v36  ;;  %v2327_v37 = vmul.f32 %v10705_v41, %v2310_v36  ;;  %v10721_v23 = vld [vmem:[#allocation189_spill] sm:$0xff] }
 0x32b   : > { %v2340_v58 = vadd.f32 %v2336_v6, %v2302_v50  ;;  %v2337_v8 = vmul.f32 %v10706_v51, %v2310_v36  ;;  %v2284_v0 = vadd.f32 %v10713_v16, %v2254_v59  ;;  %v2294_v48 = vadd.f32 %v10714_v27, %v2264_v63  ;;  %v2426_v54 = vpop.permute.xlu1 %2425 }
 0x32c   : > { %v2321_v62 = vadd.f32 %v2317_v26, %v2283_v22  ;;  %v2331_v40 = vadd.f32 %v2327_v37, %v2293_v28  ;;  %v2304_v9 = vadd.f32 %v10715_v29, %v2274_v55  ;;  %v2318_v7 = vmul.f32 %v10704_v12, %v2312_v45  ;;  %v10726_v26 = vld [vmem:[#allocation158_spill] sm:$0xff] }
 0x32d   : > { %v2341_v21 = vadd.f32 %v2337_v8, %v2303_v52  ;;  %v2328_v60 = vmul.f32 %v10705_v41, %v2312_v45  ;;  %v2338_v1 = vmul.f32 %v10706_v51, %v2312_v45  ;;  %v2365_v42 = vmul.f32 %v10716_v30, %v2356_v34 }
 0x32e   : > { %v2322_v36 = vadd.f32 %v2318_v7, %v2284_v0  ;;  %v2375_v61 = vmul.f32 %v10717_v38, %v2356_v34  ;;  %v2385_v39 = vmul.f32 %v10718_v13, %v2356_v34  ;;  %v2366_v17 = vmul.f32 %v10716_v30, %v2358_v46  ;;  %v2424_v34 = vpop.permute.xlu0 %2423 }
 0x32f   : > { %v2332_v24 = vadd.f32 %v2328_v60, %v2294_v48  ;;  %v2342_v56 = vadd.f32 %v2338_v1, %v2304_v9  ;;  %v2369_v59 = vadd.f32 %v2365_v42, %v2319_v53  ;;  %v2376_v3 = vmul.f32 %v10717_v38, %v2358_v46  ;;  %v10728_v9 = vld [vmem:[#allocation186_spill] sm:$0xff]  ;;  %v10730_v1 = vld [vmem:[#allocation145_spill] sm:$0xff]  ;;  %v10731_v42 = vld [vmem:[#allocation163_spill] sm:$0xff] }
 0x330   : > { %v2379_v2 = vadd.f32 %v2375_v61, %v2329_v18  ;;  %v2389_v43 = vadd.f32 %v2385_v39, %v2339_v33  ;;  %v2370_v10 = vadd.f32 %v2366_v17, %v2320_v19  ;;  %v2386_v45 = vmul.f32 %v10718_v13, %v2358_v46  ;;  %v10720_v33 = vld [vmem:[#allocation55_spill] sm:$0xff]  ;;  %v10725_v19 = vld [vmem:[#allocation185_spill] sm:$0xff]  ;;  %v10733_v39 = vld [vmem:[#allocation46_spill] sm:$0xff] }
 0x331   : > { %v2380_v12 = vadd.f32 %v2376_v3, %v2330_v5  ;;  %v2367_v14 = vmul.f32 %v10716_v30, %v2360_v49  ;;  %v2377_v63 = vmul.f32 %v10717_v38, %v2360_v49  ;;  %v2387_v55 = vmul.f32 %v10718_v13, %v2360_v49  ;;  %v2430_v3 = vpop.permute.xlu1 %2429 }
 0x332   : > { %v2390_v41 = vadd.f32 %v2386_v45, %v2340_v58  ;;  %v2368_v31 = vmul.f32 %v10716_v30, %v2362_v47  ;;  %v2378_v51 = vmul.f32 %v10717_v38, %v2362_v47  ;;  %v2388_v11 = vmul.f32 %v10718_v13, %v2362_v47  ;;  %v10727_v58 = vld [vmem:[#allocation159_spill] sm:$0xff] }
 0x333   : > { %v2371_v53 = vadd.f32 %v2367_v14, %v2321_v62  ;;  %v2381_v32 = vadd.f32 %v2377_v63, %v2331_v40  ;;  %v2391_v4 = vadd.f32 %v2387_v55, %v2341_v21  ;;  %v2399_v15 = vadd.f32 %v10719_v35, %v2369_v59  ;;  %v2428_v62 = vpop.permute.xlu0 %2427  ;;  %v10729_v21 = vld [vmem:[#allocation187_spill] sm:$0xff]  ;;  %v10737_v63 = vld [vmem:[#allocation194_spill] sm:$0xff] }
 0x334   : > { %v2372_v50 = vadd.f32 %v2368_v31, %v2322_v36  ;;  %v2382_v46 = vadd.f32 %v2378_v51, %v2332_v24  ;;  %v2392_v18 = vadd.f32 %v2388_v11, %v2342_v56  ;;  %v2409_v57 = vadd.f32 %v10720_v33, %v2379_v2  ;;  %v10732_v36 = vld [vmem:[#allocation164_spill] sm:$0xff]  ;;  %v10734_v24 = vld [vmem:[#allocation190_spill] sm:$0xff]  ;;  %v10735_v2 = vld [vmem:[#allocation191_spill] sm:$0xff] }
 0x335   : > { %v2419_v6 = vadd.f32 %v10721_v23, %v2389_v43  ;;  %v2433_v22 = vmul.f32 %v10722_v25, %v2424_v34  ;;  %v2443_v28 = vmul.f32 %v10723_v20, %v2424_v34  ;;  %v2453_v52 = vmul.f32 %v10724_v44, %v2424_v34  ;;  %v10739_v51 = vld [vmem:[#allocation102_spill] sm:$0xff]  ;;  %v10741_v23 = vld [vmem:[#allocation103_spill] sm:$0xff] }
 0x336   : > { %v2400_v5 = vadd.f32 %v10725_v19, %v2370_v10  ;;  %v2410_v37 = vadd.f32 %v10726_v26, %v2380_v12  ;;  %v2420_v8 = vadd.f32 %v10727_v58, %v2390_v41  ;;  %v2434_v16 = vmul.f32 %v10722_v25, %v2426_v54  ;;  %v10736_v12 = vld [vmem:[#allocation160_spill] sm:$0xff]  ;;  %v10738_v41 = vld [vmem:[#allocation101_spill] sm:$0xff] }
 0x337   : > { %v2437_v0 = vadd.f32 %v2433_v22, %v2399_v15  ;;  %v2447_v27 = vadd.f32 %v2443_v28, %v2409_v57  ;;  %v2457_v48 = vadd.f32 %v2453_v52, %v2419_v6  ;;  %v2444_v49 = vmul.f32 %v10723_v20, %v2426_v54  ;;  %v2576_v15 = vpop.permute.xlu0 %2575  ;;  %v10742_v6 = vld [vmem:[#allocation192_spill] sm:$0xff]  ;;  %v10743_v28 = vld [vmem:[#allocation207_spill] sm:$0xff] }
 0x338   : > { %v2438_v40 = vadd.f32 %v2434_v16, %v2400_v5  ;;  %v2454_v29 = vmul.f32 %v10724_v44, %v2426_v54  ;;  %v2401_v7 = vadd.f32 %v10728_v9, %v2371_v53  ;;  %v2411_v60 = vadd.f32 %v10729_v21, %v2381_v32  ;;  %v10740_v54 = vld [vmem:[#allocation206_spill] sm:$0xff]  ;;  %v10746_v58 = vld [vmem:[#allocation212_spill] sm:$0xff] }
 0x339   : > { %v2475_v30 = vadd.f32 %v10730_v1, %v2437_v0  ;;  %v2485_v47 = vadd.f32 %v10731_v42, %v2447_v27  ;;  %v2495_v38 = vadd.f32 %v10732_v36, %v2457_v48  ;;  %v2448_v61 = vadd.f32 %v2444_v49, %v2410_v37  ;;  %v10745_v37 = vld [vmem:[#allocation193_spill] sm:$0xff]  ;;  %v2578_v0 = vpop.permute.xlu1 %2577  ;;  %v10748_v27 = vld [vmem:[#allocation143_spill] sm:$0xff]  ;;  %v10749_v48 = vld [vmem:[#allocation144_spill] sm:$0xff] }
 0x33a   : > { %v2458_v13 = vadd.f32 %v2454_v29, %v2420_v8  ;;  %v2476_v17 = vadd.f32 %v10733_v39, %v2438_v40  ;;  %v2421_v56 = vadd.f32 %v10734_v24, %v2391_v4  ;;  %v2435_v59 = vmul.f32 %v10722_v25, %v2428_v62  ;;  %v10747_v8 = vld [vmem:[#allocation213_spill] sm:$0xff] }
 0x33b   : > { %v2486_v43 = vadd.f32 %v10735_v2, %v2448_v61  ;;  %v2445_v10 = vmul.f32 %v10723_v20, %v2428_v62  ;;  %v2455_v45 = vmul.f32 %v10724_v44, %v2428_v62  ;;  %v2402_v14 = vadd.f32 %v10736_v12, %v2372_v50  ;;  %v10750_v62 = vld [vmem:[#allocation137_spill] sm:$0xff]  ;;  %v10758_v2 = vld [vmem:[#allocation203_spill] sm:$0xff] }
 0x33c   : > { %v2496_v55 = vadd.f32 %v10737_v63, %v2458_v13  ;;  %v2439_v34 = vadd.f32 %v2435_v59, %v2401_v7  ;;  %v2412_v31 = vadd.f32 %v10738_v41, %v2382_v46  ;;  %v2422_v11 = vadd.f32 %v10739_v51, %v2392_v18  ;;  %v10744_v46 = vld [vmem:[#allocation208_spill] sm:$0xff]  ;;  %v10751_v29 = vld [vmem:[#allocation141_spill] sm:$0xff]  ;;  %v10752_v7 = vld [vmem:[#allocation146_spill] sm:$0xff]  ;;  %v2580_v59 = vpop.permute.xlu0 %2579 }
 0x33d   : > { %v2449_v53 = vadd.f32 %v2445_v10, %v2411_v60  ;;  %v2459_v32 = vadd.f32 %v2455_v45, %v2421_v56  ;;  %v2436_v4 = vmul.f32 %v10722_v25, %v2430_v3  ;;  %v2446_v35 = vmul.f32 %v10723_v20, %v2430_v3  ;;  %v10753_v60 = vld [vmem:[#allocation215_spill] sm:$0xff]  ;;  %v10757_v24 = vld [vmem:[#allocation105_spill] sm:$0xff] }
 0x33e   : > { %v2477_v33 = vadd.f32 %v10740_v54, %v2439_v34  ;;  %v2456_v57 = vmul.f32 %v10724_v44, %v2430_v3  ;;  %v2505_v50 = vadd.f32 %v10741_v23, %v2475_v30  ;;  %v2515_v22 = vadd.f32 %v10742_v6, %v2485_v47  ;;  %v10754_v30 = vld [vmem:[#allocation44_spill] sm:$0xff]  ;;  %v10756_v13 = vld [vmem:[#allocation195_spill] sm:$0xff]  ;;  %v10760_v34 = vld [vmem:[#allocation209_spill] sm:$0xff] }
 0x33f   : > { %v2487_v52 = vadd.f32 %v10743_v28, %v2449_v53  ;;  %v2497_v19 = vadd.f32 %v10744_v46, %v2459_v32  ;;  %v2440_v18 = vadd.f32 %v2436_v4, %v2402_v14  ;;  %v2450_v5 = vadd.f32 %v2446_v35, %v2412_v31  ;;  %v10755_v47 = vld [vmem:[#allocation104_spill] sm:$0xff]  ;;  %v10759_v14 = vld [vmem:[#allocation205_spill] sm:$0xff]  ;;  %v10761_v31 = vld [vmem:[#allocation106_spill] sm:$0xff]  ;;  %v2582_v35 = vpop.permute.xlu1 %2581 }
 0x340   : > { %v2460_v26 = vadd.f32 %v2456_v57, %v2422_v11  ;;  %v2525_v25 = vadd.f32 %v10745_v37, %v2495_v38  ;;  %v2543_v20 = vadd.f32 %v10746_v58, %v2505_v50  ;;  %v2553_v16 = vadd.f32 %v10747_v8, %v2515_v22  ;;  %v10764_v57 = vld [vmem:[#allocation216_spill] sm:$0xff]  ;;  %v10765_v6 = vld [vmem:[#allocation217_spill] sm:$0xff]  ;;  %v10766_v28 = vld [vmem:[#allocation218_spill] sm:$0xff] }
 0x341   : > { %v2478_v44 = vadd.f32 %v10748_v27, %v2440_v18  ;;  %v2488_v49 = vadd.f32 %v10749_v48, %v2450_v5  ;;  %v2585_v40 = vmul.f32 %v10750_v62, %v2576_v15  ;;  %v2595_v9 = vmul.f32 %v10751_v29, %v2576_v15  ;;  %v10767_v18 = vld [vmem:[#allocation198_spill] sm:$0xff]  ;;  %v10769_v37 = vld [vmem:[#allocation108_spill] sm:$0xff] }
 0x342   : > { %v2498_v21 = vadd.f32 %v10752_v7, %v2460_v26  ;;  %v2563_v1 = vadd.f32 %v10753_v60, %v2525_v25  ;;  %v2605_v42 = vmul.f32 %v10754_v30, %v2576_v15  ;;  %v2506_v36 = vadd.f32 %v10755_v47, %v2476_v17  ;;  %v10768_v26 = vld [vmem:[#allocation107_spill] sm:$0xff]  ;;  %v10772_v7 = vld [vmem:[#allocation214_spill] sm:$0xff]  ;;  %v10774_v47 = vld [vmem:[#allocation200_spill] sm:$0xff] }
 0x343   : > { %v2589_v38 = vadd.f32 %v2585_v40, %v2543_v20  ;;  %v2599_v61 = vadd.f32 %v2595_v9, %v2553_v16  ;;  %v2516_v39 = vadd.f32 %v10756_v13, %v2486_v43  ;;  %v2526_v56 = vadd.f32 %v10757_v24, %v2496_v55  ;;  %v10762_v43 = vld [vmem:[#allocation196_spill] sm:$0xff]  ;;  %v10763_v55 = vld [vmem:[#allocation197_spill] sm:$0xff]  ;;  %v2644_v20 = vpop.permute.xlu0 %2643  ;;  %v10771_v40 = vld [vmem:[#allocation211_spill] sm:$0xff]  ;;  %v2646_v24 = vpop.permute.xlu1 %2645 }
 0x344   : > { %v2609_v3 = vadd.f32 %v2605_v42, %v2563_v1  ;;  %v2544_v10 = vadd.f32 %v10758_v2, %v2506_v36  ;;  %v2586_v45 = vmul.f32 %v10750_v62, %v2578_v0  ;;  %v2596_v12 = vmul.f32 %v10751_v29, %v2578_v0  ;;  %v10773_v1 = vld [vmem:[#allocation109_spill] sm:$0xff]  ;;  %v10776_v13 = vld [vmem:[#allocation147_spill] sm:$0xff]  ;;  %v10777_v2 = vld [vmem:[#allocation148_spill] sm:$0xff] }
 0x345   : > { %v2554_v63 = vadd.f32 %v10759_v14, %v2516_v39  ;;  %v2564_v41 = vadd.f32 %v10760_v34, %v2526_v56  ;;  %v2606_v17 = vmul.f32 %v10754_v30, %v2578_v0  ;;  %v2507_v51 = vadd.f32 %v10761_v31, %v2477_v33  ;;  %v10770_v0 = vld [vmem:[#allocation210_spill] sm:$0xff]  ;;  %v10775_v36 = vld [vmem:[#allocation201_spill] sm:$0xff] }
 0x346   : > { %v2590_v11 = vadd.f32 %v2586_v45, %v2544_v10  ;;  %v2517_v53 = vadd.f32 %v10762_v43, %v2487_v52  ;;  %v2527_v32 = vadd.f32 %v10763_v55, %v2497_v19  ;;  %v2587_v4 = vmul.f32 %v10750_v62, %v2580_v59  ;;  %v10778_v10 = vld [vmem:[#allocation204_spill] sm:$0xff]  ;;  %v10779_v14 = vld [vmem:[#allocation202_spill] sm:$0xff] }
 0x347   : > { %v2600_v15 = vadd.f32 %v2596_v12, %v2554_v63  ;;  %v2610_v54 = vadd.f32 %v2606_v17, %v2564_v41  ;;  %v2545_v23 = vadd.f32 %v10764_v57, %v2507_v51  ;;  %v2597_v50 = vmul.f32 %v10751_v29, %v2580_v59  ;;  %v2648_v51 = vpop.permute.xlu0 %2647  ;;  %v10782_v55 = vld [vmem:[#allocation112_spill] sm:$0xff] }
 0x348   : > { %v2555_v22 = vadd.f32 %v10765_v6, %v2517_v53  ;;  %v2565_v46 = vadd.f32 %v10766_v28, %v2527_v32  ;;  %v2607_v33 = vmul.f32 %v10754_v30, %v2580_v59  ;;  %v2508_v5 = vadd.f32 %v10767_v18, %v2478_v44 }
 0x349   : > { %v2591_v52 = vadd.f32 %v2587_v4, %v2545_v23  ;;  %v2518_v19 = vadd.f32 %v10768_v26, %v2488_v49  ;;  %v2528_v25 = vadd.f32 %v10769_v37, %v2498_v21  ;;  %v2588_v58 = vmul.f32 %v10750_v62, %v2582_v35  ;;  %v10783_v4 = vld [vmem:[#allocation161_spill] sm:$0xff] }
 0x34a   : > { %v2601_v8 = vadd.f32 %v2597_v50, %v2555_v22  ;;  %v2611_v16 = vadd.f32 %v2607_v33, %v2565_v46  ;;  %v2546_v27 = vadd.f32 %v10770_v0, %v2508_v5  ;;  %v2598_v48 = vmul.f32 %v10751_v29, %v2582_v35  ;;  %v10784_v50 = vld [vmem:[#allocation31_spill] sm:$0xff]  ;;  %v10785_v22 = vld [vmem:[#allocation165_spill] sm:$0xff]  ;;  %v10786_v33 = vld [vmem:[#allocation34_spill] sm:$0xff] }
 0x34b   : > { %v2556_v9 = vadd.f32 %v10771_v40, %v2518_v19  ;;  %v2566_v60 = vadd.f32 %v10772_v7, %v2528_v25  ;;  %v2608_v44 = vmul.f32 %v10754_v30, %v2582_v35  ;;  %v2619_v42 = vadd.f32 %v10773_v1, %v2589_v38  ;;  %v10780_v30 = vld [vmem:[#allocation110_spill] sm:$0xff]  ;;  %v10781_v38 = vld [vmem:[#allocation111_spill] sm:$0xff]  ;;  %v10787_v5 = vld [vmem:[#allocation37_spill] sm:$0xff] }
 0x34c   : > { %v2592_v49 = vadd.f32 %v2588_v58, %v2546_v27  ;;  %v2629_v21 = vadd.f32 %v10774_v47, %v2599_v61  ;;  %v2639_v62 = vadd.f32 %v10775_v36, %v2609_v3  ;;  %v2653_v39 = vmul.f32 %v10776_v13, %v2644_v20  ;;  %v10789_v27 = vld [vmem:[#allocation30_spill] sm:$0xff]  ;;  %v10790_v40 = vld [vmem:[#allocation33_spill] sm:$0xff]  ;;  %v10791_v7 = vld [vmem:[#allocation36_spill] sm:$0xff]  ;;  %v2650_v47 = vpop.permute.xlu1 %2649 }
 0x34d   : > { %v2602_v56 = vadd.f32 %v2598_v48, %v2556_v9  ;;  %v2612_v59 = vadd.f32 %v2608_v44, %v2566_v60  ;;  %v2663_v29 = vmul.f32 %v10777_v2, %v2644_v20  ;;  %v2673_v45 = vmul.f32 %v10778_v10, %v2644_v20 }
 0x34e   : > { %v2657_v12 = vadd.f32 %v2653_v39, %v2619_v42  ;;  %v2620_v63 = vadd.f32 %v10779_v14, %v2590_v11  ;;  %v2630_v34 = vadd.f32 %v10780_v30, %v2600_v15  ;;  %v2640_v41 = vadd.f32 %v10781_v38, %v2610_v54  ;;  %v10793_v39 = vld [vmem:[#allocation113_spill] sm:$0xff]  ;;  %v10796_v38 = vld [vmem:[#allocation123_spill] sm:$0xff] }
 0x34f   : > { %v2667_v17 = vadd.f32 %v2663_v29, %v2629_v21  ;;  %v2677_v61 = vadd.f32 %v2673_v45, %v2639_v62  ;;  %v2654_v3 = vmul.f32 %v10776_v13, %v2646_v24  ;;  %v2664_v31 = vmul.f32 %v10777_v2, %v2646_v24  ;;  %v10794_v29 = vld [vmem:[#allocation114_spill] sm:$0xff] }
 0x350   : > { %v2685_v43 = vmax.f32 %v2657_v12, 0.0  ;;  %v2674_v53 = vmul.f32 %v10778_v10, %v2646_v24  ;;  %v2621_v32 = vadd.f32 %v10782_v55, %v2591_v52  ;;  %v2631_v35 = vadd.f32 %v10783_v4, %v2601_v8 }
 0x351   : > { %v2706_v57 = vmax.f32 %v2667_v17, 0.0  ;;  %v2727_v11 = vmax.f32 %v2677_v61, 0.0  ;;  %v2658_v23 = vadd.f32 %v2654_v3, %v2620_v63  ;;  %v2668_v15 = vadd.f32 %v2664_v31, %v2630_v34  ;;  %v10795_v63 = vld [vmem:[#allocation32_spill] sm:$0xff]  ;;  %v10797_v3 = vld [vmem:[#allocation29_spill] sm:$0xff] }
 0x352   : > { %v2689_v54 = vadd.f32 %v2685_v43, %v10784_v50  ;;  %v2678_v6 = vadd.f32 %v2674_v53, %v2640_v41  ;;  %v2641_v28 = vadd.f32 %v10785_v22, %v2611_v16  ;;  %v2655_v46 = vmul.f32 %v10776_v13, %v2648_v51 }
 0x353   : > { %v2710_v18 = vadd.f32 %v2706_v57, %v10786_v33  ;;  %v2731_v26 = vadd.f32 %v2727_v11, %v10787_v5  ;;  %v2686_v19 = vmax.f32 %v2658_v23, 0.0  ;;  %v2707_v37 = vmax.f32 %v2668_v15, 0.0 }
 0x354   : > { %v8166_v25 = vsel %vm4322_vm6, %v2689_v54, 0.0  ;;  %v2728_v58 = vmax.f32 %v2678_v6, 0.0  ;;  %v2659_v20 = vadd.f32 %v2655_v46, %v2621_v32  ;;  %v2665_v8 = vmul.f32 %v10777_v2, %v2648_v51  ;;  %v10800_v46 = vld [vmem:[#allocation28_spill] sm:$0xff] }
 0x355   : > { %v8171_v0 = vsel %vm4322_vm6, %v2710_v18, 0.0  ;;  %v8175_v16 = vsel %vm4322_vm6, %v2731_v26, 0.0  ;;  %v2690_v48 = vadd.f32 %v2686_v19, %v10789_v27  ;;  %v2711_v9 = vadd.f32 %v2707_v37, %v10790_v40  ;;  %2868 = vrot.lane.b32.xlu0 %v8166_v25, %s4242_s23  ;;  %v10801_v18 = vld [vmem:[#allocation35_spill] sm:$0xff]  ;;  %v10802_v26 = vld [vmem:[#allocation38_spill] sm:$0xff] }
 0x356   : > { %v2732_v60 = vadd.f32 %v2728_v58, %v10791_v7  ;;  %v2669_v44 = vadd.f32 %v2665_v8, %v2631_v35  ;;  %v2675_v1 = vmul.f32 %v10778_v10, %v2648_v51  ;;  %v2687_v42 = vmax.f32 %v2659_v20, 0.0 }
 0x357   : > { %v8185_v36 = vsel %vm4327_vm9, %v2690_v48, 0.0  ;;  %v8189_v62 = vsel %vm4327_vm9, %v2711_v9, 0.0  ;;  %v2622_v24 = vadd.f32 %v10793_v39, %v2592_v49  ;;  %v2632_v45 = vadd.f32 %v10794_v29, %v2602_v56 }
 0x358   : > { %v8195_v12 = vsel %vm4327_vm9, %v2732_v60, 0.0  ;;  %v2679_v14 = vadd.f32 %v2675_v1, %v2641_v28  ;;  %v2691_v30 = vadd.f32 %v2687_v42, %v10795_v63  ;;  %v2708_v34 = vmax.f32 %v2669_v44, 0.0  ;;  %2870 = vrot.lane.b32.xlu1 %v8185_v36, %s4242_s23 }
 0x359   : > { %v2642_v41 = vadd.f32 %v10796_v38, %v2612_v59  ;;  %v2656_v17 = vmul.f32 %v10776_v13, %v2650_v47  ;;  %v2666_v61 = vmul.f32 %v10777_v2, %v2650_v47  ;;  %v2676_v49 = vmul.f32 %v10778_v10, %v2650_v47  ;;  %v10798_v2 = vld [vmem:[#allocation39_spill] sm:$0xff] }
 0x35a   : > { %v8206_v56 = vsel %vm4327_vm9, %v2691_v30, 0.0  ;;  %v2712_v31 = vadd.f32 %v2708_v34, %v10797_v3  ;;  %v2729_v51 = vmax.f32 %v2679_v14, 0.0  ;;  %v2754_v43 = vrot.slane %v8166_v25, 7 }
 0x35b   : > { %v2660_v53 = vadd.f32 %v2656_v17, %v2622_v24  ;;  %v2670_v55 = vadd.f32 %v2666_v61, %v2632_v45  ;;  %v2680_v32 = vadd.f32 %v2676_v49, %v2642_v41  ;;  %2872 = vrot.lane.b32.xlu0 %v8206_v56, %s4242_s23  ;;  %v2755_v13 = vrot.slane %v8185_v36, 7 }
 0x35c   : > { %v8215_v59 = vsel %vm4327_vm9, %v2712_v31, 0.0  ;;  %v2733_v10 = vadd.f32 %v2729_v51, %v10798_v2  ;;  %v2756_v4 = vrot.slane %v8206_v56, 7  ;;  %v2974_v35 = vrot.slane %v8166_v25, 1 }
 0x35d   : > { %v2688_v57 = vmax.f32 %v2660_v53, 0.0  ;;  %v2709_v11 = vmax.f32 %v2670_v55, 0.0  ;;  %v2730_v23 = vmax.f32 %v2680_v32, 0.0  ;;  %v8222_v50 = vsel %vm200_vm2, %v2754_v43, %v2755_v13 }
 0x35e   : > { %v8226_v54 = vsel %vm4327_vm9, %v2733_v10, 0.0  ;;  %v8230_v6 = vsel %vm200_vm2, %v2755_v13, %v2756_v4  ;;  %v2975_v22 = vrot.slane %v8185_v36, 1  ;;  %v2976_v28 = vrot.slane %v8206_v56, 1 }
 0x35f   : > { %v2692_v33 = vadd.f32 %v2688_v57, %v10800_v46  ;;  %v2713_v5 = vadd.f32 %v2709_v11, %v10801_v18  ;;  %v2734_v19 = vadd.f32 %v2730_v23, %v10802_v26  ;;  %2936 = vrot.lane.b32.xlu0 %v8166_v25, %s4243_s24  ;;  %v3092_v37 = vrot.slane %v8171_v0, 7 }
 0x360   : > { %v8242_v58 = vsel %vm421_vm3, %v2974_v35, %v2975_v22  ;;  %v8246_v20 = vsel %vm421_vm3, %v2975_v22, %v2976_v28  ;;  %v3093_v8 = vrot.slane %v8189_v62, 7  ;;  %v3094_v27 = vrot.slane %v8215_v59, 7 }
 0x361   : > { %v8252_v40 = vsel %vm4331_vm11, %v2692_v33, 0.0  ;;  %v8256_v9 = vsel %vm4331_vm11, %v2713_v5, 0.0  ;;  %v8260_v7 = vsel %vm4331_vm11, %v2734_v19, 0.0  ;;  %v3312_v60 = vrot.slane %v8171_v0, 1 }
 0x362   : > { %2874 = vrot.lane.b32.xlu1 %v8252_v40, %s4242_s23  ;;  %v2757_v44 = vrot.slane %v8252_v40, 7  ;;  %v2977_v1 = vrot.slane %v8252_v40, 1  ;;  %v3095_v42 = vrot.slane %v8256_v9, 7  ;;  %v8270_v47 = vsel %vm200_vm2, %v3092_v37, %v3093_v8 }
 0x363   : > { %2940 = vrot.lane.b32.xlu0 %v8206_v56, %s4243_s24  ;;  %v8276_v39 = vsel %vm200_vm2, %v3093_v8, %v3094_v27  ;;  %v3313_v24 = vrot.slane %v8189_v62, 1  ;;  %v3314_v29 = vrot.slane %v8215_v59, 1  ;;  %v3315_v45 = vrot.slane %v8256_v9, 1 }
 0x364   : > { %v8283_v14 = vsel %vm200_vm2, %v2757_v44, %v2754_v43  ;;  %v8287_v63 = vsel %vm200_vm2, %v2756_v4, %v2757_v44  ;;  %v8291_v30 = vsel %vm421_vm3, %v2976_v28, %v2977_v1  ;;  %v8295_v34 = vsel %vm421_vm3, %v2977_v1, %v2974_v35 }
 0x365   : > { %v8299_v38 = vsel %vm200_vm2, %v3095_v42, %v3092_v37  ;;  %v8303_v41 = vsel %vm200_vm2, %v3094_v27, %v3095_v42  ;;  %v8307_v17 = vsel %vm421_vm3, %v3312_v60, %v3313_v24  ;;  %v8311_v61 = vsel %vm421_vm3, %v3313_v24, %v3314_v29 }
 0x366   : > { %2938 = vrot.lane.b32.xlu1 %v8185_v36, %s4243_s24  ;;  %v8317_v49 = vsel %vm421_vm3, %v3314_v29, %v3315_v45  ;;  %v8321_v3 = vsel %vm421_vm3, %v3315_v45, %v3312_v60  ;;  %v3430_v31 = vrot.slane %v8175_v16, 7  ;;  %v3433_v51 = vrot.slane %v8260_v7, 7 }
 0x367   : > { %3206 = vrot.lane.b32.xlu0 %v8171_v0, %s4242_s23  ;;  %v3431_v43 = vrot.slane %v8195_v12, 7  ;;  %v3432_v55 = vrot.slane %v8226_v54, 7  ;;  %v3650_v13 = vrot.slane %v8175_v16, 1  ;;  %v3651_v2 = vrot.slane %v8195_v12, 1 }
 0x368   : > { %v8330_v53 = vsel %vm200_vm2, %v3433_v51, %v3430_v31  ;;  %v3652_v35 = vrot.slane %v8226_v54, 1  ;;  %v3653_v11 = vrot.slane %v8260_v7, 1  ;;  %v8459_v15 = vstv %s4020_s25  ;;  %s8559_s25 = sld [smem:[#allocation13 + $0xd]] }
 0x369   : > { %v8335_v32 = vsel %vm200_vm2, %v3430_v31, %v3431_v43  ;;  %v8343_v10 = vsel %vm200_vm2, %v3431_v43, %v3432_v55  ;;  %v8347_v4 = vsel %vm200_vm2, %v3432_v55, %v3433_v51  ;;  %v8354_v57 = vsel %vm421_vm3, %v3650_v13, %v3651_v2 }
 0x36a   : > { %2942 = vrot.lane.b32.xlu1 %v8252_v40, %s4243_s24  ;;  %v8359_v23 = vsel %vm421_vm3, %v3651_v2, %v3652_v35  ;;  %v8363_v22 = vsel %vm421_vm3, %v3652_v35, %v3653_v11  ;;  %v8367_v28 = vsel %vm421_vm3, %v3653_v11, %v3650_v13  ;;  %v8461_v46 = vstv %s4021_s1  ;;  %s8569_s1 = sld [smem:[#allocation13 + $0x32]] }
 0x36b   : > { %3210 = vrot.lane.b32.xlu0 %v8215_v59, %s4242_s23  ;;  %v8465_v33 = vstv %s4022_s26  ;;  %v8467_v18 = vstv %s4026_s27  ;;  %v8469_v5 = vstv %s4027_s28  ;;  %s8583_s26 = sld [smem:[#allocation13 + $0x28]]  ;;  %s8585_s27 = sld [smem:[#allocation13 + $0x43]] }
 0x36c   : > { %v8471_v26 = vstv %s4028_s29  ;;  %v8477_v19 = vstv %s4047_s30  ;;  %v8479_v37 = vstv %s4048_s10  ;;  %v8481_v8 = vstv %s4049_s11  ;;  %s8592_s28 = sld [smem:[#allocation13 + $0x4d]]  ;;  %s8641_s29 = sld [smem:[#allocation13 + $0x10]] }
 0x36d   : > { %v2801_v27 = vstv %s8437_s21  ;;  %v8490_v60 = vstv %s4053_s12  ;;  %v2811_v44 = vstv %s8441_s6  ;;  %v2821_v1 = vstv %s4016_s3  ;;  %s8541_s21 = sld [smem:[#allocation13 + $0x25]]  ;;  %s8567_s6 = sld [smem:[#allocation13 + $0x17]] }
 0x36e   : > { %3208 = vrot.lane.b32.xlu1 %v8189_v62, %s4242_s23  ;;  %v8497_v42 = vstv %s4054_s5  ;;  %v8499_v24 = vstv %s4055_s13  ;;  %v8502_v29 = vmul.f32 %v2801_v27, %v8283_v14  ;;  %v8505_v45 = vmul.f32 %v2811_v44, %v8283_v14  ;;  %s8643_s30 = sld [smem:[#allocation13 + $0x2b]]  ;;  %s8657_s10 = sld [smem:[#allocation13 + $0x46]] }
 0x36f   : > { %3274 = vrot.lane.b32.xlu0 %v8171_v0, %s4243_s24  ;;  %v8508_v31 = vmul.f32 %v2801_v27, %v8222_v50  ;;  %v2907_v51 = vstv %s8439_s22  ;;  %v2917_v43 = vstv %s8451_s14  ;;  %v2927_v55 = vstv %s8453_s15  ;;  %s8557_s22 = sld [smem:[#allocation13 + $0x40]]  ;;  %s8679_s12 = sld [smem:[#allocation14 + $0x1]] }
 0x370   : > { %v8514_v13 = vmul.f32 %v2821_v1, %v8283_v14  ;;  %v8517_v2 = vmul.f32 %v2811_v44, %v8222_v50  ;;  %v8520_v35 = vmul.f32 %v2821_v1, %v8222_v50  ;;  %v8523_v11 = vmul.f32 %v2801_v27, %v8230_v6  ;;  %s8661_s11 = sld [smem:[#allocation14]]  ;;  %s8681_s3 = sld [smem:[#allocation14 + $0x2]] }
 0x371   : > { %10804 = vst [vmem:[#allocation56_spill] sm:$0xff] %v8508_v31  ;;  %v8530_v21 = vmul.f32 %v2811_v44, %v8230_v6  ;;  %v8539_v48 = vmul.f32 %v2811_v44, %v8287_v63  ;;  %v8546_v52 = vmul.f32 %v2821_v1, %v8287_v63  ;;  %v8562_v44 = vstv %s8473_s17  ;;  %s8691_s5 = sld [smem:[#allocation13]]  ;;  %s8693_s13 = sld [smem:[#allocation13 + $0x1b]] }
 0x372   : > { %3212 = vrot.lane.b32.xlu1 %v8256_v9, %s4242_s23  ;;  %10805 = vst [vmem:[#allocation57_spill] sm:$0xff] %v8517_v2  ;;  %10806 = vst [vmem:[#allocation58_spill] sm:$0xff] %v8520_v35  ;;  %v8552_v35 = vmul.f32 %v2917_v43, %v8166_v25  ;;  %v8611_v2 = vmul.f32 %v2917_v43, %v8252_v40  ;;  %s8708_s14 = sld [smem:[#allocation13 + $0x36]]  ;;  %s8719_s15 = sld [smem:[#allocation13 + $0x13]] }
 0x373   : > { %3278 = vrot.lane.b32.xlu0 %v8215_v59, %s4243_s24  ;;  %10808 = vst [vmem:[#allocation59_spill] sm:$0xff] %v8539_v48  ;;  %10809 = vst [vmem:[#allocation60_spill] sm:$0xff] %v8546_v52  ;;  %v8565_v48 = vstv %s8475_s2  ;;  %v3041_v52 = vstv %s8486_s18  ;;  %s8749_s17 = sld [smem:[#allocation13 + $0x49]]  ;;  %s8761_s2 = sld [smem:[#allocation13 + $0x16]] }
 0x374   : > { %10811 = vst [vmem:[#allocation66_spill] sm:$0xff] %v8552_v35  ;;  %v3031_v35 = vstv %s8484_s4  ;;  %10820 = vst [vmem:[#allocation68_spill] sm:$0xff] %v8611_v2  ;;  %s8775_s4 = sld [smem:[#allocation13 + $0x31]]  ;;  %s8777_s18 = sld [smem:[#allocation13 + $0x4c]] }
 0x376   : > { %3276 = vrot.lane.b32.xlu1 %v8189_v62, %s4243_s24 }
 0x377   : > { %3544 = vrot.lane.b32.xlu0 %v8175_v16, %s4242_s23 }
 0x37a   : > { %3280 = vrot.lane.b32.xlu1 %v8256_v9, %s4243_s24 }
 0x37b   : > { %3548 = vrot.lane.b32.xlu0 %v8226_v54, %s4242_s23 }
 0x37e   : > { %3546 = vrot.lane.b32.xlu1 %v8195_v12, %s4242_s23 }
 0x37f   : > { %3612 = vrot.lane.b32.xlu0 %v8175_v16, %s4243_s24 }
 0x382   : > { %3550 = vrot.lane.b32.xlu1 %v8260_v7, %s4242_s23 }
 0x383   : > { %3616 = vrot.lane.b32.xlu0 %v8226_v54, %s4243_s24 }
 0x386   : > { %3614 = vrot.lane.b32.xlu1 %v8195_v12, %s4243_s24 }
 0x387   : > { %2762 = vrot.lane.b32.xlu0 %v8283_v14, %s4242_s23 }
 0x38a   : > { %3618 = vrot.lane.b32.xlu1 %v8260_v7, %s4243_s24 }
 0x38b   : > { %2766 = vrot.lane.b32.xlu0 %v8230_v6, %s4242_s23 }
 0x38e   : > { %2764 = vrot.lane.b32.xlu1 %v8222_v50, %s4242_s23 }
 0x38f   : > { %2830 = vrot.lane.b32.xlu0 %v8283_v14, %s4243_s24  ;;  %v8533_v14 = vmul.f32 %v2821_v1, %v8230_v6  ;;  %v3021_v1 = vstv %s8463_s16  ;;  %s8735_s16 = sld [smem:[#allocation13 + $0x2e]] }
 0x390   : > { %v8626_v31 = vmul.f32 %v3021_v1, %v8246_v20 }
 0x392   : > { %2768 = vrot.lane.b32.xlu1 %v8287_v63, %s4242_s23  ;;  %10825 = vst [vmem:[#allocation72_spill] sm:$0xff] %v8626_v31 }
 0x393   : > { %2834 = vrot.lane.b32.xlu0 %v8230_v6, %s4243_s24  ;;  %v8549_v6 = vmul.f32 %v2907_v51, %v8166_v25 }
 0x395   : > { %10810 = vst [vmem:[#allocation61_spill] sm:$0xff] %v8549_v6  ;;  %v8608_v6 = vmul.f32 %v2907_v51, %v8252_v40 }
 0x396   : > { %2832 = vrot.lane.b32.xlu1 %v8222_v50, %s4243_s24  ;;  %v8536_v50 = vmul.f32 %v2801_v27, %v8287_v63  ;;  %v8555_v27 = vmul.f32 %v2927_v55, %v8166_v25  ;;  %v8576_v25 = vmul.f32 %v2917_v43, %v8185_v36 }
 0x397   : > { %2982 = vrot.lane.b32.xlu0 %v8242_v58, %s4242_s23  ;;  %10819 = vst [vmem:[#allocation116_spill] sm:$0xff] %v8608_v6 }
 0x398   : > { %10807 = vst [vmem:[#allocation65_spill] sm:$0xff] %v8536_v50  ;;  %10812 = vst [vmem:[#allocation67_spill] sm:$0xff] %v8555_v27  ;;  %v8579_v27 = vmul.f32 %v2927_v55, %v8185_v36  ;;  %v8590_v50 = vstv %s8492_s7  ;;  %s8815_s7 = sld [smem:[#allocation13 + $0x2]] }
 0x399   : > { %10814 = vst [vmem:[#allocation63_spill] sm:$0xff] %v8576_v25 }
 0x39a   : > { %2836 = vrot.lane.b32.xlu1 %v8287_v63, %s4243_s24  ;;  %v8572_v63 = vmul.f32 %v2907_v51, %v8185_v36  ;;  %10815 = vst [vmem:[#allocation64_spill] sm:$0xff] %v8579_v27  ;;  %v8598_v36 = vmul.f32 %v2917_v43, %v8206_v56  ;;  %v8601_v27 = vmul.f32 %v2927_v55, %v8206_v56 }
 0x39b   : > { %2986 = vrot.lane.b32.xlu0 %v8291_v30, %s4242_s23  ;;  %v8632_v43 = vmul.f32 %v3041_v52, %v8246_v20 }
 0x39c   : > { %10813 = vst [vmem:[#allocation62_spill] sm:$0xff] %v8572_v63  ;;  %v8595_v63 = vmul.f32 %v2907_v51, %v8206_v56  ;;  %10817 = vst [vmem:[#allocation162_spill] sm:$0xff] %v8598_v36  ;;  %v8617_v36 = vmul.f32 %v3021_v1, %v8242_v58  ;;  %v8620_v56 = vmul.f32 %v3031_v35, %v8242_v58 }
 0x39d   : > { %10818 = vst [vmem:[#allocation115_spill] sm:$0xff] %v8601_v27  ;;  %v8623_v27 = vmul.f32 %v3041_v52, %v8242_v58  ;;  %v8629_v51 = vmul.f32 %v3031_v35, %v8246_v20  ;;  %10827 = vst [vmem:[#allocation131_spill] sm:$0xff] %v8632_v43  ;;  %v8664_v43 = vmul.f32 %v3041_v52, %v8295_v34 }
 0x39e   : > { %2984 = vrot.lane.b32.xlu1 %v8246_v20, %s4242_s23  ;;  %10816 = vst [vmem:[#allocation128_spill] sm:$0xff] %v8595_v63  ;;  %v8614_v63 = vmul.f32 %v2927_v55, %v8252_v40  ;;  %10822 = vst [vmem:[#allocation70_spill] sm:$0xff] %v8617_v36  ;;  %v8635_v40 = vmul.f32 %v3021_v1, %v8291_v30  ;;  %v8638_v55 = vmul.f32 %v3031_v35, %v8291_v30 }
 0x39f   : > { %3050 = vrot.lane.b32.xlu0 %v8242_v58, %s4243_s24  ;;  %10823 = vst [vmem:[#allocation50_spill] sm:$0xff] %v8620_v56  ;;  %10824 = vst [vmem:[#allocation71_spill] sm:$0xff] %v8623_v27  ;;  %v3139_v56 = vstv %s8525_s20  ;;  %v8648_v58 = vmul.f32 %v3041_v52, %v8291_v30  ;;  %s8823_s20 = sld [smem:[#allocation13 + $0x19]] }
 0x3a0   : > { %10821 = vst [vmem:[#allocation69_spill] sm:$0xff] %v8614_v63  ;;  %10826 = vst [vmem:[#allocation130_spill] sm:$0xff] %v8629_v51  ;;  %v3265_v51 = vstv %s8585_s27  ;;  %v8714_v31 = vmul.f32 %v3139_v56, %v8276_v39  ;;  %v8727_v36 = vmul.f32 %v3139_v56, %v8303_v41  ;;  %s8875_s27 = sld [smem:[#allocation13 + $0x3c]] }
 0x3a1   : > { %10828 = vst [vmem:[#allocation132_spill] sm:$0xff] %v8635_v40  ;;  %10829 = vst [vmem:[#allocation73_spill] sm:$0xff] %v8638_v55  ;;  %v8654_v40 = vmul.f32 %v3031_v35, %v8295_v34  ;;  %v3149_v55 = vstv %s8541_s21  ;;  %s8830_s21 = sld [smem:[#allocation13 + $0x1d]] }
 0x3a2   : > { %2988 = vrot.lane.b32.xlu1 %v8295_v34, %s4242_s23  ;;  %10830 = vst [vmem:[#allocation52_spill] sm:$0xff] %v8648_v58  ;;  %10833 = vst [vmem:[#allocation118_spill] sm:$0xff] %v8664_v43  ;;  %v8670_v35 = vmul.f32 %v3149_v55, %v8299_v38  ;;  %v3245_v43 = vstv %s8559_s25  ;;  %v3255_v58 = vstv %s8583_s26  ;;  %s8843_s25 = sld [smem:[#allocation13 + $0x38]]  ;;  %s8873_s26 = sld [smem:[#allocation13 + $0x21]] }
 0x3a3   : > { %3054 = vrot.lane.b32.xlu0 %v8291_v30, %s4243_s24  ;;  %10832 = vst [vmem:[#allocation117_spill] sm:$0xff] %v8654_v40  ;;  %v8667_v30 = vmul.f32 %v3139_v56, %v8299_v38  ;;  %v8674_v40 = vstv %s8567_s6  ;;  %10841 = vst [vmem:[#allocation151_spill] sm:$0xff] %v8714_v31  ;;  %s8855_s6 = sld [smem:[#allocation13 + $0x4f]] }
 0x3a4   : > { %10835 = vst [vmem:[#allocation175_spill] sm:$0xff] %v8670_v35  ;;  %v8696_v35 = vmul.f32 %v3149_v55, %v8270_v47  ;;  %10844 = vst [vmem:[#allocation120_spill] sm:$0xff] %v8727_v36 }
 0x3a5   : > { %10834 = vst [vmem:[#allocation119_spill] sm:$0xff] %v8667_v30 }
 0x3a6   : > { %3052 = vrot.lane.b32.xlu1 %v8246_v20, %s4243_s24  ;;  %v8651_v20 = vmul.f32 %v3021_v1, %v8295_v34  ;;  %v3159_v1 = vstv %s8557_s22  ;;  %10838 = vst [vmem:[#allocation76_spill] sm:$0xff] %v8696_v35  ;;  %v8717_v35 = vmul.f32 %v3149_v55, %v8276_v39  ;;  %s8839_s22 = sld [smem:[#allocation13 + $0x34]] }
 0x3a7   : > { %3100 = vrot.lane.b32.xlu0 %v8299_v38, %s4242_s23  ;;  %v8684_v52 = vmul.f32 %v3159_v1, %v8299_v38  ;;  %v8724_v27 = vmul.f32 %v3159_v1, %v8276_v39  ;;  %v8733_v31 = vmul.f32 %v3159_v1, %v8303_v41 }
 0x3a8   : > { %10831 = vst [vmem:[#allocation172_spill] sm:$0xff] %v8651_v20  ;;  %v8677_v20 = vstv %s8569_s1  ;;  %10842 = vst [vmem:[#allocation77_spill] sm:$0xff] %v8717_v35  ;;  %v8738_v35 = vmul.f32 %v3245_v43, %v8171_v0  ;;  %s8859_s1 = sld [smem:[#allocation13 + $0x6]] }
 0x3a9   : > { %10836 = vst [vmem:[#allocation74_spill] sm:$0xff] %v8684_v52  ;;  %v8706_v52 = vstv %s8592_s28  ;;  %10843 = vst [vmem:[#allocation78_spill] sm:$0xff] %v8724_v27  ;;  %s8889_s28 = sld [smem:[#allocation13 + $0x8]] }
 0x3aa   : > { %3056 = vrot.lane.b32.xlu1 %v8295_v34, %s4243_s24  ;;  %v8687_v34 = vmul.f32 %v3139_v56, %v8270_v47  ;;  %10839 = vst [vmem:[#allocation149_spill] sm:$0xff] %v8706_v52  ;;  %10846 = vst [vmem:[#allocation166_spill] sm:$0xff] %v8733_v31  ;;  %v8747_v56 = vmul.f32 %v3245_v43, %v8189_v62  ;;  %v8799_v31 = vstv %s8681_s3  ;;  %s8942_s3 = sld [smem:[#allocation13 + $0xb]] }
 0x3ab   : > { %3104 = vrot.lane.b32.xlu0 %v8276_v39, %s4242_s23  ;;  %10847 = vst [vmem:[#allocation79_spill] sm:$0xff] %v8738_v35  ;;  %v3359_v35 = vstv %s8641_s29  ;;  %s8891_s29 = sld [smem:[#allocation13 + $0x23]] }
 0x3ac   : > { %10837 = vst [vmem:[#allocation75_spill] sm:$0xff] %v8687_v34  ;;  %v8711_v34 = vmul.f32 %v3159_v1, %v8270_v47  ;;  %10850 = vst [vmem:[#allocation167_spill] sm:$0xff] %v8747_v56  ;;  %v8757_v1 = vmul.f32 %v3265_v51, %v8189_v62  ;;  %v8769_v56 = vmul.f32 %v3255_v58, %v8215_v59 }
 0x3ad   : > { %v8862_v36 = vmul.f32 %v3359_v35, %v8321_v3 }
 0x3ae   : > { %3102 = vrot.lane.b32.xlu1 %v8270_v47, %s4242_s23  ;;  %10840 = vst [vmem:[#allocation150_spill] sm:$0xff] %v8711_v34  ;;  %v8741_v34 = vmul.f32 %v3255_v58, %v8171_v0  ;;  %10852 = vst [vmem:[#allocation122_spill] sm:$0xff] %v8757_v1  ;;  %v8782_v1 = vstv %s8661_s11  ;;  %s8921_s11 = sld [smem:[#allocation13 + $0x24]] }
 0x3af   : > { %3168 = vrot.lane.b32.xlu0 %v8299_v38, %s4243_s24  ;;  %10854 = vst [vmem:[#allocation83_spill] sm:$0xff] %v8769_v56  ;;  %v8788_v56 = vmul.f32 %v3255_v58, %v8256_v9  ;;  %10868 = vst [vmem:[#allocation156_spill] sm:$0xff] %v8862_v36 }
 0x3b0   : > { %10848 = vst [vmem:[#allocation80_spill] sm:$0xff] %v8741_v34  ;;  %v3369_v34 = vstv %s8643_s30  ;;  %s8903_s30 = sld [smem:[#allocation13 + $0x3e]] }
 0x3b1   : > { %10857 = vst [vmem:[#allocation152_spill] sm:$0xff] %v8788_v56  ;;  %v8813_v56 = vstv %s8693_s13  ;;  %s8960_s13 = sld [smem:[#allocation13 + $0x41]] }
 0x3b2   : > { %3106 = vrot.lane.b32.xlu1 %v8303_v41, %s4242_s23 }
 0x3b3   : > { %3172 = vrot.lane.b32.xlu0 %v8276_v39, %s4243_s24  ;;  %v8744_v39 = vmul.f32 %v3265_v51, %v8171_v0  ;;  %v8766_v0 = vmul.f32 %v3245_v43, %v8215_v59 }
 0x3b5   : > { %10849 = vst [vmem:[#allocation82_spill] sm:$0xff] %v8744_v39  ;;  %10853 = vst [vmem:[#allocation81_spill] sm:$0xff] %v8766_v0  ;;  %v8785_v0 = vmul.f32 %v3245_v43, %v8256_v9  ;;  %v8796_v39 = vstv %s8679_s12  ;;  %v8805_v43 = vmul.f32 %v3369_v34, %v8307_v17  ;;  %s8923_s12 = sld [smem:[#allocation13 + $0x3f]] }
 0x3b6   : > { %3170 = vrot.lane.b32.xlu1 %v8270_v47, %s4243_s24  ;;  %v8730_v47 = vmul.f32 %v3149_v55, %v8303_v41  ;;  %v8754_v55 = vmul.f32 %v3255_v58, %v8189_v62  ;;  %v3379_v62 = vstv %s8657_s10  ;;  %v8810_v58 = vstv %s8691_s5  ;;  %s8905_s10 = sld [smem:[#allocation13 + $0x9]]  ;;  %s8944_s5 = sld [smem:[#allocation13 + $0x26]] }
 0x3b7   : > { %3320 = vrot.lane.b32.xlu0 %v8307_v17, %s4242_s23  ;;  %10856 = vst [vmem:[#allocation85_spill] sm:$0xff] %v8785_v0  ;;  %10860 = vst [vmem:[#allocation153_spill] sm:$0xff] %v8805_v43  ;;  %v8828_v43 = vstv %s8708_s14  ;;  %s8962_s14 = sld [smem:[#allocation13 + $0xf]] }
 0x3b8   : > { %10845 = vst [vmem:[#allocation121_spill] sm:$0xff] %v8730_v47  ;;  %10851 = vst [vmem:[#allocation168_spill] sm:$0xff] %v8754_v55  ;;  %v8772_v55 = vmul.f32 %v3265_v51, %v8215_v59  ;;  %v8791_v59 = vmul.f32 %v3265_v51, %v8256_v9  ;;  %v8802_v47 = vmul.f32 %v3359_v35, %v8307_v17 }
 0x3b9   : > { %v8818_v9 = vmul.f32 %v3379_v62, %v8307_v17  ;;  %v8821_v51 = vmul.f32 %v3359_v35, %v8311_v61 }
 0x3ba   : > { %3174 = vrot.lane.b32.xlu1 %v8303_v41, %s4243_s24  ;;  %10855 = vst [vmem:[#allocation84_spill] sm:$0xff] %v8772_v55  ;;  %10858 = vst [vmem:[#allocation133_spill] sm:$0xff] %v8791_v59  ;;  %v8836_v59 = vmul.f32 %v3379_v62, %v8311_v61 }
 0x3bb   : > { %3324 = vrot.lane.b32.xlu0 %v8317_v49, %s4242_s23  ;;  %10859 = vst [vmem:[#allocation171_spill] sm:$0xff] %v8802_v47  ;;  %10861 = vst [vmem:[#allocation40_spill] sm:$0xff] %v8818_v9  ;;  %v8833_v47 = vmul.f32 %v3369_v34, %v8311_v61  ;;  %v8849_v9 = vmul.f32 %v3369_v34, %v8317_v49 }
 0x3bc   : > { %10862 = vst [vmem:[#allocation154_spill] sm:$0xff] %v8821_v51  ;;  %10864 = vst [vmem:[#allocation86_spill] sm:$0xff] %v8836_v59  ;;  %v8846_v51 = vmul.f32 %v3359_v35, %v8317_v49 }
 0x3bd   : > { %10863 = vst [vmem:[#allocation42_spill] sm:$0xff] %v8833_v47  ;;  %10866 = vst [vmem:[#allocation88_spill] sm:$0xff] %v8849_v9  ;;  %v8852_v47 = vmul.f32 %v3379_v62, %v8317_v49  ;;  %v8868_v9 = vmul.f32 %v3379_v62, %v8321_v3 }
 0x3be   : > { %3322 = vrot.lane.b32.xlu1 %v8311_v61, %s4242_s23  ;;  %10865 = vst [vmem:[#allocation87_spill] sm:$0xff] %v8846_v51  ;;  %v8865_v51 = vmul.f32 %v3369_v34, %v8321_v3 }
 0x3bf   : > { %3388 = vrot.lane.b32.xlu0 %v8307_v17, %s4243_s24  ;;  %v3477_v17 = vstv %s8719_s15  ;;  %10867 = vst [vmem:[#allocation155_spill] sm:$0xff] %v8852_v47  ;;  %10870 = vst [vmem:[#allocation184_spill] sm:$0xff] %v8868_v9  ;;  %v3603_v9 = vstv %s8777_s18  ;;  %s8974_s15 = sld [smem:[#allocation13 + $0x2a]] }
 0x3c0   : > { %10869 = vst [vmem:[#allocation183_spill] sm:$0xff] %v8865_v51  ;;  %v8878_v27 = vmul.f32 %v3477_v17, %v8330_v53  ;;  %v8884_v34 = vmul.f32 %v3477_v17, %v8335_v32  ;;  %v3583_v51 = vstv %s8761_s2  ;;  %v8926_v36 = vmul.f32 %v3477_v17, %v8347_v4  ;;  %s9003_s2 = sld [smem:[#allocation13 + $0x2c]]  ;;  %s9035_s18 = sld [smem:[#allocation13 + $0x12]] }
 0x3c1   : > { %v8996_v63 = vmul.f32 %v3583_v51, %v8260_v7 }
 0x3c2   : > { %3326 = vrot.lane.b32.xlu1 %v8321_v3, %s4242_s23  ;;  %10871 = vst [vmem:[#allocation51_spill] sm:$0xff] %v8878_v27  ;;  %10873 = vst [vmem:[#allocation41_spill] sm:$0xff] %v8884_v34  ;;  %v3593_v27 = vstv %s8775_s4  ;;  %s9005_s4 = sld [smem:[#allocation13 + $0x47]] }
 0x3c3   : > { %3392 = vrot.lane.b32.xlu0 %v8317_v49, %s4243_s24  ;;  %v3497_v49 = vstv %s8749_s17  ;;  %10880 = vst [vmem:[#allocation90_spill] sm:$0xff] %v8926_v36  ;;  %s8987_s17 = sld [smem:[#allocation13 + $0x11]]  ;;  %10892 = vst [vmem:[#allocation54_spill] sm:$0xff] %v8996_v63  ;;  %v9092_v63 = vstv %s8944_s5 }
 0x3c4   : > { %v8908_v34 = vmul.f32 %v3497_v49, %v8335_v32  ;;  %10916 = vst [vmem:[#allocation189_spill] sm:$0xff] %v9092_v63 }
 0x3c6   : > { %3390 = vrot.lane.b32.xlu1 %v8311_v61, %s4243_s24  ;;  %v3487_v61 = vstv %s8735_s16  ;;  %10876 = vst [vmem:[#allocation188_spill] sm:$0xff] %v8908_v34  ;;  %s8976_s16 = sld [smem:[#allocation13 + $0x45]]  ;;  %v8993_v34 = vmul.f32 %v3603_v9, %v8226_v54  ;;  %v9177_v6 = vstv %s9035_s18 }
 0x3c7   : > { %3438 = vrot.lane.b32.xlu0 %v8330_v53, %s4242_s23  ;;  %v8605_v25 = vpop.permute.xlu0 %2868  ;;  %v8881_v35 = vmul.f32 %v3487_v61, %v8330_v53  ;;  %v8897_v62 = vmul.f32 %v3487_v61, %v8335_v32  ;;  %10925 = vst [vmem:[#allocation145_spill] sm:$0xff] %v9177_v6 }
 0x3c8   : > { %10891 = vst [vmem:[#allocation176_spill] sm:$0xff] %v8993_v34  ;;  %v9115_v63 = vmul.f32 %v8459_v15, %v8605_v25 }
 0x3c9   : > { %10872 = vst [vmem:[#allocation173_spill] sm:$0xff] %v8881_v35  ;;  %10875 = vst [vmem:[#allocation174_spill] sm:$0xff] %v8897_v62  ;;  %v8911_v35 = vmul.f32 %v3477_v17, %v8343_v10  ;;  %v8917_v62 = vmul.f32 %v3497_v49, %v8343_v10  ;;  %v8947_v17 = vmul.f32 %v3593_v27, %v8175_v16 }
 0x3ca   : > { %3394 = vrot.lane.b32.xlu1 %v8321_v3, %s4243_s24  ;;  %v8703_v38 = vpop.permute.xlu1 %2870  ;;  %v8894_v3 = vmul.f32 %v3497_v49, %v8330_v53 }
 0x3cb   : > { %3442 = vrot.lane.b32.xlu0 %v8343_v10, %s4242_s23  ;;  %10877 = vst [vmem:[#allocation48_spill] sm:$0xff] %v8911_v35  ;;  %10879 = vst [vmem:[#allocation89_spill] sm:$0xff] %v8917_v62  ;;  %v8940_v35 = vstv %s8815_s7  ;;  %s9065_s7 = sld [smem:[#allocation13 + $0x48]] }
 0x3cc   : > { %10874 = vst [vmem:[#allocation47_spill] sm:$0xff] %v8894_v3  ;;  %10884 = vst [vmem:[#allocation91_spill] sm:$0xff] %v8947_v17  ;;  %v3697_v17 = vstv %s8823_s20  ;;  %s9081_s20 = sld [smem:[#allocation13 + $0x14]] }
 0x3cd   : > { %v8689_v30 = vpop.permute.xlu0 %2872 }
 0x3ce   : > { %3440 = vrot.lane.b32.xlu1 %v8335_v32, %s4242_s23  ;;  %v9160_v2 = vmul.f32 %v8465_v33, %v8689_v30 }
 0x3cf   : > { %3506 = vrot.lane.b32.xlu0 %v8330_v53, %s4243_s24  ;;  %v8914_v53 = vmul.f32 %v3487_v61, %v8343_v10 }
 0x3d1   : > { %v8751_v41 = vpop.permute.xlu0 %2936  ;;  %10878 = vst [vmem:[#allocation157_spill] sm:$0xff] %v8914_v53  ;;  %v8932_v53 = vmul.f32 %v3497_v49, %v8347_v4  ;;  %v8958_v49 = vstv %s8830_s21  ;;  %s9094_s21 = sld [smem:[#allocation13 + $0x2f]] }
 0x3d2   : > { %3444 = vrot.lane.b32.xlu1 %v8347_v4, %s4242_s23 }
 0x3d3   : > { %3510 = vrot.lane.b32.xlu0 %v8343_v10, %s4243_s24  ;;  %10882 = vst [vmem:[#allocation135_spill] sm:$0xff] %v8932_v53  ;;  %v8935_v10 = vmul.f32 %v3583_v51, %v8175_v16  ;;  %v3707_v53 = vstv %s8839_s22  ;;  %s9096_s22 = sld [smem:[#allocation13 + $0x4a]] }
 0x3d4   : > { %v8793_v55 = vpop.permute.xlu1 %2874 }
 0x3d5   : > { %v8807_v0 = vpop.permute.xlu0 %2940  ;;  %10883 = vst [vmem:[#allocation136_spill] sm:$0xff] %v8935_v10  ;;  %v8965_v10 = vmul.f32 %v3593_v27, %v8195_v12 }
 0x3d6   : > { %3508 = vrot.lane.b32.xlu1 %v8335_v32, %s4243_s24  ;;  %v8929_v32 = vmul.f32 %v3487_v61, %v8347_v4  ;;  %v8950_v61 = vmul.f32 %v3603_v9, %v8175_v16  ;;  %v8972_v16 = vstv %s8843_s25  ;;  %v9205_v6 = vmul.f32 %v8469_v5, %v8807_v0  ;;  %s9211_s25 = sld [smem:[#allocation13 + $0x33]] }
 0x3d7   : > { %3658 = vrot.lane.b32.xlu0 %v8354_v57, %s4242_s23  ;;  %10887 = vst [vmem:[#allocation45_spill] sm:$0xff] %v8965_v10  ;;  %v8990_v10 = vmul.f32 %v3593_v27, %v8226_v54 }
 0x3d8   : > { %v8857_v59 = vpop.permute.xlu1 %2938  ;;  %10881 = vst [vmem:[#allocation134_spill] sm:$0xff] %v8929_v32  ;;  %10885 = vst [vmem:[#allocation92_spill] sm:$0xff] %v8950_v61  ;;  %v8982_v61 = vmul.f32 %v3583_v51, %v8226_v54  ;;  %v3717_v32 = vstv %s8855_s6  ;;  %v9014_v54 = vmul.f32 %v3707_v53, %v8354_v57  ;;  %s9213_s6 = sld [smem:[#allocation13 + $0x4e]] }
 0x3d9   : > { %v8871_v47 = vpop.permute.xlu0 %3206  ;;  %10890 = vst [vmem:[#allocation53_spill] sm:$0xff] %v8990_v10  ;;  %v9011_v10 = vmul.f32 %v3697_v17, %v8354_v57  ;;  %v9099_v34 = vmul.f32 %v3717_v32, %v8367_v28  ;;  %10929 = vst [vmem:[#allocation190_spill] sm:$0xff] %v9205_v6  ;;  %v9230_v6 = vmul.f32 %v8469_v5, %v8857_v59 }
 0x3da   : > { %3512 = vrot.lane.b32.xlu1 %v8347_v4, %s4243_s24  ;;  %v8953_v4 = vmul.f32 %v3583_v51, %v8195_v12  ;;  %10889 = vst [vmem:[#allocation142_spill] sm:$0xff] %v8982_v61  ;;  %v9008_v61 = vmul.f32 %v3603_v9, %v8260_v7  ;;  %10896 = vst [vmem:[#allocation94_spill] sm:$0xff] %v9014_v54  ;;  %v9022_v51 = vmul.f32 %v3717_v32, %v8354_v57 }
 0x3db   : > { %3662 = vrot.lane.b32.xlu0 %v8363_v22, %s4242_s23  ;;  %10895 = vst [vmem:[#allocation140_spill] sm:$0xff] %v9011_v10  ;;  %v9031_v54 = vmul.f32 %v3697_v17, %v8363_v22  ;;  %v9055_v10 = vstv %s8873_s26  ;;  %10917 = vst [vmem:[#allocation169_spill] sm:$0xff] %v9099_v34  ;;  %s9262_s26 = sld [smem:[#allocation13 + $0x35]] }
 0x3dc   : > { %v8919_v3 = vpop.permute.xlu1 %2942  ;;  %10886 = vst [vmem:[#allocation93_spill] sm:$0xff] %v8953_v4  ;;  %v8979_v4 = vmul.f32 %v3603_v9, %v8195_v12  ;;  %v8999_v12 = vmul.f32 %v3593_v27, %v8260_v7  ;;  %10894 = vst [vmem:[#allocation139_spill] sm:$0xff] %v9008_v61  ;;  %v9017_v27 = vmul.f32 %v3697_v17, %v8359_v23  ;;  %v9058_v61 = vstv %s8875_s27  ;;  %s9280_s27 = sld [smem:[#allocation13 + $0x50]] }
 0x3dd   : > { %v8937_v62 = vpop.permute.xlu0 %3210  ;;  %10898 = vst [vmem:[#allocation178_spill] sm:$0xff] %v9022_v51  ;;  %v9025_v7 = vmul.f32 %v3707_v53, %v8359_v23  ;;  %v9028_v9 = vmul.f32 %v3717_v32, %v8359_v23  ;;  %10901 = vst [vmem:[#allocation125_spill] sm:$0xff] %v9031_v54  ;;  %v9047_v54 = vmul.f32 %v3707_v53, %v8367_v28  ;;  %v9052_v51 = vstv %s8859_s1  ;;  %s9260_s1 = sld [smem:[#allocation13 + $0x1a]] }
 0x3de   : > { %3660 = vrot.lane.b32.xlu1 %v8359_v23, %s4242_s23  ;;  %10888 = vst [vmem:[#allocation199_spill] sm:$0xff] %v8979_v4  ;;  %10893 = vst [vmem:[#allocation138_spill] sm:$0xff] %v8999_v12  ;;  %v9089_v12 = vstv %s8942_s3 }
 0x3df   : > { %3726 = vrot.lane.b32.xlu0 %v8354_v57, %s4243_s24  ;;  %10897 = vst [vmem:[#allocation177_spill] sm:$0xff] %v9017_v27  ;;  %10899 = vst [vmem:[#allocation49_spill] sm:$0xff] %v9025_v7  ;;  %v9038_v57 = vmul.f32 %v3707_v53, %v8363_v22  ;;  %v9041_v7 = vmul.f32 %v3717_v32, %v8363_v22  ;;  %v9070_v53 = vstv %s8891_s29 }
 0x3e0   : > { %v8985_v36 = vpop.permute.xlu1 %3208  ;;  %10900 = vst [vmem:[#allocation124_spill] sm:$0xff] %v9028_v9  ;;  %v9044_v9 = vmul.f32 %v3697_v17, %v8367_v28  ;;  %10905 = vst [vmem:[#allocation97_spill] sm:$0xff] %v9047_v54  ;;  %v9073_v17 = vstv %s8903_s30  ;;  %v9076_v54 = vstv %s8905_s10  ;;  %v9123_v32 = vmul.f32 %v8465_v33, %v8605_v25  ;;  %s9765_s30 = scalar_lea.vmem %s9833_s9, %s3817_s19 }
 0x3e1   : > { %v9001_v4 = vpop.permute.xlu0 %3274  ;;  %10902 = vst [vmem:[#allocation179_spill] sm:$0xff] %v9038_v57  ;;  %10903 = vst [vmem:[#allocation95_spill] sm:$0xff] %v9041_v7  ;;  %v9061_v57 = vstv %s8889_s28  ;;  %v9086_v7 = vstv %s8923_s12 }
 0x3e2   : > { %3664 = vrot.lane.b32.xlu1 %v8367_v28, %s4242_s23  ;;  %10904 = vst [vmem:[#allocation96_spill] sm:$0xff] %v9044_v9  ;;  %10906 = vst [vmem:[#allocation180_spill] sm:$0xff] %v9052_v51  ;;  %s9063_s23 = sld [smem:[#allocation13 + $0x2d]]  ;;  %v9079_v9 = vstv %s8921_s11  ;;  %v9191_v51 = vstv %s9065_s7 }
 0x3e3   : > { %3730 = vrot.lane.b32.xlu0 %v8363_v22, %s4243_s24  ;;  %10907 = vst [vmem:[#allocation98_spill] sm:$0xff] %v9055_v10  ;;  %10908 = vst [vmem:[#allocation181_spill] sm:$0xff] %v9058_v61 }
 0x3e4   : > { %v9049_v27 = vpop.permute.xlu1 %3212  ;;  %10909 = vst [vmem:[#allocation182_spill] sm:$0xff] %v9061_v57  ;;  %10910 = vst [vmem:[#allocation99_spill] sm:$0xff] %v9070_v53  ;;  %v9148_v53 = vmul.f32 %v8465_v33, %v8703_v38  ;;  %v9156_v57 = vmul.f32 %v8461_v46, %v8689_v30 }
 0x3e5   : > { %v9067_v22 = vpop.permute.xlu0 %3278  ;;  %10911 = vst [vmem:[#allocation126_spill] sm:$0xff] %v9073_v17  ;;  %10912 = vst [vmem:[#allocation127_spill] sm:$0xff] %v9076_v54  ;;  %v9105_v54 = vstv %s8962_s14  ;;  %v9141_v17 = vstv %s9003_s2 }
 0x3e6   : > { %10913 = vst [vmem:[#allocation129_spill] sm:$0xff] %v9079_v9  ;;  %3728 = vrot.lane.b32.xlu1 %v8359_v23, %s4243_s24  ;;  %10914 = vst [vmem:[#allocation100_spill] sm:$0xff] %v9086_v7  ;;  %v9102_v9 = vstv %s8960_s13  ;;  %v9108_v23 = vstv %s8974_s15  ;;  %v9111_v7 = vstv %s8976_s16 }
 0x3e7   : > { %10915 = vst [vmem:[#allocation55_spill] sm:$0xff] %v9089_v12  ;;  %10918 = vst [vmem:[#allocation170_spill] sm:$0xff] %v9102_v9  ;;  %v9119_v12 = vmul.f32 %v8461_v46, %v8605_v25  ;;  %v9144_v25 = vstv %s9005_s4 }
 0x3e8   : > { %10919 = vst [vmem:[#allocation43_spill] sm:$0xff] %v9105_v54  ;;  %10920 = vst [vmem:[#allocation185_spill] sm:$0xff] %v9108_v23  ;;  %v9125_v34 = vpop.permute.xlu1 %3276  ;;  %v9128_v54 = vstv %s8987_s17  ;;  %v9136_v23 = vmul.f32 %v8461_v46, %v8703_v38  ;;  %v9188_v10 = vstv %s9063_s23 }
 0x3e9   : > { %10921 = vst [vmem:[#allocation158_spill] sm:$0xff] %v9111_v7  ;;  %10922 = vst [vmem:[#allocation159_spill] sm:$0xff] %v9128_v54  ;;  %v9132_v7 = vmul.f32 %v8459_v15, %v8703_v38  ;;  %v9138_v9 = vpop.permute.xlu0 %3544  ;;  %v9152_v54 = vmul.f32 %v8459_v15, %v8689_v30  ;;  %v9170_v38 = vmul.f32 %v8469_v5, %v8751_v41 }
 0x3ea   : > { %10923 = vst [vmem:[#allocation186_spill] sm:$0xff] %v9141_v17  ;;  %10924 = vst [vmem:[#allocation187_spill] sm:$0xff] %v9144_v25  ;;  %3732 = vrot.lane.b32.xlu1 %v8367_v28, %s4243_s24  ;;  %v9166_v25 = vmul.f32 %v8467_v18, %v8751_v41  ;;  %v9174_v17 = vmul.f32 %v8471_v26, %v8751_v41  ;;  %v9181_v30 = vmul.f32 %v8459_v15, %v8793_v55  ;;  %s9193_s24 = sld [smem:[#allocation13 + $0x18]] }
 0x3eb   : > { %v9185_v28 = vmul.f32 %v8461_v46, %v8793_v55  ;;  %10926 = vst [vmem:[#allocation163_spill] sm:$0xff] %v9188_v10  ;;  %10927 = vst [vmem:[#allocation164_spill] sm:$0xff] %v9191_v51  ;;  %v9197_v41 = vmul.f32 %v8465_v33, %v8793_v55  ;;  %v9201_v15 = vmul.f32 %v8467_v18, %v8807_v0  ;;  %v9220_v55 = vstv %s9081_s20 }
 0x3ec   : > { %v3281_v61 = vpop.permute.xlu1 %3280  ;;  %v9209_v46 = vmul.f32 %v8471_v26, %v8807_v0  ;;  %v9217_v33 = vmul.f32 %v8467_v18, %v8857_v59  ;;  %10932 = vst [vmem:[#allocation194_spill] sm:$0xff] %v9220_v55  ;;  %v9223_v51 = vstv %s9094_s21  ;;  %v9234_v0 = vmul.f32 %v8471_v26, %v8857_v59 }
 0x3ed   : > { %10928 = vst [vmem:[#allocation46_spill] sm:$0xff] %v9201_v15  ;;  %v3549_v10 = vpop.permute.xlu0 %3548  ;;  %10933 = vst [vmem:[#allocation101_spill] sm:$0xff] %v9223_v51  ;;  %v9226_v15 = vstv %s9096_s22  ;;  %v9246_v51 = vmul.f32 %v8467_v18, %v8919_v3  ;;  %v9254_v59 = vmul.f32 %v8471_v26, %v8919_v3  ;;  %v9258_v55 = vmul.f32 %v8481_v8, %v8871_v47 }
 0x3ee   : > { %10930 = vst [vmem:[#allocation191_spill] sm:$0xff] %v9209_v46  ;;  %10931 = vst [vmem:[#allocation160_spill] sm:$0xff] %v9217_v33  ;;  %v9238_v46 = vmul.f32 %v8477_v19, %v8871_v47  ;;  %v9242_v33 = vmul.f32 %v8479_v37, %v8871_v47  ;;  %v9266_v18 = vmul.f32 %v8477_v19, %v8985_v36 }
 0x3ef   : > { %10934 = vst [vmem:[#allocation102_spill] sm:$0xff] %v9226_v15  ;;  %v9250_v15 = vmul.f32 %v8469_v5, %v8919_v3  ;;  %10936 = vst [vmem:[#allocation103_spill] sm:$0xff] %v9258_v55  ;;  %v9270_v5 = vmul.f32 %v8477_v19, %v8937_v62  ;;  %v9274_v26 = vmul.f32 %v8479_v37, %v8937_v62 }
 0x3f0   : > { %10935 = vst [vmem:[#allocation206_spill] sm:$0xff] %v9238_v46  ;;  %v3547_v46 = vpop.permute.xlu1 %3546  ;;  %v9278_v47 = vmul.f32 %v8481_v8, %v8937_v62  ;;  %v9284_v55 = vmul.f32 %v8479_v37, %v8985_v36  ;;  %v9296_v62 = vmul.f32 %v8497_v42, %v9001_v4 }
 0x3f1   : > { %10937 = vst [vmem:[#allocation192_spill] sm:$0xff] %v9270_v5  ;;  %10938 = vst [vmem:[#allocation207_spill] sm:$0xff] %v9274_v26  ;;  %v3613_v3 = vpop.permute.xlu0 %3612  ;;  %v9288_v5 = vmul.f32 %v8481_v8, %v8985_v36  ;;  %v9292_v26 = vmul.f32 %v8490_v60, %v9001_v4  ;;  %v9308_v36 = vmul.f32 %v8481_v8, %v9049_v27 }
 0x3f2   : > { %10939 = vst [vmem:[#allocation208_spill] sm:$0xff] %v9278_v47  ;;  %10940 = vst [vmem:[#allocation193_spill] sm:$0xff] %v9284_v55  ;;  %v9300_v47 = vmul.f32 %v8477_v19, %v9049_v27  ;;  %v9304_v55 = vmul.f32 %v8479_v37, %v9049_v27  ;;  %v9320_v19 = vmul.f32 %v8497_v42, %v9067_v22 }
 0x3f3   : > { %10941 = vst [vmem:[#allocation212_spill] sm:$0xff] %v9288_v5  ;;  %10942 = vst [vmem:[#allocation213_spill] sm:$0xff] %v9292_v26  ;;  %v9312_v5 = vmul.f32 %v8499_v24, %v9001_v4  ;;  %v9316_v26 = vmul.f32 %v8490_v60, %v9067_v22  ;;  %v9324_v37 = vmul.f32 %v8499_v24, %v9067_v22 }
 0x3f4   : > { %10943 = vst [vmem:[#allocation143_spill] sm:$0xff] %v9300_v47  ;;  %10944 = vst [vmem:[#allocation144_spill] sm:$0xff] %v9304_v55  ;;  %v3551_v55 = vpop.permute.xlu1 %3550  ;;  %v9327_v47 = vstv %s9193_s24  ;;  %v9331_v8 = vmul.f32 %v8490_v60, %v9125_v34  ;;  %v9335_v4 = vmul.f32 %v8497_v42, %v9125_v34  ;;  %v9345_v22 = vmul.f32 %v8499_v24, %v9125_v34 }
 0x3f5   : > { %10945 = vst [vmem:[#allocation137_spill] sm:$0xff] %v9316_v26  ;;  %10946 = vst [vmem:[#allocation141_spill] sm:$0xff] %v9320_v19  ;;  %v3617_v27 = vpop.permute.xlu0 %3616  ;;  %v9338_v26 = vstv %s9211_s25  ;;  %v9341_v19 = vstv %s9213_s6  ;;  %v9366_v34 = vmul.f32 %v8499_v24, %v3281_v61  ;;  %v9387_v24 = vmul.f32 %v8565_v48, %v3547_v46 }
 0x3f6   : > { %10947 = vst [vmem:[#allocation146_spill] sm:$0xff] %v9324_v37  ;;  %10948 = vst [vmem:[#allocation215_spill] sm:$0xff] %v9327_v47  ;;  %v9349_v47 = vmul.f32 %v8562_v44, %v9138_v9  ;;  %v9353_v37 = vmul.f32 %v8565_v48, %v9138_v9 }
 0x3f7   : > { %10949 = vst [vmem:[#allocation44_spill] sm:$0xff] %v9335_v4  ;;  %10950 = vst [vmem:[#allocation104_spill] sm:$0xff] %v9338_v26  ;;  %v9357_v4 = vmul.f32 %v8590_v50, %v9138_v9  ;;  %v9360_v26 = vmul.f32 %v8490_v60, %v3281_v61  ;;  %v9381_v60 = vstv %s9262_s26 }
 0x3f8   : > { %10951 = vst [vmem:[#allocation195_spill] sm:$0xff] %v9341_v19  ;;  %10952 = vst [vmem:[#allocation105_spill] sm:$0xff] %v9345_v22  ;;  %v9363_v19 = vmul.f32 %v8497_v42, %v3281_v61  ;;  %v9372_v22 = vmul.f32 %v8565_v48, %v3549_v10  ;;  %v3615_v9 = vpop.permute.xlu1 %3614  ;;  %v9384_v42 = vmul.f32 %v8562_v44, %v3547_v46 }
 0x3f9   : > { %10953 = vst [vmem:[#allocation203_spill] sm:$0xff] %v9349_v47  ;;  %10954 = vst [vmem:[#allocation205_spill] sm:$0xff] %v9353_v37  ;;  %v9369_v47 = vmul.f32 %v8562_v44, %v3549_v10  ;;  %v9375_v37 = vmul.f32 %v8590_v50, %v3549_v10  ;;  %v9390_v61 = vmul.f32 %v8590_v50, %v3547_v46 }
 0x3fa   : > { %10955 = vst [vmem:[#allocation209_spill] sm:$0xff] %v9357_v4  ;;  %10956 = vst [vmem:[#allocation106_spill] sm:$0xff] %v9363_v19  ;;  %v9378_v4 = vstv %s9260_s1  ;;  %v9396_v10 = vmul.f32 %v8674_v40, %v3613_v3  ;;  %v9408_v46 = vmul.f32 %v8677_v20, %v3613_v3 }
 0x3fb   : > { %10957 = vst [vmem:[#allocation196_spill] sm:$0xff] %v9366_v34  ;;  %10958 = vst [vmem:[#allocation197_spill] sm:$0xff] %v9369_v47  ;;  %v2763_v47 = vpop.permute.xlu0 %2762  ;;  %v9393_v34 = vstv %s9280_s27 }
 0x3fc   : > { %10959 = vst [vmem:[#allocation216_spill] sm:$0xff] %v9372_v22  ;;  %10960 = vst [vmem:[#allocation217_spill] sm:$0xff] %v9375_v37  ;;  %v2772_v37 = vmul.f32 %v8810_v58, %v2763_v47  ;;  %v9402_v22 = vmul.f32 %v8562_v44, %v3551_v55 }
 0x3fd   : > { %10961 = vst [vmem:[#allocation218_spill] sm:$0xff] %v9378_v4  ;;  %10962 = vst [vmem:[#allocation198_spill] sm:$0xff] %v9381_v60  ;;  %v2782_v4 = vmul.f32 %v8813_v56, %v2763_v47  ;;  %v2792_v60 = vmul.f32 %v8828_v43, %v2763_v47 }
 0x3fe   : > { %10963 = vst [vmem:[#allocation107_spill] sm:$0xff] %v9384_v42  ;;  %10964 = vst [vmem:[#allocation108_spill] sm:$0xff] %v9387_v24  ;;  %v9405_v24 = vmul.f32 %v8565_v48, %v3551_v55  ;;  %v9419_v42 = vpop.permute.xlu1 %3618  ;;  %v2776_v44 = vadd.f32 %v2772_v37, %v8782_v1  ;;  %v9424_v48 = vmul.f32 %v8674_v40, %v3615_v9 }
 0x3ff   : > { %10965 = vst [vmem:[#allocation210_spill] sm:$0xff] %v9390_v61  ;;  %10966 = vst [vmem:[#allocation211_spill] sm:$0xff] %v9393_v34  ;;  %v9411_v34 = vmul.f32 %v8706_v52, %v3613_v3  ;;  %v9417_v61 = vmul.f32 %v8674_v40, %v3617_v27  ;;  %v2786_v47 = vadd.f32 %v2782_v4, %v8796_v39 }
 0x400   : > { %10967 = vst [vmem:[#allocation214_spill] sm:$0xff] %v9396_v10  ;;  %10968 = vst [vmem:[#allocation109_spill] sm:$0xff] %v9402_v22  ;;  %v9414_v10 = vmul.f32 %v8590_v50, %v3551_v55  ;;  %v9430_v3 = vmul.f32 %v8706_v52, %v3617_v27  ;;  %v2796_v50 = vadd.f32 %v2792_v60, %v8799_v31  ;;  %v2767_v55 = vpop.permute.xlu0 %2766 }
 0x401   : > { %10969 = vst [vmem:[#allocation200_spill] sm:$0xff] %v9405_v24  ;;  %10970 = vst [vmem:[#allocation201_spill] sm:$0xff] %v9408_v46  ;;  %v9427_v24 = vmul.f32 %v8677_v20, %v3617_v27  ;;  %v2784_v37 = vmul.f32 %v8813_v56, %v2767_v55  ;;  %v2794_v4 = vmul.f32 %v8828_v43, %v2767_v55 }
 0x402   : > { %10971 = vst [vmem:[#allocation147_spill] sm:$0xff] %v9411_v34  ;;  %10972 = vst [vmem:[#allocation148_spill] sm:$0xff] %v9414_v10  ;;  %v2774_v34 = vmul.f32 %v8810_v58, %v2767_v55  ;;  %v9448_v27 = vmul.f32 %v8677_v20, %v9419_v42  ;;  %v2806_v60 = vadd.f32 %v8502_v29, %v2776_v44 }
 0x403   : > { %10973 = vst [vmem:[#allocation204_spill] sm:$0xff] %v9417_v61  ;;  %10974 = vst [vmem:[#allocation202_spill] sm:$0xff] %v9419_v42  ;;  %v9434_v61 = vmul.f32 %v8677_v20, %v3615_v9  ;;  %v2788_v10 = vadd.f32 %v2784_v37, %v8796_v39  ;;  %v2798_v55 = vadd.f32 %v2794_v4, %v8799_v31 }
 0x404   : > { %10975 = vst [vmem:[#allocation110_spill] sm:$0xff] %v9424_v48  ;;  %10976 = vst [vmem:[#allocation111_spill] sm:$0xff] %v9427_v24  ;;  %v9440_v48 = vmul.f32 %v8706_v52, %v3615_v9  ;;  %v9444_v24 = vmul.f32 %v8674_v40, %v9419_v42  ;;  %v2816_v9 = vadd.f32 %v8505_v45, %v2786_v47  ;;  %v2831_v52 = vpop.permute.xlu0 %2830 }
 0x405   : > { %10977 = vst [vmem:[#allocation112_spill] sm:$0xff] %v9430_v3  ;;  %10978 = vst [vmem:[#allocation161_spill] sm:$0xff] %v9434_v61  ;;  %v2765_v3 = vpop.permute.xlu1 %2764  ;;  %v2778_v61 = vadd.f32 %v2774_v34, %v8782_v1  ;;  %v2826_v20 = vadd.f32 %v8514_v13, %v2796_v50  ;;  %v2840_v29 = vmul.f32 %v8940_v35, %v2831_v52 }
 0x406   : > { %10979 = vst [vmem:[#allocation31_spill] sm:$0xff] %v9440_v48  ;;  %10980 = vst [vmem:[#allocation165_spill] sm:$0xff] %v9444_v24  ;;  %v2773_v48 = vmul.f32 %v8810_v58, %v2765_v3  ;;  %v2783_v40 = vmul.f32 %v8813_v56, %v2765_v3  ;;  %v2793_v24 = vmul.f32 %v8828_v43, %v2765_v3 }
 0x407   : > { %10981 = vst [vmem:[#allocation34_spill] sm:$0xff] %v9448_v27  ;;  %v2850_v44 = vmul.f32 %v8958_v49, %v2831_v52  ;;  %v2860_v34 = vmul.f32 %v8972_v16, %v2831_v52  ;;  %v2808_v37 = vadd.f32 %v8523_v11, %v2778_v61  ;;  %v2818_v27 = vadd.f32 %v8530_v21, %v2788_v10  ;;  %v10982_v61 = vld [vmem:[#allocation56_spill] sm:$0xff]  ;;  %v10983_v10 = vld [vmem:[#allocation57_spill] sm:$0xff] }
 0x408   : > { %v2777_v4 = vadd.f32 %v2773_v48, %v8782_v1  ;;  %v2787_v45 = vadd.f32 %v2783_v40, %v8796_v39  ;;  %v2797_v47 = vadd.f32 %v2793_v24, %v8799_v31  ;;  %v2844_v42 = vadd.f32 %v2840_v29, %v2806_v60  ;;  %v2835_v19 = vpop.permute.xlu0 %2834 }
 0x409   : > { %v2769_v3 = vpop.permute.xlu1 %2768  ;;  %v2854_v22 = vadd.f32 %v2850_v44, %v2816_v9  ;;  %v2864_v13 = vadd.f32 %v2860_v34, %v2826_v20  ;;  %v2828_v50 = vadd.f32 %v8533_v14, %v2798_v55  ;;  %v2842_v20 = vmul.f32 %v8940_v35, %v2835_v19 }
 0x40a   : > { %v2775_v46 = vmul.f32 %v8810_v58, %v2769_v3  ;;  %v2785_v52 = vmul.f32 %v8813_v56, %v2769_v3  ;;  %v2795_v11 = vmul.f32 %v8828_v43, %v2769_v3  ;;  %v2807_v48 = vadd.f32 %v10982_v61, %v2777_v4  ;;  %v10984_v56 = vld [vmem:[#allocation58_spill] sm:$0xff] }
 0x40b   : > { %v2882_v40 = vadd.f32 %v9115_v63, %v2844_v42  ;;  %v2892_v24 = vadd.f32 %v9119_v12, %v2854_v22  ;;  %v2902_v21 = vadd.f32 %v9123_v32, %v2864_v13  ;;  %v2817_v60 = vadd.f32 %v10983_v10, %v2787_v45  ;;  %v10985_v12 = vld [vmem:[#allocation61_spill] sm:$0xff]  ;;  %v10987_v45 = vld [vmem:[#allocation59_spill] sm:$0xff] }
 0x40c   : > { %v2779_v9 = vadd.f32 %v2775_v46, %v8782_v1  ;;  %v2789_v14 = vadd.f32 %v2785_v52, %v8796_v39  ;;  %v2799_v58 = vadd.f32 %v2795_v11, %v8799_v31  ;;  %v2827_v55 = vadd.f32 %v10984_v56, %v2797_v47  ;;  %v10986_v39 = vld [vmem:[#allocation65_spill] sm:$0xff]  ;;  %v2983_v31 = vpop.permute.xlu0 %2982 }
 0x40d   : > { %v2833_v43 = vpop.permute.xlu1 %2832  ;;  %v2852_v29 = vmul.f32 %v8958_v49, %v2835_v19  ;;  %v2862_v63 = vmul.f32 %v8972_v16, %v2835_v19  ;;  %v2912_v22 = vadd.f32 %v10985_v12, %v2882_v40  ;;  %v2846_v44 = vadd.f32 %v2842_v20, %v2808_v37  ;;  %v10988_v19 = vld [vmem:[#allocation60_spill] sm:$0xff]  ;;  %v10993_v12 = vld [vmem:[#allocation181_spill] sm:$0xff] }
 0x40e   : > { %v2841_v32 = vmul.f32 %v8940_v35, %v2833_v43  ;;  %v2851_v42 = vmul.f32 %v8958_v49, %v2833_v43  ;;  %v2861_v1 = vmul.f32 %v8972_v16, %v2833_v43  ;;  %v2809_v46 = vadd.f32 %v10986_v39, %v2779_v9  ;;  %v10989_v43 = vld [vmem:[#allocation66_spill] sm:$0xff]  ;;  %v10991_v20 = vld [vmem:[#allocation180_spill] sm:$0xff] }
 0x40f   : > { %v2856_v34 = vadd.f32 %v2852_v29, %v2818_v27  ;;  %v2866_v4 = vadd.f32 %v2862_v63, %v2828_v50  ;;  %v2819_v47 = vadd.f32 %v10987_v45, %v2789_v14  ;;  %v2829_v11 = vadd.f32 %v10988_v19, %v2799_v58  ;;  %v10990_v58 = vld [vmem:[#allocation67_spill] sm:$0xff]  ;;  %v10992_v29 = vld [vmem:[#allocation98_spill] sm:$0xff] }
 0x410   : > { %v2845_v3 = vadd.f32 %v2841_v32, %v2807_v48  ;;  %v2855_v13 = vadd.f32 %v2851_v42, %v2817_v60  ;;  %v2865_v52 = vadd.f32 %v2861_v1, %v2827_v55  ;;  %v2884_v61 = vadd.f32 %v9152_v54, %v2846_v44  ;;  %v2987_v60 = vpop.permute.xlu0 %2986  ;;  %v10994_v1 = vld [vmem:[#allocation62_spill] sm:$0xff]  ;;  %v10995_v44 = vld [vmem:[#allocation63_spill] sm:$0xff] }
 0x411   : > { %v2894_v40 = vadd.f32 %v9156_v57, %v2856_v34  ;;  %v2904_v10 = vadd.f32 %v9160_v2, %v2866_v4  ;;  %v2837_v56 = vpop.permute.xlu1 %2836  ;;  %v2922_v9 = vadd.f32 %v10989_v43, %v2892_v24  ;;  %v2932_v57 = vadd.f32 %v10990_v58, %v2902_v21  ;;  %v10996_v4 = vld [vmem:[#allocation64_spill] sm:$0xff]  ;;  %v11002_v58 = vld [vmem:[#allocation190_spill] sm:$0xff] }
 0x412   : > { %v2883_v37 = vadd.f32 %v9132_v7, %v2845_v3  ;;  %v2893_v27 = vadd.f32 %v9136_v23, %v2855_v13  ;;  %v2903_v50 = vadd.f32 %v9148_v53, %v2865_v52  ;;  %v2843_v48 = vmul.f32 %v8940_v35, %v2837_v56  ;;  %v10998_v52 = vld [vmem:[#allocation128_spill] sm:$0xff] }
 0x413   : > { %v2853_v14 = vmul.f32 %v8958_v49, %v2837_v56  ;;  %v2863_v54 = vmul.f32 %v8972_v16, %v2837_v56  ;;  %v2950_v2 = vadd.f32 %v9166_v25, %v2912_v22  ;;  %v2960_v24 = vadd.f32 %v9170_v38, %v2922_v9  ;;  %v11000_v9 = vld [vmem:[#allocation115_spill] sm:$0xff] }
 0x414   : > { %v2847_v55 = vadd.f32 %v2843_v48, %v2809_v46  ;;  %v2992_v7 = vmul.f32 %v10991_v20, %v2983_v31  ;;  %v3002_v23 = vmul.f32 %v10992_v29, %v2983_v31  ;;  %v2970_v35 = vadd.f32 %v9174_v17, %v2932_v57  ;;  %v3051_v22 = vpop.permute.xlu0 %3050  ;;  %v10997_v17 = vld [vmem:[#allocation160_spill] sm:$0xff] }
 0x415   : > { %v2857_v63 = vadd.f32 %v2853_v14, %v2819_v47  ;;  %v2867_v53 = vadd.f32 %v2863_v54, %v2829_v11  ;;  %v3012_v32 = vmul.f32 %v10993_v12, %v2983_v31  ;;  %v2985_v49 = vpop.permute.xlu1 %2984  ;;  %v2913_v25 = vadd.f32 %v10994_v1, %v2883_v37  ;;  %v11001_v14 = vld [vmem:[#allocation46_spill] sm:$0xff] }
 0x416   : > { %v2885_v16 = vadd.f32 %v9181_v30, %v2847_v55  ;;  %v2996_v42 = vadd.f32 %v2992_v7, %v2950_v2  ;;  %v3006_v21 = vadd.f32 %v3002_v23, %v2960_v24  ;;  %v2923_v34 = vadd.f32 %v10995_v44, %v2893_v27  ;;  %v11004_v24 = vld [vmem:[#allocation116_spill] sm:$0xff] }
 0x417   : > { %v2895_v38 = vadd.f32 %v9185_v28, %v2857_v63  ;;  %v2905_v39 = vadd.f32 %v9197_v41, %v2867_v53  ;;  %v3016_v46 = vadd.f32 %v3012_v32, %v2970_v35  ;;  %v2933_v45 = vadd.f32 %v10996_v4, %v2903_v50  ;;  %v10999_v28 = vld [vmem:[#allocation162_spill] sm:$0xff]  ;;  %v11006_v53 = vld [vmem:[#allocation69_spill] sm:$0xff] }
 0x418   : > { %v2951_v47 = vadd.f32 %v10997_v17, %v2913_v25  ;;  %v2993_v31 = vmul.f32 %v10991_v20, %v2985_v49  ;;  %v3003_v30 = vmul.f32 %v10992_v29, %v2985_v49  ;;  %v2961_v3 = vadd.f32 %v9230_v6, %v2923_v34  ;;  %v3055_v50 = vpop.permute.xlu0 %3054 }
 0x419   : > { %v3013_v13 = vmul.f32 %v10993_v12, %v2985_v49  ;;  %v2914_v19 = vadd.f32 %v10998_v52, %v2884_v61  ;;  %v2924_v11 = vadd.f32 %v10999_v28, %v2894_v40  ;;  %v2989_v41 = vpop.permute.xlu1 %2988  ;;  %v2971_v56 = vadd.f32 %v9234_v0, %v2933_v45  ;;  %v11003_v61 = vld [vmem:[#allocation191_spill] sm:$0xff]  ;;  %v11007_v45 = vld [vmem:[#allocation70_spill] sm:$0xff] }
 0x41a   : > { %v2997_v43 = vadd.f32 %v2993_v31, %v2951_v47  ;;  %v2934_v37 = vadd.f32 %v11000_v9, %v2904_v10  ;;  %v2994_v27 = vmul.f32 %v10991_v20, %v2987_v60  ;;  %v3007_v48 = vadd.f32 %v3003_v30, %v2961_v3  ;;  %v11005_v10 = vld [vmem:[#allocation68_spill] sm:$0xff]  ;;  %v11008_v47 = vld [vmem:[#allocation50_spill] sm:$0xff]  ;;  %v11009_v31 = vld [vmem:[#allocation71_spill] sm:$0xff] }
 0x41b   : > { %v2952_v54 = vadd.f32 %v11001_v14, %v2914_v19  ;;  %v2962_v6 = vadd.f32 %v11002_v58, %v2924_v11  ;;  %v3004_v57 = vmul.f32 %v10992_v29, %v2987_v60  ;;  %v3017_v2 = vadd.f32 %v3013_v13, %v2971_v56  ;;  %v11010_v3 = vld [vmem:[#allocation182_spill] sm:$0xff]  ;;  %v11011_v52 = vld [vmem:[#allocation99_spill] sm:$0xff]  ;;  %v11016_v58 = vld [vmem:[#allocation132_spill] sm:$0xff] }
 0x41c   : > { %v2972_v55 = vadd.f32 %v11003_v61, %v2934_v37  ;;  %v3014_v40 = vmul.f32 %v10993_v12, %v2987_v60  ;;  %v2915_v0 = vadd.f32 %v11004_v24, %v2885_v16  ;;  %v2925_v63 = vadd.f32 %v11005_v10, %v2895_v38  ;;  %v3101_v34 = vpop.permute.xlu0 %3100  ;;  %v11012_v19 = vld [vmem:[#allocation126_spill] sm:$0xff]  ;;  %v11018_v61 = vld [vmem:[#allocation52_spill] sm:$0xff] }
 0x41d   : > { %v2998_v7 = vadd.f32 %v2994_v27, %v2952_v54  ;;  %v3008_v23 = vadd.f32 %v3004_v57, %v2962_v6  ;;  %v2935_v35 = vadd.f32 %v11006_v53, %v2905_v39  ;;  %v3053_v32 = vpop.permute.xlu1 %3052  ;;  %v2995_v25 = vmul.f32 %v10991_v20, %v2989_v41 }
 0x41e   : > { %v3018_v49 = vadd.f32 %v3014_v40, %v2972_v55  ;;  %v2953_v1 = vadd.f32 %v9246_v51, %v2915_v0  ;;  %v3005_v44 = vmul.f32 %v10992_v29, %v2989_v41  ;;  %v2963_v4 = vadd.f32 %v9250_v15, %v2925_v63  ;;  %v11019_v63 = vld [vmem:[#allocation172_spill] sm:$0xff] }
 0x41f   : > { %v2973_v60 = vadd.f32 %v9254_v59, %v2935_v35  ;;  %v3015_v16 = vmul.f32 %v10993_v12, %v2989_v41  ;;  %v3026_v17 = vadd.f32 %v11007_v45, %v2996_v42  ;;  %v3036_v39 = vadd.f32 %v11008_v47, %v3006_v21  ;;  %v11013_v59 = vld [vmem:[#allocation72_spill] sm:$0xff]  ;;  %v11014_v12 = vld [vmem:[#allocation130_spill] sm:$0xff]  ;;  %v11015_v42 = vld [vmem:[#allocation131_spill] sm:$0xff] }
 0x420   : > { %v2999_v38 = vadd.f32 %v2995_v25, %v2953_v1  ;;  %v3046_v30 = vadd.f32 %v11009_v31, %v3016_v46  ;;  %v3060_v51 = vmul.f32 %v11010_v3, %v3051_v22  ;;  %v3009_v13 = vadd.f32 %v3005_v44, %v2963_v4  ;;  %v3105_v37 = vpop.permute.xlu0 %3104  ;;  %v11020_v35 = vld [vmem:[#allocation117_spill] sm:$0xff]  ;;  %v11022_v45 = vld [vmem:[#allocation127_spill] sm:$0xff] }
 0x421   : > { %v3019_v20 = vadd.f32 %v3015_v16, %v2973_v60  ;;  %v3070_v29 = vmul.f32 %v11011_v52, %v3051_v22  ;;  %v3080_v28 = vmul.f32 %v11012_v19, %v3051_v22  ;;  %v3057_v15 = vpop.permute.xlu1 %3056  ;;  %v3027_v56 = vadd.f32 %v11013_v59, %v2997_v43  ;;  %v11017_v22 = vld [vmem:[#allocation73_spill] sm:$0xff] }
 0x422   : > { %v3064_v11 = vadd.f32 %v3060_v51, %v3026_v17  ;;  %v3037_v41 = vadd.f32 %v11014_v12, %v3007_v48  ;;  %v3047_v9 = vadd.f32 %v11015_v42, %v3017_v2  ;;  %v3061_v46 = vmul.f32 %v11010_v3, %v3053_v32 }
 0x423   : > { %v3074_v21 = vadd.f32 %v3070_v29, %v3036_v39  ;;  %v3084_v27 = vadd.f32 %v3080_v28, %v3046_v30  ;;  %v3071_v14 = vmul.f32 %v11011_v52, %v3053_v32  ;;  %v3081_v54 = vmul.f32 %v11012_v19, %v3053_v32 }
 0x424   : > { %v3028_v6 = vadd.f32 %v11016_v58, %v2998_v7  ;;  %v3038_v57 = vadd.f32 %v11017_v22, %v3008_v23  ;;  %v3048_v55 = vadd.f32 %v11018_v61, %v3018_v49  ;;  %v3065_v43 = vadd.f32 %v3061_v46, %v3027_v56  ;;  %v3169_v1 = vpop.permute.xlu0 %3168  ;;  %v11021_v23 = vld [vmem:[#allocation118_spill] sm:$0xff]  ;;  %v11025_v58 = vld [vmem:[#allocation119_spill] sm:$0xff] }
 0x425   : > { %v3075_v40 = vadd.f32 %v3071_v14, %v3037_v41  ;;  %v3062_v48 = vmul.f32 %v11010_v3, %v3055_v50  ;;  %v3072_v2 = vmul.f32 %v11011_v52, %v3055_v50  ;;  %v3103_v24 = vpop.permute.xlu1 %3102  ;;  %v3085_v0 = vadd.f32 %v3081_v54, %v3047_v9 }
 0x426   : > { %v3082_v10 = vmul.f32 %v11012_v19, %v3055_v50  ;;  %v3029_v53 = vadd.f32 %v11019_v63, %v2999_v38  ;;  %v3039_v32 = vadd.f32 %v11020_v35, %v3009_v13  ;;  %v3049_v44 = vadd.f32 %v11021_v23, %v3019_v20  ;;  %v11023_v50 = vld [vmem:[#allocation129_spill] sm:$0xff]  ;;  %v11024_v38 = vld [vmem:[#allocation100_spill] sm:$0xff]  ;;  %v11030_v63 = vld [vmem:[#allocation170_spill] sm:$0xff] }
 0x427   : > { %v3066_v7 = vadd.f32 %v3062_v48, %v3028_v6  ;;  %v3076_v25 = vadd.f32 %v3072_v2, %v3038_v57  ;;  %v3063_v49 = vmul.f32 %v11010_v3, %v3057_v15  ;;  %v3073_v60 = vmul.f32 %v11011_v52, %v3057_v15  ;;  %v11028_v2 = vld [vmem:[#allocation55_spill] sm:$0xff]  ;;  %v11033_v23 = vld [vmem:[#allocation150_spill] sm:$0xff] }
 0x428   : > { %v3086_v4 = vadd.f32 %v3082_v10, %v3048_v55  ;;  %v3083_v16 = vmul.f32 %v11012_v19, %v3057_v15  ;;  %v3110_v17 = vmul.f32 %v11022_v45, %v3101_v34  ;;  %v3120_v39 = vmul.f32 %v11023_v50, %v3101_v34  ;;  %v3173_v28 = vpop.permute.xlu0 %3172  ;;  %v11026_v55 = vld [vmem:[#allocation175_spill] sm:$0xff] }
 0x429   : > { %v3067_v47 = vadd.f32 %v3063_v49, %v3029_v53  ;;  %v3130_v31 = vmul.f32 %v11024_v38, %v3101_v34  ;;  %v3111_v30 = vmul.f32 %v11022_v45, %v3103_v24  ;;  %v3107_v51 = vpop.permute.xlu1 %3106  ;;  %v3077_v13 = vadd.f32 %v3073_v60, %v3039_v32  ;;  %v11031_v35 = vld [vmem:[#allocation75_spill] sm:$0xff] }
 0x42a   : > { %v3087_v29 = vadd.f32 %v3083_v16, %v3049_v44  ;;  %v3114_v20 = vadd.f32 %v3110_v17, %v3064_v11  ;;  %v3121_v3 = vmul.f32 %v11023_v50, %v3103_v24  ;;  %v3124_v59 = vadd.f32 %v3120_v39, %v3074_v21  ;;  %v11034_v39 = vld [vmem:[#allocation151_spill] sm:$0xff] }
 0x42b   : > { %v3134_v52 = vadd.f32 %v3130_v31, %v3084_v27  ;;  %v3115_v56 = vadd.f32 %v3111_v30, %v3065_v43  ;;  %v3131_v19 = vmul.f32 %v11024_v38, %v3103_v24  ;;  %v3112_v12 = vmul.f32 %v11022_v45, %v3105_v37  ;;  %v11036_v30 = vld [vmem:[#allocation206_spill] sm:$0xff] }
 0x42c   : > { %v3125_v15 = vadd.f32 %v3121_v3, %v3075_v40  ;;  %v3122_v41 = vmul.f32 %v11023_v50, %v3105_v37  ;;  %v3132_v34 = vmul.f32 %v11024_v38, %v3105_v37  ;;  %v3113_v9 = vmul.f32 %v11022_v45, %v3107_v51  ;;  %v3321_v40 = vpop.permute.xlu0 %3320  ;;  %v11027_v37 = vld [vmem:[#allocation74_spill] sm:$0xff] }
 0x42d   : > { %v3135_v42 = vadd.f32 %v3131_v19, %v3085_v0  ;;  %v3123_v11 = vmul.f32 %v11023_v50, %v3107_v51  ;;  %v3133_v46 = vmul.f32 %v11024_v38, %v3107_v51  ;;  %v3171_v14 = vpop.permute.xlu1 %3170  ;;  %v3116_v21 = vadd.f32 %v3112_v12, %v3066_v7  ;;  %v11029_v0 = vld [vmem:[#allocation189_spill] sm:$0xff]  ;;  %v11032_v7 = vld [vmem:[#allocation76_spill] sm:$0xff] }
 0x42e   : > { %v3126_v27 = vadd.f32 %v3122_v41, %v3076_v25  ;;  %v3136_v54 = vadd.f32 %v3132_v34, %v3086_v4  ;;  %v3144_v6 = vadd.f32 %v11025_v58, %v3114_v20  ;;  %v3117_v22 = vadd.f32 %v3113_v9, %v3067_v47  ;;  %v11039_v34 = vld [vmem:[#allocation193_spill] sm:$0xff] }
 0x42f   : > { %v3127_v57 = vadd.f32 %v3123_v11, %v3077_v13  ;;  %v3137_v61 = vadd.f32 %v3133_v46, %v3087_v29  ;;  %v3154_v43 = vadd.f32 %v11026_v55, %v3124_v59  ;;  %v3164_v48 = vadd.f32 %v11027_v37, %v3134_v52  ;;  %v11037_v29 = vld [vmem:[#allocation103_spill] sm:$0xff]  ;;  %v11040_v46 = vld [vmem:[#allocation120_spill] sm:$0xff]  ;;  %v11042_v58 = vld [vmem:[#allocation121_spill] sm:$0xff] }
 0x430   : > { %v3178_v24 = vmul.f32 %v11028_v2, %v3169_v1  ;;  %v3188_v10 = vmul.f32 %v11029_v0, %v3169_v1  ;;  %v3198_v53 = vmul.f32 %v11030_v63, %v3169_v1  ;;  %v3145_v32 = vadd.f32 %v11031_v35, %v3115_v56  ;;  %v11035_v1 = vld [vmem:[#allocation77_spill] sm:$0xff]  ;;  %v11038_v56 = vld [vmem:[#allocation78_spill] sm:$0xff]  ;;  %v3325_v41 = vpop.permute.xlu0 %3324 }
 0x431   : > { %v3155_v25 = vadd.f32 %v11032_v7, %v3125_v15  ;;  %v3165_v44 = vadd.f32 %v11033_v23, %v3135_v42  ;;  %v3179_v49 = vmul.f32 %v11028_v2, %v3171_v14  ;;  %v3175_v4 = vpop.permute.xlu1 %3174  ;;  %v3189_v17 = vmul.f32 %v11029_v0, %v3171_v14 }
 0x432   : > { %v3182_v60 = vadd.f32 %v3178_v24, %v3144_v6  ;;  %v3192_v16 = vadd.f32 %v3188_v10, %v3154_v43  ;;  %v3202_v45 = vadd.f32 %v3198_v53, %v3164_v48  ;;  %v3199_v50 = vmul.f32 %v11030_v63, %v3171_v14  ;;  %v11041_v14 = vld [vmem:[#allocation212_spill] sm:$0xff] }
 0x433   : > { %v3183_v47 = vadd.f32 %v3179_v49, %v3145_v32  ;;  %v3146_v38 = vadd.f32 %v11034_v39, %v3116_v21  ;;  %v3156_v31 = vadd.f32 %v11035_v1, %v3126_v27  ;;  %v3193_v3 = vadd.f32 %v3189_v17, %v3155_v25  ;;  %v11044_v24 = vld [vmem:[#allocation192_spill] sm:$0xff]  ;;  %v11047_v25 = vld [vmem:[#allocation207_spill] sm:$0xff] }
 0x434   : > { %v3220_v51 = vadd.f32 %v11036_v30, %v3182_v60  ;;  %v3230_v13 = vadd.f32 %v9242_v33, %v3192_v16  ;;  %v3240_v20 = vadd.f32 %v11037_v29, %v3202_v45  ;;  %v3203_v59 = vadd.f32 %v3199_v50, %v3165_v44  ;;  %v11049_v16 = vld [vmem:[#allocation82_spill] sm:$0xff]  ;;  %v11050_v45 = vld [vmem:[#allocation213_spill] sm:$0xff]  ;;  %v11052_v50 = vld [vmem:[#allocation144_spill] sm:$0xff] }
 0x435   : > { %v3221_v52 = vadd.f32 %v9266_v18, %v3183_v47  ;;  %v3166_v19 = vadd.f32 %v11038_v56, %v3136_v54  ;;  %v3180_v15 = vmul.f32 %v11028_v2, %v3173_v28  ;;  %v3323_v12 = vpop.permute.xlu1 %3322  ;;  %v3231_v42 = vadd.f32 %v11039_v34, %v3193_v3  ;;  %v11043_v18 = vld [vmem:[#allocation166_spill] sm:$0xff]  ;;  %v3389_v47 = vpop.permute.xlu0 %3388 }
 0x436   : > { %v3190_v9 = vmul.f32 %v11029_v0, %v3173_v28  ;;  %v3200_v11 = vmul.f32 %v11030_v63, %v3173_v28  ;;  %v3147_v33 = vadd.f32 %v11040_v46, %v3117_v22  ;;  %v3241_v21 = vadd.f32 %v11041_v14, %v3203_v59  ;;  %v11045_v28 = vld [vmem:[#allocation79_spill] sm:$0xff]  ;;  %v11046_v22 = vld [vmem:[#allocation80_spill] sm:$0xff]  ;;  %v11055_v29 = vld [vmem:[#allocation158_spill] sm:$0xff] }
 0x437   : > { %v3184_v27 = vadd.f32 %v3180_v15, %v3146_v38  ;;  %v3157_v6 = vadd.f32 %v11042_v58, %v3127_v57  ;;  %v3167_v55 = vadd.f32 %v11043_v18, %v3137_v61  ;;  %v3181_v37 = vmul.f32 %v11028_v2, %v3175_v4  ;;  %v11048_v57 = vld [vmem:[#allocation208_spill] sm:$0xff]  ;;  %v11053_v38 = vld [vmem:[#allocation43_spill] sm:$0xff]  ;;  %v11060_v58 = vld [vmem:[#allocation105_spill] sm:$0xff] }
 0x438   : > { %v3194_v54 = vadd.f32 %v3190_v9, %v3156_v31  ;;  %v3204_v43 = vadd.f32 %v3200_v11, %v3166_v19  ;;  %v3191_v48 = vmul.f32 %v11029_v0, %v3175_v4  ;;  %v3201_v53 = vmul.f32 %v11030_v63, %v3175_v4  ;;  %v11051_v63 = vld [vmem:[#allocation143_spill] sm:$0xff]  ;;  %v11054_v31 = vld [vmem:[#allocation185_spill] sm:$0xff]  ;;  %v11057_v15 = vld [vmem:[#allocation168_spill] sm:$0xff] }
 0x439   : > { %v3222_v10 = vadd.f32 %v11044_v24, %v3184_v27  ;;  %v3250_v35 = vadd.f32 %v11045_v28, %v3220_v51  ;;  %v3260_v32 = vadd.f32 %v11046_v22, %v3230_v13  ;;  %v3327_v7 = vpop.permute.xlu1 %3326  ;;  %v3185_v61 = vadd.f32 %v3181_v37, %v3147_v33  ;;  %v11058_v9 = vld [vmem:[#allocation122_spill] sm:$0xff]  ;;  %v11059_v27 = vld [vmem:[#allocation44_spill] sm:$0xff]  ;;  %v11065_v22 = vld [vmem:[#allocation141_spill] sm:$0xff] }
 0x43a   : > { %v3232_v23 = vadd.f32 %v11047_v25, %v3194_v54  ;;  %v3242_v44 = vadd.f32 %v11048_v57, %v3204_v43  ;;  %v3195_v49 = vadd.f32 %v3191_v48, %v3157_v6  ;;  %v3205_v60 = vadd.f32 %v3201_v53, %v3167_v55  ;;  %v11061_v6 = vld [vmem:[#allocation81_spill] sm:$0xff]  ;;  %v11062_v54 = vld [vmem:[#allocation83_spill] sm:$0xff]  ;;  %v11063_v43 = vld [vmem:[#allocation84_spill] sm:$0xff] }
 0x43b   : > { %v3270_v2 = vadd.f32 %v11049_v16, %v3240_v20  ;;  %v3288_v0 = vadd.f32 %v11050_v45, %v3250_v35  ;;  %v3298_v17 = vadd.f32 %v9296_v62, %v3260_v32  ;;  %v3223_v4 = vadd.f32 %v11051_v63, %v3185_v61  ;;  %v11056_v20 = vld [vmem:[#allocation167_spill] sm:$0xff]  ;;  %v11064_v53 = vld [vmem:[#allocation137_spill] sm:$0xff]  ;;  %v11066_v25 = vld [vmem:[#allocation146_spill] sm:$0xff] }
 0x43c   : > { %v3233_v39 = vadd.f32 %v11052_v50, %v3195_v49  ;;  %v3330_v1 = vmul.f32 %v11053_v38, %v3321_v40  ;;  %v3340_v30 = vmul.f32 %v11054_v31, %v3321_v40  ;;  %v3243_v51 = vadd.f32 %v9308_v36, %v3205_v60  ;;  %v11067_v57 = vld [vmem:[#allocation85_spill] sm:$0xff] }
 0x43d   : > { %v3308_v13 = vadd.f32 %v9312_v5, %v3270_v2  ;;  %v3350_v3 = vmul.f32 %v11055_v29, %v3321_v40  ;;  %v3251_v59 = vadd.f32 %v11056_v20, %v3221_v52  ;;  %v3391_v56 = vpop.permute.xlu1 %3390  ;;  %v3261_v34 = vadd.f32 %v11057_v15, %v3231_v42  ;;  %v11069_v16 = vld [vmem:[#allocation133_spill] sm:$0xff] }
 0x43e   : > { %v3334_v19 = vadd.f32 %v3330_v1, %v3288_v0  ;;  %v3344_v62 = vadd.f32 %v3340_v30, %v3298_v17  ;;  %v3271_v11 = vadd.f32 %v11058_v9, %v3241_v21  ;;  %v3331_v14 = vmul.f32 %v11053_v38, %v3323_v12  ;;  %v11070_v1 = vld [vmem:[#allocation106_spill] sm:$0xff] }
 0x43f   : > { %v3354_v46 = vadd.f32 %v3350_v3, %v3308_v13  ;;  %v3289_v33 = vadd.f32 %v9331_v8, %v3251_v59  ;;  %v3341_v36 = vmul.f32 %v11054_v31, %v3323_v12  ;;  %v3299_v5 = vadd.f32 %v11059_v27, %v3261_v34  ;;  %v3393_v8 = vpop.permute.xlu0 %3392  ;;  %v11071_v13 = vld [vmem:[#allocation196_spill] sm:$0xff]  ;;  %v11072_v3 = vld [vmem:[#allocation171_spill] sm:$0xff] }
 0x440   : > { %v3309_v40 = vadd.f32 %v11060_v58, %v3271_v11  ;;  %v3351_v52 = vmul.f32 %v11055_v29, %v3323_v12  ;;  %v3252_v18 = vadd.f32 %v11061_v6, %v3222_v10  ;;  %v3262_v42 = vadd.f32 %v11062_v54, %v3232_v23  ;;  %v11078_v58 = vld [vmem:[#allocation154_spill] sm:$0xff] }
 0x441   : > { %v3335_v55 = vadd.f32 %v3331_v14, %v3289_v33  ;;  %v3272_v21 = vadd.f32 %v11063_v43, %v3242_v44  ;;  %v3332_v37 = vmul.f32 %v11053_v38, %v3325_v41  ;;  %v3345_v48 = vadd.f32 %v3341_v36, %v3299_v5  ;;  %v3395_v23 = vpop.permute.xlu1 %3394  ;;  %v11068_v44 = vld [vmem:[#allocation152_spill] sm:$0xff]  ;;  %v11076_v14 = vld [vmem:[#allocation186_spill] sm:$0xff]  ;;  %v11077_v36 = vld [vmem:[#allocation187_spill] sm:$0xff] }
 0x442   : > { %v3355_v24 = vadd.f32 %v3351_v52, %v3309_v40  ;;  %v3290_v28 = vadd.f32 %v11064_v53, %v3252_v18  ;;  %v3342_v35 = vmul.f32 %v11054_v31, %v3325_v41  ;;  %v3300_v32 = vadd.f32 %v11065_v22, %v3262_v42  ;;  %v11081_v43 = vld [vmem:[#allocation87_spill] sm:$0xff] }
 0x443   : > { %v3310_v12 = vadd.f32 %v11066_v25, %v3272_v21  ;;  %v3352_v10 = vmul.f32 %v11055_v29, %v3325_v41  ;;  %v3253_v61 = vadd.f32 %v11067_v57, %v3223_v4  ;;  %v3263_v60 = vadd.f32 %v11068_v44, %v3233_v39  ;;  %v11073_v39 = vld [vmem:[#allocation153_spill] sm:$0xff]  ;;  %v3439_v11 = vpop.permute.xlu0 %3438  ;;  %v11083_v53 = vld [vmem:[#allocation155_spill] sm:$0xff]  ;;  %v11084_v25 = vld [vmem:[#allocation156_spill] sm:$0xff] }
 0x444   : > { %v3336_v49 = vadd.f32 %v3332_v37, %v3290_v28  ;;  %v3273_v2 = vadd.f32 %v11069_v16, %v3243_v51  ;;  %v3333_v45 = vmul.f32 %v11053_v38, %v3327_v7  ;;  %v3346_v0 = vadd.f32 %v3342_v35, %v3300_v32  ;;  %v11074_v51 = vld [vmem:[#allocation40_spill] sm:$0xff]  ;;  %v11075_v38 = vld [vmem:[#allocation159_spill] sm:$0xff] }
 0x445   : > { %v3356_v17 = vadd.f32 %v3352_v10, %v3310_v12  ;;  %v3291_v63 = vadd.f32 %v9360_v26, %v3253_v61  ;;  %v3343_v50 = vmul.f32 %v11054_v31, %v3327_v7  ;;  %v3301_v30 = vadd.f32 %v11070_v1, %v3263_v60  ;;  %v3441_v6 = vpop.permute.xlu1 %3440  ;;  %v11082_v37 = vld [vmem:[#allocation88_spill] sm:$0xff]  ;;  %v11085_v10 = vld [vmem:[#allocation183_spill] sm:$0xff] }
 0x446   : > { %v3311_v41 = vadd.f32 %v11071_v13, %v3273_v2  ;;  %v3353_v4 = vmul.f32 %v11055_v29, %v3327_v7  ;;  %v3364_v20 = vadd.f32 %v11072_v3, %v3334_v19  ;;  %v3374_v15 = vadd.f32 %v11073_v39, %v3344_v62  ;;  %v11079_v7 = vld [vmem:[#allocation42_spill] sm:$0xff]  ;;  %v11086_v44 = vld [vmem:[#allocation184_spill] sm:$0xff]  ;;  %v11088_v1 = vld [vmem:[#allocation163_spill] sm:$0xff] }
 0x447   : > { %v3337_v59 = vadd.f32 %v3333_v45, %v3291_v63  ;;  %v3384_v34 = vadd.f32 %v11074_v51, %v3354_v46  ;;  %v3398_v9 = vmul.f32 %v11075_v38, %v3389_v47  ;;  %v3347_v33 = vadd.f32 %v3343_v50, %v3301_v30  ;;  %v11080_v19 = vld [vmem:[#allocation86_spill] sm:$0xff]  ;;  %v11089_v13 = vld [vmem:[#allocation164_spill] sm:$0xff] }
 0x448   : > { %v3357_v26 = vadd.f32 %v3353_v4, %v3311_v41  ;;  %v3408_v31 = vmul.f32 %v11076_v14, %v3389_v47  ;;  %v3418_v27 = vmul.f32 %v11077_v36, %v3389_v47  ;;  %v3365_v40 = vadd.f32 %v11078_v58, %v3335_v55 }
 0x449   : > { %v3402_v5 = vadd.f32 %v3398_v9, %v3364_v20  ;;  %v3375_v29 = vadd.f32 %v11079_v7, %v3345_v48  ;;  %v3385_v52 = vadd.f32 %v11080_v19, %v3355_v24  ;;  %v3399_v46 = vmul.f32 %v11075_v38, %v3391_v56  ;;  %v3445_v50 = vpop.permute.xlu1 %3444  ;;  %v11090_v7 = vld [vmem:[#allocation51_spill] sm:$0xff] }
 0x44a   : > { %v3412_v62 = vadd.f32 %v3408_v31, %v3374_v15  ;;  %v3422_v18 = vadd.f32 %v3418_v27, %v3384_v34  ;;  %v3409_v54 = vmul.f32 %v11076_v14, %v3391_v56  ;;  %v3419_v42 = vmul.f32 %v11077_v36, %v3391_v56  ;;  %v3443_v56 = vpop.permute.xlu0 %3442 }
 0x44b   : > { %v3366_v21 = vadd.f32 %v11081_v43, %v3336_v49  ;;  %v3376_v47 = vadd.f32 %v11082_v37, %v3346_v0  ;;  %v3386_v28 = vadd.f32 %v11083_v53, %v3356_v17  ;;  %v3403_v55 = vadd.f32 %v3399_v46, %v3365_v40  ;;  %v11087_v17 = vld [vmem:[#allocation145_spill] sm:$0xff]  ;;  %v11093_v43 = vld [vmem:[#allocation194_spill] sm:$0xff] }
 0x44c   : > { %v3413_v35 = vadd.f32 %v3409_v54, %v3375_v29  ;;  %v3400_v48 = vmul.f32 %v11075_v38, %v3393_v8  ;;  %v3410_v24 = vmul.f32 %v11076_v14, %v3393_v8  ;;  %v3423_v22 = vadd.f32 %v3419_v42, %v3385_v52  ;;  %v11092_v54 = vld [vmem:[#allocation47_spill] sm:$0xff]  ;;  %v11094_v37 = vld [vmem:[#allocation101_spill] sm:$0xff]  ;;  %v11095_v53 = vld [vmem:[#allocation102_spill] sm:$0xff] }
 0x44d   : > { %v3420_v32 = vmul.f32 %v11077_v36, %v3393_v8  ;;  %v3367_v12 = vadd.f32 %v11084_v25, %v3337_v59  ;;  %v3377_v57 = vadd.f32 %v11085_v10, %v3347_v33  ;;  %v3387_v60 = vadd.f32 %v11086_v44, %v3357_v26  ;;  %v3509_v19 = vpop.permute.xlu1 %3508 }
 0x44e   : > { %v3404_v61 = vadd.f32 %v3400_v48, %v3366_v21  ;;  %v3414_v49 = vadd.f32 %v3410_v24, %v3376_v47  ;;  %v3401_v16 = vmul.f32 %v11075_v38, %v3395_v23  ;;  %v3411_v45 = vmul.f32 %v11076_v14, %v3395_v23  ;;  %v11097_v48 = vld [vmem:[#allocation174_spill] sm:$0xff] }
 0x44f   : > { %v3424_v2 = vadd.f32 %v3420_v32, %v3386_v28  ;;  %v3421_v0 = vmul.f32 %v11077_v36, %v3395_v23  ;;  %v3448_v63 = vmul.f32 %v11087_v17, %v3439_v11  ;;  %v3458_v30 = vmul.f32 %v11088_v1, %v3439_v11 }
 0x450   : > { %v3405_v8 = vadd.f32 %v3401_v16, %v3367_v12  ;;  %v3468_v41 = vmul.f32 %v11089_v13, %v3439_v11  ;;  %v3449_v4 = vmul.f32 %v11087_v17, %v3441_v6  ;;  %v3415_v3 = vadd.f32 %v3411_v45, %v3377_v57  ;;  %v3507_v11 = vpop.permute.xlu0 %3506 }
 0x451   : > { %v3425_v20 = vadd.f32 %v3421_v0, %v3387_v60  ;;  %v3452_v59 = vadd.f32 %v3448_v63, %v3402_v5  ;;  %v3459_v39 = vmul.f32 %v11088_v1, %v3441_v6  ;;  %v3462_v15 = vadd.f32 %v3458_v30, %v3412_v62  ;;  %v11099_v60 = vld [vmem:[#allocation48_spill] sm:$0xff]  ;;  %v11101_v0 = vld [vmem:[#allocation203_spill] sm:$0xff]  ;;  %v11102_v63 = vld [vmem:[#allocation205_spill] sm:$0xff] }
 0x452   : > { %v3472_v51 = vadd.f32 %v3468_v41, %v3422_v18  ;;  %v3453_v34 = vadd.f32 %v3449_v4, %v3403_v55  ;;  %v3469_v23 = vmul.f32 %v11089_v13, %v3441_v6  ;;  %v3450_v9 = vmul.f32 %v11087_v17, %v3443_v56  ;;  %v11091_v18 = vld [vmem:[#allocation173_spill] sm:$0xff]  ;;  %v11104_v41 = vld [vmem:[#allocation107_spill] sm:$0xff] }
 0x453   : > { %v3463_v38 = vadd.f32 %v3459_v39, %v3413_v35  ;;  %v3460_v33 = vmul.f32 %v11088_v1, %v3443_v56  ;;  %v3470_v26 = vmul.f32 %v11089_v13, %v3443_v56  ;;  %v3451_v31 = vmul.f32 %v11087_v17, %v3445_v50  ;;  %v11096_v55 = vld [vmem:[#allocation41_spill] sm:$0xff]  ;;  %v3513_v39 = vpop.permute.xlu1 %3512 }
 0x454   : > { %v3473_v14 = vadd.f32 %v3469_v23, %v3423_v22  ;;  %v3461_v36 = vmul.f32 %v11088_v1, %v3445_v50  ;;  %v3471_v27 = vmul.f32 %v11089_v13, %v3445_v50  ;;  %v3454_v5 = vadd.f32 %v3450_v9, %v3404_v61  ;;  %v11098_v22 = vld [vmem:[#allocation188_spill] sm:$0xff]  ;;  %v3511_v61 = vpop.permute.xlu0 %3510 }
 0x455   : > { %v3464_v58 = vadd.f32 %v3460_v33, %v3414_v49  ;;  %v3474_v40 = vadd.f32 %v3470_v26, %v3424_v2  ;;  %v3482_v29 = vadd.f32 %v11090_v7, %v3452_v59  ;;  %v3455_v52 = vadd.f32 %v3451_v31, %v3405_v8  ;;  %v11100_v2 = vld [vmem:[#allocation157_spill] sm:$0xff]  ;;  %v11108_v33 = vld [vmem:[#allocation210_spill] sm:$0xff] }
 0x456   : > { %v3465_v6 = vadd.f32 %v3461_v36, %v3415_v3  ;;  %v3475_v62 = vadd.f32 %v3471_v27, %v3425_v20  ;;  %v3492_v46 = vadd.f32 %v11091_v18, %v3462_v15  ;;  %v3502_v42 = vadd.f32 %v11092_v54, %v3472_v51  ;;  %v11103_v8 = vld [vmem:[#allocation209_spill] sm:$0xff]  ;;  %v11106_v15 = vld [vmem:[#allocation108_spill] sm:$0xff]  ;;  %v11110_v36 = vld [vmem:[#allocation135_spill] sm:$0xff] }
 0x457   : > { %v3516_v21 = vmul.f32 %v11093_v43, %v3507_v11  ;;  %v3526_v47 = vmul.f32 %v11094_v37, %v3507_v11  ;;  %v3536_v28 = vmul.f32 %v11095_v53, %v3507_v11  ;;  %v3483_v35 = vadd.f32 %v11096_v55, %v3453_v34  ;;  %v11105_v3 = vld [vmem:[#allocation89_spill] sm:$0xff]  ;;  %v11112_v54 = vld [vmem:[#allocation136_spill] sm:$0xff] }
 0x458   : > { %v3493_v24 = vadd.f32 %v11097_v48, %v3463_v38  ;;  %v3503_v32 = vadd.f32 %v11098_v22, %v3473_v14  ;;  %v3517_v25 = vmul.f32 %v11093_v43, %v3509_v19  ;;  %v3527_v56 = vmul.f32 %v11094_v37, %v3509_v19  ;;  %v11107_v38 = vld [vmem:[#allocation90_spill] sm:$0xff] }
 0x459   : > { %v3520_v12 = vadd.f32 %v3516_v21, %v3482_v29  ;;  %v3530_v10 = vadd.f32 %v3526_v47, %v3492_v46  ;;  %v3540_v57 = vadd.f32 %v3536_v28, %v3502_v42  ;;  %v3537_v44 = vmul.f32 %v11095_v53, %v3509_v19  ;;  %v11109_v14 = vld [vmem:[#allocation134_spill] sm:$0xff]  ;;  %v3659_v29 = vpop.permute.xlu0 %3658  ;;  %v11111_v19 = vld [vmem:[#allocation197_spill] sm:$0xff]  ;;  %v11113_v42 = vld [vmem:[#allocation91_spill] sm:$0xff] }
 0x45a   : > { %v3521_v49 = vadd.f32 %v3517_v25, %v3483_v35  ;;  %v3484_v16 = vadd.f32 %v11099_v60, %v3454_v5  ;;  %v3494_v45 = vadd.f32 %v11100_v2, %v3464_v58  ;;  %v3531_v30 = vadd.f32 %v3527_v56, %v3493_v24  ;;  %v11114_v47 = vld [vmem:[#allocation216_spill] sm:$0xff]  ;;  %v11117_v22 = vld [vmem:[#allocation214_spill] sm:$0xff] }
 0x45b   : > { %v3558_v17 = vadd.f32 %v11101_v0, %v3520_v12  ;;  %v3568_v50 = vadd.f32 %v11102_v63, %v3530_v10  ;;  %v3578_v1 = vadd.f32 %v11103_v8, %v3540_v57  ;;  %v3541_v13 = vadd.f32 %v3537_v44, %v3503_v32  ;;  %v11116_v24 = vld [vmem:[#allocation92_spill] sm:$0xff]  ;;  %v11118_v32 = vld [vmem:[#allocation201_spill] sm:$0xff]  ;;  %v3661_v12 = vpop.permute.xlu1 %3660 }
 0x45c   : > { %v3559_v4 = vadd.f32 %v11104_v41, %v3521_v49  ;;  %v3504_v20 = vadd.f32 %v11105_v3, %v3474_v40  ;;  %v3518_v59 = vmul.f32 %v11093_v43, %v3511_v61  ;;  %v3569_v51 = vadd.f32 %v11106_v15, %v3531_v30  ;;  %v11119_v10 = vld [vmem:[#allocation109_spill] sm:$0xff]  ;;  %v11120_v57 = vld [vmem:[#allocation200_spill] sm:$0xff] }
 0x45d   : > { %v3528_v34 = vmul.f32 %v11094_v37, %v3511_v61  ;;  %v3538_v23 = vmul.f32 %v11095_v53, %v3511_v61  ;;  %v3485_v9 = vadd.f32 %v11107_v38, %v3455_v52  ;;  %v3579_v26 = vadd.f32 %v11108_v33, %v3541_v13  ;;  %v11121_v61 = vld [vmem:[#allocation215_spill] sm:$0xff]  ;;  %v11122_v44 = vld [vmem:[#allocation104_spill] sm:$0xff]  ;;  %v11128_v30 = vld [vmem:[#allocation149_spill] sm:$0xff]  ;;  %v3663_v15 = vpop.permute.xlu0 %3662 }
 0x45e   : > { %v3522_v11 = vadd.f32 %v3518_v59, %v3484_v16  ;;  %v3495_v31 = vadd.f32 %v11109_v14, %v3465_v6  ;;  %v3505_v27 = vadd.f32 %v11110_v36, %v3475_v62  ;;  %v3519_v40 = vmul.f32 %v11093_v43, %v3513_v39  ;;  %v11115_v6 = vld [vmem:[#allocation217_spill] sm:$0xff]  ;;  %v11123_v16 = vld [vmem:[#allocation148_spill] sm:$0xff]  ;;  %v11130_v59 = vld [vmem:[#allocation199_spill] sm:$0xff] }
 0x45f   : > { %v3532_v5 = vadd.f32 %v3528_v34, %v3494_v45  ;;  %v3542_v58 = vadd.f32 %v3538_v23, %v3504_v20  ;;  %v3529_v7 = vmul.f32 %v11094_v37, %v3513_v39  ;;  %v3539_v46 = vmul.f32 %v11095_v53, %v3513_v39  ;;  %v11124_v45 = vld [vmem:[#allocation147_spill] sm:$0xff]  ;;  %v11129_v3 = vld [vmem:[#allocation45_spill] sm:$0xff]  ;;  %v11131_v23 = vld [vmem:[#allocation110_spill] sm:$0xff] }
 0x460   : > { %v3560_v18 = vadd.f32 %v11111_v19, %v3522_v11  ;;  %v3588_v52 = vadd.f32 %v11112_v54, %v3558_v17  ;;  %v3598_v21 = vadd.f32 %v11113_v42, %v3568_v50  ;;  %v3523_v62 = vadd.f32 %v3519_v40, %v3485_v9  ;;  %v11125_v17 = vld [vmem:[#allocation195_spill] sm:$0xff]  ;;  %v11126_v50 = vld [vmem:[#allocation93_spill] sm:$0xff]  ;;  %v3665_v19 = vpop.permute.xlu1 %3664 }
 0x461   : > { %v3570_v28 = vadd.f32 %v11114_v47, %v3532_v5  ;;  %v3580_v55 = vadd.f32 %v11115_v6, %v3542_v58  ;;  %v3533_v35 = vadd.f32 %v3529_v7, %v3495_v31  ;;  %v3543_v48 = vadd.f32 %v3539_v46, %v3505_v27  ;;  %v11132_v11 = vld [vmem:[#allocation161_spill] sm:$0xff]  ;;  %v11133_v31 = vld [vmem:[#allocation31_spill] sm:$0xff]  ;;  %v11134_v27 = vld [vmem:[#allocation142_spill] sm:$0xff] }
 0x462   : > { %v3608_v43 = vadd.f32 %v11116_v24, %v3578_v1  ;;  %v3626_v37 = vadd.f32 %v11117_v22, %v3588_v52  ;;  %v3636_v25 = vadd.f32 %v11118_v32, %v3598_v21  ;;  %v3561_v53 = vadd.f32 %v11119_v10, %v3523_v62  ;;  %v11127_v1 = vld [vmem:[#allocation202_spill] sm:$0xff]  ;;  %v11137_v52 = vld [vmem:[#allocation204_spill] sm:$0xff]  ;;  %v11138_v47 = vld [vmem:[#allocation111_spill] sm:$0xff] }
 0x463   : > { %v3571_v56 = vadd.f32 %v11120_v57, %v3533_v35  ;;  %v3668_v49 = vmul.f32 %v11121_v61, %v3659_v29  ;;  %v3678_v60 = vmul.f32 %v11122_v44, %v3659_v29  ;;  %v3581_v2 = vadd.f32 %v11123_v16, %v3543_v48  ;;  %v11139_v62 = vld [vmem:[#allocation112_spill] sm:$0xff]  ;;  %v11140_v48 = vld [vmem:[#allocation54_spill] sm:$0xff]  ;;  %v11142_v22 = vld [vmem:[#allocation139_spill] sm:$0xff] }
 0x464   : > { %v3646_v0 = vadd.f32 %v11124_v45, %v3608_v43  ;;  %v3688_v63 = vmul.f32 %v11125_v17, %v3659_v29  ;;  %v3589_v8 = vadd.f32 %v11126_v50, %v3559_v4  ;;  %v3645_v13 = vmul.f32 %v11128_v30, %v11127_v1  ;;  %v11141_v43 = vld [vmem:[#allocation138_spill] sm:$0xff]  ;;  %v11143_v57 = vld [vmem:[#allocation165_spill] sm:$0xff] }
 0x465   : > { %v3672_v41 = vadd.f32 %v3668_v49, %v3626_v37  ;;  %v3599_v20 = vadd.f32 %v11129_v3, %v3569_v51  ;;  %v3609_v39 = vadd.f32 %v11130_v59, %v3579_v26  ;;  %v3682_v34 = vadd.f32 %v3678_v60, %v3636_v25  ;;  %v11135_v51 = vld [vmem:[#allocation53_spill] sm:$0xff]  ;;  %v11136_v26 = vld [vmem:[#allocation176_spill] sm:$0xff]  ;;  %v3727_v25 = vpop.permute.xlu0 %3726  ;;  %v11144_v45 = vld [vmem:[#allocation34_spill] sm:$0xff]  ;;  %v3729_v3 = vpop.permute.xlu1 %3728 }
 0x466   : > { %v3627_v38 = vadd.f32 %v11131_v23, %v3589_v8  ;;  %v3669_v9 = vmul.f32 %v11121_v61, %v3661_v12  ;;  %v3679_v33 = vmul.f32 %v11122_v44, %v3661_v12  ;;  %v3689_v36 = vmul.f32 %v11125_v17, %v3661_v12  ;;  %v11148_v59 = vld [vmem:[#allocation178_spill] sm:$0xff] }
 0x467   : > { %v3637_v14 = vadd.f32 %v11132_v11, %v3599_v20  ;;  %v3647_v4 = vadd.f32 %v11133_v31, %v3609_v39  ;;  %v3590_v5 = vadd.f32 %v11134_v27, %v3560_v18  ;;  %v3692_v58 = vadd.f32 %v3688_v63, %v3646_v0 }
 0x468   : > { %v3600_v40 = vadd.f32 %v11135_v51, %v3570_v28  ;;  %v3610_v7 = vadd.f32 %v11136_v26, %v3580_v55  ;;  %v3670_v29 = vmul.f32 %v11121_v61, %v3663_v15  ;;  %v3673_v46 = vadd.f32 %v3669_v9, %v3627_v38  ;;  %v11152_v9 = vld [vmem:[#allocation49_spill] sm:$0xff] }
 0x469   : > { %v3683_v54 = vadd.f32 %v3679_v33, %v3637_v14  ;;  %v3628_v42 = vadd.f32 %v11137_v52, %v3590_v5  ;;  %v3680_v21 = vmul.f32 %v11122_v44, %v3663_v15  ;;  %v3690_v18 = vmul.f32 %v11125_v17, %v3663_v15  ;;  %v11149_v15 = vld [vmem:[#allocation198_spill] sm:$0xff]  ;;  %v11155_v26 = vld [vmem:[#allocation125_spill] sm:$0xff] }
 0x46a   : > { %v3638_v6 = vadd.f32 %v11138_v47, %v3600_v40  ;;  %v3648_v35 = vadd.f32 %v11139_v62, %v3610_v7  ;;  %v3591_v24 = vadd.f32 %v11140_v48, %v3561_v53  ;;  %v3693_v28 = vadd.f32 %v3689_v36, %v3647_v4  ;;  %v3731_v36 = vpop.permute.xlu0 %3730  ;;  %v3733_v62 = vpop.permute.xlu1 %3732 }
 0x46b   : > { %v3601_v55 = vadd.f32 %v11141_v43, %v3571_v56  ;;  %v3611_v37 = vadd.f32 %v11142_v22, %v3581_v2  ;;  %v3671_v32 = vmul.f32 %v11121_v61, %v3665_v19  ;;  %v3674_v12 = vadd.f32 %v3670_v29, %v3628_v42  ;;  %v11145_v56 = vld [vmem:[#allocation140_spill] sm:$0xff]  ;;  %v11146_v2 = vld [vmem:[#allocation94_spill] sm:$0xff]  ;;  %v11156_v42 = vld [vmem:[#allocation179_spill] sm:$0xff] }
 0x46c   : > { %v3684_v10 = vadd.f32 %v3680_v21, %v3638_v6  ;;  %v3629_v49 = vadd.f32 %v11143_v57, %v3591_v24  ;;  %v3681_v60 = vmul.f32 %v11122_v44, %v3665_v19  ;;  %v3694_v16 = vadd.f32 %v3690_v18, %v3648_v35  ;;  %v11147_v61 = vld [vmem:[#allocation218_spill] sm:$0xff]  ;;  %v11150_v44 = vld [vmem:[#allocation211_spill] sm:$0xff] }
 0x46d   : > { %v3639_v0 = vadd.f32 %v11144_v45, %v3601_v55  ;;  %v3649_v63 = vadd.f32 %v3645_v13, %v3611_v37  ;;  %v3691_v53 = vmul.f32 %v11125_v17, %v3665_v19  ;;  %v3702_v8 = vadd.f32 %v11145_v56, %v3672_v41  ;;  %v11151_v41 = vld [vmem:[#allocation177_spill] sm:$0xff]  ;;  %v11158_v24 = vld [vmem:[#allocation95_spill] sm:$0xff] }
 0x46e   : > { %v3675_v50 = vadd.f32 %v3671_v32, %v3629_v49  ;;  %v3712_v1 = vadd.f32 %v11146_v2, %v3682_v34  ;;  %v3736_v30 = vmul.f32 %v11147_v61, %v3727_v25  ;;  %v3722_v39 = vadd.f32 %v11148_v59, %v3692_v58  ;;  %v11154_v58 = vld [vmem:[#allocation124_spill] sm:$0xff] }
 0x46f   : > { %v3685_v20 = vadd.f32 %v3681_v60, %v3639_v0  ;;  %v3746_v23 = vmul.f32 %v11149_v15, %v3727_v25  ;;  %v3756_v38 = vmul.f32 %v11150_v44, %v3727_v25  ;;  %v3695_v17 = vadd.f32 %v3691_v53, %v3649_v63  ;;  %v11159_v32 = vld [vmem:[#allocation96_spill] sm:$0xff]  ;;  %v11161_v0 = vld [vmem:[#allocation169_spill] sm:$0xff] }
 0x470   : > { %v3740_v13 = vadd.f32 %v3736_v30, %v3702_v8  ;;  %v3703_v34 = vadd.f32 %v11151_v41, %v3673_v46  ;;  %v3713_v33 = vadd.f32 %v11152_v9, %v3683_v54  ;;  %v3737_v31 = vmul.f32 %v11147_v61, %v3729_v3 }
 0x471   : > { %v3750_v11 = vadd.f32 %v3746_v23, %v3712_v1  ;;  %v3760_v14 = vadd.f32 %v3756_v38, %v3722_v39  ;;  %v3747_v4 = vmul.f32 %v11149_v15, %v3729_v3  ;;  %v3723_v51 = vadd.f32 %v11154_v58, %v3693_v28 }
 0x472   : > { %v3764_v5 = vsel %vm4335_vm15, %v3740_v13, 0.0  ;;  %v3757_v40 = vmul.f32 %v11150_v44, %v3729_v3  ;;  %v3704_v7 = vadd.f32 %v11155_v26, %v3674_v12  ;;  %v3741_v46 = vadd.f32 %v3737_v31, %v3703_v34 }
 0x473   : > { %3769 = vst [vmem:[%s9765_s30] sm:$0xff] %v3764_v5  ;;  %v3773_v29 = vsel %vm4335_vm15, %v3750_v11, 0.0  ;;  %v3783_v19 = vsel %vm4335_vm15, %v3760_v14, 0.0  ;;  %v3751_v54 = vadd.f32 %v3747_v4, %v3713_v33  ;;  %v3714_v21 = vadd.f32 %v11156_v42, %v3684_v10  ;;  %v11160_v10 = vld [vmem:[#allocation97_spill] sm:$0xff] }
 0x474   : > { %4093 = vst [vmem:[%s9765_s30 + $0x60] sm:$0xff] %v3773_v29  ;;  %4098 = vst [vmem:[%s9765_s30 + $0xc0] sm:$0xff] %v3783_v19  ;;  %v3761_v52 = vadd.f32 %v3757_v40, %v3723_v51  ;;  %v3738_v47 = vmul.f32 %v11147_v61, %v3731_v36  ;;  %v3748_v6 = vmul.f32 %v11149_v15, %v3731_v36  ;;  %v3765_v18 = vsel %vm4339_vm0, %v3741_v46, 0.0 }
 0x475   : > { %v3774_v48 = vsel %vm4339_vm0, %v3751_v54, 0.0  ;;  %v3724_v28 = vadd.f32 %v11158_v24, %v3694_v16  ;;  %v3758_v43 = vmul.f32 %v11150_v44, %v3731_v36  ;;  %3770 = vst [vmem:[%s9765_s30 + $0x8] sm:$0xff] %v3765_v18  ;;  %v3705_v25 = vadd.f32 %v11159_v32, %v3675_v50 }
 0x476   : > { %4094 = vst [vmem:[%s9765_s30 + $0x68] sm:$0xff] %v3774_v48  ;;  %v3784_v55 = vsel %vm4339_vm0, %v3761_v52, 0.0  ;;  %v3742_v22 = vadd.f32 %v3738_v47, %v3704_v7  ;;  %v3752_v37 = vadd.f32 %v3748_v6, %v3714_v21  ;;  %v3715_v57 = vadd.f32 %v11160_v10, %v3685_v20 }
 0x477   : > { %4099 = vst [vmem:[%s9765_s30 + $0xc8] sm:$0xff] %v3784_v55  ;;  %v3762_v12 = vadd.f32 %v3758_v43, %v3724_v28  ;;  %v3739_v49 = vmul.f32 %v11147_v61, %v3733_v62  ;;  %v3749_v60 = vmul.f32 %v11149_v15, %v3733_v62  ;;  %v3725_v63 = vadd.f32 %v11161_v0, %v3695_v17  ;;  %182 = sbr.rel (!%p180_p12) target bundleno = 118 (0x76), region = 107 }
 0x478   : > { %v3766_v16 = vsel %vm4339_vm0, %v3742_v22, 0.0  ;;  %v3775_v45 = vsel %vm4339_vm0, %v3752_v37, 0.0  ;;  %v3759_v53 = vmul.f32 %v11150_v44, %v3733_v62 }
 0x479   : > { %3771 = vst [vmem:[%s9765_s30 + $0x10] sm:$0xff] %v3766_v16  ;;  %4095 = vst [vmem:[%s9765_s30 + $0x70] sm:$0xff] %v3775_v45  ;;  %v3785_v50 = vsel %vm4339_vm0, %v3762_v12, 0.0  ;;  %v3743_v56 = vadd.f32 %v3739_v49, %v3705_v25  ;;  %v3753_v8 = vadd.f32 %v3749_v60, %v3715_v57 }
 0x47a   : > { %4100 = vst [vmem:[%s9765_s30 + $0xd0] sm:$0xff] %v3785_v50  ;;  %v3763_v2 = vadd.f32 %v3759_v53, %v3725_v63 }
 0x47b   : > { %v3767_v61 = vsel %vm4343_vm1, %v3743_v56, 0.0  ;;  %v3776_v30 = vsel %vm4343_vm1, %v3753_v8, 0.0 }
 0x47c   : > { %3772 = vst [vmem:[%s9765_s30 + $0x18] sm:$0xff] %v3767_v61  ;;  %4096 = vst [vmem:[%s9765_s30 + $0x78] sm:$0xff] %v3776_v30  ;;  %v3786_v3 = vsel %vm4343_vm1, %v3763_v2, 0.0 }
 0x47d   : > { %4101 = vst [vmem:[%s9765_s30 + $0xd8] sm:$0xff] %v3786_v3 }
 0x47e   :  { %3797 = vsyncpa [#allocation4], 1 }
 0x47f   :  { %3798 = vsyncpa [#allocation6], 1 }
 0x480   :  { %3799 = vsyncpa [#allocation9], 1 }
 0x481   :  { %3800 = vsyncpa [#allocation12], 1 }
 0x482   :  { %3801 = vsyncpa [#allocation15], 1 }

</bundles_post_ra>
